<compile_context>
chip_gen: v7x
topology: tpu7x:2x2x1
jax: 0.10.0
libtpu: 0.0.40
codegen_flags: <defaults>
</compile_context>

<pallas_src>
import functools

import numpy as np
import jax
import jax.numpy as jnp
from jax.experimental import pallas as pl
from jax.experimental.pallas import tpu as pltpu

DMAX = 10
HEAD_SIZE = 8
BN_EPS = 1e-5
LN_EPS = 1e-5
BN_SCALE = 1.0 / np.sqrt(1.0 + BN_EPS)  # eval-mode BN with default init

# Conservative scoped-VMEM request: safe on v5e/v6e (128 MiB phys) and v7x (64 MiB).
VMEM_LIMIT = 32 * 1024 * 1024


def _act(x, act):
    if act == "relu":
        return jnp.maximum(x, 0.0)
    if act == "relu6":
        return jnp.clip(x, 0.0, 6.0)
    return x


def _round_up(x, m):
    return (x + m - 1) // m * m


def _pick_tile(size, candidates):
    for c in candidates:
        if size % c == 0:
            return c
    return candidates[-1]


# ----------------------------------------------------------------------------
# Tiled matmul kernel: y = act((A @ B) * scale + shift) [+ residual]
# A: (Mp, Kp) bf16, B: (Kp, Np) bf16, scale/shift: (1, Np) f32,
# residual: (Mp, Np) f32 (optional), out: (Mp, Np) f32.
# ----------------------------------------------------------------------------

def _mm_kernel(a_ref, b_ref, s_ref, t_ref, *rest, act, has_res):
    if has_res:
        r_ref, o_ref, acc_ref = rest
    else:
        (o_ref, acc_ref), r_ref = rest, None
    k = pl.program_id(2)

    @pl.when(k == 0)
    def _init():
        acc_ref[...] = jnp.zeros_like(acc_ref)

    acc_ref[...] += jnp.dot(a_ref[...], b_ref[...],
                            preferred_element_type=jnp.float32)

    @pl.when(k == pl.num_programs(2) - 1)
    def _finalize():
        y = acc_ref[...] * s_ref[...] + t_ref[...]   # fused BN (scale/shift)
        y = _act(y, act)
        if has_res:
            y = y + r_ref[...]                       # fused inverted-residual skip
        o_ref[...] = y


@functools.lru_cache(maxsize=None)
def _build_matmul(Mp, Kp, Np, tm, tk, tn, act, has_res):
    kern = functools.partial(_mm_kernel, act=act, has_res=has_res)
    in_specs = [
        pl.BlockSpec((tm, tk), lambda i, j, k: (i, k)),
        pl.BlockSpec((tk, tn), lambda i, j, k: (k, j)),
        pl.BlockSpec((1, tn), lambda i, j, k: (0, j)),
        pl.BlockSpec((1, tn), lambda i, j, k: (0, j)),
    ]
    if has_res:
        in_specs.append(pl.BlockSpec((tm, tn), lambda i, j, k: (i, j)))
    return pl.pallas_call(
        kern,
        out_shape=jax.ShapeDtypeStruct((Mp, Np), jnp.float32),
        grid=(Mp // tm, Np // tn, Kp // tk),
        in_specs=in_specs,
        out_specs=pl.BlockSpec((tm, tn), lambda i, j, k: (i, j)),
        scratch_shapes=[pltpu.VMEM((tm, tn), jnp.float32)],
        compiler_params=pltpu.CompilerParams(
            dimension_semantics=("parallel", "parallel", "arbitrary"),
            vmem_limit_bytes=VMEM_LIMIT),
    )


def matmul_bn_act(a, b, scale, shift, act="none", residual=None):
    M, K = a.shape
    N = b.shape[1]
    Mp = _round_up(M, 8)
    tm = _pick_tile(Mp, (512, 256, 128, 64, 32, 16, 8))
    Kp = _round_up(K, 128)
    tk = _pick_tile(Kp, (512, 256, 128))
    Np = _round_up(N, 128)            # lane-dense output stores
    tn = _pick_tile(Np, (256, 128))

    a_p = jnp.pad(a, ((0, Mp - M), (0, Kp - K))).astype(jnp.bfloat16)
    b_p = jnp.pad(b, ((0, Kp - K), (0, Np - N))).astype(jnp.bfloat16)
    s_p = jnp.pad(scale.astype(jnp.float32), (0, Np - N)).reshape(1, Np)
    t_p = jnp.pad(shift.astype(jnp.float32), (0, Np - N)).reshape(1, Np)

    has_res = residual is not None
    f = _build_matmul(Mp, Kp, Np, tm, tk, tn, act, has_res)
    if has_res:
        r_p = jnp.pad(residual.astype(jnp.float32), ((0, Mp - M), (0, Np - N)))
        return f(a_p, b_p, s_p, t_p, r_p)
    return f(a_p, b_p, s_p, t_p)


def conv1x1(x, w, scale, shift, act="none", residual=None, keep_padded=False):
    # x: [B, H, W, Cx] NHWC (Cx may exceed w's Cin by zero padding); w: [Cout, Cin]
    B, H, W, Cx = x.shape
    Cout, Cin = w.shape
    M = B * H * W
    a = x.reshape(M, Cx)
    wm = jnp.transpose(w)                             # (Cin, Cout)
    if Cx > Cin:                                      # padded input channels -> zero weight rows
        wm = jnp.pad(wm, ((0, Cx - Cin), (0, 0)))
    res = residual.reshape(M, Cout) if residual is not None else None
    y = matmul_bn_act(a, wm, scale, shift, act, res)  # (Mp, Np)
    if keep_padded:
        return y[:M].reshape(B, H, W, y.shape[1])
    return y[:M, :Cout].reshape(B, H, W, Cout)


# ----------------------------------------------------------------------------
# Full 3x3 conv (stem / head): taps accumulated in-kernel (no im2col in HBM).
# ----------------------------------------------------------------------------

def _conv3x3_kernel(x_ref, w_ref, s_ref, t_ref, o_ref, *, H, W, act):
    Cp = x_ref.shape[3]
    Np = o_ref.shape[3]
    acc = jnp.zeros((H * W, Np), jnp.float32)
    for kh in range(3):
        for kw in range(3):
            win = x_ref[0, pl.ds(kh, H), pl.ds(kw, W), :]       # (H, W, Cp)
            a = win.reshape(H * W, Cp)
            acc = acc + jnp.dot(a, w_ref[kh * 3 + kw],
                                preferred_element_type=jnp.float32)
    y = _act(acc * s_ref[...] + t_ref[...], act)
    o_ref[0] = y.reshape(H, W, Np)


@functools.lru_cache(maxsize=None)
def _build_conv3x3(B, H, W, Cp, Np, act):
    Hp, Wp = H + 2, W + 2
    kern = functools.partial(_conv3x3_kernel, H=H, W=W, act=act)
    return pl.pallas_call(
        kern,
        out_shape=jax.ShapeDtypeStruct((B, H, W, Np), jnp.float32),
        grid=(B,),
        in_specs=[
            pl.BlockSpec((1, Hp, Wp, Cp), lambda b: (b, 0, 0, 0)),
            pl.BlockSpec((9, Cp, Np), lambda b: (0, 0, 0)),
            pl.BlockSpec((1, Np), lambda b: (0, 0)),
            pl.BlockSpec((1, Np), lambda b: (0, 0)),
        ],
        out_specs=pl.BlockSpec((1, H, W, Np), lambda b: (b, 0, 0, 0)),
        compiler_params=pltpu.CompilerParams(
            dimension_semantics=("parallel",),
            vmem_limit_bytes=VMEM_LIMIT),
    )


def conv3x3(x, w, scale, shift, act="none"):
    # x: [B, H, W, Cin] NHWC; w: [Cout, Cin, 3, 3]; stride 1, pad 1.
    B, H, W, Cin = x.shape
    Cout = w.shape[0]
    Cp = _round_up(Cin, 8)
    Np = _round_up(Cout, 128)
    xp = jnp.pad(x, ((0, 0), (1, 1), (1, 1), (0, Cp - Cin))).astype(jnp.bfloat16)
    wk = jnp.transpose(w, (2, 3, 1, 0)).reshape(9, Cin, Cout)
    wk = jnp.pad(wk, ((0, 0), (0, Cp - Cin), (0, Np - Cout))).astype(jnp.bfloat16)
    s = jnp.pad(scale.astype(jnp.float32), (0, Np - Cout)).reshape(1, Np)
    t = jnp.pad(shift.astype(jnp.float32), (0, Np - Cout)).reshape(1, Np)
    f = _build_conv3x3(B, H, W, Cp, Np, act)
    y = f(xp, wk, s, t)                               # (B, H, W, Np)
    return y[..., :Cout]


# ----------------------------------------------------------------------------
# Depthwise 3x3, channels-last, batched + channel-tiled grid.
# Always computes at stride 1; stride-2 layers subsample in the wrapper
# (elementwise BN/act commute with subsampling, so the result is exact).
# ----------------------------------------------------------------------------

def _dw_kernel(x_ref, w_ref, s_ref, t_ref, o_ref, *, act):
    _, H, W, tc = o_ref.shape
    acc = jnp.zeros((H, W, tc), jnp.float32)
    for kh in range(3):
        for kw in range(3):
            win = x_ref[0, pl.ds(kh, H), pl.ds(kw, W), :]       # (H, W, tc)
            acc = acc + win * w_ref[kh * 3 + kw]
    o_ref[0] = _act(acc * s_ref[...] + t_ref[...], act)


@functools.lru_cache(maxsize=None)
def _build_dw(B, H, W, Cp, tc, act):
    Hp, Wp = H + 2, W + 2
    kern = functools.partial(_dw_kernel, act=act)
    return pl.pallas_call(
        kern,
        out_shape=jax.ShapeDtypeStruct((B, H, W, Cp), jnp.float32),
        grid=(B, Cp // tc),
        in_specs=[
            pl.BlockSpec((1, Hp, Wp, tc), lambda b, c: (b, 0, 0, c)),
            pl.BlockSpec((9, 1, tc), lambda b, c: (0, 0, c)),
            pl.BlockSpec((1, tc), lambda b, c: (0, c)),
            pl.BlockSpec((1, tc), lambda b, c: (0, c)),
        ],
        out_specs=pl.BlockSpec((1, H, W, tc), lambda b, c: (b, 0, 0, c)),
        compiler_params=pltpu.CompilerParams(
            dimension_semantics=("parallel", "parallel"),
            vmem_limit_bytes=VMEM_LIMIT),
    )


def depthwise3x3(x, w, scale, shift, act, stride):
    # x: [B, H, W, Cx] NHWC (Cx >= C); w: [C, 3, 3]; output channels padded to Cp.
    B, H, W, Cx = x.shape
    C = w.shape[0]
    Cp = _round_up(Cx, 128)                      # lane-dense channels
    xp = jnp.pad(x, ((0, 0), (1, 1), (1, 1), (0, Cp - Cx))).astype(jnp.float32)
    wk = jnp.transpose(w, (1, 2, 0)).reshape(9, 1, C)
    wk = jnp.pad(wk, ((0, 0), (0, 0), (0, Cp - C))).astype(jnp.float32)
    s = jnp.pad(scale.astype(jnp.float32), (0, Cp - C)).reshape(1, Cp)
    t = jnp.pad(shift.astype(jnp.float32), (0, Cp - C)).reshape(1, Cp)
    tc = 256 if Cp % 256 == 0 else 128
    f = _build_dw(B, H, W, Cp, tc, act)
    y = f(xp, wk, s, t)                          # (B, H, W, Cp) padded channels
    if stride > 1:
        # TODO(synk): stride-2 via full-res compute + wrapper subsample (exact,
        #             but 4x dw FLOP waste); strided ref slicing is not portable.
        y = y[:, ::stride, ::stride, :]
    return y


# ----------------------------------------------------------------------------
# Multi-head cost volume: fused LayerNorm2D + disparity-shift correlation +
# grouped 1x1 conv.  Per-sample grid over batch; shifts via pltpu.roll.
# ----------------------------------------------------------------------------

def _cost_kernel(l_ref, r_ref, lnw_ref, lnb_ref, gpw_ref, gpb_ref, o_ref,
                 *, max_disp):
    _, H, W, C = l_ref.shape
    n = H * W * C

    def norm(x):
        mean = jnp.mean(x)
        var = jnp.sum((x - mean) ** 2) / (n - 1)   # torch.std() is unbiased
        std = jnp.sqrt(var)
        return lnw_ref[...] * ((x - mean) / (std + LN_EPS)) + lnb_ref[...]

    l = norm(l_ref[0])
    r_cur = norm(r_ref[0])
    for d in range(max_disp):
        if W > 1:                                   # roll of width-1 axis is identity
            r_cur = pltpu.roll(r_cur, shift=1, axis=1)   # cumulative shift = d + 1
        prod = l * r_cur                            # (H, W, C)
        wd = gpw_ref[d]                             # (1, C) expanded grouped-conv weight
        o_ref[0, d] = jnp.sum(prod * wd, axis=-1) + gpb_ref[d]


@functools.lru_cache(maxsize=None)
def _build_cost(B, H, W, C, D):
    kern = functools.partial(_cost_kernel, max_disp=D)
    return pl.pallas_call(
        kern,
        out_shape=jax.ShapeDtypeStruct((B, D, H, W), jnp.float32),
        grid=(B,),
        in_specs=[
            pl.BlockSpec((1, H, W, C), lambda b: (b, 0, 0, 0)),
            pl.BlockSpec((1, H, W, C), lambda b: (b, 0, 0, 0)),
            pl.BlockSpec((1, C), lambda b: (0, 0)),
            pl.BlockSpec((1, C), lambda b: (0, 0)),
            pl.BlockSpec((D, 1, C), lambda b: (0, 0, 0)),
            pl.BlockSpec((D, 1, 1), lambda b: (0, 0, 0)),
        ],
        out_specs=pl.BlockSpec((1, D, H, W), lambda b: (b, 0, 0, 0)),
        compiler_params=pltpu.CompilerParams(
            dimension_semantics=("parallel",),
            vmem_limit_bytes=VMEM_LIMIT),
    )


def apply_mhcv(left, right, p):
    # left/right: [B, H, W, C] NHWC (exact channels).
    B, H, W, C = left.shape
    D = p["d"]
    lnw = p["ln_w"].reshape(1, C)
    lnb = p["ln_b"].reshape(1, C)
    # expand grouped-conv weight: w_full[d, c] = gp_w[d, c // head_size]
    gpw = jnp.repeat(p["gp_w"], p["hs"], axis=1).reshape(D, 1, C)
    gpb = p["gp_b"].reshape(D, 1, 1)
    f = _build_cost(B, H, W, C, D)
    cost = f(left.astype(jnp.float32), right.astype(jnp.float32),
             lnw, lnb, gpw, gpb)                    # (B, D, H, W)
    cost = jnp.transpose(cost, (0, 2, 3, 1))        # small tensor -> NHWC
    return jnp.concatenate([left, cost], axis=-1)


# ----------------------------------------------------------------------------
# JAX glue: BN fold, blocks, bilinear fusion
# ----------------------------------------------------------------------------

def bn_fold(c):
    # eval-mode BN with weight=1, bias=0, running_mean=0, running_var=1
    return (jnp.full((c,), BN_SCALE, jnp.float32), jnp.zeros((c,), jnp.float32))


def init_inverted_residual(key, inp, oup, stride, exp_ratio):
    hidden = inp * exp_ratio
    k0, k1, k2 = jax.random.split(key, 3)
    p = {"inp": inp, "oup": oup, "stride": stride, "exp": exp_ratio,
         "hidden": hidden}
    if exp_ratio != 1:
        p["w_exp"] = jax.random.normal(k0, (hidden, inp), jnp.float32) / np.sqrt(inp)
    p["w_dw"] = jax.random.normal(k1, (hidden, 3, 3), jnp.float32) / 3.0
    p["w_proj"] = jax.random.normal(k2, (oup, hidden), jnp.float32) / np.sqrt(hidden)
    return p


def apply_inverted_residual(x, p):
    # x: [B, H, W, inp] NHWC
    res = x if (p["stride"] == 1 and p["inp"] == p["oup"]) else None
    h = x
    if p["exp"] != 1:
        s, t = bn_fold(p["hidden"])
        # keep 128-padded channels flowing straight into the depthwise kernel
        h = conv1x1(h, p["w_exp"], s, t, act="relu6", keep_padded=True)
    s, t = bn_fold(p["hidden"])
    h = depthwise3x3(h, p["w_dw"], s, t, "relu6", p["stride"])
    s, t = bn_fold(p["oup"])
    h = conv1x1(h, p["w_proj"], s, t, act="none", residual=res)
    return h


def init_efficient_blk(key, inp, oup, stride, exp_ratio=1):
    k1, k2, k3 = jax.random.split(key, 3)
    return [
        init_inverted_residual(k1, inp, inp, stride, exp_ratio),
        init_inverted_residual(k2, inp, inp, 1, exp_ratio),
        init_inverted_residual(k3, inp, oup, 1, exp_ratio),
    ]


def apply_efficient_blk(x, blk):
    for p in blk:
        x = apply_inverted_residual(x, p)
    return x


def init_mhcv(key, dim, max_disp=DMAX, head_size=HEAD_SIZE):
    hn = dim // head_size
    k1, k2 = jax.random.split(key)
    return {
        "dim": dim, "hn": hn, "hs": head_size, "d": max_disp,
        "ln_w": jnp.ones((dim,), jnp.float32),
        "ln_b": jnp.zeros((dim,), jnp.float32),
        "gp_w": jax.random.normal(k1, (max_disp, hn), jnp.float32) / np.sqrt(hn),
        "gp_b": jax.random.normal(k2, (max_disp,), jnp.float32) * 0.01,
    }


def bilinear_align_corners(x, out_h, out_w):
    # TODO(synk): bilinear upsample (align_corners=True) is a JAX gather (glue),
    #             not a Pallas kernel.
    B, H, W, C = x.shape

    def src_idx(out_n, in_n):
        if out_n == 1:
            return jnp.zeros((1,), jnp.float32)
        return jnp.arange(out_n, dtype=jnp.float32) * (in_n - 1) / (out_n - 1)

    sy = src_idx(out_h, H)
    sx = src_idx(out_w, W)
    y0 = jnp.clip(jnp.floor(sy).astype(jnp.int32), 0, H - 1)
    y1 = jnp.clip(y0 + 1, 0, H - 1)
    x0 = jnp.clip(jnp.floor(sx).astype(jnp.int32), 0, W - 1)
    x1 = jnp.clip(x0 + 1, 0, W - 1)
    wy = (sy - y0.astype(jnp.float32))[None, :, None, None]
    wx = (sx - x0.astype(jnp.float32))[None, None, :, None]

    def g(yi, xi):
        return x[:, yi, :, :][:, :, xi, :]

    top = g(y0, x0) * (1.0 - wx) + g(y0, x1) * wx
    bot = g(y1, x0) * (1.0 - wx) + g(y1, x1) * wx
    return top * (1.0 - wy) + bot * wy


def feature_fusion(layer1, layer2):
    H, W = layer2.shape[1], layer2.shape[2]
    return bilinear_align_corners(layer1, H, W) + layer2


# ----------------------------------------------------------------------------
# Stereo_MulH
# ----------------------------------------------------------------------------

def init_stereo_mulh(key, max_disp=DMAX):
    ks = iter(jax.random.split(key, 32))
    p = {}
    p["l0A_w"] = jax.random.normal(next(ks), (48, 3, 3, 3), jnp.float32) / np.sqrt(27.0)
    p["l0B"] = init_efficient_blk(next(ks), 48 + max_disp, 32, 1, 1)
    p["l0C_w"] = jax.random.normal(next(ks), (1, 32, 3, 3), jnp.float32) / np.sqrt(288.0)
    p["l1A"] = init_efficient_blk(next(ks), 48, 40, 2, 1)
    p["l1B"] = init_efficient_blk(next(ks), 40 + max_disp, 8, 1, 1)
    p["l1C"] = init_efficient_blk(next(ks), 8, 32, 1, 1)
    p["l2A"] = init_efficient_blk(next(ks), 40, 56, 2, 4)
    p["l2B"] = init_efficient_blk(next(ks), 56 + max_disp, 56, 1, 4)
    p["l2C"] = init_efficient_blk(next(ks), 56, 8, 1, 4)
    p["l3A"] = init_efficient_blk(next(ks), 56, 80, 2, 5)
    p["l3B"] = init_efficient_blk(next(ks), 80 + max_disp, 96, 1, 5)
    p["l3C"] = init_efficient_blk(next(ks), 96, 56, 1, 5)
    p["l4A"] = init_efficient_blk(next(ks), 80, 64, 2, 9)
    p["l4B"] = init_efficient_blk(next(ks), 64 + max_disp, 96, 1, 9)
    p["l4C"] = init_efficient_blk(next(ks), 96, 96, 1, 9)
    p["l5A"] = init_efficient_blk(next(ks), 64, 96, 2, 9)
    p["l5B"] = init_efficient_blk(next(ks), 96 + max_disp, 96, 1, 9)
    p["l5C"] = init_efficient_blk(next(ks), 96, 96, 1, 9)
    p["l0H"] = init_mhcv(next(ks), 48, max_disp)
    p["l1H"] = init_mhcv(next(ks), 40, max_disp)
    p["l2H"] = init_mhcv(next(ks), 56, max_disp)
    p["l3H"] = init_mhcv(next(ks), 80, max_disp)
    p["l4H"] = init_mhcv(next(ks), 64, max_disp)
    p["l5H"] = init_mhcv(next(ks), 96, max_disp)
    return p


def stereo_mulh_forward(params, x):
    # x: [B, 6, H, W] NCHW; channels 0:3 = left image, 3:6 = right image.
    left = jnp.transpose(x[:, 0:3], (0, 2, 3, 1))   # -> NHWC once
    right = jnp.transpose(x[:, 3:6], (0, 2, 3, 1))

    s48, t48 = bn_fold(48)
    stage0AL = conv3x3(left, params["l0A_w"], s48, t48, act="relu")
    stage0AR = conv3x3(right, params["l0A_w"], s48, t48, act="relu")
    stage0H = apply_mhcv(stage0AL, stage0AR, params["l0H"])
    stage0B = apply_efficient_blk(stage0H, params["l0B"])

    stage1AL = apply_efficient_blk(stage0AL, params["l1A"])
    stage1AR = apply_efficient_blk(stage0AR, params["l1A"])
    stage1H = apply_mhcv(stage1AL, stage1AR, params["l1H"])
    stage1B = apply_efficient_blk(stage1H, params["l1B"])

    stage2AL = apply_efficient_blk(stage1AL, params["l2A"])
    stage2AR = apply_efficient_blk(stage1AR, params["l2A"])
    stage2H = apply_mhcv(stage2AL, stage2AR, params["l2H"])
    stage2B = apply_efficient_blk(stage2H, params["l2B"])

    stage3AL = apply_efficient_blk(stage2AL, params["l3A"])
    stage3AR = apply_efficient_blk(stage2AR, params["l3A"])
    stage3H = apply_mhcv(stage3AL, stage3AR, params["l3H"])
    stage3B = apply_efficient_blk(stage3H, params["l3B"])

    stage4AL = apply_efficient_blk(stage3AL, params["l4A"])
    stage4AR = apply_efficient_blk(stage3AR, params["l4A"])
    stage4H = apply_mhcv(stage4AL, stage4AR, params["l4H"])
    stage4B = apply_efficient_blk(stage4H, params["l4B"])

    stage5AL = apply_efficient_blk(stage4AL, params["l5A"])
    stage5AR = apply_efficient_blk(stage4AR, params["l5A"])
    stage5H = apply_mhcv(stage5AL, stage5AR, params["l5H"])
    stage5B = apply_efficient_blk(stage5H, params["l5B"])

    stage5C = apply_efficient_blk(stage5B, params["l5C"])
    stage4C = apply_efficient_blk(feature_fusion(stage5C, stage4B), params["l4C"])
    stage3C = apply_efficient_blk(feature_fusion(stage4C, stage3B), params["l3C"])
    stage2C = apply_efficient_blk(feature_fusion(stage3C, stage2B), params["l2C"])
    stage1C = apply_efficient_blk(feature_fusion(stage2C, stage1B), params["l1C"])
    s1, t1 = bn_fold(1)
    stage0C = conv3x3(feature_fusion(stage1C, stage0B), params["l0C_w"],
                      s1, t1, act="relu")
    return jnp.transpose(stage0C, (0, 3, 1, 2))     # -> NCHW once at the output


if __name__ == "__main__":
    key = jax.random.PRNGKey(0)
    pkey, xkey = jax.random.split(key)
    params = init_stereo_mulh(pkey)

    B, H, W = 2, 32, 32
    x = jax.random.normal(xkey, (B, 6, H, W), jnp.float32)

    out = stereo_mulh_forward(params, x)
    out = jax.block_until_ready(out)
    assert out.shape == (B, 1, H, W), out.shape
    assert bool(jnp.all(jnp.isfinite(out)))
    print("KERNEL_OK")
</pallas_src>

<mosaic_0001>
module attributes {stable_mosaic.version = 11 : i64} {
  func.func @_conv3x3_kernel(%arg0: i32, %arg1: memref<1x34x34x8xbf16, #tpu.memory_space<vmem>>, %arg2: memref<9x8x128xbf16, #tpu.memory_space<vmem>>, %arg3: memref<1x128xf32, #tpu.memory_space<vmem>>, %arg4: memref<1x128xf32, #tpu.memory_space<vmem>>, %arg5: memref<1x32x32x128xf32, #tpu.memory_space<vmem>>) attributes {dimension_semantics = [#tpu.dimension_semantics<parallel>], iteration_bounds = array<i64: 2>, scalar_prefetch = 0 : i64, scratch_operands = 0 : i64, tpu.core_type = #tpu.core_type<tc>, window_params = [{transform_indices = @transform_0, window_bounds = array<i64: 1, 34, 34, 8>}, {pipeline_mode = #tpu.pipeline_mode<synchronous>, transform_indices = @transform_1, window_bounds = array<i64: 9, 8, 128>}, {pipeline_mode = #tpu.pipeline_mode<synchronous>, transform_indices = @transform_2, window_bounds = array<i64: 1, 128>}, {pipeline_mode = #tpu.pipeline_mode<synchronous>, transform_indices = @transform_3, window_bounds = array<i64: 1, 128>}, {transform_indices = @transform_4, window_bounds = array<i64: 1, 32, 32, 128>}]} {
    %cst = arith.constant 0.000000e+00 : f32
    %0 = vector.broadcast %cst : f32 to vector<1024x128xf32>
    %c0 = arith.constant 0 : index
    %c0_0 = arith.constant 0 : index
    %c0_1 = arith.constant 0 : index
    %c0_2 = arith.constant 0 : index
    %1 = vector.load %arg1[%c0, %c0_0, %c0_1, %c0_2] : memref<1x34x34x8xbf16, #tpu.memory_space<vmem>>, vector<1x32x32x8xbf16>
    %2 = vector.shape_cast %1 : vector<1x32x32x8xbf16> to vector<32x32x8xbf16>
    %3 = vector.shape_cast %2 : vector<32x32x8xbf16> to vector<1024x8xbf16>
    %c0_3 = arith.constant 0 : index
    %c0_4 = arith.constant 0 : index
    %c0_5 = arith.constant 0 : index
    %4 = vector.load %arg2[%c0_3, %c0_4, %c0_5] : memref<9x8x128xbf16, #tpu.memory_space<vmem>>, vector<1x8x128xbf16>
    %5 = vector.shape_cast %4 : vector<1x8x128xbf16> to vector<8x128xbf16>
    %cst_6 = arith.constant dense<0.000000e+00> : vector<1024x128xf32>
    %6 = tpu.matmul %3, %5, %cst_6 {dimension_numbers = #tpu.dot_dimension_numbers<[1], [0], [0], [1], [0, 0, 1, 1], [], []>} : vector<1024x8xbf16>, vector<8x128xbf16>, vector<1024x128xf32> -> vector<1024x128xf32>
    %7 = arith.addf %0, %6 : vector<1024x128xf32>
    %c0_7 = arith.constant 0 : index
    %c0_8 = arith.constant 0 : index
    %c1 = arith.constant 1 : index
    %c0_9 = arith.constant 0 : index
    %8 = vector.load %arg1[%c0_7, %c0_8, %c1, %c0_9] : memref<1x34x34x8xbf16, #tpu.memory_space<vmem>>, vector<1x32x32x8xbf16>
    %9 = vector.shape_cast %8 : vector<1x32x32x8xbf16> to vector<32x32x8xbf16>
    %10 = vector.shape_cast %9 : vector<32x32x8xbf16> to vector<1024x8xbf16>
    %c1_10 = arith.constant 1 : index
    %c0_11 = arith.constant 0 : index
    %c0_12 = arith.constant 0 : index
    %11 = vector.load %arg2[%c1_10, %c0_11, %c0_12] : memref<9x8x128xbf16, #tpu.memory_space<vmem>>, vector<1x8x128xbf16>
    %12 = vector.shape_cast %11 : vector<1x8x128xbf16> to vector<8x128xbf16>
    %cst_13 = arith.constant dense<0.000000e+00> : vector<1024x128xf32>
    %13 = tpu.matmul %10, %12, %cst_13 {dimension_numbers = #tpu.dot_dimension_numbers<[1], [0], [0], [1], [0, 0, 1, 1], [], []>} : vector<1024x8xbf16>, vector<8x128xbf16>, vector<1024x128xf32> -> vector<1024x128xf32>
    %14 = arith.addf %7, %13 : vector<1024x128xf32>
    %c0_14 = arith.constant 0 : index
    %c0_15 = arith.constant 0 : index
    %c2 = arith.constant 2 : index
    %c0_16 = arith.constant 0 : index
    %15 = vector.load %arg1[%c0_14, %c0_15, %c2, %c0_16] : memref<1x34x34x8xbf16, #tpu.memory_space<vmem>>, vector<1x32x32x8xbf16>
    %16 = vector.shape_cast %15 : vector<1x32x32x8xbf16> to vector<32x32x8xbf16>
    %17 = vector.shape_cast %16 : vector<32x32x8xbf16> to vector<1024x8xbf16>
    %c2_17 = arith.constant 2 : index
    %c0_18 = arith.constant 0 : index
    %c0_19 = arith.constant 0 : index
    %18 = vector.load %arg2[%c2_17, %c0_18, %c0_19] : memref<9x8x128xbf16, #tpu.memory_space<vmem>>, vector<1x8x128xbf16>
    %19 = vector.shape_cast %18 : vector<1x8x128xbf16> to vector<8x128xbf16>
    %cst_20 = arith.constant dense<0.000000e+00> : vector<1024x128xf32>
    %20 = tpu.matmul %17, %19, %cst_20 {dimension_numbers = #tpu.dot_dimension_numbers<[1], [0], [0], [1], [0, 0, 1, 1], [], []>} : vector<1024x8xbf16>, vector<8x128xbf16>, vector<1024x128xf32> -> vector<1024x128xf32>
    %21 = arith.addf %14, %20 : vector<1024x128xf32>
    %c0_21 = arith.constant 0 : index
    %c1_22 = arith.constant 1 : index
    %c0_23 = arith.constant 0 : index
    %c0_24 = arith.constant 0 : index
    %22 = vector.load %arg1[%c0_21, %c1_22, %c0_23, %c0_24] : memref<1x34x34x8xbf16, #tpu.memory_space<vmem>>, vector<1x32x32x8xbf16>
    %23 = vector.shape_cast %22 : vector<1x32x32x8xbf16> to vector<32x32x8xbf16>
    %24 = vector.shape_cast %23 : vector<32x32x8xbf16> to vector<1024x8xbf16>
    %c3 = arith.constant 3 : index
    %c0_25 = arith.constant 0 : index
    %c0_26 = arith.constant 0 : index
    %25 = vector.load %arg2[%c3, %c0_25, %c0_26] : memref<9x8x128xbf16, #tpu.memory_space<vmem>>, vector<1x8x128xbf16>
    %26 = vector.shape_cast %25 : vector<1x8x128xbf16> to vector<8x128xbf16>
    %cst_27 = arith.constant dense<0.000000e+00> : vector<1024x128xf32>
    %27 = tpu.matmul %24, %26, %cst_27 {dimension_numbers = #tpu.dot_dimension_numbers<[1], [0], [0], [1], [0, 0, 1, 1], [], []>} : vector<1024x8xbf16>, vector<8x128xbf16>, vector<1024x128xf32> -> vector<1024x128xf32>
    %28 = arith.addf %21, %27 : vector<1024x128xf32>
    %c0_28 = arith.constant 0 : index
    %c1_29 = arith.constant 1 : index
    %c1_30 = arith.constant 1 : index
    %c0_31 = arith.constant 0 : index
    %29 = vector.load %arg1[%c0_28, %c1_29, %c1_30, %c0_31] : memref<1x34x34x8xbf16, #tpu.memory_space<vmem>>, vector<1x32x32x8xbf16>
    %30 = vector.shape_cast %29 : vector<1x32x32x8xbf16> to vector<32x32x8xbf16>
    %31 = vector.shape_cast %30 : vector<32x32x8xbf16> to vector<1024x8xbf16>
    %c4 = arith.constant 4 : index
    %c0_32 = arith.constant 0 : index
    %c0_33 = arith.constant 0 : index
    %32 = vector.load %arg2[%c4, %c0_32, %c0_33] : memref<9x8x128xbf16, #tpu.memory_space<vmem>>, vector<1x8x128xbf16>
    %33 = vector.shape_cast %32 : vector<1x8x128xbf16> to vector<8x128xbf16>
    %cst_34 = arith.constant dense<0.000000e+00> : vector<1024x128xf32>
    %34 = tpu.matmul %31, %33, %cst_34 {dimension_numbers = #tpu.dot_dimension_numbers<[1], [0], [0], [1], [0, 0, 1, 1], [], []>} : vector<1024x8xbf16>, vector<8x128xbf16>, vector<1024x128xf32> -> vector<1024x128xf32>
    %35 = arith.addf %28, %34 : vector<1024x128xf32>
    %c0_35 = arith.constant 0 : index
    %c1_36 = arith.constant 1 : index
    %c2_37 = arith.constant 2 : index
    %c0_38 = arith.constant 0 : index
    %36 = vector.load %arg1[%c0_35, %c1_36, %c2_37, %c0_38] : memref<1x34x34x8xbf16, #tpu.memory_space<vmem>>, vector<1x32x32x8xbf16>
    %37 = vector.shape_cast %36 : vector<1x32x32x8xbf16> to vector<32x32x8xbf16>
    %38 = vector.shape_cast %37 : vector<32x32x8xbf16> to vector<1024x8xbf16>
    %c5 = arith.constant 5 : index
    %c0_39 = arith.constant 0 : index
    %c0_40 = arith.constant 0 : index
    %39 = vector.load %arg2[%c5, %c0_39, %c0_40] : memref<9x8x128xbf16, #tpu.memory_space<vmem>>, vector<1x8x128xbf16>
    %40 = vector.shape_cast %39 : vector<1x8x128xbf16> to vector<8x128xbf16>
    %cst_41 = arith.constant dense<0.000000e+00> : vector<1024x128xf32>
    %41 = tpu.matmul %38, %40, %cst_41 {dimension_numbers = #tpu.dot_dimension_numbers<[1], [0], [0], [1], [0, 0, 1, 1], [], []>} : vector<1024x8xbf16>, vector<8x128xbf16>, vector<1024x128xf32> -> vector<1024x128xf32>
    %42 = arith.addf %35, %41 : vector<1024x128xf32>
    %c0_42 = arith.constant 0 : index
    %c2_43 = arith.constant 2 : index
    %c0_44 = arith.constant 0 : index
    %c0_45 = arith.constant 0 : index
    %43 = vector.load %arg1[%c0_42, %c2_43, %c0_44, %c0_45] : memref<1x34x34x8xbf16, #tpu.memory_space<vmem>>, vector<1x32x32x8xbf16>
    %44 = vector.shape_cast %43 : vector<1x32x32x8xbf16> to vector<32x32x8xbf16>
    %45 = vector.shape_cast %44 : vector<32x32x8xbf16> to vector<1024x8xbf16>
    %c6 = arith.constant 6 : index
    %c0_46 = arith.constant 0 : index
    %c0_47 = arith.constant 0 : index
    %46 = vector.load %arg2[%c6, %c0_46, %c0_47] : memref<9x8x128xbf16, #tpu.memory_space<vmem>>, vector<1x8x128xbf16>
    %47 = vector.shape_cast %46 : vector<1x8x128xbf16> to vector<8x128xbf16>
    %cst_48 = arith.constant dense<0.000000e+00> : vector<1024x128xf32>
    %48 = tpu.matmul %45, %47, %cst_48 {dimension_numbers = #tpu.dot_dimension_numbers<[1], [0], [0], [1], [0, 0, 1, 1], [], []>} : vector<1024x8xbf16>, vector<8x128xbf16>, vector<1024x128xf32> -> vector<1024x128xf32>
    %49 = arith.addf %42, %48 : vector<1024x128xf32>
    %c0_49 = arith.constant 0 : index
    %c2_50 = arith.constant 2 : index
    %c1_51 = arith.constant 1 : index
    %c0_52 = arith.constant 0 : index
    %50 = vector.load %arg1[%c0_49, %c2_50, %c1_51, %c0_52] : memref<1x34x34x8xbf16, #tpu.memory_space<vmem>>, vector<1x32x32x8xbf16>
    %51 = vector.shape_cast %50 : vector<1x32x32x8xbf16> to vector<32x32x8xbf16>
    %52 = vector.shape_cast %51 : vector<32x32x8xbf16> to vector<1024x8xbf16>
    %c7 = arith.constant 7 : index
    %c0_53 = arith.constant 0 : index
    %c0_54 = arith.constant 0 : index
    %53 = vector.load %arg2[%c7, %c0_53, %c0_54] : memref<9x8x128xbf16, #tpu.memory_space<vmem>>, vector<1x8x128xbf16>
    %54 = vector.shape_cast %53 : vector<1x8x128xbf16> to vector<8x128xbf16>
    %cst_55 = arith.constant dense<0.000000e+00> : vector<1024x128xf32>
    %55 = tpu.matmul %52, %54, %cst_55 {dimension_numbers = #tpu.dot_dimension_numbers<[1], [0], [0], [1], [0, 0, 1, 1], [], []>} : vector<1024x8xbf16>, vector<8x128xbf16>, vector<1024x128xf32> -> vector<1024x128xf32>
    %56 = arith.addf %49, %55 : vector<1024x128xf32>
    %c0_56 = arith.constant 0 : index
    %c2_57 = arith.constant 2 : index
    %c2_58 = arith.constant 2 : index
    %c0_59 = arith.constant 0 : index
    %57 = vector.load %arg1[%c0_56, %c2_57, %c2_58, %c0_59] : memref<1x34x34x8xbf16, #tpu.memory_space<vmem>>, vector<1x32x32x8xbf16>
    %58 = vector.shape_cast %57 : vector<1x32x32x8xbf16> to vector<32x32x8xbf16>
    %59 = vector.shape_cast %58 : vector<32x32x8xbf16> to vector<1024x8xbf16>
    %c8 = arith.constant 8 : index
    %c0_60 = arith.constant 0 : index
    %c0_61 = arith.constant 0 : index
    %60 = vector.load %arg2[%c8, %c0_60, %c0_61] : memref<9x8x128xbf16, #tpu.memory_space<vmem>>, vector<1x8x128xbf16>
    %61 = vector.shape_cast %60 : vector<1x8x128xbf16> to vector<8x128xbf16>
    %cst_62 = arith.constant dense<0.000000e+00> : vector<1024x128xf32>
    %62 = tpu.matmul %59, %61, %cst_62 {dimension_numbers = #tpu.dot_dimension_numbers<[1], [0], [0], [1], [0, 0, 1, 1], [], []>} : vector<1024x8xbf16>, vector<8x128xbf16>, vector<1024x128xf32> -> vector<1024x128xf32>
    %63 = arith.addf %56, %62 : vector<1024x128xf32>
    %c0_63 = arith.constant 0 : index
    %c0_64 = arith.constant 0 : index
    %64 = vector.load %arg3[%c0_63, %c0_64] : memref<1x128xf32, #tpu.memory_space<vmem>>, vector<1x128xf32>
    %65 = vector.broadcast %64 : vector<1x128xf32> to vector<1024x128xf32>
    %66 = arith.mulf %63, %65 : vector<1024x128xf32>
    %c0_65 = arith.constant 0 : index
    %c0_66 = arith.constant 0 : index
    %67 = vector.load %arg4[%c0_65, %c0_66] : memref<1x128xf32, #tpu.memory_space<vmem>>, vector<1x128xf32>
    %68 = vector.broadcast %67 : vector<1x128xf32> to vector<1024x128xf32>
    %69 = arith.addf %66, %68 : vector<1024x128xf32>
    %cst_67 = arith.constant 0.000000e+00 : f32
    %70 = vector.broadcast %cst_67 : f32 to vector<1024x128xf32>
    %71 = arith.maximumf %69, %70 : vector<1024x128xf32>
    %72 = vector.shape_cast %71 : vector<1024x128xf32> to vector<32x32x128xf32>
    %c0_68 = arith.constant 0 : index
    %c0_69 = arith.constant 0 : index
    %c0_70 = arith.constant 0 : index
    %c0_71 = arith.constant 0 : index
    %73 = vector.load %arg5[%c0_68, %c0_69, %c0_70, %c0_71] : memref<1x32x32x128xf32, #tpu.memory_space<vmem>>, vector<1x32x32x128xf32>
    %74 = vector.shape_cast %73 : vector<1x32x32x128xf32> to vector<32x32x128xf32>
    %75 = vector.shape_cast %72 : vector<32x32x128xf32> to vector<1x32x32x128xf32>
    tpu.vector_store %arg5[%c0_68, %c0_69, %c0_70, %c0_71], %75 {strides = array<i32>} : memref<1x32x32x128xf32, #tpu.memory_space<vmem>>, vector<1x32x32x128xf32>,
    return
  }
  func.func @transform_0(%arg0: i32) -> (i32, i32, i32, i32) {
    %c0_i32 = arith.constant 0 : i32
    %c0_i32_0 = arith.constant 0 : i32
    %c0_i32_1 = arith.constant 0 : i32
    %c0_i32_2 = arith.constant 0 : i32
    return %arg0, %c0_i32, %c0_i32_0, %c0_i32_1 : i32, i32, i32, i32
  }
  func.func @transform_1(%arg0: i32) -> (i32, i32, i32) {
    %c0_i32 = arith.constant 0 : i32
    %c0_i32_0 = arith.constant 0 : i32
    %c0_i32_1 = arith.constant 0 : i32
    %c0_i32_2 = arith.constant 0 : i32
    return %c0_i32, %c0_i32_0, %c0_i32_1 : i32, i32, i32
  }
  func.func @transform_2(%arg0: i32) -> (i32, i32) {
    %c0_i32 = arith.constant 0 : i32
    %c0_i32_0 = arith.constant 0 : i32
    %c0_i32_1 = arith.constant 0 : i32
    return %c0_i32, %c0_i32_0 : i32, i32
  }
  func.func @transform_3(%arg0: i32) -> (i32, i32) {
    %c0_i32 = arith.constant 0 : i32
    %c0_i32_0 = arith.constant 0 : i32
    %c0_i32_1 = arith.constant 0 : i32
    return %c0_i32, %c0_i32_0 : i32, i32
  }
  func.func @transform_4(%arg0: i32) -> (i32, i32, i32, i32) {
    %c0_i32 = arith.constant 0 : i32
    %c0_i32_0 = arith.constant 0 : i32
    %c0_i32_1 = arith.constant 0 : i32
    %c0_i32_2 = arith.constant 0 : i32
    return %arg0, %c0_i32, %c0_i32_0, %c0_i32_1 : i32, i32, i32, i32
  }
}

</mosaic_0001>

<bundles_post_ra>
// kernel: tpu_custom_call.1
= control target key start
LH: loop header
LB: loop body
LE: loop exit
PB: predicated region body
PF: predicated region fallthrough
CT: control target
= control target key end

     0   :  { %9 = vsyncpa [#allocation3], 0  ;;  %s28849_s0 = inlined_call_operand.vmem [shape: bf16[2,34,34,8], index: 0, kind: input, shape index: {}]   ;;  %s28850_s1 = inlined_call_operand.vmem [shape: bf16[9,8,128], index: 1, kind: input, shape index: {}]   ;;  %s28851_s2 = inlined_call_operand.vmem [shape: f32[1,128], index: 2, kind: input, shape index: {}]   ;;  %s28852_s3 = inlined_call_operand.vmem [shape: f32[1,128], index: 3, kind: input, shape index: {}]   ;;  %s28853_s4 = inlined_call_operand.hbm [shape: f32[2,32,32,128], index: 4, kind: output, shape index: {}]  }
   0x1   :  { %11 = vsyncpa [#allocation3 + $0x1], 0  ;;  %s22668_s15 = smov 0   ;;  %s22670_s16 = smov 0  }
   0x2   :  { %s22672_s17 = smov 0   ;;  %s22674_s18 = smov 0  }
   0x3 LB: > { %s22689_s19 = sadd.s32 4294967295, %s22638_s18   ;;  %s17182_s20 = sadd.s32 4294967294, %s22638_s18   ;;  %s22638_s18 = sphi %s22674_s18, %s29219_s18   ;;  %s22634_s17 = sphi %s22672_s17, %s29218_s17   ;;  %s22630_s16 = sphi %s22670_s16, %s29217_s16   ;;  %s22626_s15 = sphi %s22668_s15, %s29216_s15  }
   0x4   : > { %s22693_s21 = sadd.s32 1, %s22638_s18   ;;  %s113_s22 = sadd.s32 1, %s22634_s17 }
   0x5   : > { %s110_s23 = ssub.s32 %s22638_s18, %s22693_s21  ;;  %p123_p0 = scmp.ne.s32.totalorder %s22634_s17, %s22630_s16 }
   0x6   : > { %p111_p1 = scmp.eq.s32.totalorder %s110_s23, 0  ;;  %p124_p2 = scmp.eq.s32.totalorder %s22689_s19, 1 }
   0x7   : > { %p129_p3 = scmp.ne.s32.totalorder %s22630_s16, %s22626_s15  ;;  %p130_p4 = scmp.eq.s32.totalorder %s17182_s20, 1 }
   0x8   : > { %s22704_s24 = scalar_select %p111_p1, %s22634_s17, %s113_s22  }
   0x9   : > { %p22706_p5 = por %p124_p2, %p123_p0  ;;  %p22710_p6 = por %p130_p4, %p129_p3 }
   0xa   : > { %p17185_p7 = scmp.ge.s32.totalorder %s22638_s18, 1  ;;  %p165_p8 = scmp.lt.s32.totalorder %s22638_s18, 3 }
   0xc   : > { %p166_p9 = pnand %p17185_p7, %p165_p8 }
   0xe   : > { %169 = sbr.rel (%p166_p9) target bundleno = 1613 (0x64d), region = 36 }
  0x15   : > { %v17188_v0 = vld [vmem:[%s28850_s1 + $0x4] sm:$0xf]  ;;  %vm2156_vm0 = vcmask 1043456   ;;  %v18023_v1 = vld [vmem:[%s28850_s1 + $0x10] sm:$0xf]  ;;  %p191_p10 = scmp.lt.s32.totalorder %s22689_s19, 1 }
  0x16   : > { %21873 = vmatprep.subr.msk.bf16.mxu1 %vm2156_vm0, %v17188_v0  ;;  %21877 = vmatprep.subr.msk.bf16.mxu0 %vm2156_vm0, %v18023_v1  ;;  %v2158_v2 = vsel %vm2156_vm0, %v17188_v0, 0  ;;  %v22727_v3 = vsel %vm2156_vm0, %v18023_v1, 0  ;;  %v325_v4 = vld [vmem:[%s28850_s1] sm:$0xf]  ;;  %v18216_v5 = vld [vmem:[%s28850_s1 + $0x14] sm:$0xf] }
  0x17   : > { %28907 = vst [vmem:[#allocation5_spill] sm:$0xff] %v22727_v3  ;;  %19678 = vmatpush3.bf16.msra.mxu1 %v2158_v2  ;;  %20198 = vmatpush3.bf16.msra.mxu0 %v22727_v3  ;;  %s192_s5 = scalar_select %p191_p10, %s22689_s19, 1  ;;  %vm358_vm1 = vsmask.f32 3328  ;;  %vm359_vm2 = vsmask.f32 7440 }
  0x18   : > { %21874 = vmatprep.subr.msk.bf16.mxu1 %vm2156_vm0, %v325_v4  ;;  %21879 = vmatprep.subr.msk.bf16.mxu0 %vm2156_vm0, %v18216_v5  ;;  %v22745_v6 = vsel %vm2156_vm0, %v325_v4, 0  ;;  %v22748_v7 = vsel %vm2156_vm0, %v18216_v5, 0  ;;  %vm1963_vm3 = vcmask 64512   ;;  %vm22764_vm4 = vmor %vm358_vm1, %vm359_vm2  ;;  %v28908_v32 = vmov 0  ;;  %s188_s14 = sand.u32 1, %s22630_s16   ;;  %s19091_s7 = sshll.u32 %s22689_s19, 14 }
  0x19   : > { %s21883_s10 = smul.u32 680, %s192_s5  ;;  %v28909_v32 = vsel %vm22764_vm4, 4294967295, %v28908_v32  ;;  %vm3861_vm5 = vcmask 1042432   ;;  %vm3862_vm6 = vcmask 1046532   ;;  %s28232_s28 = sshll.u32 %s188_s14, 10 }
  0x1a   : > { %28910 = vst [vmem:[#allocation6_spill] sm:$0xff] %v28909_v32  ;;  %vm23271_vm7 = vmor %vm3861_vm5, %vm3862_vm6  ;;  %s28273_s29 = scalar_lea.vmem [#allocation2], %s28232_s28  ;;  %s28799_s11 = scalar_lea.hbm %s28853_s4, %s19091_s7 }
  0x1b   : > { %s22742_s13 = scalar_lea.vmem %s28849_s0, %s21883_s10  ;;  %s17120_s8 = sshll.u32 %s28273_s29, 4  ;;  %s28801_s8 = int_to_ptr.vmem [resolvable:$true] %s17120_s8 }
  0x1c   : > { %v197_v8 = vld [vmem:[%s22742_s13] sm:$0xf]  ;;  %v198_v9 = vld [vmem:[%s22742_s13 + $0x4] sm:$0xf]  ;;  %v199_v10 = vld [vmem:[%s22742_s13 + $0x8] sm:$0xf] }
  0x1d   : > { %v362_v11 = vshrl.u32 %v197_v8, 16  ;;  %v365_v12 = vshll.u32 %v197_v8, 16  ;;  %v371_v13 = vshll.u32 %v198_v9, 16  ;;  %v375_v14 = vshrl.u32 %v198_v9, 16  ;;  %v17863_v17 = vld [vmem:[%s22742_s13 + $0x14] sm:$0xf] }
  0x1e   : > { %v381_v15 = vshll.u32 %v199_v10, 16  ;;  %v385_v16 = vshrl.u32 %v199_v10, 16  ;;  %v22755_v18 = vld [vmem:[%s22742_s13 + $0x18] sm:$0xf]  ;;  %v22758_v23 = vld [vmem:[%s22742_s13 + $0x1c] sm:$0xf] }
  0x1f   : > { %v364_v19 = vrot.slane %v362_v11, 4  ;;  %v367_v20 = vrot.slane %v365_v12, 5  ;;  %v373_v21 = vrot.slane %v371_v13, 5  ;;  %v377_v22 = vrot.slane %v375_v14, 4  ;;  %v200_v41 = vld [vmem:[%s22742_s13 + $0xc] sm:$0xf] }
  0x20   : > { %v383_v24 = vrot.slane %v381_v15, 5  ;;  %v387_v25 = vrot.slane %v385_v16, 4  ;;  %v6822_v26 = vshrl.u32 %v17863_v17, 16  ;;  %v6825_v27 = vshll.u32 %v17863_v17, 16  ;;  %v326_v45 = vld [vmem:[%s22742_s13 + $0x10] sm:$0x1] }
  0x21   : > { %v368_v28 = vor.u32 %v367_v20, %v364_v19  ;;  %v378_v29 = vor.u32 %v377_v22, %v373_v21  ;;  %v6831_v30 = vshll.u32 %v22755_v18, 16  ;;  %v6835_v31 = vshrl.u32 %v22755_v18, 16  ;;  %v22778_v58 = vld [vmem:[%s22742_s13 + $0x20] sm:$0xf]  ;;  %v22789_v63 = vld [vmem:[%s22742_s13 + $0x24] sm:$0x1] }
  0x22   : > { %v388_v33 = vor.u32 %v387_v25, %v383_v24  ;;  %v6824_v34 = vrot.slane %v6822_v26, 4  ;;  %v6827_v35 = vrot.slane %v6825_v27, 5  ;;  %v6841_v36 = vshll.u32 %v22758_v23, 16  ;;  %v201_v5 = vld [vmem:[%s22742_s13 + $0x14] sm:$0xf]  ;;  %s28808_s19 = scalar_lea.sflag [#allocation3], %s188_s14 }
  0x23   : > { %v369_v37 = vrot.slane %v368_v28, 4  ;;  %v379_v38 = vrot.slane %v378_v29, 4  ;;  %v6833_v39 = vrot.slane %v6831_v30, 5  ;;  %v6837_v40 = vrot.slane %v6835_v31, 4  ;;  %v202_v16 = vld [vmem:[%s22742_s13 + $0x18] sm:$0xf] }
  0x24   : > { %v6828_v42 = vor.u32 %v6827_v35, %v6824_v34  ;;  %v6843_v43 = vrot.slane %v6841_v36, 5  ;;  %v6845_v44 = vshrl.u32 %v22758_v23, 16  ;;  %v389_v48 = vrot.slane %v388_v33, 4  ;;  %v17868_v28 = vld [vmem:[%s22742_s13 + $0x28] sm:$0xf]  ;;  %s22576_s12 = scalar_lea.vmem %s28801_s8, 16384 }
  0x25   : > { %v374_v46 = vsel %vm22764_vm4, %v369_v37, %v373_v21  ;;  %v384_v47 = vsel %vm22764_vm4, %v379_v38, %v383_v24  ;;  %v6838_v49 = vor.u32 %v6837_v40, %v6833_v39  ;;  %v9488_v53 = vrot.slane %v22758_v23, 5  ;;  %v203_v21 = vld [vmem:[%s22742_s13 + $0x1c] sm:$0xf]  ;;  %v17869_v38 = vld [vmem:[%s22742_s13 + $0x2c] sm:$0xf]  ;;  %p22577_p11 = scmp.ne.s32.totalorder %s28801_s8, %s22576_s12  ;;  %s22640_s20 = smov [#allocation2]  }
  0x26   : > { %v17189_v50 = vcombine.low %v374_v46, %v384_v47  ;;  %v6829_v51 = vrot.slane %v6828_v42, 4  ;;  %v6847_v52 = vrot.slane %v6845_v44, 4  ;;  %v391_v55 = vshll.u32 %v200_v41, 16  ;;  %v17870_v46 = vld [vmem:[%s22742_s13 + $0x30] sm:$0xf]  ;;  %s22580_s22 = sshll.u32 %s22640_s20, 4  ;;  %s22581_s22 = int_to_ptr.vmem [resolvable:$false] %s22580_s22 }
  0x27   : > { %v6839_v54 = vrot.slane %v6838_v49, 4  ;;  %v395_v56 = vshrl.u32 %v200_v41, 16  ;;  %v401_v57 = vshll.u32 %v326_v45, 16  ;;  %v9485_v61 = vrot.slane %v22755_v18, 5  ;;  %v18016_v3 = vld [vmem:[%s22742_s13 + $0x278] sm:$0xf]  ;;  %p22578_p12 = pnand %p22577_p11, %p22706_p5  ;;  %p22583_p0 = scmp.lt.s32.totalorder %s28801_s8, %s22581_s22 }
  0x28   : > { %19679 = vmatprep.mubr.msk.bf16.mxu1 %vm1963_vm3, %v17189_v50  ;;  %v6834_v59 = vsel %vm22764_vm4, %v6829_v51, %v6833_v39  ;;  %v6848_v60 = vor.u32 %v6847_v52, %v6843_v43  ;;  %v22786_v62 = vrot.slane %v9488_v53, 4  ;;  %v393_v1 = vrot.slane %v391_v55, 5  ;;  %v204_v52 = vld [vmem:[%s22742_s13 + $0x20] sm:$0xf]  ;;  %v18019_v32 = vld [vmem:[%s22742_s13 + $0x284] sm:$0xf] }
  0x29   : > { %v6844_v0 = vsel %vm22764_vm4, %v6839_v54, %v6843_v43  ;;  %v397_v2 = vrot.slane %v395_v56, 4  ;;  %v403_v4 = vrot.slane %v401_v57, 5  ;;  %v6851_v10 = vshll.u32 %v22778_v58, 16  ;;  %p22579_p13 = pneg %p22578_p12  ;;  %s22582_s23 = scalar_lea.vmem %s22581_s22, 32768 }
  0x2a   : > { %v6849_v8 = vrot.slane %v6848_v60, 4  ;;  %v18024_v9 = vcombine.low %v6834_v59, %v6844_v0  ;;  %v6855_v11 = vshrl.u32 %v22778_v58, 16  ;;  %v394_v12 = vsel %vm22764_vm4, %v389_v48, %v393_v1  ;;  %p22584_p1 = scmp.lt.s32.totalorder %s22582_s23, %s22576_s12 }
  0x2b   : > { %v398_v13 = vor.u32 %v397_v2, %v393_v1  ;;  %v6861_v14 = vshll.u32 %v22789_v63, 16  ;;  %v9491_v15 = vrot.slane %v22778_v58, 5  ;;  %v6853_v17 = vrot.slane %v6851_v10, 5  ;;  %v327_v1 = vld [vmem:[%s22742_s13 + $0x24] sm:$0x1] }
  0x2c   : > { %20199 = vmatprep.mubr.msk.bf16.mxu0 %vm1963_vm3, %v18024_v9  ;;  %v6857_v19 = vrot.slane %v6855_v11, 4  ;;  %v9494_v20 = vrot.slane %v22789_v63, 5  ;;  %v406_v22 = vshrl.u32 %v201_v5, 16  ;;  %v409_v27 = vshll.u32 %v201_v5, 16  ;;  %v22117_v58 = vld [vmem:[%s28850_s1 + $0x18] sm:$0xf]  ;;  %p22585_p2 = por %p22584_p1, %p22583_p0 }
  0x2d   : > { %v399_v24 = vrot.slane %v398_v13, 4  ;;  %v6863_v25 = vrot.slane %v6861_v14, 5  ;;  %v22806_v26 = vrot.slane %v9491_v15, 4  ;;  %v6854_v29 = vsel %vm22764_vm4, %v6849_v8, %v6853_v17  ;;  %v17871_v13 = vld [vmem:[%s22742_s13 + $0x34] sm:$0xf] }
  0x2e   : > { %v6858_v30 = vor.u32 %v6857_v19, %v6853_v17  ;;  %v408_v31 = vrot.slane %v406_v22, 4  ;;  %v415_v33 = vshll.u32 %v202_v16, 16  ;;  %v411_v35 = vrot.slane %v409_v27, 5  ;;  %v17872_v27 = vld [vmem:[%s22742_s13 + $0x38] sm:$0x1]  ;;  %p22586_p3 = pnand %p22585_p2, %p22579_p13 }
  0x2f   : > { %v404_v34 = vsel %vm22764_vm4, %v399_v24, %v403_v4  ;;  %v419_v36 = vshrl.u32 %v202_v16, 16  ;;  %v425_v37 = vshll.u32 %v203_v21, 16  ;;  %v6866_v42 = vshrl.u32 %v17868_v28, 16 }
  0x30   : > { %v17190_v39 = vcombine.low %v394_v12, %v404_v34  ;;  %v6859_v40 = vrot.slane %v6858_v30, 4  ;;  %v417_v41 = vrot.slane %v415_v33, 5  ;;  %v412_v43 = vor.u32 %v411_v35, %v408_v31  ;;  %v205_v31 = vld [vmem:[%s22742_s13 + $0x28] sm:$0xf] }
  0x31   : > { %v421_v44 = vrot.slane %v419_v36, 4  ;;  %v427_v45 = vrot.slane %v425_v37, 5  ;;  %v6869_v47 = vshll.u32 %v17868_v28, 16  ;;  %v6868_v49 = vrot.slane %v6866_v42, 4  ;;  %v206_v37 = vld [vmem:[%s22742_s13 + $0x2c] sm:$0xf] }
  0x32   : > { %19680 = vmatmul.mubr.msk.bf16.vlgmr.msra.gmra.mrb[0].mxu1 %vm1963_vm3, %v17190_v39  ;;  %v6864_v48 = vsel %vm22764_vm4, %v6859_v40, %v6863_v25  ;;  %v6875_v50 = vshll.u32 %v17869_v38, 16  ;;  %v6879_v51 = vshrl.u32 %v17869_v38, 16  ;;  %v413_v55 = vrot.slane %v412_v43, 4 }
  0x33   : > { %19808 = vmatpush3.bf16.msra.mxu1 %v22745_v6  ;;  %v18025_v54 = vcombine.low %v6854_v29, %v6864_v48  ;;  %v422_v56 = vor.u32 %v421_v44, %v417_v41  ;;  %v6871_v57 = vrot.slane %v6869_v47, 5  ;;  %v6885_v0 = vshll.u32 %v17870_v46, 16 }
  0x34   : > { %v6877_v59 = vrot.slane %v6875_v50, 5  ;;  %v6881_v60 = vrot.slane %v6879_v51, 4  ;;  %v429_v2 = vshrl.u32 %v203_v21, 16  ;;  %v418_v4 = vsel %vm22764_vm4, %v413_v55, %v417_v41  ;;  %v17873_v51 = vld [vmem:[%s22742_s13 + $0x3c] sm:$0xf] }
  0x35   : > { %20200 = vmatmul.mubr.msk.bf16.vlgmr.msra.gmra.mrb[0].mxu0 %vm1963_vm3, %v18025_v54  ;;  %v423_v5 = vrot.slane %v422_v56, 4  ;;  %v6872_v8 = vor.u32 %v6871_v57, %v6868_v49  ;;  %v435_v9 = vshll.u32 %v204_v52, 16  ;;  %v6887_v10 = vrot.slane %v6885_v0, 5  ;;  %v17874_v57 = vld [vmem:[%s22742_s13 + $0x40] sm:$0xf] }
  0x36   : > { %20328 = vmatpush3.bf16.msra.mxu0 %v22748_v7  ;;  %v6882_v6 = vor.u32 %v6881_v60, %v6877_v59  ;;  %v431_v11 = vrot.slane %v429_v2, 4  ;;  %v439_v12 = vshrl.u32 %v204_v52, 16  ;;  %v445_v19 = vshll.u32 %v327_v1, 16 }
  0x37   : > { %v428_v14 = vsel %vm22764_vm4, %v423_v5, %v427_v45  ;;  %v6873_v16 = vrot.slane %v6872_v8, 4  ;;  %v437_v17 = vrot.slane %v435_v9, 5  ;;  %v6889_v29 = vshrl.u32 %v17870_v46, 16 }
  0x38   : > { %v17191_v21 = vcombine.low %v418_v4, %v428_v14  ;;  %v6883_v22 = vrot.slane %v6882_v6, 4  ;;  %v432_v24 = vor.u32 %v431_v11, %v427_v45  ;;  %v441_v25 = vrot.slane %v439_v12, 4  ;;  %v207_v45 = vld [vmem:[%s22742_s13 + $0x30] sm:$0xf] }
  0x39   : > { %v6878_v7 = vsel %vm22764_vm4, %v6873_v16, %v6877_v59  ;;  %v447_v28 = vrot.slane %v445_v19, 5  ;;  %v6895_v30 = vshll.u32 %v17871_v13, 16  ;;  %v6899_v36 = vshrl.u32 %v17871_v13, 16  ;;  %v208_v19 = vld [vmem:[%s22742_s13 + $0x34] sm:$0xf] }
  0x3a   : > { %19683 = vmatprep.mubr.msk.bf16.mxu1 %vm1963_vm3, %v17191_v21  ;;  %v6888_v33 = vsel %vm22764_vm4, %v6883_v22, %v6887_v10  ;;  %v433_v34 = vrot.slane %v432_v24, 4  ;;  %v442_v35 = vor.u32 %v441_v25, %v437_v17  ;;  %v6891_v39 = vrot.slane %v6889_v29, 4 }
  0x3b   : > { %v18026_v38 = vcombine.low %v6878_v7, %v6888_v33  ;;  %v6897_v40 = vrot.slane %v6895_v30, 5  ;;  %v6905_v41 = vshll.u32 %v17872_v27, 16  ;;  %v6901_v44 = vrot.slane %v6899_v36, 4  ;;  %v328_v33 = vld [vmem:[%s22742_s13 + $0x38] sm:$0x1] }
  0x3c   : > { %v438_v42 = vsel %vm22764_vm4, %v433_v34, %v437_v17  ;;  %v443_v43 = vrot.slane %v442_v35, 4  ;;  %v450_v46 = vshrl.u32 %v205_v31, 16  ;;  %v6892_v47 = vor.u32 %v6891_v39, %v6887_v10  ;;  %v17875_v10 = vld [vmem:[%s22742_s13 + $0x44] sm:$0xf] }
  0x3d   : > { %20203 = vmatprep.mubr.msk.bf16.mxu0 %vm1963_vm3, %v18026_v38  ;;  %v6907_v48 = vrot.slane %v6905_v41, 5  ;;  %v453_v49 = vshll.u32 %v205_v31, 16  ;;  %v459_v50 = vshll.u32 %v206_v37, 16  ;;  %v6902_v54 = vor.u32 %v6901_v44, %v6897_v40 }
  0x3e   : > { %v448_v52 = vsel %vm22764_vm4, %v443_v43, %v447_v28  ;;  %v452_v55 = vrot.slane %v450_v46, 4  ;;  %v463_v56 = vshrl.u32 %v206_v37, 16  ;;  %v6893_v60 = vrot.slane %v6892_v47, 4 }
  0x3f   : > { %v17192_v59 = vcombine.low %v438_v42, %v448_v52  ;;  %v455_v0 = vrot.slane %v453_v49, 5  ;;  %v461_v1 = vrot.slane %v459_v50, 5  ;;  %v6903_v2 = vrot.slane %v6902_v54, 4 }
  0x40   : > { %v465_v4 = vrot.slane %v463_v56, 4  ;;  %v469_v5 = vshll.u32 %v207_v45, 16  ;;  %v6910_v8 = vshrl.u32 %v17873_v51, 16  ;;  %v6898_v9 = vsel %vm22764_vm4, %v6893_v60, %v6897_v40  ;;  %v17876_v40 = vld [vmem:[%s22742_s13 + $0x48] sm:$0xf] }
  0x41   : > { %19684 = vmatmul.mubr.msk.bf16.gmra.mrb[4].mxu1 %vm1963_vm3, %v17192_v59  ;;  %v456_v6 = vor.u32 %v455_v0, %v452_v55  ;;  %v6913_v11 = vshll.u32 %v17873_v51, 16  ;;  %v6919_v12 = vshll.u32 %v17874_v57, 16  ;;  %v6908_v13 = vsel %vm22764_vm4, %v6903_v2, %v6907_v48  ;;  %v17877_v48 = vld [vmem:[%s22742_s13 + $0x4c] sm:$0x1]  ;;  %v209_v55 = vld [vmem:[%s22742_s13 + $0x3c] sm:$0xf] }
  0x42   : > { %v466_v14 = vor.u32 %v465_v4, %v461_v1  ;;  %v471_v16 = vrot.slane %v469_v5, 5  ;;  %v6912_v17 = vrot.slane %v6910_v8, 4  ;;  %v18027_v21 = vcombine.low %v6898_v9, %v6908_v13 }
  0x43   : > { %v457_v22 = vrot.slane %v456_v6, 4  ;;  %v6915_v24 = vrot.slane %v6913_v11, 5  ;;  %v6921_v25 = vrot.slane %v6919_v12, 5  ;;  %v6923_v7 = vshrl.u32 %v17874_v57, 16  ;;  %v210_v6 = vld [vmem:[%s22742_s13 + $0x40] sm:$0xf] }
  0x44   : > { %v467_v27 = vrot.slane %v466_v14, 4  ;;  %v6929_v28 = vshll.u32 %v17875_v10, 16  ;;  %v473_v29 = vshrl.u32 %v207_v45, 16  ;;  %20204 = vmatmul.mubr.msk.bf16.gmra.mrb[4].mxu0 %vm1963_vm3, %v18027_v21  ;;  %v479_v34 = vshll.u32 %v208_v19, 16 }
  0x45   : > { %v462_v30 = vsel %vm22764_vm4, %v457_v22, %v461_v1  ;;  %v6916_v31 = vor.u32 %v6915_v24, %v6912_v17  ;;  %v483_v35 = vshrl.u32 %v208_v19, 16  ;;  %v6925_v37 = vrot.slane %v6923_v7, 4  ;;  %v17878_v17 = vld [vmem:[%s22742_s13 + $0x50] sm:$0xf] }
  0x46   : > { %v472_v36 = vsel %vm22764_vm4, %v467_v27, %v471_v16  ;;  %v6931_v38 = vrot.slane %v6929_v28, 5  ;;  %v475_v39 = vrot.slane %v473_v29, 4  ;;  %v481_v43 = vrot.slane %v479_v34, 5  ;;  %v17879_v29 = vld [vmem:[%s22742_s13 + $0x54] sm:$0xf] }
  0x47   : > { %v17193_v41 = vcombine.low %v462_v30, %v472_v36  ;;  %v6917_v42 = vrot.slane %v6916_v31, 4  ;;  %v485_v44 = vrot.slane %v483_v35, 4  ;;  %v6926_v45 = vor.u32 %v6925_v37, %v6921_v25 }
  0x48   : > { %v476_v46 = vor.u32 %v475_v39, %v471_v16  ;;  %v489_v47 = vshll.u32 %v328_v33, 16  ;;  %v6933_v49 = vshrl.u32 %v17875_v10, 16  ;;  %v6939_v52 = vshll.u32 %v17876_v40, 16  ;;  %v211_v10 = vld [vmem:[%s22742_s13 + $0x44] sm:$0xf] }
  0x49   : > { %19687 = vmatprep.mubr.msk.bf16.mxu1 %vm1963_vm3, %v17193_v41  ;;  %v6922_v50 = vsel %vm22764_vm4, %v6917_v42, %v6921_v25  ;;  %v486_v51 = vor.u32 %v485_v44, %v481_v43  ;;  %v6943_v54 = vshrl.u32 %v17876_v40, 16  ;;  %v6927_v56 = vrot.slane %v6926_v45, 4  ;;  %v17880_v33 = vld [vmem:[%s22742_s13 + $0x58] sm:$0xf]  ;;  %v212_v40 = vld [vmem:[%s22742_s13 + $0x48] sm:$0xf] }
  0x4a   : > { %v477_v57 = vrot.slane %v476_v46, 4  ;;  %v491_v59 = vrot.slane %v489_v47, 5  ;;  %v6935_v60 = vrot.slane %v6933_v49, 4  ;;  %v6941_v1 = vrot.slane %v6939_v52, 5 }
  0x4b   : > { %v487_v0 = vrot.slane %v486_v51, 4  ;;  %v6945_v2 = vrot.slane %v6943_v54, 4  ;;  %v6949_v4 = vshll.u32 %v17877_v48, 16  ;;  %v6932_v5 = vsel %vm22764_vm4, %v6927_v56, %v6931_v38  ;;  %v329_v51 = vld [vmem:[%s22742_s13 + $0x4c] sm:$0x1] }
  0x4c   : > { %v482_v8 = vsel %vm22764_vm4, %v477_v57, %v481_v43  ;;  %v6936_v9 = vor.u32 %v6935_v60, %v6931_v38  ;;  %v494_v11 = vshrl.u32 %v209_v55, 16  ;;  %v18028_v12 = vcombine.low %v6922_v50, %v6932_v5 }
  0x4d   : > { %v492_v13 = vsel %vm22764_vm4, %v487_v0, %v491_v59  ;;  %v6946_v14 = vor.u32 %v6945_v2, %v6941_v1  ;;  %v6951_v16 = vrot.slane %v6949_v4, 5  ;;  %v497_v24 = vshll.u32 %v209_v55, 16  ;;  %v17881_v4 = vld [vmem:[%s22742_s13 + $0x5c] sm:$0xf] }
  0x4e   : > { %v17194_v19 = vcombine.low %v482_v8, %v492_v13  ;;  %v6937_v21 = vrot.slane %v6936_v9, 4  ;;  %v496_v22 = vrot.slane %v494_v11, 4  ;;  %20207 = vmatprep.mubr.msk.bf16.mxu0 %vm1963_vm3, %v18028_v12  ;;  %v503_v27 = vshll.u32 %v210_v6, 16 }
  0x4f   : > { %v6947_v25 = vrot.slane %v6946_v14, 4  ;;  %v507_v7 = vshrl.u32 %v210_v6, 16  ;;  %v513_v28 = vshll.u32 %v211_v10, 16  ;;  %v499_v31 = vrot.slane %v497_v24, 5 }
  0x50   : > { %19688 = vmatmul.mubr.msk.bf16.gmra.mrb[8].mxu1 %vm1963_vm3, %v17194_v19  ;;  %v6942_v30 = vsel %vm22764_vm4, %v6937_v21, %v6941_v1  ;;  %v6954_v34 = vshrl.u32 %v17878_v17, 16  ;;  %v6957_v35 = vshll.u32 %v17878_v17, 16  ;;  %v505_v37 = vrot.slane %v503_v27, 5 }
  0x51   : > { %v6952_v36 = vsel %vm22764_vm4, %v6947_v25, %v6951_v16  ;;  %v509_v38 = vrot.slane %v507_v7, 4  ;;  %v515_v39 = vrot.slane %v513_v28, 5  ;;  %v500_v42 = vor.u32 %v499_v31, %v496_v22  ;;  %v213_v16 = vld [vmem:[%s22742_s13 + $0x50] sm:$0xf]  ;;  %v214_v31 = vld [vmem:[%s22742_s13 + $0x54] sm:$0xf] }
  0x52   : > { %v18029_v41 = vcombine.low %v6942_v30, %v6952_v36  ;;  %v6956_v43 = vrot.slane %v6954_v34, 4  ;;  %v6959_v44 = vrot.slane %v6957_v35, 5  ;;  %v6963_v46 = vshll.u32 %v17879_v29, 16 }
  0x53   : > { %v510_v45 = vor.u32 %v509_v38, %v505_v37  ;;  %v6967_v47 = vshrl.u32 %v17879_v29, 16  ;;  %v6973_v48 = vshll.u32 %v17880_v33, 16  ;;  %v501_v49 = vrot.slane %v500_v42, 4  ;;  %v215_v38 = vld [vmem:[%s22742_s13 + $0x58] sm:$0xf] }
  0x54   : > { %20208 = vmatmul.mubr.msk.bf16.gmra.mrb[8].mxu0 %vm1963_vm3, %v18029_v41  ;;  %v6960_v50 = vor.u32 %v6959_v44, %v6956_v43  ;;  %v517_v52 = vshrl.u32 %v211_v10, 16  ;;  %v523_v54 = vshll.u32 %v212_v40, 16  ;;  %v6965_v56 = vrot.slane %v6963_v46, 5  ;;  %v17882_v10 = vld [vmem:[%s22742_s13 + $0x60] sm:$0x1] }
  0x55   : > { %v511_v55 = vrot.slane %v510_v45, 4  ;;  %v6969_v57 = vrot.slane %v6967_v47, 4  ;;  %v6975_v59 = vrot.slane %v6973_v48, 5  ;;  %v506_v60 = vsel %vm22764_vm4, %v501_v49, %v505_v37 }
  0x56   : > { %v6961_v0 = vrot.slane %v6960_v50, 4  ;;  %v519_v1 = vrot.slane %v517_v52, 4  ;;  %v525_v2 = vrot.slane %v523_v54, 5  ;;  %v527_v9 = vshrl.u32 %v212_v40, 16 }
  0x57   : > { %v516_v5 = vsel %vm22764_vm4, %v511_v55, %v515_v39  ;;  %v6970_v8 = vor.u32 %v6969_v57, %v6965_v56  ;;  %v533_v6 = vshll.u32 %v329_v51, 16  ;;  %v6977_v14 = vshrl.u32 %v17880_v33, 16  ;;  %v17884_v51 = vld [vmem:[%s22742_s13 + $0x68] sm:$0xf] }
  0x58   : > { %v17195_v11 = vcombine.low %v506_v60, %v516_v5  ;;  %v6966_v12 = vsel %vm22764_vm4, %v6961_v0, %v6965_v56  ;;  %v520_v13 = vor.u32 %v519_v1, %v515_v39  ;;  %v529_v19 = vrot.slane %v527_v9, 4  ;;  %v17883_v39 = vld [vmem:[%s22742_s13 + $0x64] sm:$0xf] }
  0x59   : > { %v6971_v17 = vrot.slane %v6970_v8, 4  ;;  %v535_v21 = vrot.slane %v533_v6, 5  ;;  %v6983_v22 = vshll.u32 %v17881_v4, 16  ;;  %v6979_v25 = vrot.slane %v6977_v14, 4  ;;  %v216_v6 = vld [vmem:[%s22742_s13 + $0x5c] sm:$0xf] }
  0x5a   : > { %19691 = vmatprep.mubr.msk.bf16.mxu1 %vm1963_vm3, %v17195_v11  ;;  %v521_v24 = vrot.slane %v520_v13, 4  ;;  %v6987_v27 = vshrl.u32 %v17881_v4, 16  ;;  %v6993_v7 = vshll.u32 %v17882_v10, 16  ;;  %v530_v29 = vor.u32 %v529_v19, %v525_v2  ;;  %v330_v19 = vld [vmem:[%s22742_s13 + $0x60] sm:$0x1] }
  0x5b   : > { %v6976_v28 = vsel %vm22764_vm4, %v6971_v17, %v6975_v59  ;;  %v6985_v30 = vrot.slane %v6983_v22, 5  ;;  %v538_v33 = vshrl.u32 %v213_v16, 16  ;;  %v6980_v36 = vor.u32 %v6979_v25, %v6975_v59  ;;  %v17885_v59 = vld [vmem:[%s22742_s13 + $0x6c] sm:$0xf] }
  0x5c   : > { %v18030_v34 = vcombine.low %v6966_v12, %v6976_v28  ;;  %v526_v35 = vsel %vm22764_vm4, %v521_v24, %v525_v2  ;;  %v6989_v37 = vrot.slane %v6987_v27, 4  ;;  %v531_v40 = vrot.slane %v530_v29, 4 }
  0x5d   : > { %v6995_v41 = vrot.slane %v6993_v7, 5  ;;  %v540_v42 = vrot.slane %v538_v33, 4  ;;  %v541_v43 = vshll.u32 %v213_v16, 16  ;;  %v6981_v44 = vrot.slane %v6980_v36, 4 }
  0x5e   : > { %20211 = vmatprep.mubr.msk.bf16.mxu0 %vm1963_vm3, %v18030_v34  ;;  %v6990_v45 = vor.u32 %v6989_v37, %v6985_v30  ;;  %v547_v46 = vshll.u32 %v214_v31, 16  ;;  %v551_v47 = vshrl.u32 %v214_v31, 16  ;;  %v536_v48 = vsel %vm22764_vm4, %v531_v40, %v535_v21  ;;  %v17886_v31 = vld [vmem:[%s22742_s13 + $0x70] sm:$0xf] }
  0x5f   : > { %v543_v49 = vrot.slane %v541_v43, 5  ;;  %v557_v50 = vshll.u32 %v215_v38, 16  ;;  %v6998_v52 = vshrl.u32 %v17883_v39, 16  ;;  %v17196_v54 = vcombine.low %v526_v35, %v536_v48 }
  0x60   : > { %v6986_v55 = vsel %vm22764_vm4, %v6981_v44, %v6985_v30  ;;  %v6991_v56 = vrot.slane %v6990_v45, 4  ;;  %v549_v57 = vrot.slane %v547_v46, 5  ;;  %v553_v0 = vrot.slane %v551_v47, 4  ;;  %v217_v46 = vld [vmem:[%s22742_s13 + $0x64] sm:$0xf] }
  0x61   : > { %v544_v60 = vor.u32 %v543_v49, %v540_v42  ;;  %v559_v1 = vrot.slane %v557_v50, 5  ;;  %v7000_v2 = vrot.slane %v6998_v52, 4  ;;  %19692 = vmatmul.mubr.msk.bf16.gmra.mrb[12].mxu1 %vm1963_vm3, %v17196_v54  ;;  %v7001_v5 = vshll.u32 %v17883_v39, 16 }
  0x62   : > { %v6996_v4 = vsel %vm22764_vm4, %v6991_v56, %v6995_v41  ;;  %v7007_v8 = vshll.u32 %v17884_v51, 16  ;;  %v7011_v9 = vshrl.u32 %v17884_v51, 16  ;;  %v554_v12 = vor.u32 %v553_v0, %v549_v57  ;;  %v17887_v41 = vld [vmem:[%s22742_s13 + $0x74] sm:$0x1]  ;;  %v218_v51 = vld [vmem:[%s22742_s13 + $0x68] sm:$0xf] }
  0x63   : > { %v18031_v10 = vcombine.low %v6986_v55, %v6996_v4  ;;  %v545_v11 = vrot.slane %v544_v60, 4  ;;  %v7017_v13 = vshll.u32 %v17885_v59, 16  ;;  %v7003_v14 = vrot.slane %v7001_v5, 5  ;;  %v219_v0 = vld [vmem:[%s22742_s13 + $0x6c] sm:$0xf] }
  0x64   : > { %v7009_v16 = vrot.slane %v7007_v8, 5  ;;  %v7013_v17 = vrot.slane %v7011_v9, 4  ;;  %v561_v21 = vshrl.u32 %v215_v38, 16  ;;  %v555_v24 = vrot.slane %v554_v12, 4  ;;  %v17888_v9 = vld [vmem:[%s22742_s13 + $0x78] sm:$0xf] }
  0x65   : > { %20212 = vmatmul.mubr.msk.bf16.gmra.mrb[12].mxu0 %vm1963_vm3, %v18031_v10  ;;  %v550_v22 = vsel %vm22764_vm4, %v545_v11, %v549_v57  ;;  %v7019_v25 = vrot.slane %v7017_v13, 5  ;;  %v567_v27 = vshll.u32 %v216_v6, 16  ;;  %v7004_v7 = vor.u32 %v7003_v14, %v7000_v2  ;;  %v17889_v13 = vld [vmem:[%s22742_s13 + $0x7c] sm:$0xf] }
  0x66   : > { %v7014_v28 = vor.u32 %v7013_v17, %v7009_v16  ;;  %v563_v29 = vrot.slane %v561_v21, 4  ;;  %v571_v30 = vshrl.u32 %v216_v6, 16  ;;  %v560_v33 = vsel %vm22764_vm4, %v555_v24, %v559_v1 }
  0x67   : > { %v569_v34 = vrot.slane %v567_v27, 5  ;;  %v577_v35 = vshll.u32 %v330_v19, 16  ;;  %v7021_v36 = vshrl.u32 %v17885_v59, 16  ;;  %v17197_v37 = vcombine.low %v550_v22, %v560_v33 }
  0x68   : > { %v7005_v38 = vrot.slane %v7004_v7, 4  ;;  %v7015_v39 = vrot.slane %v7014_v28, 4  ;;  %v564_v40 = vor.u32 %v563_v29, %v559_v1  ;;  %v573_v42 = vrot.slane %v571_v30, 4  ;;  %v17890_v7 = vld [vmem:[%s22742_s13 + $0x80] sm:$0xf] }
  0x69   : > { %v579_v43 = vrot.slane %v577_v35, 5  ;;  %v7023_v44 = vrot.slane %v7021_v36, 4  ;;  %v7027_v45 = vshll.u32 %v17886_v31, 16  ;;  %19695 = vmatprep.mubr.msk.bf16.mxu1 %vm1963_vm3, %v17197_v37  ;;  %v7031_v50 = vshrl.u32 %v17886_v31, 16  ;;  %v220_v36 = vld [vmem:[%s22742_s13 + $0x70] sm:$0xf] }
  0x6a   : > { %v7010_v47 = vsel %vm22764_vm4, %v7005_v38, %v7009_v16  ;;  %v7020_v48 = vsel %vm22764_vm4, %v7015_v39, %v7019_v25  ;;  %v565_v49 = vrot.slane %v564_v40, 4  ;;  %v574_v54 = vor.u32 %v573_v42, %v569_v34 }
  0x6b   : > { %v18032_v52 = vcombine.low %v7010_v47, %v7020_v48  ;;  %v7024_v55 = vor.u32 %v7023_v44, %v7019_v25  ;;  %v7029_v56 = vrot.slane %v7027_v45, 5  ;;  %v7033_v59 = vrot.slane %v7031_v50, 4  ;;  %v331_v47 = vld [vmem:[%s22742_s13 + $0x74] sm:$0x1] }
  0x6c   : > { %v570_v57 = vsel %vm22764_vm4, %v565_v49, %v569_v34  ;;  %v7037_v60 = vshll.u32 %v17887_v41, 16  ;;  %v582_v1 = vshrl.u32 %v217_v46, 16  ;;  %v575_v2 = vrot.slane %v574_v54, 4 }
  0x6d   : > { %20215 = vmatprep.mubr.msk.bf16.mxu0 %vm1963_vm3, %v18032_v52  ;;  %v7025_v4 = vrot.slane %v7024_v55, 4  ;;  %v585_v5 = vshll.u32 %v217_v46, 16  ;;  %v591_v8 = vshll.u32 %v218_v51, 16  ;;  %v7034_v6 = vor.u32 %v7033_v59, %v7029_v56  ;;  %v17891_v55 = vld [vmem:[%s22742_s13 + $0x84] sm:$0xf] }
  0x6e   : > { %v7039_v10 = vrot.slane %v7037_v60, 5  ;;  %v584_v11 = vrot.slane %v582_v1, 4  ;;  %v595_v12 = vshrl.u32 %v218_v51, 16  ;;  %v580_v14 = vsel %vm22764_vm4, %v575_v2, %v579_v43 }
  0x6f   : > { %v7030_v16 = vsel %vm22764_vm4, %v7025_v4, %v7029_v56  ;;  %v587_v17 = vrot.slane %v585_v5, 5  ;;  %v593_v19 = vrot.slane %v591_v8, 5  ;;  %v17198_v21 = vcombine.low %v570_v57, %v580_v14 }
  0x70   : > { %v7035_v22 = vrot.slane %v7034_v6, 4  ;;  %v597_v24 = vrot.slane %v595_v12, 4  ;;  %v601_v25 = vshll.u32 %v219_v0, 16  ;;  %v7042_v28 = vshrl.u32 %v17888_v9, 16 }
  0x71   : > { %v588_v27 = vor.u32 %v587_v17, %v584_v11  ;;  %v7045_v29 = vshll.u32 %v17888_v9, 16  ;;  %v7051_v30 = vshll.u32 %v17889_v13, 16  ;;  %19696 = vmatmul.mubr.msk.bf16.gmra.mrb[16].mxu1 %vm1963_vm3, %v17198_v21  ;;  %v7055_v35 = vshrl.u32 %v17889_v13, 16  ;;  %v17892_v9 = vld [vmem:[%s22742_s13 + $0x88] sm:$0x1] }
  0x72   : > { %v7040_v31 = vsel %vm22764_vm4, %v7035_v22, %v7039_v10  ;;  %v598_v33 = vor.u32 %v597_v24, %v593_v19  ;;  %v603_v34 = vrot.slane %v601_v25, 5  ;;  %v7044_v39 = vrot.slane %v7042_v28, 4  ;;  %v221_v11 = vld [vmem:[%s22742_s13 + $0x78] sm:$0xf]  ;;  %v222_v17 = vld [vmem:[%s22742_s13 + $0x7c] sm:$0xf] }
  0x73   : > { %v18033_v37 = vcombine.low %v7030_v16, %v7040_v31  ;;  %v589_v38 = vrot.slane %v588_v27, 4  ;;  %v7047_v40 = vrot.slane %v7045_v29, 5  ;;  %v7053_v42 = vrot.slane %v7051_v30, 5  ;;  %v223_v31 = vld [vmem:[%s22742_s13 + $0x80] sm:$0xf] }
  0x74   : > { %v599_v41 = vrot.slane %v598_v33, 4  ;;  %v7057_v43 = vrot.slane %v7055_v35, 4  ;;  %v7061_v44 = vshll.u32 %v17890_v7, 16  ;;  %v605_v48 = vshrl.u32 %v219_v0, 16  ;;  %v17893_v35 = vld [vmem:[%s22742_s13 + $0x8c] sm:$0xf] }
  0x75   : > { %20216 = vmatmul.mubr.msk.bf16.gmra.mrb[16].mxu0 %vm1963_vm3, %v18033_v37  ;;  %v594_v45 = vsel %vm22764_vm4, %v589_v38, %v593_v19  ;;  %v7048_v46 = vor.u32 %v7047_v40, %v7044_v39  ;;  %v611_v49 = vshll.u32 %v220_v36, 16  ;;  %v615_v54 = vshrl.u32 %v220_v36, 16  ;;  %v17894_v40 = vld [vmem:[%s22742_s13 + $0x90] sm:$0xf] }
  0x76   : > { %v604_v50 = vsel %vm22764_vm4, %v599_v41, %v603_v34  ;;  %v7058_v51 = vor.u32 %v7057_v43, %v7053_v42  ;;  %v7063_v52 = vrot.slane %v7061_v44, 5  ;;  %v607_v59 = vrot.slane %v605_v48, 4 }
  0x77   : > { %v17199_v56 = vcombine.low %v594_v45, %v604_v50  ;;  %v7049_v57 = vrot.slane %v7048_v46, 4  ;;  %v613_v60 = vrot.slane %v611_v49, 5  ;;  %v617_v2 = vrot.slane %v615_v54, 4 }
  0x78   : > { %v7059_v1 = vrot.slane %v7058_v51, 4  ;;  %v621_v4 = vshll.u32 %v331_v47, 16  ;;  %v7065_v5 = vshrl.u32 %v17890_v7, 16  ;;  %v608_v8 = vor.u32 %v607_v59, %v603_v34  ;;  %v17895_v51 = vld [vmem:[%s22742_s13 + $0x94] sm:$0xf] }
  0x79   : > { %19699 = vmatprep.mubr.msk.bf16.mxu1 %vm1963_vm3, %v17199_v56  ;;  %v7054_v0 = vsel %vm22764_vm4, %v7049_v57, %v7053_v42  ;;  %v7071_v6 = vshll.u32 %v17891_v55, 16  ;;  %v7075_v10 = vshrl.u32 %v17891_v55, 16  ;;  %v618_v13 = vor.u32 %v617_v2, %v613_v60  ;;  %v224_v55 = vld [vmem:[%s22742_s13 + $0x84] sm:$0xf] }
  0x7a   : > { %v7064_v12 = vsel %vm22764_vm4, %v7059_v1, %v7063_v52  ;;  %v623_v14 = vrot.slane %v621_v4, 5  ;;  %v7067_v16 = vrot.slane %v7065_v5, 4  ;;  %v609_v21 = vrot.slane %v608_v8, 4 }
  0x7b   : > { %v18034_v19 = vcombine.low %v7054_v0, %v7064_v12  ;;  %v7073_v22 = vrot.slane %v7071_v6, 5  ;;  %v7077_v24 = vrot.slane %v7075_v10, 4  ;;  %v619_v25 = vrot.slane %v618_v13, 4 }
  0x7c   : > { %v7068_v27 = vor.u32 %v7067_v16, %v7063_v52  ;;  %v7081_v7 = vshll.u32 %v17892_v9, 16  ;;  %v626_v28 = vshrl.u32 %v221_v11, 16  ;;  %v614_v29 = vsel %vm22764_vm4, %v609_v21, %v613_v60  ;;  %v332_v9 = vld [vmem:[%s22742_s13 + $0x88] sm:$0x1]  ;;  %v17896_v16 = vld [vmem:[%s22742_s13 + $0x98] sm:$0xf] }
  0x7d   : > { %20219 = vmatprep.mubr.msk.bf16.mxu0 %vm1963_vm3, %v18034_v19  ;;  %v7078_v30 = vor.u32 %v7077_v24, %v7073_v22  ;;  %v629_v33 = vshll.u32 %v221_v11, 16  ;;  %v635_v34 = vshll.u32 %v222_v17, 16  ;;  %v624_v36 = vsel %vm22764_vm4, %v619_v25, %v623_v14 }
  0x7e   : > { %v7069_v37 = vrot.slane %v7068_v27, 4  ;;  %v7083_v38 = vrot.slane %v7081_v7, 5  ;;  %v628_v39 = vrot.slane %v626_v28, 4  ;;  %v17200_v41 = vcombine.low %v614_v29, %v624_v36  ;;  %v17897_v28 = vld [vmem:[%s22742_s13 + $0x9c] sm:$0x1] }
  0x7f   : > { %v7079_v42 = vrot.slane %v7078_v30, 4  ;;  %v631_v43 = vrot.slane %v629_v33, 5  ;;  %v637_v44 = vrot.slane %v635_v34, 5  ;;  %v639_v46 = vshrl.u32 %v222_v17, 16  ;;  %v225_v34 = vld [vmem:[%s22742_s13 + $0x8c] sm:$0xf] }
  0x80   : > { %v7074_v45 = vsel %vm22764_vm4, %v7069_v37, %v7073_v22  ;;  %v645_v47 = vshll.u32 %v223_v31, 16  ;;  %v7086_v48 = vshrl.u32 %v17893_v35, 16  ;;  %19700 = vmatmul.mubr.msk.bf16.gmra.mrb[20].mxu1 %vm1963_vm3, %v17200_v41  ;;  %v7089_v52 = vshll.u32 %v17893_v35, 16 }
  0x81   : > { %v7084_v49 = vsel %vm22764_vm4, %v7079_v42, %v7083_v38  ;;  %v632_v50 = vor.u32 %v631_v43, %v628_v39  ;;  %v7095_v54 = vshll.u32 %v17894_v40, 16  ;;  %v641_v57 = vrot.slane %v639_v46, 4  ;;  %v226_v39 = vld [vmem:[%s22742_s13 + $0x90] sm:$0xf] }
  0x82   : > { %v18035_v56 = vcombine.low %v7074_v45, %v7084_v49  ;;  %v647_v59 = vrot.slane %v645_v47, 5  ;;  %v7088_v60 = vrot.slane %v7086_v48, 4  ;;  %v7091_v2 = vrot.slane %v7089_v52, 5  ;;  %v17898_v49 = vld [vmem:[%s22742_s13 + $0xa0] sm:$0xf] }
  0x83   : > { %v633_v1 = vrot.slane %v632_v50, 4  ;;  %v7097_v4 = vrot.slane %v7095_v54, 5  ;;  %v7099_v5 = vshrl.u32 %v17894_v40, 16  ;;  %v642_v0 = vor.u32 %v641_v57, %v637_v44 }
  0x84   : > { %20220 = vmatmul.mubr.msk.bf16.gmra.mrb[20].mxu0 %vm1963_vm3, %v18035_v56  ;;  %v7105_v8 = vshll.u32 %v17895_v51, 16  ;;  %v649_v6 = vshrl.u32 %v223_v31, 16  ;;  %v655_v10 = vshll.u32 %v224_v55, 16  ;;  %v7092_v12 = vor.u32 %v7091_v2, %v7088_v60 }
  0x85   : > { %v638_v11 = vsel %vm22764_vm4, %v633_v1, %v637_v44  ;;  %v7101_v13 = vrot.slane %v7099_v5, 4  ;;  %v659_v14 = vshrl.u32 %v224_v55, 16  ;;  %v643_v17 = vrot.slane %v642_v0, 4  ;;  %v227_v44 = vld [vmem:[%s22742_s13 + $0x94] sm:$0xf] }
  0x86   : > { %v7107_v19 = vrot.slane %v7105_v8, 5  ;;  %v651_v21 = vrot.slane %v649_v6, 4  ;;  %v657_v22 = vrot.slane %v655_v10, 5  ;;  %v7093_v24 = vrot.slane %v7092_v12, 4  ;;  %v17899_v6 = vld [vmem:[%s22742_s13 + $0xa4] sm:$0xf] }
  0x87   : > { %v7102_v25 = vor.u32 %v7101_v13, %v7097_v4  ;;  %v661_v27 = vrot.slane %v659_v14, 4  ;;  %v665_v7 = vshll.u32 %v332_v9, 16  ;;  %v648_v29 = vsel %vm22764_vm4, %v643_v17, %v647_v59  ;;  %v17900_v12 = vld [vmem:[%s22742_s13 + $0xa8] sm:$0xf] }
  0x88   : > { %v652_v30 = vor.u32 %v651_v21, %v647_v59  ;;  %v7109_v31 = vshrl.u32 %v17895_v51, 16  ;;  %v7115_v33 = vshll.u32 %v17896_v16, 16  ;;  %v17201_v35 = vcombine.low %v638_v11, %v648_v29 }
  0x89   : > { %v7098_v36 = vsel %vm22764_vm4, %v7093_v24, %v7097_v4  ;;  %v7103_v37 = vrot.slane %v7102_v25, 4  ;;  %v662_v38 = vor.u32 %v661_v27, %v657_v22  ;;  %v667_v41 = vrot.slane %v665_v7, 5 }
  0x8a   : > { %v653_v40 = vrot.slane %v652_v30, 4  ;;  %v7111_v42 = vrot.slane %v7109_v31, 4  ;;  %v7117_v43 = vrot.slane %v7115_v33, 5  ;;  %19703 = vmatprep.mubr.msk.bf16.mxu1 %vm1963_vm3, %v17201_v35  ;;  %v7119_v47 = vshrl.u32 %v17896_v16, 16  ;;  %v228_v31 = vld [vmem:[%s22742_s13 + $0x98] sm:$0xf] }
  0x8b   : > { %v7108_v45 = vsel %vm22764_vm4, %v7103_v37, %v7107_v19  ;;  %v663_v46 = vrot.slane %v662_v38, 4  ;;  %v7125_v48 = vshll.u32 %v17897_v28, 16  ;;  %v670_v54 = vshrl.u32 %v225_v34, 16  ;;  %v333_v37 = vld [vmem:[%s22742_s13 + $0x9c] sm:$0x1] }
  0x8c   : > { %v18036_v50 = vcombine.low %v7098_v36, %v7108_v45  ;;  %v658_v51 = vsel %vm22764_vm4, %v653_v40, %v657_v22  ;;  %v7112_v52 = vor.u32 %v7111_v42, %v7107_v19  ;;  %v7121_v56 = vrot.slane %v7119_v47, 4  ;;  %v17901_v42 = vld [vmem:[%s22742_s13 + $0xac] sm:$0xf] }
  0x8d   : > { %v668_v55 = vsel %vm22764_vm4, %v663_v46, %v667_v41  ;;  %v7127_v57 = vrot.slane %v7125_v48, 5  ;;  %v673_v59 = vshll.u32 %v225_v34, 16  ;;  %v672_v2 = vrot.slane %v670_v54, 4 }
  0x8e   : > { %20223 = vmatprep.mubr.msk.bf16.mxu0 %vm1963_vm3, %v18036_v50  ;;  %v17202_v60 = vcombine.low %v658_v51, %v668_v55  ;;  %v7113_v1 = vrot.slane %v7112_v52, 4  ;;  %v679_v4 = vshll.u32 %v226_v39, 16  ;;  %v7122_v5 = vor.u32 %v7121_v56, %v7117_v43  ;;  %v17902_v51 = vld [vmem:[%s22742_s13 + $0xb0] sm:$0x1] }
  0x8f   : > { %v675_v0 = vrot.slane %v673_v59, 5  ;;  %v683_v8 = vshrl.u32 %v226_v39, 16  ;;  %v689_v9 = vshll.u32 %v227_v44, 16  ;;  %v7130_v13 = vshrl.u32 %v17898_v49, 16 }
  0x90   : > { %19704 = vmatmul.mubr.msk.bf16.gmra.mrb[24].mxu1 %vm1963_vm3, %v17202_v60  ;;  %v7118_v10 = vsel %vm22764_vm4, %v7113_v1, %v7117_v43  ;;  %v681_v11 = vrot.slane %v679_v4, 5  ;;  %v7133_v14 = vshll.u32 %v17898_v49, 16  ;;  %v7123_v16 = vrot.slane %v7122_v5, 4  ;;  %v230_v4 = vld [vmem:[%s22742_s13 + $0xa4] sm:$0xf] }
  0x91   : > { %v676_v17 = vor.u32 %v675_v0, %v672_v2  ;;  %v685_v19 = vrot.slane %v683_v8, 4  ;;  %v691_v21 = vrot.slane %v689_v9, 5  ;;  %v7132_v22 = vrot.slane %v7130_v13, 4 }
  0x92   : > { %v7135_v24 = vrot.slane %v7133_v14, 5  ;;  %v7139_v25 = vshll.u32 %v17899_v6, 16  ;;  %v7143_v27 = vshrl.u32 %v17899_v6, 16  ;;  %v7128_v7 = vsel %vm22764_vm4, %v7123_v16, %v7127_v57  ;;  %v229_v57 = vld [vmem:[%s22742_s13 + $0xa0] sm:$0xf] }
  0x93   : > { %v677_v28 = vrot.slane %v676_v17, 4  ;;  %v686_v29 = vor.u32 %v685_v19, %v681_v11  ;;  %v7149_v30 = vshll.u32 %v17900_v12, 16  ;;  %v18037_v33 = vcombine.low %v7118_v10, %v7128_v7  ;;  %v231_v6 = vld [vmem:[%s22742_s13 + $0xa8] sm:$0xf]  ;;  %v17904_v7 = vld [vmem:[%s22742_s13 + $0xb8] sm:$0xf] }
  0x94   : > { %v7136_v34 = vor.u32 %v7135_v24, %v7132_v22  ;;  %v7141_v35 = vrot.slane %v7139_v25, 5  ;;  %v7145_v36 = vrot.slane %v7143_v27, 4  ;;  %v693_v41 = vshrl.u32 %v227_v44, 16 }
  0x95   : > { %v682_v38 = vsel %vm22764_vm4, %v677_v28, %v681_v11  ;;  %v687_v39 = vrot.slane %v686_v29, 4  ;;  %v7151_v40 = vrot.slane %v7149_v30, 5  ;;  %20224 = vmatmul.mubr.msk.bf16.gmra.mrb[24].mxu0 %vm1963_vm3, %v18037_v33  ;;  %v699_v46 = vshll.u32 %v228_v31, 16 }
  0x96   : > { %v7137_v43 = vrot.slane %v7136_v34, 4  ;;  %v7146_v45 = vor.u32 %v7145_v36, %v7141_v35  ;;  %v703_v47 = vshrl.u32 %v228_v31, 16  ;;  %v695_v49 = vrot.slane %v693_v41, 4 }
  0x97   : > { %v692_v48 = vsel %vm22764_vm4, %v687_v39, %v691_v21  ;;  %v709_v50 = vshll.u32 %v333_v37, 16  ;;  %v7153_v52 = vshrl.u32 %v17900_v12, 16  ;;  %v701_v56 = vrot.slane %v699_v46, 5 }
  0x98   : > { %v17203_v54 = vcombine.low %v682_v38, %v692_v48  ;;  %v7142_v44 = vsel %vm22764_vm4, %v7137_v43, %v7141_v35  ;;  %v7147_v55 = vrot.slane %v7146_v45, 4  ;;  %v696_v59 = vor.u32 %v695_v49, %v691_v21  ;;  %v17903_v21 = vld [vmem:[%s22742_s13 + $0xb4] sm:$0xf]  ;;  %v17905_v43 = vld [vmem:[%s22742_s13 + $0xbc] sm:$0xf] }
  0x99   : > { %v705_v60 = vrot.slane %v703_v47, 4  ;;  %v711_v1 = vrot.slane %v709_v50, 5  ;;  %v7155_v2 = vrot.slane %v7153_v52, 4  ;;  %v7159_v0 = vshll.u32 %v17901_v42, 16 }
  0x9a   : > { %19707 = vmatprep.mubr.msk.bf16.mxu1 %vm1963_vm3, %v17203_v54  ;;  %v7152_v5 = vsel %vm22764_vm4, %v7147_v55, %v7151_v40  ;;  %v7163_v8 = vshrl.u32 %v17901_v42, 16  ;;  %v7169_v9 = vshll.u32 %v17902_v51, 16  ;;  %v697_v11 = vrot.slane %v696_v59, 4  ;;  %v232_v51 = vld [vmem:[%s22742_s13 + $0xac] sm:$0xf] }
  0x9b   : > { %v18038_v10 = vcombine.low %v7142_v44, %v7152_v5  ;;  %v706_v12 = vor.u32 %v705_v60, %v701_v56  ;;  %v7156_v13 = vor.u32 %v7155_v2, %v7151_v40  ;;  %v7161_v14 = vrot.slane %v7159_v0, 5 }
  0x9c   : > { %v7165_v16 = vrot.slane %v7163_v8, 4  ;;  %v7171_v17 = vrot.slane %v7169_v9, 5  ;;  %v714_v19 = vshrl.u32 %v229_v57, 16  ;;  %v702_v22 = vsel %vm22764_vm4, %v697_v11, %v701_v56  ;;  %v334_v56 = vld [vmem:[%s22742_s13 + $0xb0] sm:$0x1] }
  0x9d   : > { %20227 = vmatprep.mubr.msk.bf16.mxu0 %vm1963_vm3, %v18038_v10  ;;  %v707_v24 = vrot.slane %v706_v12, 4  ;;  %v7157_v25 = vrot.slane %v7156_v13, 4  ;;  %v717_v27 = vshll.u32 %v229_v57, 16  ;;  %v723_v30 = vshll.u32 %v230_v4, 16  ;;  %v17906_v12 = vld [vmem:[%s22742_s13 + $0xc0] sm:$0xf] }
  0x9e   : > { %v7166_v28 = vor.u32 %v7165_v16, %v7161_v14  ;;  %v716_v29 = vrot.slane %v714_v19, 4  ;;  %v727_v31 = vshrl.u32 %v230_v4, 16  ;;  %v733_v36 = vshll.u32 %v231_v6, 16  ;;  %v17907_v19 = vld [vmem:[%s22742_s13 + $0xc4] sm:$0x1] }
  0x9f   : > { %v712_v33 = vsel %vm22764_vm4, %v707_v24, %v711_v1  ;;  %v7162_v34 = vsel %vm22764_vm4, %v7157_v25, %v7161_v14  ;;  %v719_v35 = vrot.slane %v717_v27, 5  ;;  %v725_v39 = vrot.slane %v723_v30, 5 }
  0xa0   : > { %v17204_v37 = vcombine.low %v702_v22, %v712_v33  ;;  %v7167_v38 = vrot.slane %v7166_v28, 4  ;;  %v729_v40 = vrot.slane %v727_v31, 4  ;;  %v735_v42 = vrot.slane %v733_v36, 5  ;;  %v18473_v36 = vld [vmem:[%s28850_s1 + $0x18] sm:$0xf] }
  0xa1   : > { %v720_v41 = vor.u32 %v719_v35, %v716_v29  ;;  %v7174_v45 = vshrl.u32 %v17903_v21, 16  ;;  %v7177_v46 = vshll.u32 %v17903_v21, 16  ;;  %v7183_v49 = vshll.u32 %v17904_v7, 16  ;;  %v233_v21 = vld [vmem:[%s22742_s13 + $0xb4] sm:$0xf]  ;;  %21880 = vmatprep.subr.msk.bf16.mxu0 %vm2156_vm0, %v18473_v36 }
  0xa2   : > { %19708 = vmatmul.mubr.msk.bf16.gmra.mrb[28].mxu1 %vm1963_vm3, %v17204_v37  ;;  %v7172_v47 = vsel %vm22764_vm4, %v7167_v38, %v7171_v17  ;;  %v730_v48 = vor.u32 %v729_v40, %v725_v39  ;;  %v7187_v50 = vshrl.u32 %v17904_v7, 16  ;;  %v7193_v1 = vshll.u32 %v17905_v43, 16  ;;  %v234_v35 = vld [vmem:[%s22742_s13 + $0xb8] sm:$0xf] }
  0xa3   : > { %v18039_v52 = vcombine.low %v7162_v34, %v7172_v47  ;;  %v721_v54 = vrot.slane %v720_v41, 4  ;;  %v7176_v44 = vrot.slane %v7174_v45, 4  ;;  %v7179_v55 = vrot.slane %v7177_v46, 5  ;;  %v235_v41 = vld [vmem:[%s22742_s13 + $0xbc] sm:$0xf] }
  0xa4   : > { %v731_v57 = vrot.slane %v730_v48, 4  ;;  %v7185_v59 = vrot.slane %v7183_v49, 5  ;;  %v7189_v60 = vrot.slane %v7187_v50, 4  ;;  %v737_v5 = vshrl.u32 %v231_v6, 16  ;;  %v17908_v47 = vld [vmem:[%s22742_s13 + $0xc8] sm:$0xf] }
  0xa5   : > { %20228 = vmatmul.mubr.msk.bf16.gmra.mrb[28].mxu0 %vm1963_vm3, %v18039_v52  ;;  %v726_v2 = vsel %vm22764_vm4, %v721_v54, %v725_v39  ;;  %v7180_v4 = vor.u32 %v7179_v55, %v7176_v44  ;;  %v743_v0 = vshll.u32 %v232_v51, 16  ;;  %v7195_v10 = vrot.slane %v7193_v1, 5  ;;  %v17909_v52 = vld [vmem:[%s22742_s13 + $0xcc] sm:$0xf] }
  0xa6   : > { %v736_v8 = vsel %vm22764_vm4, %v731_v57, %v735_v42  ;;  %v7190_v9 = vor.u32 %v7189_v60, %v7185_v59  ;;  %v747_v11 = vshrl.u32 %v232_v51, 16  ;;  %v739_v16 = vrot.slane %v737_v5, 4 }
  0xa7   : > { %v17205_v13 = vcombine.low %v726_v2, %v736_v8  ;;  %v7181_v14 = vrot.slane %v7180_v4, 4  ;;  %v745_v17 = vrot.slane %v743_v0, 5  ;;  %v753_v25 = vshll.u32 %v334_v56, 16  ;;  %v17910_v2 = vld [vmem:[%s22742_s13 + $0xd0] sm:$0xf] }
  0xa8   : > { %v7191_v22 = vrot.slane %v7190_v9, 4  ;;  %v749_v24 = vrot.slane %v747_v11, 4  ;;  %v7197_v27 = vshrl.u32 %v17905_v43, 16  ;;  %v740_v7 = vor.u32 %v739_v16, %v735_v42  ;;  %v236_v9 = vld [vmem:[%s22742_s13 + $0xc0] sm:$0xf] }
  0xa9   : > { %19711 = vmatprep.mubr.msk.bf16.mxu1 %vm1963_vm3, %v17205_v13  ;;  %v7186_v6 = vsel %vm22764_vm4, %v7181_v14, %v7185_v59  ;;  %v7203_v28 = vshll.u32 %v17906_v12, 16  ;;  %v7207_v29 = vshrl.u32 %v17906_v12, 16  ;;  %v755_v33 = vrot.slane %v753_v25, 5 }
  0xaa   : > { %v7196_v30 = vsel %vm22764_vm4, %v7191_v22, %v7195_v10  ;;  %v750_v31 = vor.u32 %v749_v24, %v745_v17  ;;  %v7199_v34 = vrot.slane %v7197_v27, 4  ;;  %v741_v38 = vrot.slane %v740_v7, 4 }
  0xab   : > { %v18040_v37 = vcombine.low %v7186_v6, %v7196_v30  ;;  %v7205_v39 = vrot.slane %v7203_v28, 5  ;;  %v7209_v40 = vrot.slane %v7207_v29, 4  ;;  %v7213_v45 = vshll.u32 %v17907_v19, 16 }
  0xac   : > { %v751_v42 = vrot.slane %v750_v31, 4  ;;  %v7200_v43 = vor.u32 %v7199_v34, %v7195_v10  ;;  %v758_v46 = vshrl.u32 %v233_v21, 16  ;;  %v746_v48 = vsel %vm22764_vm4, %v741_v38, %v745_v17 }
  0xad   : > { %20231 = vmatprep.mubr.msk.bf16.mxu0 %vm1963_vm3, %v18040_v37  ;;  %v7210_v49 = vor.u32 %v7209_v40, %v7205_v39  ;;  %v761_v50 = vshll.u32 %v233_v21, 16  ;;  %v767_v51 = vshll.u32 %v234_v35, 16  ;;  %v7215_v55 = vrot.slane %v7213_v45, 5  ;;  %v335_v21 = vld [vmem:[%s22742_s13 + $0xc4] sm:$0x1] }
  0xae   : > { %v756_v54 = vsel %vm22764_vm4, %v751_v42, %v755_v33  ;;  %v7201_v44 = vrot.slane %v7200_v43, 4  ;;  %v760_v56 = vrot.slane %v758_v46, 4  ;;  %v771_v5 = vshrl.u32 %v234_v35, 16  ;;  %v17911_v35 = vld [vmem:[%s22742_s13 + $0xd4] sm:$0xf] }
  0xaf   : > { %v17206_v57 = vcombine.low %v746_v48, %v756_v54  ;;  %v7211_v59 = vrot.slane %v7210_v49, 4  ;;  %v763_v60 = vrot.slane %v761_v50, 5  ;;  %v769_v1 = vrot.slane %v767_v51, 5  ;;  %v17912_v40 = vld [vmem:[%s22742_s13 + $0xd8] sm:$0x1] }
  0xb0   : > { %v7206_v4 = vsel %vm22764_vm4, %v7201_v44, %v7205_v39  ;;  %v777_v0 = vshll.u32 %v235_v41, 16  ;;  %v7218_v8 = vshrl.u32 %v17908_v47, 16  ;;  %v7221_v12 = vshll.u32 %v17908_v47, 16  ;;  %v237_v46 = vld [vmem:[%s22742_s13 + $0xc8] sm:$0xf] }
  0xb1   : > { %19712 = vmatmul.mubr.msk.bf16.gmra.mrb[32].mxu1 %vm1963_vm3, %v17206_v57  ;;  %v7216_v10 = vsel %vm22764_vm4, %v7211_v59, %v7215_v55  ;;  %v764_v11 = vor.u32 %v763_v60, %v760_v56  ;;  %v7227_v13 = vshll.u32 %v17909_v52, 16  ;;  %v773_v16 = vrot.slane %v771_v5, 4  ;;  %v238_v55 = vld [vmem:[%s22742_s13 + $0xcc] sm:$0xf] }
  0xb2   : > { %v18041_v14 = vcombine.low %v7206_v4, %v7216_v10  ;;  %v779_v17 = vrot.slane %v777_v0, 5  ;;  %v7220_v19 = vrot.slane %v7218_v8, 4  ;;  %v7223_v24 = vrot.slane %v7221_v12, 5  ;;  %v17913_v8 = vld [vmem:[%s22742_s13 + $0xdc] sm:$0xf] }
  0xb3   : > { %v765_v22 = vrot.slane %v764_v11, 4  ;;  %v7229_v25 = vrot.slane %v7227_v13, 5  ;;  %v7231_v27 = vshrl.u32 %v17909_v52, 16  ;;  %v774_v6 = vor.u32 %v773_v16, %v769_v1 }
  0xb4   : > { %20232 = vmatmul.mubr.msk.bf16.gmra.mrb[32].mxu0 %vm1963_vm3, %v18041_v14  ;;  %v7237_v7 = vshll.u32 %v17910_v2, 16  ;;  %v781_v28 = vshrl.u32 %v235_v41, 16  ;;  %v787_v29 = vshll.u32 %v236_v9, 16  ;;  %v7224_v31 = vor.u32 %v7223_v24, %v7220_v19  ;;  %v17914_v19 = vld [vmem:[%s22742_s13 + $0xe0] sm:$0xf] }
  0xb5   : > { %v770_v30 = vsel %vm22764_vm4, %v765_v22, %v769_v1  ;;  %v7233_v33 = vrot.slane %v7231_v27, 4  ;;  %v791_v34 = vshrl.u32 %v236_v9, 16  ;;  %v775_v36 = vrot.slane %v774_v6, 4  ;;  %v239_v1 = vld [vmem:[%s22742_s13 + $0xd0] sm:$0xf] }
  0xb6   : > { %v7239_v37 = vrot.slane %v7237_v7, 5  ;;  %v783_v38 = vrot.slane %v781_v28, 4  ;;  %v789_v39 = vrot.slane %v787_v29, 5  ;;  %v7225_v42 = vrot.slane %v7224_v31, 4  ;;  %v17915_v31 = vld [vmem:[%s22742_s13 + $0xe4] sm:$0xf] }
  0xb7   : > { %v7234_v43 = vor.u32 %v7233_v33, %v7229_v25  ;;  %v793_v45 = vrot.slane %v791_v34, 4  ;;  %v797_v41 = vshll.u32 %v335_v21, 16  ;;  %v780_v47 = vsel %vm22764_vm4, %v775_v36, %v779_v17 }
  0xb8   : > { %v784_v48 = vor.u32 %v783_v38, %v779_v17  ;;  %v7241_v49 = vshrl.u32 %v17910_v2, 16  ;;  %v7247_v50 = vshll.u32 %v17911_v35, 16  ;;  %v17207_v51 = vcombine.low %v770_v30, %v780_v47 }
  0xb9   : > { %v7230_v52 = vsel %vm22764_vm4, %v7225_v42, %v7229_v25  ;;  %v7235_v54 = vrot.slane %v7234_v43, 4  ;;  %v794_v44 = vor.u32 %v793_v45, %v789_v39  ;;  %v799_v57 = vrot.slane %v797_v41, 5  ;;  %v240_v45 = vld [vmem:[%s22742_s13 + $0xd4] sm:$0xf] }
  0xba   : > { %v785_v56 = vrot.slane %v784_v48, 4  ;;  %v7243_v59 = vrot.slane %v7241_v49, 4  ;;  %v7249_v60 = vrot.slane %v7247_v50, 5  ;;  %19715 = vmatprep.mubr.msk.bf16.mxu1 %vm1963_vm3, %v17207_v51  ;;  %v7251_v5 = vshrl.u32 %v17911_v35, 16  ;;  %v336_v49 = vld [vmem:[%s22742_s13 + $0xd8] sm:$0x1] }
  0xbb   : > { %v7240_v2 = vsel %vm22764_vm4, %v7235_v54, %v7239_v37  ;;  %v795_v4 = vrot.slane %v794_v44, 4  ;;  %v7257_v0 = vshll.u32 %v17912_v40, 16  ;;  %v802_v12 = vshrl.u32 %v237_v46, 16 }
  0xbc   : > { %v18042_v9 = vcombine.low %v7230_v52, %v7240_v2  ;;  %v790_v10 = vsel %vm22764_vm4, %v785_v56, %v789_v39  ;;  %v7244_v11 = vor.u32 %v7243_v59, %v7239_v37  ;;  %v7253_v14 = vrot.slane %v7251_v5, 4  ;;  %v17916_v59 = vld [vmem:[%s22742_s13 + $0xe8] sm:$0xf] }
  0xbd   : > { %v800_v13 = vsel %vm22764_vm4, %v795_v4, %v799_v57  ;;  %v7259_v16 = vrot.slane %v7257_v0, 5  ;;  %v805_v17 = vshll.u32 %v237_v46, 16  ;;  %v804_v24 = vrot.slane %v802_v12, 4  ;;  %v17917_v0 = vld [vmem:[%s22742_s13 + $0xec] sm:$0x1] }
  0xbe   : > { %20235 = vmatprep.mubr.msk.bf16.mxu0 %vm1963_vm3, %v18042_v9  ;;  %v17208_v21 = vcombine.low %v790_v10, %v800_v13  ;;  %v7245_v22 = vrot.slane %v7244_v11, 4  ;;  %v811_v25 = vshll.u32 %v238_v55, 16  ;;  %v7254_v27 = vor.u32 %v7253_v14, %v7249_v60  ;;  %v241_v12 = vld [vmem:[%s22742_s13 + $0xdc] sm:$0xf] }
  0xbf   : > { %v807_v6 = vrot.slane %v805_v17, 5  ;;  %v815_v7 = vshrl.u32 %v238_v55, 16  ;;  %v821_v28 = vshll.u32 %v239_v1, 16  ;;  %v7262_v33 = vshrl.u32 %v17913_v8, 16 }
  0xc0   : > { %19716 = vmatmul.mubr.msk.bf16.gmra.mrb[36].mxu1 %vm1963_vm3, %v17208_v21  ;;  %v7250_v29 = vsel %vm22764_vm4, %v7245_v22, %v7249_v60  ;;  %v813_v30 = vrot.slane %v811_v25, 5  ;;  %v7265_v34 = vshll.u32 %v17913_v8, 16  ;;  %v7255_v35 = vrot.slane %v7254_v27, 4 }
  0xc1   : > { %v808_v36 = vor.u32 %v807_v6, %v804_v24  ;;  %v817_v37 = vrot.slane %v815_v7, 4  ;;  %v823_v38 = vrot.slane %v821_v28, 5  ;;  %v7264_v39 = vrot.slane %v7262_v33, 4  ;;  %v242_v24 = vld [vmem:[%s22742_s13 + $0xe0] sm:$0xf] }
  0xc2   : > { %v7267_v40 = vrot.slane %v7265_v34, 5  ;;  %v7271_v42 = vshll.u32 %v17914_v19, 16  ;;  %v7275_v43 = vshrl.u32 %v17914_v19, 16  ;;  %v7260_v41 = vsel %vm22764_vm4, %v7255_v35, %v7259_v16 }
  0xc3   : > { %v809_v46 = vrot.slane %v808_v36, 4  ;;  %v818_v47 = vor.u32 %v817_v37, %v813_v30  ;;  %v7281_v48 = vshll.u32 %v17915_v31, 16  ;;  %v18043_v50 = vcombine.low %v7250_v29, %v7260_v41  ;;  %v243_v36 = vld [vmem:[%s22742_s13 + $0xe4] sm:$0xf] }
  0xc4   : > { %v7268_v51 = vor.u32 %v7267_v40, %v7264_v39  ;;  %v7273_v52 = vrot.slane %v7271_v42, 5  ;;  %v7277_v54 = vrot.slane %v7275_v43, 4  ;;  %v825_v57 = vshrl.u32 %v239_v1, 16 }
  0xc5   : > { %v814_v44 = vsel %vm22764_vm4, %v809_v46, %v813_v30  ;;  %v819_v55 = vrot.slane %v818_v47, 4  ;;  %v7283_v56 = vrot.slane %v7281_v48, 5  ;;  %20236 = vmatmul.mubr.msk.bf16.gmra.mrb[36].mxu0 %vm1963_vm3, %v18043_v50  ;;  %v831_v4 = vshll.u32 %v240_v45, 16  ;;  %v17918_v47 = vld [vmem:[%s22742_s13 + $0xf0] sm:$0xf] }
  0xc6   : > { %v7269_v60 = vrot.slane %v7268_v51, 4  ;;  %v7278_v2 = vor.u32 %v7277_v54, %v7273_v52  ;;  %v835_v5 = vshrl.u32 %v240_v45, 16  ;;  %v827_v9 = vrot.slane %v825_v57, 4 }
  0xc7   : > { %v824_v8 = vsel %vm22764_vm4, %v819_v55, %v823_v38  ;;  %v841_v10 = vshll.u32 %v336_v49, 16  ;;  %v7285_v11 = vshrl.u32 %v17915_v31, 16  ;;  %v833_v16 = vrot.slane %v831_v4, 5 }
  0xc8   : > { %v17209_v13 = vcombine.low %v814_v44, %v824_v8  ;;  %v7274_v1 = vsel %vm22764_vm4, %v7269_v60, %v7273_v52  ;;  %v7279_v14 = vrot.slane %v7278_v2, 4  ;;  %v828_v17 = vor.u32 %v827_v9, %v823_v38  ;;  %v17919_v52 = vld [vmem:[%s22742_s13 + $0xf4] sm:$0xf]  ;;  %v17920_v60 = vld [vmem:[%s22742_s13 + $0xf8] sm:$0xf] }
  0xc9   : > { %v837_v19 = vrot.slane %v835_v5, 4  ;;  %v843_v21 = vrot.slane %v841_v10, 5  ;;  %v7287_v22 = vrot.slane %v7285_v11, 4  ;;  %v7291_v27 = vshll.u32 %v17916_v59, 16  ;;  %v244_v10 = vld [vmem:[%s22742_s13 + $0xe8] sm:$0xf] }
  0xca   : > { %19719 = vmatprep.mubr.msk.bf16.mxu1 %vm1963_vm3, %v17209_v13  ;;  %v7284_v25 = vsel %vm22764_vm4, %v7279_v14, %v7283_v56  ;;  %v7295_v6 = vshrl.u32 %v17916_v59, 16  ;;  %v7301_v7 = vshll.u32 %v17917_v0, 16  ;;  %v829_v29 = vrot.slane %v828_v17, 4  ;;  %v337_v14 = vld [vmem:[%s22742_s13 + $0xec] sm:$0x1] }
  0xcb   : > { %v18044_v28 = vcombine.low %v7274_v1, %v7284_v25  ;;  %v838_v30 = vor.u32 %v837_v19, %v833_v16  ;;  %v7288_v31 = vor.u32 %v7287_v22, %v7283_v56  ;;  %v7293_v33 = vrot.slane %v7291_v27, 5  ;;  %v17921_v22 = vld [vmem:[%s22742_s13 + $0xfc] sm:$0xf] }
  0xcc   : > { %v7297_v34 = vrot.slane %v7295_v6, 4  ;;  %v7303_v35 = vrot.slane %v7301_v7, 5  ;;  %v846_v37 = vshrl.u32 %v241_v12, 16  ;;  %v834_v38 = vsel %vm22764_vm4, %v829_v29, %v833_v16 }
  0xcd   : > { %20239 = vmatprep.mubr.msk.bf16.mxu0 %vm1963_vm3, %v18044_v28  ;;  %v839_v39 = vrot.slane %v838_v30, 4  ;;  %v7289_v40 = vrot.slane %v7288_v31, 4  ;;  %v849_v42 = vshll.u32 %v241_v12, 16  ;;  %v855_v41 = vshll.u32 %v242_v24, 16 }
  0xce   : > { %v7298_v43 = vor.u32 %v7297_v34, %v7293_v33  ;;  %v848_v45 = vrot.slane %v846_v37, 4  ;;  %v859_v46 = vshrl.u32 %v242_v24, 16  ;;  %v865_v51 = vshll.u32 %v243_v36, 16 }
  0xcf   : > { %v844_v48 = vsel %vm22764_vm4, %v839_v39, %v843_v21  ;;  %v7294_v49 = vsel %vm22764_vm4, %v7289_v40, %v7293_v33  ;;  %v851_v50 = vrot.slane %v849_v42, 5  ;;  %v857_v55 = vrot.slane %v855_v41, 5  ;;  %v17922_v40 = vld [vmem:[%s22742_s13 + $0x100] sm:$0x1] }
  0xd0   : > { %v17210_v54 = vcombine.low %v834_v38, %v844_v48  ;;  %v7299_v44 = vrot.slane %v7298_v43, 4  ;;  %v861_v56 = vrot.slane %v859_v46, 4  ;;  %v867_v59 = vrot.slane %v865_v51, 5  ;;  %v245_v46 = vld [vmem:[%s22742_s13 + $0xf0] sm:$0xf] }
  0xd1   : > { %v852_v57 = vor.u32 %v851_v50, %v848_v45  ;;  %v7306_v2 = vshrl.u32 %v17918_v47, 16  ;;  %v7309_v4 = vshll.u32 %v17918_v47, 16  ;;  %v7315_v8 = vshll.u32 %v17919_v52, 16  ;;  %v246_v47 = vld [vmem:[%s22742_s13 + $0xf4] sm:$0xf] }
  0xd2   : > { %19720 = vmatmul.mubr.msk.bf16.gmra.mrb[40].mxu1 %vm1963_vm3, %v17210_v54  ;;  %v7304_v5 = vsel %vm22764_vm4, %v7299_v44, %v7303_v35  ;;  %v862_v0 = vor.u32 %v861_v56, %v857_v55  ;;  %v7319_v9 = vshrl.u32 %v17919_v52, 16  ;;  %v7325_v21 = vshll.u32 %v17920_v60, 16  ;;  %v247_v56 = vld [vmem:[%s22742_s13 + $0xf8] sm:$0xf] }
  0xd3   : > { %v18045_v11 = vcombine.low %v7294_v49, %v7304_v5  ;;  %v853_v12 = vrot.slane %v852_v57, 4  ;;  %v7308_v13 = vrot.slane %v7306_v2, 4  ;;  %v7311_v1 = vrot.slane %v7309_v4, 5  ;;  %v17923_v4 = vld [vmem:[%s22742_s13 + $0x104] sm:$0xf] }
  0xd4   : > { %v863_v16 = vrot.slane %v862_v0, 4  ;;  %v7317_v17 = vrot.slane %v7315_v8, 5  ;;  %v7321_v19 = vrot.slane %v7319_v9, 4  ;;  %v869_v27 = vshrl.u32 %v243_v36, 16 }
  0xd5   : > { %20240 = vmatmul.mubr.msk.bf16.gmra.mrb[40].mxu0 %vm1963_vm3, %v18045_v11  ;;  %v858_v24 = vsel %vm22764_vm4, %v853_v12, %v857_v55  ;;  %v7312_v25 = vor.u32 %v7311_v1, %v7308_v13  ;;  %v875_v6 = vshll.u32 %v244_v10, 16  ;;  %v7327_v29 = vrot.slane %v7325_v21, 5  ;;  %v17925_v21 = vld [vmem:[%s22742_s13 + $0x10c] sm:$0xf] }
  0xd6   : > { %v868_v7 = vsel %vm22764_vm4, %v863_v16, %v867_v59  ;;  %v7322_v28 = vor.u32 %v7321_v19, %v7317_v17  ;;  %v879_v30 = vshrl.u32 %v244_v10, 16  ;;  %v871_v34 = vrot.slane %v869_v27, 4  ;;  %v17924_v10 = vld [vmem:[%s22742_s13 + $0x108] sm:$0xf] }
  0xd7   : > { %v17211_v31 = vcombine.low %v858_v24, %v868_v7  ;;  %v7313_v33 = vrot.slane %v7312_v25, 4  ;;  %v877_v35 = vrot.slane %v875_v6, 5  ;;  %v885_v39 = vshll.u32 %v337_v14, 16 }
  0xd8   : > { %v7323_v37 = vrot.slane %v7322_v28, 4  ;;  %v881_v38 = vrot.slane %v879_v30, 4  ;;  %v7329_v42 = vshrl.u32 %v17920_v60, 16  ;;  %v872_v43 = vor.u32 %v871_v34, %v867_v59 }
  0xd9   : > { %19723 = vmatprep.mubr.msk.bf16.mxu1 %vm1963_vm3, %v17211_v31  ;;  %v7318_v36 = vsel %vm22764_vm4, %v7313_v33, %v7317_v17  ;;  %v7335_v45 = vshll.u32 %v17921_v22, 16  ;;  %v7339_v41 = vshrl.u32 %v17921_v22, 16  ;;  %v887_v50 = vrot.slane %v885_v39, 5  ;;  %v248_v22 = vld [vmem:[%s22742_s13 + $0xfc] sm:$0xf] }
  0xda   : > { %v7328_v48 = vsel %vm22764_vm4, %v7323_v37, %v7327_v29  ;;  %v882_v49 = vor.u32 %v881_v38, %v877_v35  ;;  %v7331_v51 = vrot.slane %v7329_v42, 4  ;;  %v873_v54 = vrot.slane %v872_v43, 4  ;;  %v338_v43 = vld [vmem:[%s22742_s13 + $0x100] sm:$0x1] }
  0xdb   : > { %v18046_v52 = vcombine.low %v7318_v36, %v7328_v48  ;;  %v7337_v44 = vrot.slane %v7335_v45, 5  ;;  %v7341_v55 = vrot.slane %v7339_v41, 4  ;;  %v7345_v59 = vshll.u32 %v17922_v40, 16 }
  0xdc   : > { %v883_v57 = vrot.slane %v882_v49, 4  ;;  %v7332_v60 = vor.u32 %v7331_v51, %v7327_v29  ;;  %v890_v2 = vshrl.u32 %v245_v46, 16  ;;  %v878_v5 = vsel %vm22764_vm4, %v873_v54, %v877_v35 }
  0xdd   : > { %20243 = vmatprep.mubr.msk.bf16.mxu0 %vm1963_vm3, %v18046_v52  ;;  %v7342_v0 = vor.u32 %v7341_v55, %v7337_v44  ;;  %v893_v8 = vshll.u32 %v245_v46, 16  ;;  %v899_v9 = vshll.u32 %v246_v47, 16  ;;  %v7347_v13 = vrot.slane %v7345_v59, 5 }
  0xde   : > { %v888_v11 = vsel %vm22764_vm4, %v883_v57, %v887_v50  ;;  %v7333_v12 = vrot.slane %v7332_v60, 4  ;;  %v892_v1 = vrot.slane %v890_v2, 4  ;;  %v903_v25 = vshrl.u32 %v246_v47, 16  ;;  %v17926_v50 = vld [vmem:[%s22742_s13 + $0x110] sm:$0xf] }
  0xdf   : > { %v17212_v14 = vcombine.low %v878_v5, %v888_v11  ;;  %v7343_v16 = vrot.slane %v7342_v0, 4  ;;  %v895_v17 = vrot.slane %v893_v8, 5  ;;  %v901_v19 = vrot.slane %v899_v9, 5  ;;  %v249_v8 = vld [vmem:[%s22742_s13 + $0x104] sm:$0xf] }
  0xe0   : > { %v7338_v24 = vsel %vm22764_vm4, %v7333_v12, %v7337_v44  ;;  %v909_v27 = vshll.u32 %v247_v56, 16  ;;  %v7350_v6 = vshrl.u32 %v17923_v4, 16  ;;  %v7353_v29 = vshll.u32 %v17923_v4, 16 }
  0xe1   : > { %19724 = vmatmul.mubr.msk.bf16.gmra.mrb[44].mxu1 %vm1963_vm3, %v17212_v14  ;;  %v7348_v7 = vsel %vm22764_vm4, %v7343_v16, %v7347_v13  ;;  %v896_v28 = vor.u32 %v895_v17, %v892_v1  ;;  %v7359_v30 = vshll.u32 %v17924_v10, 16  ;;  %v905_v33 = vrot.slane %v903_v25, 4  ;;  %v250_v13 = vld [vmem:[%s22742_s13 + $0x108] sm:$0xf] }
  0xe2   : > { %v18047_v31 = vcombine.low %v7338_v24, %v7348_v7  ;;  %v911_v34 = vrot.slane %v909_v27, 5  ;;  %v7352_v35 = vrot.slane %v7350_v6, 4  ;;  %v7355_v38 = vrot.slane %v7353_v29, 5  ;;  %v17928_v27 = vld [vmem:[%s22742_s13 + $0x118] sm:$0xf] }
  0xe3   : > { %v897_v37 = vrot.slane %v896_v28, 4  ;;  %v7361_v39 = vrot.slane %v7359_v30, 5  ;;  %v7363_v40 = vshrl.u32 %v17924_v10, 16  ;;  %v906_v42 = vor.u32 %v905_v33, %v901_v19 }
  0xe4   : > { %20244 = vmatmul.mubr.msk.bf16.gmra.mrb[44].mxu0 %vm1963_vm3, %v18047_v31  ;;  %v7369_v36 = vshll.u32 %v17925_v21, 16  ;;  %v913_v45 = vshrl.u32 %v247_v56, 16  ;;  %v919_v41 = vshll.u32 %v248_v22, 16  ;;  %v7356_v47 = vor.u32 %v7355_v38, %v7352_v35  ;;  %v17927_v56 = vld [vmem:[%s22742_s13 + $0x114] sm:$0x1] }
  0xe5   : > { %v902_v46 = vsel %vm22764_vm4, %v897_v37, %v901_v19  ;;  %v7365_v48 = vrot.slane %v7363_v40, 4  ;;  %v923_v49 = vshrl.u32 %v248_v22, 16  ;;  %v907_v51 = vrot.slane %v906_v42, 4  ;;  %v251_v19 = vld [vmem:[%s22742_s13 + $0x10c] sm:$0xf] }
  0xe6   : > { %v7371_v52 = vrot.slane %v7369_v36, 5  ;;  %v915_v54 = vrot.slane %v913_v45, 4  ;;  %v921_v44 = vrot.slane %v919_v41, 5  ;;  %v7357_v55 = vrot.slane %v7356_v47, 4  ;;  %v17929_v45 = vld [vmem:[%s22742_s13 + $0x11c] sm:$0xf] }
  0xe7   : > { %v7366_v57 = vor.u32 %v7365_v48, %v7361_v39  ;;  %v925_v60 = vrot.slane %v923_v49, 4  ;;  %v929_v59 = vshll.u32 %v338_v43, 16  ;;  %v912_v2 = vsel %vm22764_vm4, %v907_v51, %v911_v34  ;;  %v17930_v47 = vld [vmem:[%s22742_s13 + $0x120] sm:$0xf] }
  0xe8   : > { %v916_v4 = vor.u32 %v915_v54, %v911_v34  ;;  %v7373_v5 = vshrl.u32 %v17925_v21, 16  ;;  %v7379_v0 = vshll.u32 %v17926_v50, 16  ;;  %v17213_v9 = vcombine.low %v902_v46, %v912_v2 }
  0xe9   : > { %v7362_v10 = vsel %vm22764_vm4, %v7357_v55, %v7361_v39  ;;  %v7367_v11 = vrot.slane %v7366_v57, 4  ;;  %v926_v12 = vor.u32 %v925_v60, %v921_v44  ;;  %v931_v14 = vrot.slane %v929_v59, 5 }
  0xea   : > { %v917_v1 = vrot.slane %v916_v4, 4  ;;  %v7375_v16 = vrot.slane %v7373_v5, 4  ;;  %v7381_v17 = vrot.slane %v7379_v0, 5  ;;  %19727 = vmatprep.mubr.msk.bf16.mxu1 %vm1963_vm3, %v17213_v9  ;;  %v7383_v24 = vshrl.u32 %v17926_v50, 16  ;;  %v252_v5 = vld [vmem:[%s22742_s13 + $0x110] sm:$0xf] }
  0xeb   : > { %v7372_v21 = vsel %vm22764_vm4, %v7367_v11, %v7371_v52  ;;  %v927_v22 = vrot.slane %v926_v12, 4  ;;  %v7389_v25 = vshll.u32 %v17927_v56, 16  ;;  %v934_v29 = vshrl.u32 %v249_v8, 16  ;;  %v339_v11 = vld [vmem:[%s22742_s13 + $0x114] sm:$0x1] }
  0xec   : > { %v18048_v6 = vcombine.low %v7362_v10, %v7372_v21  ;;  %v922_v7 = vsel %vm22764_vm4, %v917_v1, %v921_v44  ;;  %v7376_v28 = vor.u32 %v7375_v16, %v7371_v52  ;;  %v7385_v31 = vrot.slane %v7383_v24, 4  ;;  %v17931_v16 = vld [vmem:[%s22742_s13 + $0x124] sm:$0xf] }
  0xed   : > { %v932_v30 = vsel %vm22764_vm4, %v927_v22, %v931_v14  ;;  %v7391_v33 = vrot.slane %v7389_v25, 5  ;;  %v937_v34 = vshll.u32 %v249_v8, 16  ;;  %v936_v38 = vrot.slane %v934_v29, 4 }
  0xee   : > { %20247 = vmatprep.mubr.msk.bf16.mxu0 %vm1963_vm3, %v18048_v6  ;;  %v17214_v35 = vcombine.low %v922_v7, %v932_v30  ;;  %v7377_v37 = vrot.slane %v7376_v28, 4  ;;  %v943_v39 = vshll.u32 %v250_v13, 16  ;;  %v7386_v40 = vor.u32 %v7385_v31, %v7381_v17 }
  0xef   : > { %v939_v42 = vrot.slane %v937_v34, 5  ;;  %v947_v36 = vshrl.u32 %v250_v13, 16  ;;  %v953_v43 = vshll.u32 %v251_v19, 16  ;;  %v7394_v48 = vshrl.u32 %v17928_v27, 16 }
  0xf0   : > { %19728 = vmatmul.mubr.msk.bf16.gmra.mrb[48].mxu1 %vm1963_vm3, %v17214_v35  ;;  %v7382_v41 = vsel %vm22764_vm4, %v7377_v37, %v7381_v17  ;;  %v945_v46 = vrot.slane %v943_v39, 5  ;;  %v7397_v49 = vshll.u32 %v17928_v27, 16  ;;  %v7387_v50 = vrot.slane %v7386_v40, 4  ;;  %v17932_v17 = vld [vmem:[%s22742_s13 + $0x128] sm:$0x1] }
  0xf1   : > { %v940_v51 = vor.u32 %v939_v42, %v936_v38  ;;  %v949_v52 = vrot.slane %v947_v36, 4  ;;  %v955_v54 = vrot.slane %v953_v43, 5  ;;  %v7396_v44 = vrot.slane %v7394_v48, 4  ;;  %v253_v38 = vld [vmem:[%s22742_s13 + $0x118] sm:$0xf] }
  0xf2   : > { %v7399_v55 = vrot.slane %v7397_v49, 5  ;;  %v7403_v57 = vshll.u32 %v17929_v45, 16  ;;  %v7407_v60 = vshrl.u32 %v17929_v45, 16  ;;  %v7392_v59 = vsel %vm22764_vm4, %v7387_v50, %v7391_v33  ;;  %v255_v48 = vld [vmem:[%s22742_s13 + $0x120] sm:$0xf] }
  0xf3   : > { %v941_v56 = vrot.slane %v940_v51, 4  ;;  %v950_v2 = vor.u32 %v949_v52, %v945_v46  ;;  %v7413_v4 = vshll.u32 %v17930_v47, 16  ;;  %v18049_v0 = vcombine.low %v7382_v41, %v7392_v59 }
  0xf4   : > { %v7400_v8 = vor.u32 %v7399_v55, %v7396_v44  ;;  %v7405_v9 = vrot.slane %v7403_v57, 5  ;;  %v7409_v10 = vrot.slane %v7407_v60, 4  ;;  %v957_v14 = vshrl.u32 %v251_v19, 16 }
  0xf5   : > { %v946_v12 = vsel %vm22764_vm4, %v941_v56, %v945_v46  ;;  %v951_v13 = vrot.slane %v950_v2, 4  ;;  %v7415_v1 = vrot.slane %v7413_v4, 5  ;;  %20248 = vmatmul.mubr.msk.bf16.gmra.mrb[48].mxu0 %vm1963_vm3, %v18049_v0  ;;  %v963_v24 = vshll.u32 %v252_v5, 16 }
  0xf6   : > { %v7401_v21 = vrot.slane %v7400_v8, 4  ;;  %v7410_v22 = vor.u32 %v7409_v10, %v7405_v9  ;;  %v967_v25 = vshrl.u32 %v252_v5, 16  ;;  %v959_v6 = vrot.slane %v957_v14, 4  ;;  %v17934_v5 = vld [vmem:[%s22742_s13 + $0x130] sm:$0xf] }
  0xf7   : > { %v956_v27 = vsel %vm22764_vm4, %v951_v13, %v955_v54  ;;  %v973_v7 = vshll.u32 %v339_v11, 16  ;;  %v7417_v28 = vshrl.u32 %v17930_v47, 16  ;;  %v965_v31 = vrot.slane %v963_v24, 5  ;;  %v254_v47 = vld [vmem:[%s22742_s13 + $0x11c] sm:$0xf] }
  0xf8   : > { %v17215_v29 = vcombine.low %v946_v12, %v956_v27  ;;  %v7406_v30 = vsel %vm22764_vm4, %v7401_v21, %v7405_v9  ;;  %v7411_v19 = vrot.slane %v7410_v22, 4  ;;  %v960_v33 = vor.u32 %v959_v6, %v955_v54  ;;  %v17933_v54 = vld [vmem:[%s22742_s13 + $0x12c] sm:$0xf]  ;;  %v17935_v11 = vld [vmem:[%s22742_s13 + $0x134] sm:$0xf] }
  0xf9   : > { %v969_v34 = vrot.slane %v967_v25, 4  ;;  %v975_v35 = vrot.slane %v973_v7, 5  ;;  %v7419_v37 = vrot.slane %v7417_v28, 4  ;;  %v7423_v40 = vshll.u32 %v17931_v16, 16 }
  0xfa   : > { %19731 = vmatprep.mubr.msk.bf16.mxu1 %vm1963_vm3, %v17215_v29  ;;  %v7416_v39 = vsel %vm22764_vm4, %v7411_v19, %v7415_v1  ;;  %v7427_v42 = vshrl.u32 %v17931_v16, 16  ;;  %v7433_v36 = vshll.u32 %v17932_v17, 16  ;;  %v961_v45 = vrot.slane %v960_v33, 4  ;;  %v256_v16 = vld [vmem:[%s22742_s13 + $0x124] sm:$0xf] }
  0xfb   : > { %v18050_v43 = vcombine.low %v7406_v30, %v7416_v39  ;;  %v970_v41 = vor.u32 %v969_v34, %v965_v31  ;;  %v7420_v46 = vor.u32 %v7419_v37, %v7415_v1  ;;  %v7425_v49 = vrot.slane %v7423_v40, 5  ;;  %v340_v39 = vld [vmem:[%s22742_s13 + $0x128] sm:$0x1] }
  0xfc   : > { %v7429_v50 = vrot.slane %v7427_v42, 4  ;;  %v7435_v51 = vrot.slane %v7433_v36, 5  ;;  %v978_v52 = vshrl.u32 %v253_v38, 16  ;;  %v966_v44 = vsel %vm22764_vm4, %v961_v45, %v965_v31 }
  0xfd   : > { %20251 = vmatprep.mubr.msk.bf16.mxu0 %vm1963_vm3, %v18050_v43  ;;  %v971_v55 = vrot.slane %v970_v41, 4  ;;  %v7421_v57 = vrot.slane %v7420_v46, 4  ;;  %v981_v60 = vshll.u32 %v253_v38, 16  ;;  %v987_v2 = vshll.u32 %v254_v47, 16  ;;  %v17936_v46 = vld [vmem:[%s22742_s13 + $0x138] sm:$0xf] }
  0xfe   : > { %v7430_v59 = vor.u32 %v7429_v50, %v7425_v49  ;;  %v980_v56 = vrot.slane %v978_v52, 4  ;;  %v991_v4 = vshrl.u32 %v254_v47, 16  ;;  %v997_v10 = vshll.u32 %v255_v48, 16  ;;  %v17937_v52 = vld [vmem:[%s22742_s13 + $0x13c] sm:$0x1] }
  0xff   : > { %v976_v0 = vsel %vm22764_vm4, %v971_v55, %v975_v35  ;;  %v7426_v8 = vsel %vm22764_vm4, %v7421_v57, %v7425_v49  ;;  %v983_v9 = vrot.slane %v981_v60, 5  ;;  %v989_v1 = vrot.slane %v987_v2, 5 }
 0x100   : > { %v17216_v12 = vcombine.low %v966_v44, %v976_v0  ;;  %v7431_v13 = vrot.slane %v7430_v59, 4  ;;  %v993_v14 = vrot.slane %v991_v4, 4  ;;  %v999_v21 = vrot.slane %v997_v10, 5 }
 0x101   : > { %v984_v17 = vor.u32 %v983_v9, %v980_v56  ;;  %v7438_v22 = vshrl.u32 %v17933_v54, 16  ;;  %v7441_v24 = vshll.u32 %v17933_v54, 16  ;;  %v7447_v6 = vshll.u32 %v17934_v5, 16  ;;  %v257_v54 = vld [vmem:[%s22742_s13 + $0x12c] sm:$0xf] }
 0x102   : > { %19732 = vmatmul.mubr.msk.bf16.gmra.mrb[52].mxu1 %vm1963_vm3, %v17216_v12  ;;  %v7436_v25 = vsel %vm22764_vm4, %v7431_v13, %v7435_v51  ;;  %v994_v27 = vor.u32 %v993_v14, %v989_v1  ;;  %v7451_v7 = vshrl.u32 %v17934_v5, 16  ;;  %v7457_v35 = vshll.u32 %v17935_v11, 16  ;;  %v258_v9 = vld [vmem:[%s22742_s13 + $0x130] sm:$0xf]  ;;  %v17938_v14 = vld [vmem:[%s22742_s13 + $0x140] sm:$0xf] }
 0x103   : > { %v18051_v28 = vcombine.low %v7426_v8, %v7436_v25  ;;  %v985_v29 = vrot.slane %v984_v17, 4  ;;  %v7440_v30 = vrot.slane %v7438_v22, 4  ;;  %v7443_v19 = vrot.slane %v7441_v24, 5  ;;  %v17939_v24 = vld [vmem:[%s22742_s13 + $0x144] sm:$0xf] }
 0x104   : > { %v995_v31 = vrot.slane %v994_v27, 4  ;;  %v7449_v33 = vrot.slane %v7447_v6, 5  ;;  %v7453_v34 = vrot.slane %v7451_v7, 4  ;;  %v1001_v40 = vshrl.u32 %v255_v48, 16 }
 0x105   : > { %20252 = vmatmul.mubr.msk.bf16.gmra.mrb[52].mxu0 %vm1963_vm3, %v18051_v28  ;;  %v990_v37 = vsel %vm22764_vm4, %v985_v29, %v989_v1  ;;  %v7444_v38 = vor.u32 %v7443_v19, %v7440_v30  ;;  %v1007_v42 = vshll.u32 %v256_v16, 16  ;;  %v7459_v45 = vrot.slane %v7457_v35, 5  ;;  %v259_v1 = vld [vmem:[%s22742_s13 + $0x134] sm:$0xf] }
 0x106   : > { %v1000_v36 = vsel %vm22764_vm4, %v995_v31, %v999_v21  ;;  %v7454_v43 = vor.u32 %v7453_v34, %v7449_v33  ;;  %v1011_v41 = vshrl.u32 %v256_v16, 16  ;;  %v1003_v50 = vrot.slane %v1001_v40, 4 }
 0x107   : > { %v17217_v47 = vcombine.low %v990_v37, %v1000_v36  ;;  %v7445_v49 = vrot.slane %v7444_v38, 4  ;;  %v1009_v51 = vrot.slane %v1007_v42, 5  ;;  %v1017_v57 = vshll.u32 %v340_v39, 16 }
 0x108   : > { %v7455_v44 = vrot.slane %v7454_v43, 4  ;;  %v1013_v55 = vrot.slane %v1011_v41, 4  ;;  %v7461_v48 = vshrl.u32 %v17935_v11, 16  ;;  %v1004_v59 = vor.u32 %v1003_v50, %v999_v21  ;;  %v17940_v43 = vld [vmem:[%s22742_s13 + $0x148] sm:$0xf] }
 0x109   : > { %19735 = vmatprep.mubr.msk.bf16.mxu1 %vm1963_vm3, %v17217_v47  ;;  %v7450_v60 = vsel %vm22764_vm4, %v7445_v49, %v7449_v33  ;;  %v7467_v56 = vshll.u32 %v17936_v46, 16  ;;  %v7471_v2 = vshrl.u32 %v17936_v46, 16  ;;  %v1019_v0 = vrot.slane %v1017_v57, 5  ;;  %v260_v46 = vld [vmem:[%s22742_s13 + $0x138] sm:$0xf] }
 0x10a   : > { %v7460_v4 = vsel %vm22764_vm4, %v7455_v44, %v7459_v45  ;;  %v1014_v5 = vor.u32 %v1013_v55, %v1009_v51  ;;  %v7463_v8 = vrot.slane %v7461_v48, 4  ;;  %v1005_v12 = vrot.slane %v1004_v59, 4 }
 0x10b   : > { %v18052_v10 = vcombine.low %v7450_v60, %v7460_v4  ;;  %v7469_v11 = vrot.slane %v7467_v56, 5  ;;  %v7473_v13 = vrot.slane %v7471_v2, 4  ;;  %v7477_v22 = vshll.u32 %v17937_v52, 16  ;;  %v341_v52 = vld [vmem:[%s22742_s13 + $0x13c] sm:$0x1] }
 0x10c   : > { %v1015_v16 = vrot.slane %v1014_v5, 4  ;;  %v7464_v17 = vor.u32 %v7463_v8, %v7459_v45  ;;  %v1022_v21 = vshrl.u32 %v257_v54, 16  ;;  %v1010_v25 = vsel %vm22764_vm4, %v1005_v12, %v1009_v51  ;;  %v17941_v8 = vld [vmem:[%s22742_s13 + $0x14c] sm:$0xf] }
 0x10d   : > { %20255 = vmatprep.mubr.msk.bf16.mxu0 %vm1963_vm3, %v18052_v10  ;;  %v7474_v27 = vor.u32 %v7473_v13, %v7469_v11  ;;  %v1025_v6 = vshll.u32 %v257_v54, 16  ;;  %v1031_v7 = vshll.u32 %v258_v9, 16  ;;  %v7479_v30 = vrot.slane %v7477_v22, 5  ;;  %v17942_v13 = vld [vmem:[%s22742_s13 + $0x150] sm:$0x1] }
 0x10e   : > { %v1020_v28 = vsel %vm22764_vm4, %v1015_v16, %v1019_v0  ;;  %v7465_v29 = vrot.slane %v7464_v17, 4  ;;  %v1024_v19 = vrot.slane %v1022_v21, 4  ;;  %v1035_v38 = vshrl.u32 %v258_v9, 16 }
 0x10f   : > { %v17218_v31 = vcombine.low %v1010_v25, %v1020_v28  ;;  %v7475_v33 = vrot.slane %v7474_v27, 4  ;;  %v1027_v34 = vrot.slane %v1025_v6, 5  ;;  %v1033_v35 = vrot.slane %v1031_v7, 5 }
 0x110   : > { %v7470_v37 = vsel %vm22764_vm4, %v7465_v29, %v7469_v11  ;;  %v1041_v39 = vshll.u32 %v259_v1, 16  ;;  %v7482_v40 = vshrl.u32 %v17938_v14, 16  ;;  %v7485_v45 = vshll.u32 %v17938_v14, 16 }
 0x111   : > { %19736 = vmatmul.mubr.msk.bf16.gmra.mrb[56].mxu1 %vm1963_vm3, %v17218_v31  ;;  %v7480_v42 = vsel %vm22764_vm4, %v7475_v33, %v7479_v30  ;;  %v1028_v36 = vor.u32 %v1027_v34, %v1024_v19  ;;  %v7491_v41 = vshll.u32 %v17939_v24, 16  ;;  %v1037_v49 = vrot.slane %v1035_v38, 4  ;;  %v262_v30 = vld [vmem:[%s22742_s13 + $0x144] sm:$0xf] }
 0x112   : > { %v18053_v47 = vcombine.low %v7470_v37, %v7480_v42  ;;  %v1043_v50 = vrot.slane %v1041_v39, 5  ;;  %v7484_v51 = vrot.slane %v7482_v40, 4  ;;  %v7487_v44 = vrot.slane %v7485_v45, 5 }
 0x113   : > { %v1029_v54 = vrot.slane %v1028_v36, 4  ;;  %v7493_v55 = vrot.slane %v7491_v41, 5  ;;  %v7495_v57 = vshrl.u32 %v17939_v24, 16  ;;  %v1038_v48 = vor.u32 %v1037_v49, %v1033_v35 }
 0x114   : > { %20256 = vmatmul.mubr.msk.bf16.gmra.mrb[56].mxu0 %vm1963_vm3, %v18053_v47  ;;  %v7501_v60 = vshll.u32 %v17940_v43, 16  ;;  %v1045_v59 = vshrl.u32 %v259_v1, 16  ;;  %v1051_v56 = vshll.u32 %v260_v46, 16  ;;  %v7488_v4 = vor.u32 %v7487_v44, %v7484_v51  ;;  %v261_v1 = vld [vmem:[%s22742_s13 + $0x140] sm:$0xf] }
 0x115   : > { %v1034_v2 = vsel %vm22764_vm4, %v1029_v54, %v1033_v35  ;;  %v7497_v5 = vrot.slane %v7495_v57, 4  ;;  %v1055_v0 = vshrl.u32 %v260_v46, 16  ;;  %v1039_v9 = vrot.slane %v1038_v48, 4 }
 0x116   : > { %v7503_v10 = vrot.slane %v7501_v60, 5  ;;  %v1047_v12 = vrot.slane %v1045_v59, 4  ;;  %v1053_v11 = vrot.slane %v1051_v56, 5  ;;  %v7489_v14 = vrot.slane %v7488_v4, 4 }
 0x117   : > { %v7498_v16 = vor.u32 %v7497_v5, %v7493_v55  ;;  %v1057_v17 = vrot.slane %v1055_v0, 4  ;;  %v1061_v22 = vshll.u32 %v341_v52, 16  ;;  %v1044_v21 = vsel %vm22764_vm4, %v1039_v9, %v1043_v50 }
 0x118   : > { %v1048_v24 = vor.u32 %v1047_v12, %v1043_v50  ;;  %v7505_v25 = vshrl.u32 %v17940_v43, 16  ;;  %v7511_v27 = vshll.u32 %v17941_v8, 16  ;;  %v17219_v6 = vcombine.low %v1034_v2, %v1044_v21  ;;  %v263_v43 = vld [vmem:[%s22742_s13 + $0x148] sm:$0xf]  ;;  %v264_v50 = vld [vmem:[%s22742_s13 + $0x14c] sm:$0xf] }
 0x119   : > { %v7494_v7 = vsel %vm22764_vm4, %v7489_v14, %v7493_v55  ;;  %v7499_v28 = vrot.slane %v7498_v16, 4  ;;  %v1058_v29 = vor.u32 %v1057_v17, %v1053_v11  ;;  %v1063_v31 = vrot.slane %v1061_v22, 5  ;;  %v18152_v55 = vld [vmem:[%s22742_s13 + $0x14] sm:$0xe] }
 0x11a   : > { %v1049_v19 = vrot.slane %v1048_v24, 4  ;;  %v7507_v33 = vrot.slane %v7505_v25, 4  ;;  %v7513_v34 = vrot.slane %v7511_v27, 5  ;;  %19739 = vmatprep.mubr.msk.bf16.mxu1 %vm1963_vm3, %v17219_v6  ;;  %v7515_v38 = vshrl.u32 %v17941_v8, 16  ;;  %v265_v16 = vld [vmem:[%s22742_s13 + $0x154] sm:$0xf] }
 0x11b   : > { %v7504_v35 = vsel %vm22764_vm4, %v7499_v28, %v7503_v10  ;;  %v1059_v37 = vrot.slane %v1058_v29, 4  ;;  %v7521_v39 = vshll.u32 %v17942_v13, 16  ;;  %v1066_v45 = vshrl.u32 %v261_v1, 16 }
 0x11c   : > { %v18054_v40 = vcombine.low %v7494_v7, %v7504_v35  ;;  %v1054_v42 = vsel %vm22764_vm4, %v1049_v19, %v1053_v11  ;;  %v7508_v36 = vor.u32 %v7507_v33, %v7503_v10  ;;  %v7517_v46 = vrot.slane %v7515_v38, 4  ;;  %v342_v10 = vld [vmem:[%s22742_s13 + $0x150] sm:$0x1]  ;;  %v266_v7 = vld [vmem:[%s22742_s13 + $0x158] sm:$0xf] }
 0x11d   : > { %v1064_v41 = vsel %vm22764_vm4, %v1059_v37, %v1063_v31  ;;  %v7523_v47 = vrot.slane %v7521_v39, 5  ;;  %v1069_v49 = vshll.u32 %v261_v1, 16  ;;  %v1068_v54 = vrot.slane %v1066_v45, 4  ;;  %v267_v35 = vld [vmem:[%s22742_s13 + $0x15c] sm:$0xf] }
 0x11e   : > { %20259 = vmatprep.mubr.msk.bf16.mxu0 %vm1963_vm3, %v18054_v40  ;;  %v17220_v51 = vcombine.low %v1054_v42, %v1064_v41  ;;  %v7509_v52 = vrot.slane %v7508_v36, 4  ;;  %v1075_v44 = vshll.u32 %v262_v30, 16  ;;  %v7518_v57 = vor.u32 %v7517_v46, %v7513_v34  ;;  %v18153_v40 = vld [vmem:[%s22742_s13 + $0x28] sm:$0xe] }
 0x11f   : > { %v1071_v48 = vrot.slane %v1069_v49, 5  ;;  %v1079_v60 = vshrl.u32 %v262_v30, 16  ;;  %v1085_v59 = vshll.u32 %v263_v43, 16  ;;  %v18184_v12 = vrot.slane %v18152_v55, 9 }
 0x120   : > { %19740 = vmatmul.mubr.msk.bf16.gmra.mrb[60].mxu1 %vm1963_vm3, %v17220_v51  ;;  %v7514_v56 = vsel %vm22764_vm4, %v7509_v52, %v7513_v34  ;;  %v1077_v2 = vrot.slane %v1075_v44, 5  ;;  %v7519_v4 = vrot.slane %v7518_v57, 4  ;;  %v9487_v11 = vrot.slane %v9485_v61, 4  ;;  %v22118_v51 = vld [vmem:[%s22742_s13 + $0x2c] sm:$0xf] }
 0x121   : > { %v1072_v5 = vor.u32 %v1071_v48, %v1068_v54  ;;  %v1081_v0 = vrot.slane %v1079_v60, 4  ;;  %v1087_v8 = vrot.slane %v1085_v59, 5  ;;  %v1089_v13 = vshrl.u32 %v263_v43, 16  ;;  %v22119_v57 = vld [vmem:[%s22742_s13 + $0x30] sm:$0xf] }
 0x122   : > { %v1095_v14 = vshll.u32 %v264_v50, 16  ;;  %v7524_v17 = vsel %vm22764_vm4, %v7519_v4, %v7523_v47  ;;  %v1099_v21 = vshrl.u32 %v264_v50, 16  ;;  %v9486_v25 = vsel %vm23271_vm7, %v18184_v12, %v9485_v61  ;;  %v343_v60 = vld [vmem:[%s22742_s13 + $0x164] sm:$0x1] }
 0x123   : > { %v1073_v22 = vrot.slane %v1072_v5, 4  ;;  %v1082_v1 = vor.u32 %v1081_v0, %v1077_v2  ;;  %v18055_v24 = vcombine.low %v7514_v56, %v7524_v17  ;;  %v9489_v27 = vsel %vm23271_vm7, %v9487_v11, %v9488_v53  ;;  %v269_v5 = vld [vmem:[%s22742_s13 + $0x168] sm:$0xf]  ;;  %v270_v17 = vld [vmem:[%s22742_s13 + $0x16c] sm:$0xf] }
 0x124   : > { %v1091_v6 = vrot.slane %v1089_v13, 4  ;;  %v18217_v30 = vcombine.low %v9486_v25, %v9489_v27  ;;  %v1097_v19 = vrot.slane %v1095_v14, 5  ;;  %v1101_v31 = vrot.slane %v1099_v21, 4  ;;  %v271_v25 = vld [vmem:[%s22742_s13 + $0x170] sm:$0xf] }
 0x125   : > { %v1078_v28 = vsel %vm22764_vm4, %v1073_v22, %v1077_v2  ;;  %v1083_v29 = vrot.slane %v1082_v1, 4  ;;  %20260 = vmatmul.mubr.msk.bf16.gmra.mrb[60].mxu0 %vm1963_vm3, %v18055_v24  ;;  %v1105_v61 = vshll.u32 %v342_v10, 16  ;;  %v9492_v23 = vsel %vm23271_vm7, %v22786_v62, %v9491_v15 }
 0x126   : > { %v1092_v18 = vor.u32 %v1091_v6, %v1087_v8  ;;  %20329 = vmatprep.mubr.msk.bf16.mxu0 %vm1963_vm3, %v18217_v30  ;;  %v9495_v33 = vsel %vm23271_vm7, %v22806_v26, %v9494_v20  ;;  %v11605_v34 = vsel %vm2156_vm0, %v22117_v58, 0  ;;  %v1110_v62 = vshrl.u32 %v265_v16, 16  ;;  %v268_v20 = vld [vmem:[%s22742_s13 + $0x160] sm:$0xf] }
 0x127   : > { %v1088_v53 = vsel %vm22764_vm4, %v1083_v29, %v1087_v8  ;;  %v1102_v38 = vor.u32 %v1101_v31, %v1097_v19  ;;  %v1107_v39 = vrot.slane %v1105_v61, 5  ;;  %v18218_v42 = vcombine.low %v9492_v23, %v9495_v33 }
 0x128   : > { %v17221_v15 = vcombine.low %v1078_v28, %v1088_v53  ;;  %v1093_v37 = vrot.slane %v1092_v18, 4  ;;  %v1112_v63 = vrot.slane %v1110_v62, 4  ;;  %v1113_v36 = vshll.u32 %v265_v16, 16  ;;  %v22120_v28 = vld [vmem:[%s22742_s13 + $0x34] sm:$0xf] }
 0x129   : > { %v1119_v43 = vshll.u32 %v266_v7, 16  ;;  %v1103_v45 = vrot.slane %v1102_v38, 4  ;;  %v1123_v41 = vshrl.u32 %v266_v7, 16  ;;  %v1129_v46 = vshll.u32 %v267_v35, 16  ;;  %v22121_v18 = vld [vmem:[%s22742_s13 + $0x38] sm:$0x1] }
 0x12a   : > { %19743 = vmatprep.mubr.msk.bf16.mxu1 %vm1963_vm3, %v17221_v15  ;;  %v1098_v26 = vsel %vm22764_vm4, %v1093_v37, %v1097_v19  ;;  %v1115_v47 = vrot.slane %v1113_v36, 5  ;;  %v18185_v50 = vrot.slane %v18153_v40, 9  ;;  %v9498_v52 = vrot.slane %v22118_v51, 5  ;;  %v18154_v37 = vld [vmem:[%s22742_s13 + $0x3c] sm:$0xe] }
 0x12b   : > { %v1121_v49 = vrot.slane %v1119_v43, 5  ;;  %v1108_v54 = vsel %vm22764_vm4, %v1103_v45, %v1107_v39  ;;  %v1125_v44 = vrot.slane %v1123_v41, 4  ;;  %v1131_v55 = vrot.slane %v1129_v46, 5  ;;  %v272_v38 = vld [vmem:[%s22742_s13 + $0x174] sm:$0xf] }
 0x12c   : > { %v9501_v48 = vrot.slane %v22119_v57, 5  ;;  %v17222_v59 = vcombine.low %v1098_v26, %v1108_v54  ;;  %v1116_v56 = vor.u32 %v1115_v47, %v1112_v63  ;;  %v9499_v2 = vsel %vm23271_vm7, %v18185_v50, %v9498_v52  ;;  %v344_v36 = vld [vmem:[%s22742_s13 + $0x178] sm:$0x1] }
 0x12d   : > { %v9500_v4 = vrot.slane %v9498_v52, 4  ;;  %20330 = vmatmul.mubr.msk.bf16.vlgmr.msra.gmra.mrb[0].mxu0 %vm1963_vm3, %v18218_v42  ;;  %v1126_v0 = vor.u32 %v1125_v44, %v1121_v49  ;;  %v1133_v8 = vshrl.u32 %v267_v35, 16  ;;  %v1139_v10 = vshll.u32 %v268_v20, 16  ;;  %v22122_v52 = vld [vmem:[%s22742_s13 + $0x40] sm:$0xf] }
 0x12e   : > { %v1143_v12 = vshrl.u32 %v268_v20, 16  ;;  %19744 = vmatmul.mubr.msk.bf16.gmra.mrb[64].mxu1 %vm1963_vm3, %v17222_v59  ;;  %20458 = vmatpush3.bf16.msra.mxu0 %v11605_v34  ;;  %v1117_v11 = vrot.slane %v1116_v56, 4  ;;  %v1149_v14 = vshll.u32 %v343_v60, 16  ;;  %v9503_v16 = vrot.slane %v9501_v48, 4  ;;  %v22123_v44 = vld [vmem:[%s22742_s13 + $0x44] sm:$0xf] }
 0x12f   : > { %v9502_v13 = vsel %vm23271_vm7, %v9500_v4, %v9501_v48  ;;  %v1127_v22 = vrot.slane %v1126_v0, 4  ;;  %v1135_v21 = vrot.slane %v1133_v8, 4  ;;  %v1141_v24 = vrot.slane %v1139_v10, 5  ;;  %v273_v56 = vld [vmem:[%s22742_s13 + $0x17c] sm:$0xf] }
 0x130   : > { %v18219_v1 = vcombine.low %v9499_v2, %v9502_v13  ;;  %v1122_v27 = vsel %vm22764_vm4, %v1117_v11, %v1121_v49  ;;  %v1145_v6 = vrot.slane %v1143_v12, 4  ;;  %v1151_v7 = vrot.slane %v1149_v14, 5  ;;  %v274_v8 = vld [vmem:[%s22742_s13 + $0x180] sm:$0xf] }
 0x131   : > { %v9504_v29 = vrot.slane %v22120_v28, 5  ;;  %v1132_v30 = vsel %vm22764_vm4, %v1127_v22, %v1131_v55  ;;  %v1136_v19 = vor.u32 %v1135_v21, %v1131_v55  ;;  %v9507_v31 = vrot.slane %v22121_v18, 5  ;;  %v22125_v28 = vld [vmem:[%s22742_s13 + $0x4c] sm:$0x1] }
 0x132   : > { %20333 = vmatprep.mubr.msk.bf16.mxu0 %vm1963_vm3, %v18219_v1  ;;  %v1154_v61 = vshrl.u32 %v269_v5, 16  ;;  %v17223_v23 = vcombine.low %v1122_v27, %v1132_v30  ;;  %v1146_v53 = vor.u32 %v1145_v6, %v1141_v24  ;;  %v1157_v62 = vshll.u32 %v269_v5, 16  ;;  %v22124_v6 = vld [vmem:[%s22742_s13 + $0x48] sm:$0xf] }
 0x133   : > { %v9505_v33 = vsel %vm23271_vm7, %v9503_v16, %v9504_v29  ;;  %v9506_v58 = vrot.slane %v9504_v29, 4  ;;  %v1137_v34 = vrot.slane %v1136_v19, 4  ;;  %v1163_v15 = vshll.u32 %v270_v17, 16 }
 0x134   : > { %v1156_v35 = vrot.slane %v1154_v61, 4  ;;  %19747 = vmatprep.mubr.msk.bf16.mxu1 %vm1963_vm3, %v17223_v23  ;;  %v1147_v39 = vrot.slane %v1146_v53, 4  ;;  %v1167_v42 = vshrl.u32 %v270_v17, 16  ;;  %v1173_v63 = vshll.u32 %v271_v25, 16 }
 0x135   : > { %v9508_v40 = vsel %vm23271_vm7, %v9506_v58, %v9507_v31  ;;  %v1142_v43 = vsel %vm22764_vm4, %v1137_v34, %v1141_v24  ;;  %v1159_v26 = vrot.slane %v1157_v62, 5  ;;  %v1165_v45 = vrot.slane %v1163_v15, 5  ;;  %v275_v31 = vld [vmem:[%s22742_s13 + $0x184] sm:$0xf] }
 0x136   : > { %v18220_v20 = vcombine.low %v9505_v33, %v9508_v40  ;;  %v1152_v41 = vsel %vm22764_vm4, %v1147_v39, %v1151_v7  ;;  %v1169_v46 = vrot.slane %v1167_v42, 4  ;;  %v1175_v47 = vrot.slane %v1173_v63, 5  ;;  %v276_v39 = vld [vmem:[%s22742_s13 + $0x188] sm:$0xf] }
 0x137   : > { %v18186_v49 = vrot.slane %v18154_v37, 9  ;;  %v17224_v50 = vcombine.low %v1142_v43, %v1152_v41  ;;  %v1160_v51 = vor.u32 %v1159_v26, %v1156_v35  ;;  %v9511_v54 = vrot.slane %v22122_v52, 5  ;;  %v18155_v35 = vld [vmem:[%s22742_s13 + $0x50] sm:$0xe] }
 0x138   : > { %20334 = vmatmul.mubr.msk.bf16.gmra.mrb[4].mxu0 %vm1963_vm3, %v18220_v20  ;;  %v9514_v55 = vrot.slane %v22123_v44, 5  ;;  %v1170_v57 = vor.u32 %v1169_v46, %v1165_v45  ;;  %v1177_v48 = vshrl.u32 %v271_v25, 16  ;;  %v1183_v60 = vshll.u32 %v272_v38, 16  ;;  %v345_v46 = vld [vmem:[%s22742_s13 + $0x18c] sm:$0x1] }
 0x139   : > { %v1187_v59 = vshrl.u32 %v272_v38, 16  ;;  %19748 = vmatmul.mubr.msk.bf16.gmra.mrb[68].mxu1 %vm1963_vm3, %v17224_v50  ;;  %v1161_v2 = vrot.slane %v1160_v51, 4  ;;  %v9512_v4 = vsel %vm23271_vm7, %v18186_v49, %v9511_v54  ;;  %v9513_v5 = vrot.slane %v9511_v54, 4  ;;  %v22127_v50 = vld [vmem:[%s22742_s13 + $0x58] sm:$0xf] }
 0x13a   : > { %v1193_v0 = vshll.u32 %v344_v36, 16  ;;  %v1171_v10 = vrot.slane %v1170_v57, 4  ;;  %v1179_v12 = vrot.slane %v1177_v48, 4  ;;  %v1185_v11 = vrot.slane %v1183_v60, 5  ;;  %v277_v48 = vld [vmem:[%s22742_s13 + $0x190] sm:$0xf] }
 0x13b   : > { %v1189_v13 = vrot.slane %v1187_v59, 4  ;;  %v1166_v14 = vsel %vm22764_vm4, %v1161_v2, %v1165_v45  ;;  %v9515_v16 = vsel %vm23271_vm7, %v9513_v5, %v9514_v55  ;;  %v9516_v22 = vrot.slane %v9514_v55, 4  ;;  %v22126_v45 = vld [vmem:[%s22742_s13 + $0x54] sm:$0xf] }
 0x13c   : > { %v1195_v17 = vrot.slane %v1193_v0, 5  ;;  %v1176_v1 = vsel %vm22764_vm4, %v1171_v10, %v1175_v47  ;;  %v18221_v21 = vcombine.low %v9512_v4, %v9515_v16  ;;  %v1180_v24 = vor.u32 %v1179_v12, %v1175_v47  ;;  %v278_v4 = vld [vmem:[%s22742_s13 + $0x194] sm:$0xf] }
 0x13d   : > { %v1190_v25 = vor.u32 %v1189_v13, %v1185_v11  ;;  %v17225_v27 = vcombine.low %v1166_v14, %v1176_v1  ;;  %v9517_v7 = vrot.slane %v22124_v6, 5  ;;  %v9520_v29 = vrot.slane %v22125_v28, 5  ;;  %v279_v6 = vld [vmem:[%s22742_s13 + $0x198] sm:$0xf] }
 0x13e   : > { %v1198_v30 = vshrl.u32 %v273_v56, 16  ;;  %20337 = vmatprep.mubr.msk.bf16.mxu0 %vm1963_vm3, %v18221_v21  ;;  %v1181_v19 = vrot.slane %v1180_v24, 4  ;;  %v1201_v61 = vshll.u32 %v273_v56, 16  ;;  %v1207_v23 = vshll.u32 %v274_v8, 16  ;;  %v22129_v21 = vld [vmem:[%s22742_s13 + $0x60] sm:$0x1] }
 0x13f   : > { %v1191_v18 = vrot.slane %v1190_v25, 4  ;;  %19751 = vmatprep.mubr.msk.bf16.mxu1 %vm1963_vm3, %v17225_v27  ;;  %v9518_v53 = vsel %vm23271_vm7, %v9516_v22, %v9517_v7  ;;  %v9519_v33 = vrot.slane %v9517_v7, 4  ;;  %v1211_v34 = vshrl.u32 %v274_v8, 16  ;;  %v22128_v22 = vld [vmem:[%s22742_s13 + $0x5c] sm:$0xf] }
 0x140   : > { %v1200_v58 = vrot.slane %v1198_v30, 4  ;;  %v1186_v62 = vsel %vm22764_vm4, %v1181_v19, %v1185_v11  ;;  %v1203_v37 = vrot.slane %v1201_v61, 5  ;;  %v1209_v38 = vrot.slane %v1207_v23, 5 }
 0x141   : > { %v1196_v15 = vsel %vm22764_vm4, %v1191_v18, %v1195_v17  ;;  %v9521_v42 = vsel %vm23271_vm7, %v9519_v33, %v9520_v29  ;;  %v1213_v63 = vrot.slane %v1211_v34, 4  ;;  %v1217_v36 = vshll.u32 %v275_v31, 16 }
 0x142   : > { %v17226_v40 = vcombine.low %v1186_v62, %v1196_v15  ;;  %v18222_v43 = vcombine.low %v9518_v53, %v9521_v42  ;;  %v1204_v20 = vor.u32 %v1203_v37, %v1200_v58  ;;  %v18187_v26 = vrot.slane %v18155_v35, 9  ;;  %v280_v15 = vld [vmem:[%s22742_s13 + $0x19c] sm:$0xf] }
 0x143   : > { %v9524_v41 = vrot.slane %v22126_v45, 5  ;;  %v1214_v47 = vor.u32 %v1213_v63, %v1209_v38  ;;  %v1219_v49 = vrot.slane %v1217_v36, 5  ;;  %v9527_v51 = vrot.slane %v22127_v50, 5  ;;  %v281_v50 = vld [vmem:[%s22742_s13 + $0x1a4] sm:$0xf] }
 0x144   : > { %19752 = vmatmul.mubr.msk.bf16.gmra.mrb[72].mxu1 %vm1963_vm3, %v17226_v40  ;;  %v1221_v52 = vshrl.u32 %v275_v31, 16  ;;  %20338 = vmatmul.mubr.msk.bf16.gmra.mrb[8].mxu0 %vm1963_vm3, %v18222_v43  ;;  %v1205_v54 = vrot.slane %v1204_v20, 4  ;;  %v1227_v57 = vshll.u32 %v276_v39, 16  ;;  %v1231_v56 = vshrl.u32 %v276_v39, 16  ;;  %v18156_v31 = vld [vmem:[%s22742_s13 + $0x64] sm:$0xe] }
 0x145   : > { %v9525_v44 = vsel %vm23271_vm7, %v18187_v26, %v9524_v41  ;;  %v9526_v55 = vrot.slane %v9524_v41, 4  ;;  %v1215_v60 = vrot.slane %v1214_v47, 4  ;;  %v1237_v2 = vshll.u32 %v345_v46, 16  ;;  %v22130_v43 = vld [vmem:[%s22742_s13 + $0x68] sm:$0xf] }
 0x146   : > { %v1223_v59 = vrot.slane %v1221_v52, 4  ;;  %v1210_v5 = vsel %vm22764_vm4, %v1205_v54, %v1209_v38  ;;  %v1229_v8 = vrot.slane %v1227_v57, 5  ;;  %v9529_v10 = vrot.slane %v9527_v51, 4  ;;  %v346_v26 = vld [vmem:[%s22742_s13 + $0x1a0] sm:$0x1] }
 0x147   : > { %v9528_v0 = vsel %vm23271_vm7, %v9526_v55, %v9527_v51  ;;  %v1220_v12 = vsel %vm22764_vm4, %v1215_v60, %v1219_v49  ;;  %v1233_v14 = vrot.slane %v1231_v56, 4  ;;  %v1239_v17 = vrot.slane %v1237_v2, 5  ;;  %v22131_v41 = vld [vmem:[%s22742_s13 + $0x6c] sm:$0xf]  ;;  %v282_v55 = vld [vmem:[%s22742_s13 + $0x1a8] sm:$0xf] }
 0x148   : > { %v18223_v11 = vcombine.low %v9525_v44, %v9528_v0  ;;  %v1224_v13 = vor.u32 %v1223_v59, %v1219_v49  ;;  %v17227_v16 = vcombine.low %v1210_v5, %v1220_v12  ;;  %v9530_v1 = vrot.slane %v22128_v22, 5  ;;  %v22133_v22 = vld [vmem:[%s22742_s13 + $0x74] sm:$0x1] }
 0x149   : > { %v9533_v24 = vrot.slane %v22129_v21, 5  ;;  %v1234_v27 = vor.u32 %v1233_v14, %v1229_v8  ;;  %v1242_v7 = vshrl.u32 %v277_v48, 16  ;;  %v1245_v28 = vshll.u32 %v277_v48, 16 }
 0x14a   : > { %20341 = vmatprep.mubr.msk.bf16.mxu0 %vm1963_vm3, %v18223_v11  ;;  %v1225_v25 = vrot.slane %v1224_v13, 4  ;;  %19755 = vmatprep.mubr.msk.bf16.mxu1 %vm1963_vm3, %v17227_v16  ;;  %v9531_v29 = vsel %vm23271_vm7, %v9529_v10, %v9530_v1  ;;  %v9532_v30 = vrot.slane %v9530_v1, 4  ;;  %v1251_v19 = vshll.u32 %v278_v4, 16  ;;  %v283_v11 = vld [vmem:[%s22742_s13 + $0x1ac] sm:$0xf] }
 0x14b   : > { %v1255_v18 = vshrl.u32 %v278_v4, 16  ;;  %v1235_v23 = vrot.slane %v1234_v27, 4  ;;  %v1244_v53 = vrot.slane %v1242_v7, 4  ;;  %v1247_v33 = vrot.slane %v1245_v28, 5  ;;  %v18157_v13 = vld [vmem:[%s22742_s13 + $0x78] sm:$0xe] }
 0x14c   : > { %v1230_v61 = vsel %vm22764_vm4, %v1225_v25, %v1229_v8  ;;  %v9534_v58 = vsel %vm23271_vm7, %v9532_v30, %v9533_v24  ;;  %v1253_v34 = vrot.slane %v1251_v19, 5  ;;  %v1261_v62 = vshll.u32 %v279_v6, 16  ;;  %v22132_v16 = vld [vmem:[%s22742_s13 + $0x70] sm:$0xf] }
 0x14d   : > { %v1257_v35 = vrot.slane %v1255_v18, 4  ;;  %v1240_v37 = vsel %vm22764_vm4, %v1235_v23, %v1239_v17  ;;  %v18224_v38 = vcombine.low %v9531_v29, %v9534_v58  ;;  %v1248_v39 = vor.u32 %v1247_v33, %v1244_v53 }
 0x14e   : > { %v18188_v40 = vrot.slane %v18156_v31, 9  ;;  %v17228_v42 = vcombine.low %v1230_v61, %v1240_v37  ;;  %v1263_v36 = vrot.slane %v1261_v62, 5  ;;  %v9537_v20 = vrot.slane %v22130_v43, 5 }
 0x14f   : > { %v1258_v63 = vor.u32 %v1257_v35, %v1253_v34  ;;  %20342 = vmatmul.mubr.msk.bf16.gmra.mrb[12].mxu0 %vm1963_vm3, %v18224_v38  ;;  %v1249_v45 = vrot.slane %v1248_v39, 4  ;;  %v9540_v46 = vrot.slane %v22131_v41, 5  ;;  %v1265_v47 = vshrl.u32 %v279_v6, 16  ;;  %v347_v38 = vld [vmem:[%s22742_s13 + $0x1b4] sm:$0x1] }
 0x150   : > { %v1271_v49 = vshll.u32 %v280_v15, 16  ;;  %19756 = vmatmul.mubr.msk.bf16.gmra.mrb[76].mxu1 %vm1963_vm3, %v17228_v42  ;;  %v9538_v52 = vsel %vm23271_vm7, %v18188_v40, %v9537_v20  ;;  %v9539_v54 = vrot.slane %v9537_v20, 4  ;;  %v1275_v44 = vshrl.u32 %v280_v15, 16  ;;  %v22134_v40 = vld [vmem:[%s22742_s13 + $0x7c] sm:$0xf] }
 0x151   : > { %v1259_v51 = vrot.slane %v1258_v63, 4  ;;  %v1254_v57 = vsel %vm22764_vm4, %v1249_v45, %v1253_v34  ;;  %v1267_v48 = vrot.slane %v1265_v47, 4  ;;  %v1281_v59 = vshll.u32 %v346_v26, 16  ;;  %v284_v34 = vld [vmem:[%s22742_s13 + $0x1b0] sm:$0xf] }
 0x152   : > { %v1273_v60 = vrot.slane %v1271_v49, 5  ;;  %v9541_v2 = vsel %vm23271_vm7, %v9539_v54, %v9540_v46  ;;  %v1277_v4 = vrot.slane %v1275_v44, 4  ;;  %v9542_v5 = vrot.slane %v9540_v46, 4  ;;  %v22135_v63 = vld [vmem:[%s22742_s13 + $0x80] sm:$0xf] }
 0x153   : > { %v1264_v56 = vsel %vm22764_vm4, %v1259_v51, %v1263_v36  ;;  %v18225_v8 = vcombine.low %v9538_v52, %v9541_v2  ;;  %v1268_v10 = vor.u32 %v1267_v48, %v1263_v36  ;;  %v1283_v12 = vrot.slane %v1281_v59, 5  ;;  %v17477_v20 = vld [vmem:[%s28850_s1 + $0x8] sm:$0xf]  ;;  %v285_v47 = vld [vmem:[%s22742_s13 + $0x1b8] sm:$0xf] }
 0x154   : > { %v17229_v0 = vcombine.low %v1254_v57, %v1264_v56  ;;  %v1278_v14 = vor.u32 %v1277_v4, %v1273_v60  ;;  %v9543_v17 = vrot.slane %v22132_v16, 5  ;;  %v9546_v1 = vrot.slane %v22133_v22, 5  ;;  %v286_v54 = vld [vmem:[%s22742_s13 + $0x1bc] sm:$0xf]  ;;  %21875 = vmatprep.subr.msk.bf16.mxu1 %vm2156_vm0, %v17477_v20 }
 0x155   : > { %v1286_v21 = vshrl.u32 %v281_v50, 16  ;;  %20345 = vmatprep.mubr.msk.bf16.mxu0 %vm1963_vm3, %v18225_v8  ;;  %v1269_v24 = vrot.slane %v1268_v10, 4  ;;  %v1289_v25 = vshll.u32 %v281_v50, 16  ;;  %v1295_v27 = vshll.u32 %v282_v55, 16  ;;  %v22136_v8 = vld [vmem:[%s22742_s13 + $0x84] sm:$0xf] }
 0x156   : > { %19759 = vmatprep.mubr.msk.bf16.mxu1 %vm1963_vm3, %v17229_v0  ;;  %v1299_v6 = vshrl.u32 %v282_v55, 16  ;;  %v1279_v7 = vrot.slane %v1278_v14, 4  ;;  %v9544_v28 = vsel %vm23271_vm7, %v9542_v5, %v9543_v17  ;;  %v9545_v29 = vrot.slane %v9543_v17, 4  ;;  %v287_v14 = vld [vmem:[%s22742_s13 + $0x1c0] sm:$0xf] }
 0x157   : > { %v1288_v30 = vrot.slane %v1286_v21, 4  ;;  %v1274_v19 = vsel %vm22764_vm4, %v1269_v24, %v1273_v60  ;;  %v1291_v18 = vrot.slane %v1289_v25, 5  ;;  %v1297_v31 = vrot.slane %v1295_v27, 5 }
 0x158   : > { %v1301_v61 = vrot.slane %v1299_v6, 4  ;;  %v1284_v23 = vsel %vm22764_vm4, %v1279_v7, %v1283_v12  ;;  %v9547_v53 = vsel %vm23271_vm7, %v9545_v29, %v9546_v1  ;;  %v1305_v33 = vshll.u32 %v283_v11, 16 }
 0x159   : > { %v18189_v58 = vrot.slane %v18157_v13, 9  ;;  %v17230_v35 = vcombine.low %v1274_v19, %v1284_v23  ;;  %v18226_v62 = vcombine.low %v9544_v28, %v9547_v53  ;;  %v1292_v15 = vor.u32 %v1291_v18, %v1288_v30  ;;  %v18158_v28 = vld [vmem:[%s22742_s13 + $0x8c] sm:$0xe] }
 0x15a   : > { %v1302_v37 = vor.u32 %v1301_v61, %v1297_v31  ;;  %v1307_v39 = vrot.slane %v1305_v33, 5  ;;  %v9550_v42 = vrot.slane %v22134_v40, 5  ;;  %v9553_v36 = vrot.slane %v22135_v63, 5  ;;  %v348_v61 = vld [vmem:[%s22742_s13 + $0x1c8] sm:$0x1] }
 0x15b   : > { %v1309_v43 = vshrl.u32 %v283_v11, 16  ;;  %19760 = vmatmul.mubr.msk.bf16.gmra.mrb[80].mxu1 %vm1963_vm3, %v17230_v35  ;;  %20346 = vmatmul.mubr.msk.bf16.gmra.mrb[16].mxu0 %vm1963_vm3, %v18226_v62  ;;  %v1293_v26 = vrot.slane %v1292_v15, 4  ;;  %v1315_v41 = vshll.u32 %v284_v34, 16  ;;  %v1319_v46 = vshrl.u32 %v284_v34, 16  ;;  %v22137_v11 = vld [vmem:[%s22742_s13 + $0x88] sm:$0x1] }
 0x15c   : > { %v1303_v45 = vrot.slane %v1302_v37, 4  ;;  %v9551_v49 = vsel %vm23271_vm7, %v18189_v58, %v9550_v42  ;;  %v9552_v50 = vrot.slane %v9550_v42, 4  ;;  %v1325_v52 = vshll.u32 %v347_v38, 16  ;;  %v22138_v62 = vld [vmem:[%s22742_s13 + $0x90] sm:$0xf] }
 0x15d   : > { %v1311_v51 = vrot.slane %v1309_v43, 4  ;;  %v1298_v44 = vsel %vm22764_vm4, %v1293_v26, %v1297_v31  ;;  %v1317_v57 = vrot.slane %v1315_v41, 5  ;;  %v1321_v48 = vrot.slane %v1319_v46, 4  ;;  %v288_v31 = vld [vmem:[%s22742_s13 + $0x1c4] sm:$0xf] }
 0x15e   : > { %v1308_v55 = vsel %vm22764_vm4, %v1303_v45, %v1307_v39  ;;  %v9554_v59 = vsel %vm23271_vm7, %v9552_v50, %v9553_v36  ;;  %v1327_v2 = vrot.slane %v1325_v52, 5  ;;  %v9555_v0 = vrot.slane %v9553_v36, 4  ;;  %v22139_v37 = vld [vmem:[%s22742_s13 + $0x94] sm:$0xf] }
 0x15f   : > { %v17231_v60 = vcombine.low %v1298_v44, %v1308_v55  ;;  %v1312_v56 = vor.u32 %v1311_v51, %v1307_v39  ;;  %v18227_v4 = vcombine.low %v9551_v49, %v9554_v59  ;;  %v1322_v5 = vor.u32 %v1321_v48, %v1317_v57  ;;  %v289_v49 = vld [vmem:[%s22742_s13 + $0x1cc] sm:$0xf]  ;;  %v22140_v48 = vld [vmem:[%s22742_s13 + $0x98] sm:$0xf]  ;;  %v290_v59 = vld [vmem:[%s22742_s13 + $0x1d0] sm:$0xf] }
 0x160   : > { %v9556_v10 = vrot.slane %v22136_v8, 5  ;;  %v9559_v13 = vrot.slane %v22137_v11, 5  ;;  %v1330_v16 = vshrl.u32 %v285_v47, 16  ;;  %v1333_v17 = vshll.u32 %v285_v47, 16 }
 0x161   : > { %19763 = vmatprep.mubr.msk.bf16.mxu1 %vm1963_vm3, %v17231_v60  ;;  %v1313_v12 = vrot.slane %v1312_v56, 4  ;;  %20349 = vmatprep.mubr.msk.bf16.mxu0 %vm1963_vm3, %v18227_v4  ;;  %v1323_v22 = vrot.slane %v1322_v5, 4  ;;  %v1339_v24 = vshll.u32 %v286_v54, 16  ;;  %v1343_v7 = vshrl.u32 %v286_v54, 16  ;;  %v291_v56 = vld [vmem:[%s22742_s13 + $0x1d4] sm:$0xf] }
 0x162   : > { %v9557_v1 = vsel %vm23271_vm7, %v9555_v0, %v9556_v10  ;;  %v9558_v21 = vrot.slane %v9556_v10, 4  ;;  %v1332_v27 = vrot.slane %v1330_v16, 4  ;;  %v1335_v6 = vrot.slane %v1333_v17, 5  ;;  %v22141_v5 = vld [vmem:[%s22742_s13 + $0x9c] sm:$0x1] }
 0x163   : > { %v1318_v25 = vsel %vm22764_vm4, %v1313_v12, %v1317_v57  ;;  %v1328_v29 = vsel %vm22764_vm4, %v1323_v22, %v1327_v2  ;;  %v1341_v19 = vrot.slane %v1339_v24, 5  ;;  %v1349_v18 = vshll.u32 %v287_v14, 16  ;;  %v18159_v10 = vld [vmem:[%s22742_s13 + $0xa0] sm:$0xe]  ;;  %v349_v24 = vld [vmem:[%s22742_s13 + $0x1dc] sm:$0x1] }
 0x164   : > { %v9560_v30 = vsel %vm23271_vm7, %v9558_v21, %v9559_v13  ;;  %v17232_v23 = vcombine.low %v1318_v25, %v1328_v29  ;;  %v1336_v33 = vor.u32 %v1335_v6, %v1332_v27  ;;  %v1345_v58 = vrot.slane %v1343_v7, 4  ;;  %v292_v21 = vld [vmem:[%s22742_s13 + $0x1d8] sm:$0xf] }
 0x165   : > { %v18228_v53 = vcombine.low %v9557_v1, %v9560_v30  ;;  %v1351_v34 = vrot.slane %v1349_v18, 5  ;;  %v18190_v35 = vrot.slane %v18158_v28, 9  ;;  %v9563_v15 = vrot.slane %v22138_v62, 5 }
 0x166   : > { %v9566_v38 = vrot.slane %v22139_v37, 5  ;;  %19764 = vmatmul.mubr.msk.bf16.gmra.mrb[84].mxu1 %vm1963_vm3, %v17232_v23  ;;  %v1337_v39 = vrot.slane %v1336_v33, 4  ;;  %v1346_v40 = vor.u32 %v1345_v58, %v1341_v19  ;;  %v1353_v42 = vshrl.u32 %v287_v14, 16  ;;  %v22142_v33 = vld [vmem:[%s22742_s13 + $0xa4] sm:$0xf] }
 0x167   : > { %20350 = vmatmul.mubr.msk.bf16.gmra.mrb[20].mxu0 %vm1963_vm3, %v18228_v53  ;;  %v1359_v63 = vshll.u32 %v288_v31, 16  ;;  %v9564_v36 = vsel %vm23271_vm7, %v18190_v35, %v9563_v15  ;;  %v9565_v43 = vrot.slane %v9563_v15, 4  ;;  %v1363_v20 = vshrl.u32 %v288_v31, 16 }
 0x168   : > { %v1369_v26 = vshll.u32 %v348_v61, 16  ;;  %v1342_v45 = vsel %vm22764_vm4, %v1337_v39, %v1341_v19  ;;  %v1347_v41 = vrot.slane %v1346_v40, 4  ;;  %v1355_v46 = vrot.slane %v1353_v42, 4 }
 0x169   : > { %v1361_v47 = vrot.slane %v1359_v63, 5  ;;  %v9567_v50 = vsel %vm23271_vm7, %v9565_v43, %v9566_v38  ;;  %v1365_v51 = vrot.slane %v1363_v20, 4  ;;  %v9568_v54 = vrot.slane %v9566_v38, 4  ;;  %v293_v43 = vld [vmem:[%s22742_s13 + $0x1e0] sm:$0xf] }
 0x16a   : > { %v1371_v52 = vrot.slane %v1369_v26, 5  ;;  %v1352_v44 = vsel %vm22764_vm4, %v1347_v41, %v1351_v34  ;;  %v18229_v55 = vcombine.low %v9564_v36, %v9567_v50  ;;  %v1356_v57 = vor.u32 %v1355_v46, %v1351_v34  ;;  %v22143_v34 = vld [vmem:[%s22742_s13 + $0xa8] sm:$0xf]  ;;  %v294_v46 = vld [vmem:[%s22742_s13 + $0x1e4] sm:$0xf] }
 0x16b   : > { %v9569_v60 = vrot.slane %v22140_v48, 5  ;;  %v17233_v2 = vcombine.low %v1342_v45, %v1352_v44  ;;  %v1366_v4 = vor.u32 %v1365_v51, %v1361_v47  ;;  %v9572_v0 = vrot.slane %v22141_v5, 5 }
 0x16c   : > { %v1374_v8 = vshrl.u32 %v289_v49, 16  ;;  %20353 = vmatprep.mubr.msk.bf16.mxu0 %vm1963_vm3, %v18229_v55  ;;  %v1357_v12 = vrot.slane %v1356_v57, 4  ;;  %v1377_v14 = vshll.u32 %v289_v49, 16  ;;  %v1383_v22 = vshll.u32 %v290_v59, 16  ;;  %v22144_v57 = vld [vmem:[%s22742_s13 + $0xac] sm:$0xf] }
 0x16d   : > { %v9570_v11 = vsel %vm23271_vm7, %v9568_v54, %v9569_v60  ;;  %v9571_v13 = vrot.slane %v9569_v60, 4  ;;  %19767 = vmatprep.mubr.msk.bf16.mxu1 %vm1963_vm3, %v17233_v2  ;;  %v1367_v16 = vrot.slane %v1366_v4, 4  ;;  %v1387_v1 = vshrl.u32 %v290_v59, 16  ;;  %v22145_v59 = vld [vmem:[%s22742_s13 + $0xb0] sm:$0x1] }
 0x16e   : > { %v1376_v17 = vrot.slane %v1374_v8, 4  ;;  %v1362_v25 = vsel %vm22764_vm4, %v1357_v12, %v1361_v47  ;;  %v1379_v6 = vrot.slane %v1377_v14, 5  ;;  %v1393_v7 = vshll.u32 %v291_v56, 16 }
 0x16f   : > { %v9573_v27 = vsel %vm23271_vm7, %v9571_v13, %v9572_v0  ;;  %v1372_v28 = vsel %vm22764_vm4, %v1367_v16, %v1371_v52  ;;  %v1385_v30 = vrot.slane %v1383_v22, 5  ;;  %v1389_v19 = vrot.slane %v1387_v1, 4  ;;  %v295_v52 = vld [vmem:[%s22742_s13 + $0x1e8] sm:$0xf]  ;;  %v18160_v16 = vld [vmem:[%s22742_s13 + $0xb4] sm:$0xe] }
 0x170   : > { %v18230_v29 = vcombine.low %v9570_v11, %v9573_v27  ;;  %v17234_v18 = vcombine.low %v1362_v25, %v1372_v28  ;;  %v1380_v31 = vor.u32 %v1379_v6, %v1376_v17  ;;  %v1395_v61 = vrot.slane %v1393_v7, 5  ;;  %v350_v28 = vld [vmem:[%s22742_s13 + $0x1f0] sm:$0x1] }
 0x171   : > { %v18191_v23 = vrot.slane %v18159_v10, 9  ;;  %v1390_v53 = vor.u32 %v1389_v19, %v1385_v30  ;;  %v9576_v58 = vrot.slane %v22142_v33, 5  ;;  %v9579_v35 = vrot.slane %v22143_v34, 5  ;;  %v22146_v19 = vld [vmem:[%s22742_s13 + $0xb8] sm:$0xf] }
 0x172   : > { %20354 = vmatmul.mubr.msk.bf16.gmra.mrb[24].mxu0 %vm1963_vm3, %v18230_v29  ;;  %v1397_v62 = vshrl.u32 %v291_v56, 16  ;;  %19768 = vmatmul.mubr.msk.bf16.gmra.mrb[88].mxu1 %vm1963_vm3, %v17234_v18  ;;  %v1381_v15 = vrot.slane %v1380_v31, 4  ;;  %v1403_v37 = vshll.u32 %v292_v21, 16  ;;  %v1407_v38 = vshrl.u32 %v292_v21, 16  ;;  %v22147_v31 = vld [vmem:[%s22742_s13 + $0xbc] sm:$0xf] }
 0x173   : > { %v1413_v39 = vshll.u32 %v349_v24, 16  ;;  %v1391_v40 = vrot.slane %v1390_v53, 4  ;;  %v9577_v42 = vsel %vm23271_vm7, %v18191_v23, %v9576_v58  ;;  %v9578_v63 = vrot.slane %v9576_v58, 4  ;;  %v296_v24 = vld [vmem:[%s22742_s13 + $0x1ec] sm:$0xf] }
 0x174   : > { %v1399_v36 = vrot.slane %v1397_v62, 4  ;;  %v1386_v20 = vsel %vm22764_vm4, %v1381_v15, %v1385_v30  ;;  %v1405_v26 = vrot.slane %v1403_v37, 5  ;;  %v1409_v45 = vrot.slane %v1407_v38, 4  ;;  %v297_v34 = vld [vmem:[%s22742_s13 + $0x1f4] sm:$0xf] }
 0x175   : > { %v1415_v41 = vrot.slane %v1413_v39, 5  ;;  %v1396_v47 = vsel %vm22764_vm4, %v1391_v40, %v1395_v61  ;;  %v9580_v49 = vsel %vm23271_vm7, %v9578_v63, %v9579_v35  ;;  %v9581_v51 = vrot.slane %v9579_v35, 4 }
 0x176   : > { %v1400_v50 = vor.u32 %v1399_v36, %v1395_v61  ;;  %v17235_v54 = vcombine.low %v1386_v20, %v1396_v47  ;;  %v18231_v44 = vcombine.low %v9577_v42, %v9580_v49  ;;  %v1410_v55 = vor.u32 %v1409_v45, %v1405_v26  ;;  %v298_v49 = vld [vmem:[%s22742_s13 + $0x1f8] sm:$0xf] }
 0x177   : > { %v9582_v48 = vrot.slane %v22144_v57, 5  ;;  %v9585_v56 = vrot.slane %v22145_v59, 5  ;;  %v1418_v2 = vshrl.u32 %v293_v43, 16  ;;  %v1421_v4 = vshll.u32 %v293_v43, 16 }
 0x178   : > { %v1401_v60 = vrot.slane %v1400_v50, 4  ;;  %19771 = vmatprep.mubr.msk.bf16.mxu1 %vm1963_vm3, %v17235_v54  ;;  %20357 = vmatprep.mubr.msk.bf16.mxu0 %vm1963_vm3, %v18231_v44  ;;  %v1411_v5 = vrot.slane %v1410_v55, 4  ;;  %v1427_v10 = vshll.u32 %v294_v46, 16  ;;  %v1431_v14 = vshrl.u32 %v294_v46, 16  ;;  %v22148_v46 = vld [vmem:[%s22742_s13 + $0xc0] sm:$0xf] }
 0x179   : > { %v9583_v0 = vsel %vm23271_vm7, %v9581_v51, %v9582_v48  ;;  %v9584_v8 = vrot.slane %v9582_v48, 4  ;;  %v1420_v11 = vrot.slane %v1418_v2, 4  ;;  %v1423_v13 = vrot.slane %v1421_v4, 5  ;;  %v299_v44 = vld [vmem:[%s22742_s13 + $0x1fc] sm:$0xf] }
 0x17a   : > { %v1406_v12 = vsel %vm22764_vm4, %v1401_v60, %v1405_v26  ;;  %v1416_v17 = vsel %vm22764_vm4, %v1411_v5, %v1415_v41  ;;  %v1429_v1 = vrot.slane %v1427_v10, 5  ;;  %v1437_v21 = vshll.u32 %v295_v52, 16  ;;  %v351_v10 = vld [vmem:[%s22742_s13 + $0x204] sm:$0x1] }
 0x17b   : > { %v9586_v22 = vsel %vm23271_vm7, %v9584_v8, %v9585_v56  ;;  %v17236_v25 = vcombine.low %v1406_v12, %v1416_v17  ;;  %v1424_v6 = vor.u32 %v1423_v13, %v1420_v11  ;;  %v1433_v7 = vrot.slane %v1431_v14, 4  ;;  %v18161_v56 = vld [vmem:[%s22742_s13 + $0xc8] sm:$0xe]  ;;  %v300_v8 = vld [vmem:[%s22742_s13 + $0x200] sm:$0xf] }
 0x17c   : > { %v18232_v27 = vcombine.low %v9583_v0, %v9586_v22  ;;  %v1439_v29 = vrot.slane %v1437_v21, 5  ;;  %v18192_v30 = vrot.slane %v18160_v16, 9  ;;  %v9589_v18 = vrot.slane %v22146_v19, 5 }
 0x17d   : > { %v9592_v61 = vrot.slane %v22147_v31, 5  ;;  %19772 = vmatmul.mubr.msk.bf16.gmra.mrb[92].mxu1 %vm1963_vm3, %v17236_v25  ;;  %v1425_v23 = vrot.slane %v1424_v6, 4  ;;  %v1434_v53 = vor.u32 %v1433_v7, %v1429_v1  ;;  %v1441_v33 = vshrl.u32 %v295_v52, 16  ;;  %v22149_v52 = vld [vmem:[%s22742_s13 + $0xc4] sm:$0x1] }
 0x17e   : > { %20358 = vmatmul.mubr.msk.bf16.gmra.mrb[28].mxu0 %vm1963_vm3, %v18232_v27  ;;  %v1447_v58 = vshll.u32 %v296_v24, 16  ;;  %v9590_v35 = vsel %vm23271_vm7, %v18192_v30, %v9589_v18  ;;  %v9591_v62 = vrot.slane %v9589_v18, 4  ;;  %v1451_v15 = vshrl.u32 %v296_v24, 16  ;;  %v22150_v7 = vld [vmem:[%s22742_s13 + $0xcc] sm:$0xf] }
 0x17f   : > { %v1457_v37 = vshll.u32 %v350_v28, 16  ;;  %v1430_v38 = vsel %vm22764_vm4, %v1425_v23, %v1429_v1  ;;  %v1435_v39 = vrot.slane %v1434_v53, 4  ;;  %v1443_v40 = vrot.slane %v1441_v33, 4 }
 0x180   : > { %v1449_v42 = vrot.slane %v1447_v58, 5  ;;  %v9593_v63 = vsel %vm23271_vm7, %v9591_v62, %v9592_v61  ;;  %v1453_v36 = vrot.slane %v1451_v15, 4  ;;  %v9594_v20 = vrot.slane %v9592_v61, 4 }
 0x181   : > { %v1459_v43 = vrot.slane %v1457_v37, 5  ;;  %v1440_v26 = vsel %vm22764_vm4, %v1435_v39, %v1439_v29  ;;  %v18233_v45 = vcombine.low %v9590_v35, %v9593_v63  ;;  %v1444_v41 = vor.u32 %v1443_v40, %v1439_v29  ;;  %v22151_v29 = vld [vmem:[%s22742_s13 + $0xd0] sm:$0xf]  ;;  %v301_v35 = vld [vmem:[%s22742_s13 + $0x208] sm:$0xf] }
 0x182   : > { %v9595_v47 = vrot.slane %v22148_v46, 5  ;;  %v17237_v50 = vcombine.low %v1430_v38, %v1440_v26  ;;  %v1454_v51 = vor.u32 %v1453_v36, %v1449_v42  ;;  %v9598_v54 = vrot.slane %v22149_v52, 5  ;;  %v302_v39 = vld [vmem:[%s22742_s13 + $0x20c] sm:$0xf] }
 0x183   : > { %v1462_v55 = vshrl.u32 %v297_v34, 16  ;;  %20361 = vmatprep.mubr.msk.bf16.mxu0 %vm1963_vm3, %v18233_v45  ;;  %v1445_v57 = vrot.slane %v1444_v41, 4  ;;  %v1465_v59 = vshll.u32 %v297_v34, 16  ;;  %v1471_v5 = vshll.u32 %v298_v49, 16  ;;  %v22152_v41 = vld [vmem:[%s22742_s13 + $0xd4] sm:$0xf] }
 0x184   : > { %v9596_v48 = vsel %vm23271_vm7, %v9594_v20, %v9595_v47  ;;  %v9597_v60 = vrot.slane %v9595_v47, 4  ;;  %19775 = vmatprep.mubr.msk.bf16.mxu1 %vm1963_vm3, %v17237_v50  ;;  %v1455_v2 = vrot.slane %v1454_v51, 4  ;;  %v1475_v0 = vshrl.u32 %v298_v49, 16  ;;  %v22153_v49 = vld [vmem:[%s22742_s13 + $0xd8] sm:$0x1] }
 0x185   : > { %v1464_v4 = vrot.slane %v1462_v55, 4  ;;  %v1450_v12 = vsel %vm22764_vm4, %v1445_v57, %v1449_v42  ;;  %v1467_v13 = vrot.slane %v1465_v59, 5  ;;  %v1481_v14 = vshll.u32 %v299_v44, 16 }
 0x186   : > { %v9599_v11 = vsel %vm23271_vm7, %v9597_v60, %v9598_v54  ;;  %v1460_v16 = vsel %vm22764_vm4, %v1455_v2, %v1459_v43  ;;  %v1473_v22 = vrot.slane %v1471_v5, 5  ;;  %v1477_v1 = vrot.slane %v1475_v0, 4  ;;  %v303_v43 = vld [vmem:[%s22742_s13 + $0x210] sm:$0xf]  ;;  %v18162_v2 = vld [vmem:[%s22742_s13 + $0xdc] sm:$0xe] }
 0x187   : > { %v18234_v17 = vcombine.low %v9596_v48, %v9599_v11  ;;  %v17238_v21 = vcombine.low %v1450_v12, %v1460_v16  ;;  %v1468_v24 = vor.u32 %v1467_v13, %v1464_v4  ;;  %v1483_v25 = vrot.slane %v1481_v14, 5  ;;  %v352_v16 = vld [vmem:[%s22742_s13 + $0x218] sm:$0x1] }
 0x188   : > { %v18193_v27 = vrot.slane %v18161_v56, 9  ;;  %v1478_v6 = vor.u32 %v1477_v1, %v1473_v22  ;;  %v9602_v28 = vrot.slane %v22150_v7, 5  ;;  %v9605_v30 = vrot.slane %v22151_v29, 5  ;;  %v22154_v1 = vld [vmem:[%s22742_s13 + $0xe0] sm:$0xf] }
 0x189   : > { %20362 = vmatmul.mubr.msk.bf16.gmra.mrb[32].mxu0 %vm1963_vm3, %v18234_v17  ;;  %v1485_v19 = vshrl.u32 %v299_v44, 16  ;;  %19776 = vmatmul.mubr.msk.bf16.gmra.mrb[96].mxu1 %vm1963_vm3, %v17238_v21  ;;  %v1469_v18 = vrot.slane %v1468_v24, 4  ;;  %v1491_v31 = vshll.u32 %v300_v8, 16  ;;  %v1495_v61 = vshrl.u32 %v300_v8, 16  ;;  %v22155_v24 = vld [vmem:[%s22742_s13 + $0xe4] sm:$0xf] }
 0x18a   : > { %v1501_v23 = vshll.u32 %v351_v10, 16  ;;  %v1479_v53 = vrot.slane %v1478_v6, 4  ;;  %v9603_v33 = vsel %vm23271_vm7, %v18193_v27, %v9602_v28  ;;  %v9604_v58 = vrot.slane %v9602_v28, 4  ;;  %v304_v10 = vld [vmem:[%s22742_s13 + $0x214] sm:$0xf] }
 0x18b   : > { %v1487_v34 = vrot.slane %v1485_v19, 4  ;;  %v1474_v62 = vsel %vm22764_vm4, %v1469_v18, %v1473_v22  ;;  %v1493_v15 = vrot.slane %v1491_v31, 5  ;;  %v1497_v37 = vrot.slane %v1495_v61, 4  ;;  %v305_v29 = vld [vmem:[%s22742_s13 + $0x21c] sm:$0xf] }
 0x18c   : > { %v1503_v38 = vrot.slane %v1501_v23, 5  ;;  %v1484_v40 = vsel %vm22764_vm4, %v1479_v53, %v1483_v25  ;;  %v9606_v42 = vsel %vm23271_vm7, %v9604_v58, %v9605_v30  ;;  %v9607_v36 = vrot.slane %v9605_v30, 4 }
 0x18d   : > { %v1488_v63 = vor.u32 %v1487_v34, %v1483_v25  ;;  %v17239_v20 = vcombine.low %v1474_v62, %v1484_v40  ;;  %v18235_v26 = vcombine.low %v9603_v33, %v9606_v42  ;;  %v1498_v45 = vor.u32 %v1497_v37, %v1493_v15  ;;  %v306_v42 = vld [vmem:[%s22742_s13 + $0x220] sm:$0xf] }
 0x18e   : > { %v9608_v46 = vrot.slane %v22152_v41, 5  ;;  %v9611_v50 = vrot.slane %v22153_v49, 5  ;;  %v1506_v51 = vshrl.u32 %v301_v35, 16  ;;  %v1509_v52 = vshll.u32 %v301_v35, 16 }
 0x18f   : > { %v1489_v47 = vrot.slane %v1488_v63, 4  ;;  %19779 = vmatprep.mubr.msk.bf16.mxu1 %vm1963_vm3, %v17239_v20  ;;  %20365 = vmatprep.mubr.msk.bf16.mxu0 %vm1963_vm3, %v18235_v26  ;;  %v1499_v54 = vrot.slane %v1498_v45, 4  ;;  %v1515_v57 = vshll.u32 %v302_v39, 16  ;;  %v1519_v56 = vshrl.u32 %v302_v39, 16  ;;  %v22156_v39 = vld [vmem:[%s22742_s13 + $0xe8] sm:$0xf] }
 0x190   : > { %v9609_v44 = vsel %vm23271_vm7, %v9607_v36, %v9608_v46  ;;  %v9610_v55 = vrot.slane %v9608_v46, 4  ;;  %v1508_v60 = vrot.slane %v1506_v51, 4  ;;  %v1511_v59 = vrot.slane %v1509_v52, 5  ;;  %v307_v26 = vld [vmem:[%s22742_s13 + $0x224] sm:$0xf] }
 0x191   : > { %v1494_v48 = vsel %vm22764_vm4, %v1489_v47, %v1493_v15  ;;  %v1504_v4 = vsel %vm22764_vm4, %v1499_v54, %v1503_v38  ;;  %v1517_v0 = vrot.slane %v1515_v57, 5  ;;  %v1525_v8 = vshll.u32 %v303_v43, 16  ;;  %v353_v57 = vld [vmem:[%s22742_s13 + $0x22c] sm:$0x1] }
 0x192   : > { %v9612_v5 = vsel %vm23271_vm7, %v9610_v55, %v9611_v50  ;;  %v17240_v12 = vcombine.low %v1494_v48, %v1504_v4  ;;  %v1512_v13 = vor.u32 %v1511_v59, %v1508_v60  ;;  %v1521_v14 = vrot.slane %v1519_v56, 4  ;;  %v308_v55 = vld [vmem:[%s22742_s13 + $0x228] sm:$0xf] }
 0x193   : > { %v18236_v11 = vcombine.low %v9609_v44, %v9612_v5  ;;  %v1527_v17 = vrot.slane %v1525_v8, 5  ;;  %v18194_v22 = vrot.slane %v18162_v2, 9  ;;  %v9615_v21 = vrot.slane %v22154_v1, 5  ;;  %v18163_v44 = vld [vmem:[%s22742_s13 + $0xf0] sm:$0xe] }
 0x194   : > { %v9618_v25 = vrot.slane %v22155_v24, 5  ;;  %19780 = vmatmul.mubr.msk.bf16.gmra.mrb[100].mxu1 %vm1963_vm3, %v17240_v12  ;;  %v1513_v27 = vrot.slane %v1512_v13, 4  ;;  %v1522_v6 = vor.u32 %v1521_v14, %v1517_v0  ;;  %v1529_v7 = vshrl.u32 %v303_v43, 16  ;;  %v22157_v43 = vld [vmem:[%s22742_s13 + $0xec] sm:$0x1] }
 0x195   : > { %20366 = vmatmul.mubr.msk.bf16.gmra.mrb[36].mxu0 %vm1963_vm3, %v18236_v11  ;;  %v1535_v28 = vshll.u32 %v304_v10, 16  ;;  %v9616_v30 = vsel %vm23271_vm7, %v18194_v22, %v9615_v21  ;;  %v9617_v19 = vrot.slane %v9615_v21, 4  ;;  %v1539_v18 = vshrl.u32 %v304_v10, 16  ;;  %v22158_v14 = vld [vmem:[%s22742_s13 + $0xf4] sm:$0xf] }
 0x196   : > { %v1545_v31 = vshll.u32 %v352_v16, 16  ;;  %v1518_v61 = vsel %vm22764_vm4, %v1513_v27, %v1517_v0  ;;  %v1523_v23 = vrot.slane %v1522_v6, 4  ;;  %v1531_v53 = vrot.slane %v1529_v7, 4 }
 0x197   : > { %v1537_v33 = vrot.slane %v1535_v28, 5  ;;  %v9619_v58 = vsel %vm23271_vm7, %v9617_v19, %v9618_v25  ;;  %v1541_v34 = vrot.slane %v1539_v18, 4  ;;  %v9620_v62 = vrot.slane %v9618_v25, 4 }
 0x198   : > { %v1547_v35 = vrot.slane %v1545_v31, 5  ;;  %v1528_v15 = vsel %vm22764_vm4, %v1523_v23, %v1527_v17  ;;  %v18237_v37 = vcombine.low %v9616_v30, %v9619_v58  ;;  %v1532_v38 = vor.u32 %v1531_v53, %v1527_v17  ;;  %v22159_v17 = vld [vmem:[%s22742_s13 + $0xf8] sm:$0xf] }
 0x199   : > { %v9621_v40 = vrot.slane %v22156_v39, 5  ;;  %v17241_v63 = vcombine.low %v1518_v61, %v1528_v15  ;;  %v1542_v36 = vor.u32 %v1541_v34, %v1537_v33  ;;  %v9624_v20 = vrot.slane %v22157_v43, 5  ;;  %v309_v61 = vld [vmem:[%s22742_s13 + $0x230] sm:$0xf]  ;;  %v310_v34 = vld [vmem:[%s22742_s13 + $0x234] sm:$0xf] }
 0x19a   : > { %v1550_v45 = vshrl.u32 %v305_v29, 16  ;;  %20369 = vmatprep.mubr.msk.bf16.mxu0 %vm1963_vm3, %v18237_v37  ;;  %v1533_v41 = vrot.slane %v1532_v38, 4  ;;  %v1553_v49 = vshll.u32 %v305_v29, 16  ;;  %v1559_v52 = vshll.u32 %v306_v42, 16  ;;  %v22160_v38 = vld [vmem:[%s22742_s13 + $0xfc] sm:$0xf] }
 0x19b   : > { %v9622_v46 = vsel %vm23271_vm7, %v9620_v62, %v9621_v40  ;;  %v9623_v47 = vrot.slane %v9621_v40, 4  ;;  %19783 = vmatprep.mubr.msk.bf16.mxu1 %vm1963_vm3, %v17241_v63  ;;  %v1543_v50 = vrot.slane %v1542_v36, 4  ;;  %v1563_v54 = vshrl.u32 %v306_v42, 16  ;;  %v22161_v42 = vld [vmem:[%s22742_s13 + $0x100] sm:$0x1] }
 0x19c   : > { %v1552_v51 = vrot.slane %v1550_v45, 4  ;;  %v1538_v48 = vsel %vm22764_vm4, %v1533_v41, %v1537_v33  ;;  %v1555_v59 = vrot.slane %v1553_v49, 5  ;;  %v1569_v56 = vshll.u32 %v307_v26, 16 }
 0x19d   : > { %v9625_v60 = vsel %vm23271_vm7, %v9623_v47, %v9624_v20  ;;  %v1548_v2 = vsel %vm22764_vm4, %v1543_v50, %v1547_v35  ;;  %v1561_v5 = vrot.slane %v1559_v52, 5  ;;  %v1565_v0 = vrot.slane %v1563_v54, 4  ;;  %v311_v35 = vld [vmem:[%s22742_s13 + $0x238] sm:$0xf]  ;;  %v18164_v20 = vld [vmem:[%s22742_s13 + $0x104] sm:$0xe] }
 0x19e   : > { %v18238_v4 = vcombine.low %v9622_v46, %v9625_v60  ;;  %v17242_v8 = vcombine.low %v1538_v48, %v1548_v2  ;;  %v1556_v10 = vor.u32 %v1555_v59, %v1552_v51  ;;  %v1571_v12 = vrot.slane %v1569_v56, 5  ;;  %v354_v2 = vld [vmem:[%s22742_s13 + $0x240] sm:$0x1] }
 0x19f   : > { %v18195_v11 = vrot.slane %v18163_v44, 9  ;;  %v1566_v13 = vor.u32 %v1565_v0, %v1561_v5  ;;  %v9628_v16 = vrot.slane %v22158_v14, 5  ;;  %v9631_v22 = vrot.slane %v22159_v17, 5  ;;  %v22162_v0 = vld [vmem:[%s22742_s13 + $0x108] sm:$0xf] }
 0x1a0   : > { %20370 = vmatmul.mubr.msk.bf16.gmra.mrb[40].mxu0 %vm1963_vm3, %v18238_v4  ;;  %v1573_v1 = vshrl.u32 %v307_v26, 16  ;;  %19784 = vmatmul.mubr.msk.bf16.gmra.mrb[104].mxu1 %vm1963_vm3, %v17242_v8  ;;  %v1557_v21 = vrot.slane %v1556_v10, 4  ;;  %v1579_v24 = vshll.u32 %v308_v55, 16  ;;  %v1583_v25 = vshrl.u32 %v308_v55, 16  ;;  %v22163_v10 = vld [vmem:[%s22742_s13 + $0x10c] sm:$0xf] }
 0x1a1   : > { %v1589_v27 = vshll.u32 %v353_v57, 16  ;;  %v1567_v6 = vrot.slane %v1566_v13, 4  ;;  %v9629_v7 = vsel %vm23271_vm7, %v18195_v11, %v9628_v16  ;;  %v9630_v28 = vrot.slane %v9628_v16, 4  ;;  %v312_v57 = vld [vmem:[%s22742_s13 + $0x23c] sm:$0xf] }
 0x1a2   : > { %v1575_v29 = vrot.slane %v1573_v1, 4  ;;  %v1562_v30 = vsel %vm22764_vm4, %v1557_v21, %v1561_v5  ;;  %v1581_v19 = vrot.slane %v1579_v24, 5  ;;  %v1585_v18 = vrot.slane %v1583_v25, 4  ;;  %v313_v17 = vld [vmem:[%s22742_s13 + $0x244] sm:$0xf] }
 0x1a3   : > { %v1591_v31 = vrot.slane %v1589_v27, 5  ;;  %v1572_v23 = vsel %vm22764_vm4, %v1567_v6, %v1571_v12  ;;  %v9632_v53 = vsel %vm23271_vm7, %v9630_v28, %v9631_v22  ;;  %v9633_v58 = vrot.slane %v9631_v22, 4  ;;  %v314_v28 = vld [vmem:[%s22742_s13 + $0x248] sm:$0xf] }
 0x1a4   : > { %v1576_v33 = vor.u32 %v1575_v29, %v1571_v12  ;;  %v17243_v62 = vcombine.low %v1562_v30, %v1572_v23  ;;  %v18239_v15 = vcombine.low %v9629_v7, %v9632_v53  ;;  %v1586_v37 = vor.u32 %v1585_v18, %v1581_v19  ;;  %v22164_v53 = vld [vmem:[%s22742_s13 + $0x110] sm:$0xf] }
 0x1a5   : > { %v9634_v39 = vrot.slane %v22160_v38, 5  ;;  %v9637_v63 = vrot.slane %v22161_v42, 5  ;;  %v1594_v36 = vshrl.u32 %v309_v61, 16  ;;  %v1597_v43 = vshll.u32 %v309_v61, 16 }
 0x1a6   : > { %v1577_v40 = vrot.slane %v1576_v33, 4  ;;  %19787 = vmatprep.mubr.msk.bf16.mxu1 %vm1963_vm3, %v17243_v62  ;;  %20373 = vmatprep.mubr.msk.bf16.mxu0 %vm1963_vm3, %v18239_v15  ;;  %v1587_v26 = vrot.slane %v1586_v37, 4  ;;  %v1603_v46 = vshll.u32 %v310_v34, 16  ;;  %v1607_v51 = vshrl.u32 %v310_v34, 16  ;;  %v315_v15 = vld [vmem:[%s22742_s13 + $0x24c] sm:$0xf] }
 0x1a7   : > { %v9635_v45 = vsel %vm23271_vm7, %v9633_v58, %v9634_v39  ;;  %v9636_v41 = vrot.slane %v9634_v39, 4  ;;  %v1596_v49 = vrot.slane %v1594_v36, 4  ;;  %v1599_v50 = vrot.slane %v1597_v43, 5 }
 0x1a8   : > { %v1582_v47 = vsel %vm22764_vm4, %v1577_v40, %v1581_v19  ;;  %v1592_v52 = vsel %vm22764_vm4, %v1587_v26, %v1591_v31  ;;  %v1605_v44 = vrot.slane %v1603_v46, 5  ;;  %v1613_v55 = vshll.u32 %v311_v35, 16  ;;  %v18165_v26 = vld [vmem:[%s22742_s13 + $0x118] sm:$0xe] }
 0x1a9   : > { %v9638_v54 = vsel %vm23271_vm7, %v9636_v41, %v9637_v63  ;;  %v17244_v48 = vcombine.low %v1582_v47, %v1592_v52  ;;  %v1600_v59 = vor.u32 %v1599_v50, %v1596_v49  ;;  %v1609_v56 = vrot.slane %v1607_v51, 4  ;;  %v316_v49 = vld [vmem:[%s22742_s13 + $0x250] sm:$0xf]  ;;  %v355_v50 = vld [vmem:[%s22742_s13 + $0x254] sm:$0x1] }
 0x1aa   : > { %v18240_v60 = vcombine.low %v9635_v45, %v9638_v54  ;;  %v1615_v4 = vrot.slane %v1613_v55, 5  ;;  %v18196_v5 = vrot.slane %v18164_v20, 9  ;;  %v9641_v8 = vrot.slane %v22162_v0, 5 }
 0x1ab   : > { %v9644_v12 = vrot.slane %v22163_v10, 5  ;;  %19788 = vmatmul.mubr.msk.bf16.gmra.mrb[108].mxu1 %vm1963_vm3, %v17244_v48  ;;  %v1601_v11 = vrot.slane %v1600_v59, 4  ;;  %v1610_v13 = vor.u32 %v1609_v56, %v1605_v44  ;;  %v1617_v14 = vshrl.u32 %v311_v35, 16  ;;  %v22165_v35 = vld [vmem:[%s22742_s13 + $0x114] sm:$0x1] }
 0x1ac   : > { %20374 = vmatmul.mubr.msk.bf16.gmra.mrb[44].mxu0 %vm1963_vm3, %v18240_v60  ;;  %v1623_v16 = vshll.u32 %v312_v57, 16  ;;  %v9642_v22 = vsel %vm23271_vm7, %v18196_v5, %v9641_v8  ;;  %v9643_v1 = vrot.slane %v9641_v8, 4  ;;  %v1627_v21 = vshrl.u32 %v312_v57, 16  ;;  %v22166_v56 = vld [vmem:[%s22742_s13 + $0x11c] sm:$0xf] }
 0x1ad   : > { %v1633_v24 = vshll.u32 %v354_v2, 16  ;;  %v1606_v25 = vsel %vm22764_vm4, %v1601_v11, %v1605_v44  ;;  %v1611_v27 = vrot.slane %v1610_v13, 4  ;;  %v1619_v6 = vrot.slane %v1617_v14, 4 }
 0x1ae   : > { %v1625_v7 = vrot.slane %v1623_v16, 5  ;;  %v9645_v29 = vsel %vm23271_vm7, %v9643_v1, %v9644_v12  ;;  %v1629_v30 = vrot.slane %v1627_v21, 4  ;;  %v9646_v18 = vrot.slane %v9644_v12, 4 }
 0x1af   : > { %v1635_v19 = vrot.slane %v1633_v24, 5  ;;  %v1616_v31 = vsel %vm22764_vm4, %v1611_v27, %v1615_v4  ;;  %v18241_v61 = vcombine.low %v9642_v22, %v9645_v29  ;;  %v1620_v23 = vor.u32 %v1619_v6, %v1615_v4  ;;  %v22167_v4 = vld [vmem:[%s22742_s13 + $0x120] sm:$0xf]  ;;  %v318_v29 = vld [vmem:[%s22742_s13 + $0x25c] sm:$0xf] }
 0x1b0   : > { %v9647_v33 = vrot.slane %v22164_v53, 5  ;;  %v17245_v58 = vcombine.low %v1606_v25, %v1616_v31  ;;  %v1630_v34 = vor.u32 %v1629_v30, %v1625_v7  ;;  %v9650_v62 = vrot.slane %v22165_v35, 5  ;;  %v317_v25 = vld [vmem:[%s22742_s13 + $0x258] sm:$0xf]  ;;  %v22168_v31 = vld [vmem:[%s22742_s13 + $0x124] sm:$0xf] }
 0x1b1   : > { %v1638_v37 = vshrl.u32 %v313_v17, 16  ;;  %20377 = vmatprep.mubr.msk.bf16.mxu0 %vm1963_vm3, %v18241_v61  ;;  %v1621_v38 = vrot.slane %v1620_v23, 4  ;;  %v1641_v42 = vshll.u32 %v313_v17, 16  ;;  %v1647_v43 = vshll.u32 %v314_v28, 16  ;;  %v319_v23 = vld [vmem:[%s22742_s13 + $0x260] sm:$0xf] }
 0x1b2   : > { %v9648_v39 = vsel %vm23271_vm7, %v9646_v18, %v9647_v33  ;;  %v9649_v40 = vrot.slane %v9647_v33, 4  ;;  %19791 = vmatprep.mubr.msk.bf16.mxu1 %vm1963_vm3, %v17245_v58  ;;  %v1631_v63 = vrot.slane %v1630_v34, 4  ;;  %v1651_v20 = vshrl.u32 %v314_v28, 16  ;;  %v22169_v33 = vld [vmem:[%s22742_s13 + $0x128] sm:$0x1] }
 0x1b3   : > { %v1640_v36 = vrot.slane %v1638_v37, 4  ;;  %v1626_v45 = vsel %vm22764_vm4, %v1621_v38, %v1625_v7  ;;  %v1643_v46 = vrot.slane %v1641_v42, 5  ;;  %v1657_v47 = vshll.u32 %v315_v15, 16 }
 0x1b4   : > { %v9651_v41 = vsel %vm23271_vm7, %v9649_v40, %v9650_v62  ;;  %v1636_v51 = vsel %vm22764_vm4, %v1631_v63, %v1635_v19  ;;  %v1649_v54 = vrot.slane %v1647_v43, 5  ;;  %v1653_v44 = vrot.slane %v1651_v20, 4  ;;  %v18166_v62 = vld [vmem:[%s22742_s13 + $0x12c] sm:$0xe]  ;;  %v320_v40 = vld [vmem:[%s22742_s13 + $0x264] sm:$0xf] }
 0x1b5   : > { %v18242_v52 = vcombine.low %v9648_v39, %v9651_v41  ;;  %v17246_v55 = vcombine.low %v1626_v45, %v1636_v51  ;;  %v1644_v57 = vor.u32 %v1643_v46, %v1640_v36  ;;  %v1659_v48 = vrot.slane %v1657_v47, 5  ;;  %v356_v51 = vld [vmem:[%s22742_s13 + $0x268] sm:$0x1] }
 0x1b6   : > { %v18197_v60 = vrot.slane %v18165_v26, 9  ;;  %v1654_v59 = vor.u32 %v1653_v44, %v1649_v54  ;;  %v9654_v2 = vrot.slane %v22166_v56, 5  ;;  %v9657_v5 = vrot.slane %v22167_v4, 5  ;;  %v22170_v44 = vld [vmem:[%s22742_s13 + $0x130] sm:$0xf] }
 0x1b7   : > { %20378 = vmatmul.mubr.msk.bf16.gmra.mrb[48].mxu0 %vm1963_vm3, %v18242_v52  ;;  %v1661_v0 = vshrl.u32 %v315_v15, 16  ;;  %19792 = vmatmul.mubr.msk.bf16.gmra.mrb[112].mxu1 %vm1963_vm3, %v17246_v55  ;;  %v1645_v8 = vrot.slane %v1644_v57, 4  ;;  %v1667_v10 = vshll.u32 %v316_v49, 16  ;;  %v1671_v12 = vshrl.u32 %v316_v49, 16  ;;  %v22171_v57 = vld [vmem:[%s22742_s13 + $0x134] sm:$0xf] }
 0x1b8   : > { %v1677_v11 = vshll.u32 %v355_v50, 16  ;;  %v1655_v13 = vrot.slane %v1654_v59, 4  ;;  %v9655_v14 = vsel %vm23271_vm7, %v18197_v60, %v9654_v2  ;;  %v9656_v16 = vrot.slane %v9654_v2, 4 }
 0x1b9   : > { %v1663_v17 = vrot.slane %v1661_v0, 4  ;;  %v1650_v22 = vsel %vm22764_vm4, %v1645_v8, %v1649_v54  ;;  %v1669_v1 = vrot.slane %v1667_v10, 5  ;;  %v1673_v21 = vrot.slane %v1671_v12, 4 }
 0x1ba   : > { %v1679_v24 = vrot.slane %v1677_v11, 5  ;;  %v1660_v27 = vsel %vm22764_vm4, %v1655_v13, %v1659_v48  ;;  %v9658_v6 = vsel %vm23271_vm7, %v9656_v16, %v9657_v5  ;;  %v9659_v28 = vrot.slane %v9657_v5, 4 }
 0x1bb   : > { %v1664_v7 = vor.u32 %v1663_v17, %v1659_v48  ;;  %v17247_v30 = vcombine.low %v1650_v22, %v1660_v27  ;;  %v18243_v19 = vcombine.low %v9655_v14, %v9658_v6  ;;  %v1674_v18 = vor.u32 %v1673_v21, %v1669_v1  ;;  %v321_v14 = vld [vmem:[%s22742_s13 + $0x26c] sm:$0xf]  ;;  %v22172_v27 = vld [vmem:[%s22742_s13 + $0x138] sm:$0xf] }
 0x1bc   : > { %v9660_v61 = vrot.slane %v22168_v31, 5  ;;  %v9663_v58 = vrot.slane %v22169_v33, 5  ;;  %v1682_v34 = vshrl.u32 %v317_v25, 16  ;;  %v1685_v35 = vshll.u32 %v317_v25, 16 }
 0x1bd   : > { %v1665_v53 = vrot.slane %v1664_v7, 4  ;;  %19795 = vmatprep.mubr.msk.bf16.mxu1 %vm1963_vm3, %v17247_v30  ;;  %20381 = vmatprep.mubr.msk.bf16.mxu0 %vm1963_vm3, %v18243_v19  ;;  %v1675_v15 = vrot.slane %v1674_v18, 4  ;;  %v1691_v39 = vshll.u32 %v318_v29, 16  ;;  %v1695_v43 = vshrl.u32 %v318_v29, 16  ;;  %v322_v7 = vld [vmem:[%s22742_s13 + $0x270] sm:$0xf] }
 0x1be   : > { %v9661_v37 = vsel %vm23271_vm7, %v9659_v28, %v9660_v61  ;;  %v9662_v38 = vrot.slane %v9660_v61, 4  ;;  %v1684_v63 = vrot.slane %v1682_v34, 4  ;;  %v1687_v36 = vrot.slane %v1685_v35, 5  ;;  %v22173_v30 = vld [vmem:[%s22742_s13 + $0x13c] sm:$0x1] }
 0x1bf   : > { %v1670_v42 = vsel %vm22764_vm4, %v1665_v53, %v1669_v1  ;;  %v1680_v20 = vsel %vm22764_vm4, %v1675_v15, %v1679_v24  ;;  %v1693_v45 = vrot.slane %v1691_v39, 5  ;;  %v1701_v41 = vshll.u32 %v319_v23, 16  ;;  %v323_v18 = vld [vmem:[%s22742_s13 + $0x274] sm:$0xf]  ;;  %v18167_v15 = vld [vmem:[%s22742_s13 + $0x140] sm:$0xe] }
 0x1c0   : > { %v9664_v26 = vsel %vm23271_vm7, %v9662_v38, %v9663_v58  ;;  %v17248_v46 = vcombine.low %v1670_v42, %v1680_v20  ;;  %v1688_v49 = vor.u32 %v1687_v36, %v1684_v63  ;;  %v1697_v50 = vrot.slane %v1695_v43, 4  ;;  %v324_v20 = vld [vmem:[%s22742_s13 + $0x278] sm:$0xf] }
 0x1c1   : > { %v18244_v47 = vcombine.low %v9661_v37, %v9664_v26  ;;  %v1703_v52 = vrot.slane %v1701_v41, 5  ;;  %v18198_v54 = vrot.slane %v18166_v62, 9  ;;  %v9667_v55 = vrot.slane %v22170_v44, 5  ;;  %v357_v26 = vld [vmem:[%s22742_s13 + $0x27c] sm:$0x1] }
 0x1c2   : > { %v9670_v48 = vrot.slane %v22171_v57, 5  ;;  %19796 = vmatmul.mubr.msk.bf16.gmra.mrb[116].mxu1 %vm1963_vm3, %v17248_v46  ;;  %v1689_v60 = vrot.slane %v1688_v49, 4  ;;  %v1698_v59 = vor.u32 %v1697_v50, %v1693_v45  ;;  %v1705_v56 = vshrl.u32 %v319_v23, 16  ;;  %v22174_v50 = vld [vmem:[%s22742_s13 + $0x144] sm:$0xf] }
 0x1c3   : > { %20382 = vmatmul.mubr.msk.bf16.gmra.mrb[52].mxu0 %vm1963_vm3, %v18244_v47  ;;  %v1711_v2 = vshll.u32 %v320_v40, 16  ;;  %v9668_v4 = vsel %vm23271_vm7, %v18198_v54, %v9667_v55  ;;  %v9669_v5 = vrot.slane %v9667_v55, 4  ;;  %v1715_v0 = vshrl.u32 %v320_v40, 16 }
 0x1c4   : > { %v1721_v8 = vshll.u32 %v356_v51, 16  ;;  %v1694_v10 = vsel %vm22764_vm4, %v1689_v60, %v1693_v45  ;;  %v1699_v12 = vrot.slane %v1698_v59, 4  ;;  %v1707_v11 = vrot.slane %v1705_v56, 4 }
 0x1c5   : > { %v1713_v13 = vrot.slane %v1711_v2, 5  ;;  %v9671_v16 = vsel %vm23271_vm7, %v9669_v5, %v9670_v48  ;;  %v1717_v17 = vrot.slane %v1715_v0, 4  ;;  %v9672_v1 = vrot.slane %v9670_v48, 4 }
 0x1c6   : > { %v1723_v22 = vrot.slane %v1721_v8, 5  ;;  %v1704_v21 = vsel %vm22764_vm4, %v1699_v12, %v1703_v52  ;;  %v18245_v24 = vcombine.low %v9668_v4, %v9671_v16  ;;  %v1708_v25 = vor.u32 %v1707_v11, %v1703_v52  ;;  %v22175_v52 = vld [vmem:[%s22742_s13 + $0x148] sm:$0xf]  ;;  %v18168_v12 = vld [vmem:[%s22742_s13 + $0x154] sm:$0xe] }
 0x1c7   : > { %v9673_v6 = vrot.slane %v22172_v27, 5  ;;  %v17249_v28 = vcombine.low %v1694_v10, %v1704_v21  ;;  %v1718_v29 = vor.u32 %v1717_v17, %v1713_v13  ;;  %v9676_v19 = vrot.slane %v22173_v30, 5  ;;  %v17944_v17 = vld [vmem:[%s22742_s13 + $0x158] sm:$0xf]  ;;  %v17945_v27 = vld [vmem:[%s22742_s13 + $0x15c] sm:$0xf] }
 0x1c8   : > { %v1726_v31 = vshrl.u32 %v321_v14, 16  ;;  %20385 = vmatprep.mubr.msk.bf16.mxu0 %vm1963_vm3, %v18245_v24  ;;  %v1709_v61 = vrot.slane %v1708_v25, 4  ;;  %v1729_v33 = vshll.u32 %v321_v14, 16  ;;  %v1735_v35 = vshll.u32 %v322_v7, 16  ;;  %v22176_v24 = vld [vmem:[%s22742_s13 + $0x14c] sm:$0xf] }
 0x1c9   : > { %v9674_v23 = vsel %vm23271_vm7, %v9672_v1, %v9673_v6  ;;  %v9675_v53 = vrot.slane %v9673_v6, 4  ;;  %19799 = vmatprep.mubr.msk.bf16.mxu1 %vm1963_vm3, %v17249_v28  ;;  %v1719_v58 = vrot.slane %v1718_v29, 4  ;;  %v1739_v62 = vshrl.u32 %v322_v7, 16  ;;  %v22177_v7 = vld [vmem:[%s22742_s13 + $0x150] sm:$0x1] }
 0x1ca   : > { %v1728_v34 = vrot.slane %v1726_v31, 4  ;;  %v1714_v37 = vsel %vm22764_vm4, %v1709_v61, %v1713_v13  ;;  %v1731_v39 = vrot.slane %v1729_v33, 5  ;;  %v1745_v40 = vshll.u32 %v323_v18, 16 }
 0x1cb   : > { %v9677_v38 = vsel %vm23271_vm7, %v9675_v53, %v9676_v19  ;;  %v1724_v42 = vsel %vm22764_vm4, %v1719_v58, %v1723_v22  ;;  %v1737_v36 = vrot.slane %v1735_v35, 5  ;;  %v1741_v43 = vrot.slane %v1739_v62, 4  ;;  %v22179_v53 = vld [vmem:[%s22742_s13 + $0x4] sm:$0xf] }
 0x1cc   : > { %v18246_v63 = vcombine.low %v9674_v23, %v9677_v38  ;;  %v17250_v45 = vcombine.low %v1714_v37, %v1724_v42  ;;  %v1732_v41 = vor.u32 %v1731_v39, %v1728_v34  ;;  %v1747_v46 = vrot.slane %v1745_v40, 5  ;;  %v22178_v23 = vld [vmem:[%s22742_s13] sm:$0xf]  ;;  %v17947_v38 = vld [vmem:[%s22742_s13 + $0x164] sm:$0x1] }
 0x1cd   : > { %v18199_v47 = vrot.slane %v18167_v15, 9  ;;  %v1742_v49 = vor.u32 %v1741_v43, %v1737_v36  ;;  %v9680_v51 = vrot.slane %v22174_v50, 5  ;;  %v9683_v54 = vrot.slane %v22175_v52, 5  ;;  %v17946_v34 = vld [vmem:[%s22742_s13 + $0x160] sm:$0xf] }
 0x1ce   : > { %20386 = vmatmul.mubr.msk.bf16.gmra.mrb[56].mxu0 %vm1963_vm3, %v18246_v63  ;;  %v1749_v44 = vshrl.u32 %v323_v18, 16  ;;  %19800 = vmatmul.mubr.msk.bf16.gmra.mrb[120].mxu1 %vm1963_vm3, %v17250_v45  ;;  %v1733_v55 = vrot.slane %v1732_v41, 4  ;;  %v1755_v57 = vshll.u32 %v324_v20, 16  ;;  %v1759_v48 = vshrl.u32 %v324_v20, 16  ;;  %v18169_v42 = vld [vmem:[%s22742_s13 + $0x168] sm:$0xe] }
 0x1cf   : > { %v1765_v60 = vshll.u32 %v357_v26, 16  ;;  %v1743_v59 = vrot.slane %v1742_v49, 4  ;;  %v9681_v56 = vsel %vm23271_vm7, %v18199_v47, %v9680_v51  ;;  %v9682_v2 = vrot.slane %v9680_v51, 4  ;;  %v17949_v20 = vld [vmem:[%s22742_s13 + $0x16c] sm:$0xf] }
 0x1d0   : > { %v1751_v4 = vrot.slane %v1749_v44, 4  ;;  %v1738_v5 = vsel %vm22764_vm4, %v1733_v55, %v1737_v36  ;;  %v1757_v0 = vrot.slane %v1755_v57, 5  ;;  %v1761_v8 = vrot.slane %v1759_v48, 4  ;;  %v17950_v26 = vld [vmem:[%s22742_s13 + $0x170] sm:$0xf] }
 0x1d1   : > { %v1767_v10 = vrot.slane %v1765_v60, 5  ;;  %v1748_v11 = vsel %vm22764_vm4, %v1743_v59, %v1747_v46  ;;  %v9684_v13 = vsel %vm23271_vm7, %v9682_v2, %v9683_v54  ;;  %v9685_v16 = vrot.slane %v9683_v54, 4  ;;  %v23790_v51 = vld [vmem:[%s28850_s1 + $0x1c] sm:$0xf]  ;;  %v17952_v44 = vld [vmem:[%s22742_s13 + $0x178] sm:$0x1] }
 0x1d2   : > { %v1752_v14 = vor.u32 %v1751_v4, %v1747_v46  ;;  %v17251_v22 = vcombine.low %v1738_v5, %v1748_v11  ;;  %v18247_v1 = vcombine.low %v9681_v56, %v9684_v13  ;;  %v1762_v21 = vor.u32 %v1761_v8, %v1757_v0  ;;  %v17951_v46 = vld [vmem:[%s22742_s13 + $0x174] sm:$0xf]  ;;  %v17954_v55 = vld [vmem:[%s22742_s13 + $0x180] sm:$0xf]  ;;  %21881 = vmatprep.subr.msk.bf16.mxu0 %vm2156_vm0, %v23790_v51  ;;  %v23798_v57 = vld [vmem:[%s22742_s13 + $0x8] sm:$0xf] }
 0x1d3   : > { %v9686_v25 = vrot.slane %v22176_v24, 5  ;;  %v9689_v28 = vrot.slane %v22177_v7, 5  ;;  %v18200_v29 = vrot.slane %v18168_v12, 9  ;;  %v9693_v31 = vrot.slane %v17944_v17, 5  ;;  %v23801_v48 = vld [vmem:[%s22742_s13 + $0xc] sm:$0xf] }
 0x1d4   : > { %v1753_v6 = vrot.slane %v1752_v14, 4  ;;  %19803 = vmatprep.mubr.msk.bf16.mxu1 %vm1963_vm3, %v17251_v22  ;;  %20389 = vmatprep.mubr.msk.bf16.mxu0 %vm1963_vm3, %v18247_v1  ;;  %v1763_v30 = vrot.slane %v1762_v21, 4  ;;  %v17317_v33 = vcombine.low %v22178_v23, %v22179_v53  ;;  %v9696_v58 = vrot.slane %v17945_v27, 5  ;;  %v17955_v2 = vld [vmem:[%s22742_s13 + $0x184] sm:$0xf] }
 0x1d5   : > { %v9687_v19 = vsel %vm23271_vm7, %v9685_v16, %v9686_v25  ;;  %v9688_v18 = vrot.slane %v9686_v25, 4  ;;  %v9694_v15 = vsel %vm23271_vm7, %v18200_v29, %v9693_v31  ;;  %v9695_v37 = vrot.slane %v9693_v31, 4  ;;  %v18170_v4 = vld [vmem:[%s22742_s13 + $0x17c] sm:$0xe]  ;;  %v23811_v8 = vld [vmem:[%s22742_s13 + $0x18] sm:$0xf] }
 0x1d6   : > { %v1758_v61 = vsel %vm22764_vm4, %v1753_v6, %v1757_v0  ;;  %v1768_v35 = vsel %vm22764_vm4, %v1763_v30, %v1767_v10  ;;  %v9698_v36 = vrot.slane %v9696_v58, 4  ;;  %v9699_v43 = vrot.slane %v17946_v34, 5  ;;  %v22182_v0 = vld [vmem:[%s22742_s13 + $0x14] sm:$0xf]  ;;  %v22184_v22 = vld [vmem:[%s28850_s1 + $0x8] sm:$0xf] }
 0x1d7   : > { %v9690_v62 = vsel %vm23271_vm7, %v9688_v18, %v9689_v28  ;;  %v17252_v39 = vcombine.low %v1758_v61, %v1768_v35  ;;  %v9697_v63 = vsel %vm23271_vm7, %v9695_v37, %v9696_v58  ;;  %v9702_v41 = vrot.slane %v17947_v38, 5  ;;  %v17956_v27 = vld [vmem:[%s22742_s13 + $0x188] sm:$0xf]  ;;  %v17959_v7 = vld [vmem:[%s22742_s13 + $0x194] sm:$0xf] }
 0x1d8   : > { %v18248_v40 = vcombine.low %v9687_v19, %v9690_v62  ;;  %v18249_v45 = vcombine.low %v9694_v15, %v9697_v63  ;;  %v9700_v47 = vsel %vm23271_vm7, %v9698_v36, %v9699_v43  ;;  %v9701_v49 = vrot.slane %v9699_v43, 4  ;;  %v17957_v61 = vld [vmem:[%s22742_s13 + $0x18c] sm:$0x1]  ;;  %v17960_v53 = vld [vmem:[%s22742_s13 + $0x198] sm:$0xf] }
 0x1d9   : > { %19804 = vmatmul.mubr.msk.bf16.gmra.mrb[124].mxu1 %vm1963_vm3, %v17252_v39  ;;  %v18201_v50 = vrot.slane %v18169_v42, 9  ;;  %v9706_v52 = vrot.slane %v17949_v20, 5  ;;  %v9709_v54 = vrot.slane %v17950_v26, 5  ;;  %v17318_v60 = vcombine.low %v23798_v57, %v23801_v48  ;;  %v23840_v58 = vld [vmem:[%s22742_s13 + $0x1c] sm:$0xf] }
 0x1da   : > { %20390 = vmatmul.mubr.msk.bf16.gmra.mrb[60].mxu0 %vm1963_vm3, %v18248_v40  ;;  %19809 = vmatprep.mubr.msk.bf16.mxu1 %vm1963_vm3, %v17317_v33  ;;  %v9703_v59 = vsel %vm23271_vm7, %v9701_v49, %v9702_v41  ;;  %v9712_v56 = vrot.slane %v17951_v46, 5  ;;  %v17319_v10 = vcombine.low %v22182_v0, %v23811_v8  ;;  %v9715_v16 = vrot.slane %v17952_v44, 5  ;;  %v18171_v33 = vld [vmem:[%s22742_s13 + $0x190] sm:$0xe]  ;;  %v23843_v34 = vld [vmem:[%s22742_s13 + $0x20] sm:$0xf] }
 0x1db   : > { %20393 = vmatprep.mubr.msk.bf16.mxu0 %vm1963_vm3, %v18249_v45  ;;  %v18250_v5 = vcombine.low %v9700_v47, %v9703_v59  ;;  %v9707_v12 = vsel %vm23271_vm7, %v18201_v50, %v9706_v52  ;;  %v9708_v11 = vrot.slane %v9706_v52, 4  ;;  %v9711_v13 = vrot.slane %v9709_v54, 4  ;;  %v22187_v15 = vld [vmem:[%s22742_s13 + $0x28] sm:$0xf]  ;;  %v23849_v37 = vld [vmem:[%s22742_s13 + $0x2c] sm:$0xf] }
 0x1dc   : > { %v9714_v14 = vrot.slane %v9712_v56, 4  ;;  %v9719_v17 = vrot.slane %v17954_v55, 5  ;;  %v4667_v1 = vsel %vm2156_vm0, %v22184_v22, 0  ;;  %v18202_v24 = vrot.slane %v18170_v4, 9  ;;  %v17961_v26 = vld [vmem:[%s22742_s13 + $0x19c] sm:$0xf] }
 0x1dd   : > { %v9710_v21 = vsel %vm23271_vm7, %v9708_v11, %v9709_v54  ;;  %v9722_v25 = vrot.slane %v17955_v2, 5  ;;  %v9713_v29 = vsel %vm23271_vm7, %v9711_v13, %v9712_v56  ;;  %v9725_v19 = vrot.slane %v17956_v27, 5  ;;  %v17964_v45 = vld [vmem:[%s22742_s13 + $0x1a8] sm:$0xf]  ;;  %v17962_v52 = vld [vmem:[%s22742_s13 + $0x1a0] sm:$0x1] }
 0x1de   : > { %v18251_v6 = vcombine.low %v9707_v12, %v9710_v21  ;;  %v9721_v28 = vrot.slane %v9719_v17, 4  ;;  %v9716_v30 = vsel %vm23271_vm7, %v9714_v14, %v9715_v16  ;;  %v9720_v18 = vsel %vm23271_vm7, %v18202_v24, %v9719_v17  ;;  %v17965_v44 = vld [vmem:[%s22742_s13 + $0x1ac] sm:$0xf]  ;;  %v18172_v55 = vld [vmem:[%s22742_s13 + $0x1a4] sm:$0xe] }
 0x1df   : > { %v9732_v23 = vrot.slane %v17959_v7, 5  ;;  %v17320_v35 = vcombine.low %v23840_v58, %v23843_v34  ;;  %v18252_v62 = vcombine.low %v9713_v29, %v9716_v30  ;;  %v17321_v38 = vcombine.low %v22187_v15, %v23849_v37  ;;  %v23873_v59 = vld [vmem:[%s22742_s13 + $0x34] sm:$0xf]  ;;  %v22191_v4 = vld [vmem:[%s22742_s13 + $0x3c] sm:$0xf] }
 0x1e0   : > { %v9723_v31 = vsel %vm23271_vm7, %v9721_v28, %v9722_v25  ;;  %v9724_v40 = vrot.slane %v9722_v25, 4  ;;  %v9727_v42 = vrot.slane %v9725_v19, 4  ;;  %v9728_v63 = vrot.slane %v17957_v61, 5  ;;  %v17966_v22 = vld [vmem:[%s22742_s13 + $0x1b0] sm:$0xf] }
 0x1e1   : > { %19810 = vmatmul.mubr.msk.bf16.vlgmr.msra.gmra.mrb[0].mxu1 %vm1963_vm3, %v17318_v60  ;;  %v18253_v39 = vcombine.low %v9720_v18, %v9723_v31  ;;  %v18203_v36 = vrot.slane %v18171_v33, 9  ;;  %v9734_v43 = vrot.slane %v9732_v23, 4  ;;  %v9735_v20 = vrot.slane %v17960_v53, 5  ;;  %v23870_v60 = vld [vmem:[%s22742_s13 + $0x30] sm:$0xf] }
 0x1e2   : > { %20394 = vmatmul.mubr.msk.bf16.gmra.mrb[64].mxu0 %vm1963_vm3, %v18250_v5  ;;  %19938 = vmatpush3.bf16.msra.mxu1 %v4667_v1  ;;  %v9726_v41 = vsel %vm23271_vm7, %v9724_v40, %v9725_v19  ;;  %v9729_v46 = vsel %vm23271_vm7, %v9727_v42, %v9728_v63  ;;  %v9738_v47 = vrot.slane %v17961_v26, 5  ;;  %v9745_v54 = vrot.slane %v17964_v45, 5  ;;  %v23879_v5 = vld [vmem:[%s22742_s13 + $0x40] sm:$0xf]  ;;  %v17969_v1 = vld [vmem:[%s22742_s13 + $0x1bc] sm:$0xf] }
 0x1e3   : > { %19813 = vmatprep.mubr.msk.bf16.mxu1 %vm1963_vm3, %v17319_v10  ;;  %20397 = vmatprep.mubr.msk.bf16.mxu0 %vm1963_vm3, %v18251_v6  ;;  %v9733_v49 = vsel %vm23271_vm7, %v18203_v36, %v9732_v23  ;;  %v9736_v50 = vsel %vm23271_vm7, %v9734_v43, %v9735_v20  ;;  %v17322_v56 = vcombine.low %v23870_v60, %v23873_v59  ;;  %v9737_v12 = vrot.slane %v9735_v20, 4  ;;  %v17967_v7 = vld [vmem:[%s22742_s13 + $0x1b4] sm:$0x1]  ;;  %v17970_v29 = vld [vmem:[%s22742_s13 + $0x1c0] sm:$0xf] }
 0x1e4   : > { %v18254_v2 = vcombine.low %v9726_v41, %v9729_v46  ;;  %v17323_v0 = vcombine.low %v22191_v4, %v23879_v5  ;;  %v18255_v10 = vcombine.low %v9733_v49, %v9736_v50  ;;  %v9740_v11 = vrot.slane %v9738_v47, 4  ;;  %v18173_v30 = vld [vmem:[%s22742_s13 + $0x1b8] sm:$0xe]  ;;  %v23900_v19 = vld [vmem:[%s22742_s13 + $0x44] sm:$0xf] }
 0x1e5   : > { %v9741_v13 = vrot.slane %v17962_v52, 5  ;;  %v18204_v14 = vrot.slane %v18172_v55, 9  ;;  %v9747_v16 = vrot.slane %v9745_v54, 4  ;;  %v9748_v17 = vrot.slane %v17965_v44, 5  ;;  %v23903_v18 = vld [vmem:[%s22742_s13 + $0x48] sm:$0xf] }
 0x1e6   : > { %v9739_v21 = vsel %vm23271_vm7, %v9737_v12, %v9738_v47  ;;  %v9751_v25 = vrot.slane %v17966_v22, 5  ;;  %v9758_v28 = vrot.slane %v17969_v1, 5  ;;  %v17324_v31 = vcombine.low %v23900_v19, %v23903_v18  ;;  %v22195_v23 = vld [vmem:[%s22742_s13 + $0x50] sm:$0xf]  ;;  %v23909_v53 = vld [vmem:[%s22742_s13 + $0x54] sm:$0xf] }
 0x1e7   : > { %v9742_v24 = vsel %vm23271_vm7, %v9740_v11, %v9741_v13  ;;  %v9746_v27 = vsel %vm23271_vm7, %v18204_v14, %v9745_v54  ;;  %v9749_v6 = vsel %vm23271_vm7, %v9747_v16, %v9748_v17  ;;  %v17325_v33 = vcombine.low %v22195_v23, %v23909_v53  ;;  %v17971_v63 = vld [vmem:[%s22742_s13 + $0x1c4] sm:$0xf]  ;;  %v17974_v36 = vld [vmem:[%s22742_s13 + $0x1d0] sm:$0xf]  ;;  %v17972_v46 = vld [vmem:[%s22742_s13 + $0x1c8] sm:$0x1] }
 0x1e8   : > { %v18256_v61 = vcombine.low %v9739_v21, %v9742_v24  ;;  %v9753_v15 = vrot.slane %v9751_v25, 4  ;;  %v9760_v40 = vrot.slane %v9758_v28, 4  ;;  %v9761_v42 = vrot.slane %v17970_v29, 5  ;;  %v17975_v49 = vld [vmem:[%s22742_s13 + $0x1d4] sm:$0xf] }
 0x1e9   : > { %19814 = vmatmul.mubr.msk.bf16.gmra.mrb[4].mxu1 %vm1963_vm3, %v17320_v35  ;;  %v18257_v35 = vcombine.low %v9746_v27, %v9749_v6  ;;  %v9764_v26 = vrot.slane %v17971_v63, 5  ;;  %v9771_v47 = vrot.slane %v17974_v36, 5  ;;  %v18174_v50 = vld [vmem:[%s22742_s13 + $0x1cc] sm:$0xe]  ;;  %v23930_v52 = vld [vmem:[%s22742_s13 + $0x58] sm:$0xf] }
 0x1ea   : > { %20398 = vmatmul.mubr.msk.bf16.gmra.mrb[68].mxu0 %vm1963_vm3, %v18252_v62  ;;  %19817 = vmatprep.mubr.msk.bf16.mxu1 %vm1963_vm3, %v17321_v38  ;;  %v9750_v62 = vrot.slane %v9748_v17, 4  ;;  %v9754_v38 = vrot.slane %v17967_v7, 5  ;;  %v9762_v41 = vsel %vm23271_vm7, %v9760_v40, %v9761_v42  ;;  %v23933_v54 = vld [vmem:[%s22742_s13 + $0x5c] sm:$0xf]  ;;  %v9767_v11 = vrot.slane %v17972_v46, 5 }
 0x1eb   : > { %20401 = vmatprep.mubr.msk.bf16.mxu0 %vm1963_vm3, %v18253_v39  ;;  %v18205_v39 = vrot.slane %v18173_v30, 9  ;;  %v17326_v44 = vcombine.low %v23930_v52, %v23933_v54  ;;  %v9766_v12 = vrot.slane %v9764_v26, 4  ;;  %v18206_v13 = vrot.slane %v18174_v50, 9  ;;  %v17976_v17 = vld [vmem:[%s22742_s13 + $0x1d8] sm:$0xf] }
 0x1ec   : > { %v9752_v43 = vsel %vm23271_vm7, %v9750_v62, %v9751_v25  ;;  %v9755_v20 = vsel %vm23271_vm7, %v9753_v15, %v9754_v38  ;;  %v9773_v14 = vrot.slane %v9771_v47, 4  ;;  %v9774_v16 = vrot.slane %v17975_v49, 5  ;;  %v17979_v22 = vld [vmem:[%s22742_s13 + $0x1e4] sm:$0xf]  ;;  %v17977_v6 = vld [vmem:[%s22742_s13 + $0x1dc] sm:$0x1] }
 0x1ed   : > { %v9759_v45 = vsel %vm23271_vm7, %v18205_v39, %v9758_v28  ;;  %v18258_v55 = vcombine.low %v9752_v43, %v9755_v20  ;;  %v9768_v21 = vsel %vm23271_vm7, %v9766_v12, %v9767_v11  ;;  %v9777_v24 = vrot.slane %v17976_v17, 5  ;;  %v17980_v28 = vld [vmem:[%s22742_s13 + $0x1e8] sm:$0xf]  ;;  %v18175_v29 = vld [vmem:[%s22742_s13 + $0x1e0] sm:$0xe] }
 0x1ee   : > { %v9772_v25 = vsel %vm23271_vm7, %v18206_v13, %v9771_v47  ;;  %v9775_v27 = vsel %vm23271_vm7, %v9773_v14, %v9774_v16  ;;  %v9784_v7 = vrot.slane %v17979_v22, 5  ;;  %v23960_v30 = vld [vmem:[%s22742_s13 + $0x6c] sm:$0xf]  ;;  %v9776_v38 = vrot.slane %v9774_v16, 4  ;;  %v17984_v20 = vld [vmem:[%s22742_s13 + $0x1f8] sm:$0xf] }
 0x1ef   : > { %v18261_v15 = vcombine.low %v9772_v25, %v9775_v27  ;;  %v9779_v39 = vrot.slane %v9777_v24, 4  ;;  %v9780_v40 = vrot.slane %v17977_v6, 5  ;;  %v9787_v36 = vrot.slane %v17980_v28, 5  ;;  %v17981_v43 = vld [vmem:[%s22742_s13 + $0x1ec] sm:$0xf] }
 0x1f0   : > { %v9786_v63 = vrot.slane %v9784_v7, 4  ;;  %v17982_v49 = vld [vmem:[%s22742_s13 + $0x1f0] sm:$0x1]  ;;  %v9797_v50 = vrot.slane %v17984_v20, 5  ;;  %v22207_v12 = vld [vmem:[%s22742_s13 + $0x8c] sm:$0xf] }
 0x1f1   : > { %19818 = vmatmul.mubr.msk.bf16.gmra.mrb[8].mxu1 %vm1963_vm3, %v17322_v56  ;;  %v22199_v56 = vld [vmem:[%s22742_s13 + $0x64] sm:$0xf]  ;;  %v23999_v11 = vld [vmem:[%s22742_s13 + $0x90] sm:$0xf]  ;;  %v9789_v16 = vrot.slane %v9787_v36, 4  ;;  %v9793_v22 = vrot.slane %v17982_v49, 5 }
 0x1f2   : > { %20402 = vmatmul.mubr.msk.bf16.gmra.mrb[72].mxu0 %vm1963_vm3, %v18254_v2  ;;  %19821 = vmatprep.mubr.msk.bf16.mxu1 %vm1963_vm3, %v17323_v0  ;;  %v23939_v2 = vld [vmem:[%s22742_s13 + $0x68] sm:$0xf]  ;;  %v18259_v0 = vcombine.low %v9759_v45, %v9762_v41  ;;  %v9781_v45 = vsel %vm23271_vm7, %v9779_v39, %v9780_v40  ;;  %v9790_v41 = vrot.slane %v17981_v43, 5  ;;  %v9788_v47 = vsel %vm23271_vm7, %v9786_v63, %v9787_v36  ;;  %v17986_v25 = vld [vmem:[%s22742_s13 + $0x200] sm:$0xf] }
 0x1f3   : > { %20405 = vmatprep.mubr.msk.bf16.mxu0 %vm1963_vm3, %v18255_v10  ;;  %v17327_v4 = vcombine.low %v22199_v56, %v23939_v2  ;;  %v9763_v10 = vrot.slane %v9761_v42, 4  ;;  %v18207_v42 = vrot.slane %v18175_v29, 9  ;;  %v23990_v56 = vld [vmem:[%s22742_s13 + $0x80] sm:$0xf]  ;;  %v17331_v13 = vcombine.low %v22207_v12, %v23999_v11  ;;  %v17989_v27 = vld [vmem:[%s22742_s13 + $0x20c] sm:$0xf] }
 0x1f4   : > { %v9792_v17 = vrot.slane %v9790_v41, 4  ;;  %v9791_v6 = vsel %vm23271_vm7, %v9789_v16, %v9790_v41  ;;  %v9803_v28 = vrot.slane %v17986_v25, 5  ;;  %v24023_v39 = vld [vmem:[%s22742_s13 + $0x98] sm:$0xf]  ;;  %v22211_v63 = vld [vmem:[%s22742_s13 + $0xa0] sm:$0xf] }
 0x1f5   : > { %v9765_v1 = vsel %vm23271_vm7, %v9763_v10, %v9764_v26  ;;  %v9778_v26 = vsel %vm23271_vm7, %v9776_v38, %v9777_v24  ;;  %v9785_v46 = vsel %vm23271_vm7, %v18207_v42, %v9784_v7  ;;  %v24020_v38 = vld [vmem:[%s22742_s13 + $0x94] sm:$0xf]  ;;  %v24029_v36 = vld [vmem:[%s22742_s13 + $0xa4] sm:$0xf] }
 0x1f6   : > { %v18260_v23 = vcombine.low %v9765_v1, %v9768_v21  ;;  %v18262_v10 = vcombine.low %v9778_v26, %v9781_v45  ;;  %v18263_v14 = vcombine.low %v9785_v46, %v9788_v47  ;;  %v9799_v21 = vrot.slane %v9797_v50, 4 }
 0x1f7   : > { %v9794_v7 = vsel %vm23271_vm7, %v9792_v17, %v9793_v22  ;;  %v17332_v40 = vcombine.low %v24020_v38, %v24023_v39  ;;  %v17333_v43 = vcombine.low %v22211_v63, %v24029_v36  ;;  %v9805_v45 = vrot.slane %v9803_v28, 4  ;;  %v17995_v17 = vld [vmem:[%s22742_s13 + $0x224] sm:$0xf]  ;;  %v18178_v22 = vld [vmem:[%s22742_s13 + $0x21c] sm:$0xe] }
 0x1f8   : > { %v18264_v42 = vcombine.low %v9791_v6, %v9794_v7  ;;  %v24059_v6 = vld [vmem:[%s22742_s13 + $0xb8] sm:$0xf] }
 0x1f9   : > { %19822 = vmatmul.mubr.msk.bf16.gmra.mrb[12].mxu1 %vm1963_vm3, %v17324_v31  ;;  %v23963_v31 = vld [vmem:[%s22742_s13 + $0x70] sm:$0xf] }
 0x1fa   : > { %20406 = vmatmul.mubr.msk.bf16.gmra.mrb[76].mxu0 %vm1963_vm3, %v18256_v61  ;;  %19825 = vmatprep.mubr.msk.bf16.mxu1 %vm1963_vm3, %v17325_v33  ;;  %v17328_v61 = vcombine.low %v23960_v30, %v23963_v31  ;;  %v22203_v33 = vld [vmem:[%s22742_s13 + $0x78] sm:$0xf] }
 0x1fb   : > { %20409 = vmatprep.mubr.msk.bf16.mxu0 %vm1963_vm3, %v18257_v35  ;;  %v23969_v35 = vld [vmem:[%s22742_s13 + $0x7c] sm:$0xf] }
 0x1fc   : > { %v17329_v62 = vcombine.low %v22203_v33, %v23969_v35  ;;  %v9810_v33 = vrot.slane %v17989_v27, 5  ;;  %v22215_v27 = vld [vmem:[%s22742_s13 + $0xb4] sm:$0xf] }
 0x1fd   : > { %v17335_v7 = vcombine.low %v22215_v27, %v24059_v6 }
 0x1fe   : > { %v9812_v47 = vrot.slane %v9810_v33, 4 }
 0x201   : > { %19826 = vmatmul.mubr.msk.bf16.gmra.mrb[16].mxu1 %vm1963_vm3, %v17326_v44  ;;  %v17985_v44 = vld [vmem:[%s22742_s13 + $0x1fc] sm:$0xf] }
 0x202   : > { %20410 = vmatmul.mubr.msk.bf16.gmra.mrb[80].mxu0 %vm1963_vm3, %v18258_v55  ;;  %19829 = vmatprep.mubr.msk.bf16.mxu1 %vm1963_vm3, %v17327_v4  ;;  %v18176_v55 = vld [vmem:[%s22742_s13 + $0x1f4] sm:$0xe]  ;;  %v23993_v4 = vld [vmem:[%s22742_s13 + $0x84] sm:$0xf]  ;;  %v9800_v24 = vrot.slane %v17985_v44, 5 }
 0x203   : > { %20413 = vmatprep.mubr.msk.bf16.mxu0 %vm1963_vm3, %v18259_v0  ;;  %v17330_v0 = vcombine.low %v23990_v56, %v23993_v4  ;;  %v18208_v1 = vrot.slane %v18176_v55, 9  ;;  %v17994_v44 = vld [vmem:[%s22742_s13 + $0x220] sm:$0xf] }
 0x204   : > { %v9802_v26 = vrot.slane %v9800_v24, 4  ;;  %v9823_v16 = vrot.slane %v17994_v44, 5  ;;  %v24083_v44 = vld [vmem:[%s22742_s13 + $0xc0] sm:$0xf] }
 0x205   : > { %v9798_v29 = vsel %vm23271_vm7, %v18208_v1, %v9797_v50  ;;  %v17991_v50 = vld [vmem:[%s22742_s13 + $0x214] sm:$0xf]  ;;  %v24050_v1 = vld [vmem:[%s22742_s13 + $0xa8] sm:$0xf] }
 0x206   : > { %v9804_v55 = vsel %vm23271_vm7, %v9802_v26, %v9803_v28 }
 0x209   : > { %19830 = vmatmul.mubr.msk.bf16.gmra.mrb[20].mxu1 %vm1963_vm3, %v17328_v61  ;;  %v9801_v61 = vsel %vm23271_vm7, %v9799_v21, %v9800_v24  ;;  %v24053_v21 = vld [vmem:[%s22742_s13 + $0xac] sm:$0xf] }
 0x20a   : > { %20414 = vmatmul.mubr.msk.bf16.gmra.mrb[84].mxu0 %vm1963_vm3, %v18260_v23  ;;  %19833 = vmatprep.mubr.msk.bf16.mxu1 %vm1963_vm3, %v17329_v62  ;;  %v17987_v23 = vld [vmem:[%s22742_s13 + $0x204] sm:$0x1]  ;;  %v17990_v62 = vld [vmem:[%s22742_s13 + $0x210] sm:$0xf]  ;;  %v18265_v20 = vcombine.low %v9798_v29, %v9801_v61  ;;  %v17334_v24 = vcombine.low %v24050_v1, %v24053_v21 }
 0x20b   : > { %20417 = vmatprep.mubr.msk.bf16.mxu0 %vm1963_vm3, %v18261_v15  ;;  %v18177_v15 = vld [vmem:[%s22742_s13 + $0x208] sm:$0xe]  ;;  %v9806_v41 = vrot.slane %v17987_v23, 5  ;;  %v9813_v49 = vrot.slane %v17990_v62, 5  ;;  %v9825_v62 = vrot.slane %v9823_v16, 4 }
 0x20c   : > { %v18209_v46 = vrot.slane %v18177_v15, 9  ;;  %v9826_v15 = vrot.slane %v17995_v17, 5 }
 0x20d   : > { %v9815_v29 = vrot.slane %v9813_v49, 4 }
 0x20e   : > { %v9811_v12 = vsel %vm23271_vm7, %v18209_v46, %v9810_v33  ;;  %v18210_v33 = vrot.slane %v18178_v22, 9 }
 0x210   : > { %v9824_v26 = vsel %vm23271_vm7, %v18210_v33, %v9823_v16  ;;  %v9828_v16 = vrot.slane %v9826_v15, 4 }
 0x211   : > { %19834 = vmatmul.mubr.msk.bf16.gmra.mrb[24].mxu1 %vm1963_vm3, %v17330_v0  ;;  %v9807_v0 = vsel %vm23271_vm7, %v9805_v45, %v9806_v41  ;;  %v9827_v45 = vsel %vm23271_vm7, %v9825_v62, %v9826_v15  ;;  %v17997_v41 = vld [vmem:[%s22742_s13 + $0x22c] sm:$0x1]  ;;  %v18002_v15 = vld [vmem:[%s22742_s13 + $0x240] sm:$0x1] }
 0x212   : > { %20418 = vmatmul.mubr.msk.bf16.gmra.mrb[88].mxu0 %vm1963_vm3, %v18262_v10  ;;  %19837 = vmatprep.mubr.msk.bf16.mxu1 %vm1963_vm3, %v17331_v13  ;;  %v9816_v10 = vrot.slane %v17991_v50, 5  ;;  %v9814_v13 = vsel %vm23271_vm7, %v9812_v47, %v9813_v49  ;;  %v18266_v25 = vcombine.low %v9804_v55, %v9807_v0  ;;  %v18000_v47 = vld [vmem:[%s22742_s13 + $0x238] sm:$0xf]  ;;  %v18179_v49 = vld [vmem:[%s22742_s13 + $0x230] sm:$0xe]  ;;  %v9832_v22 = vrot.slane %v17997_v41, 5 }
 0x213   : > { %20421 = vmatprep.mubr.msk.bf16.mxu0 %vm1963_vm3, %v18263_v14  ;;  %v17992_v14 = vld [vmem:[%s22742_s13 + $0x218] sm:$0x1]  ;;  %v18267_v28 = vcombine.low %v9811_v12, %v9814_v13  ;;  %v24080_v50 = vld [vmem:[%s22742_s13 + $0xbc] sm:$0xf]  ;;  %v24089_v12 = vld [vmem:[%s22742_s13 + $0xcc] sm:$0xf] }
 0x214   : > { %v9818_v61 = vrot.slane %v9816_v10, 4  ;;  %v9819_v23 = vrot.slane %v17992_v14, 5  ;;  %v9817_v63 = vsel %vm23271_vm7, %v9815_v29, %v9816_v10  ;;  %v17336_v55 = vcombine.low %v24080_v50, %v24083_v44  ;;  %v22219_v10 = vld [vmem:[%s22742_s13 + $0xc8] sm:$0xf]  ;;  %v22223_v41 = vld [vmem:[%s22742_s13 + $0xdc] sm:$0xf] }
 0x215   : > { %v17337_v13 = vcombine.low %v22219_v10, %v24089_v12  ;;  %v18269_v14 = vcombine.low %v9824_v26, %v9827_v45  ;;  %v9839_v27 = vrot.slane %v18000_v47, 5  ;;  %v24113_v26 = vld [vmem:[%s22742_s13 + $0xd4] sm:$0xf]  ;;  %v24119_v47 = vld [vmem:[%s22742_s13 + $0xe0] sm:$0xf]  ;;  %v9845_v10 = vrot.slane %v18002_v15, 5 }
 0x216   : > { %v24140_v15 = vld [vmem:[%s22742_s13 + $0xe4] sm:$0xf] }
 0x219   : > { %19838 = vmatmul.mubr.msk.bf16.gmra.mrb[28].mxu1 %vm1963_vm3, %v17332_v40  ;;  %v17996_v40 = vld [vmem:[%s22742_s13 + $0x228] sm:$0xf] }
 0x21a   : > { %20422 = vmatmul.mubr.msk.bf16.gmra.mrb[92].mxu0 %vm1963_vm3, %v18264_v42  ;;  %19841 = vmatprep.mubr.msk.bf16.mxu1 %vm1963_vm3, %v17333_v43  ;;  %v17999_v42 = vld [vmem:[%s22742_s13 + $0x234] sm:$0xf]  ;;  %v9820_v43 = vsel %vm23271_vm7, %v9818_v61, %v9819_v23 }
 0x21b   : > { %20425 = vmatprep.mubr.msk.bf16.mxu0 %vm1963_vm3, %v18265_v20  ;;  %v9829_v20 = vrot.slane %v17996_v40, 5  ;;  %v9836_v46 = vrot.slane %v17999_v42, 5  ;;  %v18268_v0 = vcombine.low %v9817_v63, %v9820_v43  ;;  %v18005_v42 = vld [vmem:[%s22742_s13 + $0x24c] sm:$0xf]  ;;  %v18180_v63 = vld [vmem:[%s22742_s13 + $0x244] sm:$0xe] }
 0x21c   : > { %v24110_v43 = vld [vmem:[%s22742_s13 + $0xd0] sm:$0xf] }
 0x21d   : > { %v9831_v17 = vrot.slane %v9829_v20, 4  ;;  %v9830_v29 = vsel %vm23271_vm7, %v9828_v16, %v9829_v20  ;;  %v17338_v20 = vcombine.low %v24110_v43, %v24113_v26  ;;  %v9852_v16 = vrot.slane %v18005_v42, 5  ;;  %v24143_v42 = vld [vmem:[%s22742_s13 + $0xe8] sm:$0xf] }
 0x21f   : > { %v9833_v61 = vsel %vm23271_vm7, %v9831_v17, %v9832_v22  ;;  %v18006_v17 = vld [vmem:[%s22742_s13 + $0x250] sm:$0xf]  ;;  %v18009_v22 = vld [vmem:[%s22742_s13 + $0x25c] sm:$0xf] }
 0x220   : > { %v18270_v45 = vcombine.low %v9830_v29, %v9833_v61  ;;  %v18007_v29 = vld [vmem:[%s22742_s13 + $0x254] sm:$0x1]  ;;  %v9862_v61 = vrot.slane %v18009_v22, 5 }
 0x221   : > { %19842 = vmatmul.mubr.msk.bf16.gmra.mrb[32].mxu1 %vm1963_vm3, %v17334_v24  ;;  %v18211_v24 = vrot.slane %v18179_v49, 9 }
 0x222   : > { %20426 = vmatmul.mubr.msk.bf16.gmra.mrb[96].mxu0 %vm1963_vm3, %v18266_v25  ;;  %19845 = vmatprep.mubr.msk.bf16.mxu1 %vm1963_vm3, %v17335_v7  ;;  %v9838_v25 = vrot.slane %v9836_v46, 4  ;;  %v18001_v7 = vld [vmem:[%s22742_s13 + $0x23c] sm:$0xf] }
 0x223   : > { %20429 = vmatprep.mubr.msk.bf16.mxu0 %vm1963_vm3, %v18267_v28  ;;  %v18004_v28 = vld [vmem:[%s22742_s13 + $0x248] sm:$0xf]  ;;  %v9842_v23 = vrot.slane %v18001_v7, 5  ;;  %v9837_v33 = vsel %vm23271_vm7, %v18211_v24, %v9836_v46  ;;  %v17339_v46 = vcombine.low %v22223_v41, %v24119_v47 }
 0x224   : > { %v9840_v62 = vsel %vm23271_vm7, %v9838_v25, %v9839_v27  ;;  %v9849_v40 = vrot.slane %v18004_v28, 5 }
 0x225   : > { %v18271_v49 = vcombine.low %v9837_v33, %v9840_v62  ;;  %v18010_v33 = vld [vmem:[%s22742_s13 + $0x260] sm:$0xf]  ;;  %v18181_v62 = vld [vmem:[%s22742_s13 + $0x258] sm:$0xe] }
 0x229   : > { %19846 = vmatmul.mubr.msk.bf16.gmra.mrb[36].mxu1 %vm1963_vm3, %v17336_v55  ;;  %v9841_v55 = vrot.slane %v9839_v27, 4  ;;  %v9855_v27 = vrot.slane %v18006_v17, 5  ;;  %v18014_v17 = vld [vmem:[%s22742_s13 + $0x270] sm:$0xf] }
 0x22a   : > { %20430 = vmatmul.mubr.msk.bf16.gmra.mrb[100].mxu0 %vm1963_vm3, %v18268_v0  ;;  %19849 = vmatprep.mubr.msk.bf16.mxu1 %vm1963_vm3, %v17337_v13  ;;  %v9844_v0 = vrot.slane %v9842_v23, 4  ;;  %v18212_v13 = vrot.slane %v18180_v63, 9 }
 0x22b   : > { %20433 = vmatprep.mubr.msk.bf16.mxu0 %vm1963_vm3, %v18269_v14  ;;  %v9851_v14 = vrot.slane %v9849_v40, 4  ;;  %v9843_v24 = vsel %vm23271_vm7, %v9841_v55, %v9842_v23  ;;  %v17340_v23 = vcombine.low %v24140_v15, %v24143_v42  ;;  %v9858_v55 = vrot.slane %v18007_v29, 5 }
 0x22c   : > { %v9846_v25 = vsel %vm23271_vm7, %v9844_v0, %v9845_v10  ;;  %v9850_v7 = vsel %vm23271_vm7, %v18212_v13, %v9849_v40  ;;  %v18213_v0 = vrot.slane %v18181_v62, 9  ;;  %v9864_v10 = vrot.slane %v9862_v61, 4  ;;  %v18182_v62 = vld [vmem:[%s22742_s13 + $0x26c] sm:$0xe] }
 0x22d   : > { %v9853_v28 = vsel %vm23271_vm7, %v9851_v14, %v9852_v16  ;;  %v18272_v63 = vcombine.low %v9843_v24, %v9846_v25  ;;  %v9865_v13 = vrot.slane %v18010_v33, 5  ;;  %v18011_v14 = vld [vmem:[%s22742_s13 + $0x264] sm:$0xf]  ;;  %v9875_v29 = vrot.slane %v18014_v17, 5  ;;  %v18015_v33 = vld [vmem:[%s22742_s13 + $0x274] sm:$0xf] }
 0x22e   : > { %v18273_v41 = vcombine.low %v9850_v7, %v9853_v28  ;;  %v9868_v24 = vrot.slane %v18011_v14, 5  ;;  %v9863_v25 = vsel %vm23271_vm7, %v18213_v0, %v9862_v61  ;;  %v18012_v28 = vld [vmem:[%s22742_s13 + $0x268] sm:$0x1]  ;;  %v9878_v17 = vrot.slane %v18015_v33, 5 }
 0x22f   : > { %v9866_v7 = vsel %vm23271_vm7, %v9864_v10, %v9865_v13  ;;  %v9871_v0 = vrot.slane %v18012_v28, 5  ;;  %v18214_v10 = vrot.slane %v18182_v62, 9  ;;  %v9877_v14 = vrot.slane %v9875_v29, 4  ;;  %v18017_v28 = vld [vmem:[%s22742_s13 + $0x27c] sm:$0x1] }
 0x230   : > { %v9888_v33 = vrot.slane %v18019_v32, 5  ;;  %v18020_v62 = vld [vmem:[%s22742_s13 + $0x288] sm:$0xf] }
 0x231   : > { %19850 = vmatmul.mubr.msk.bf16.gmra.mrb[40].mxu1 %vm1963_vm3, %v17338_v20  ;;  %v22227_v20 = vld [vmem:[%s22742_s13 + $0xf0] sm:$0xf] }
 0x232   : > { %20434 = vmatmul.mubr.msk.bf16.gmra.mrb[104].mxu0 %vm1963_vm3, %v18270_v45  ;;  %19853 = vmatprep.mubr.msk.bf16.mxu1 %vm1963_vm3, %v17339_v46  ;;  %v24149_v45 = vld [vmem:[%s22742_s13 + $0xf4] sm:$0xf]  ;;  %v9854_v46 = vrot.slane %v9852_v16, 4 }
 0x233   : > { %20437 = vmatprep.mubr.msk.bf16.mxu0 %vm1963_vm3, %v18271_v49  ;;  %v17341_v40 = vcombine.low %v22227_v20, %v24149_v45  ;;  %v9857_v49 = vrot.slane %v9855_v27, 4 }
 0x234   : > { %v9856_v16 = vsel %vm23271_vm7, %v9854_v46, %v9855_v27  ;;  %v18275_v46 = vcombine.low %v9863_v25, %v9866_v7  ;;  %v9876_v25 = vsel %vm23271_vm7, %v18214_v10, %v9875_v29  ;;  %v9879_v7 = vsel %vm23271_vm7, %v9877_v14, %v9878_v17 }
 0x235   : > { %v9859_v22 = vsel %vm23271_vm7, %v9857_v49, %v9858_v55  ;;  %v9867_v49 = vrot.slane %v9865_v13, 4  ;;  %v9870_v55 = vrot.slane %v9868_v24, 4  ;;  %v9890_v14 = vrot.slane %v9888_v33, 4 }
 0x236   : > { %v18274_v20 = vcombine.low %v9856_v16, %v9859_v22  ;;  %v9881_v22 = vrot.slane %v18016_v3, 5  ;;  %v22235_v3 = vld [vmem:[%s22742_s13 + $0x118] sm:$0xf] }
 0x237   : > { %v9869_v13 = vsel %vm23271_vm7, %v9867_v49, %v9868_v24  ;;  %v9872_v16 = vsel %vm23271_vm7, %v9870_v55, %v9871_v0  ;;  %v18277_v49 = vcombine.low %v9876_v25, %v9879_v7  ;;  %v9880_v55 = vrot.slane %v9878_v17, 4 }
 0x238   : > { %v9883_v32 = vrot.slane %v9881_v22, 4  ;;  %v9884_v0 = vrot.slane %v18017_v28, 5  ;;  %v18022_v28 = vld [vmem:[%s22742_s13 + $0x290] sm:$0x1] }
 0x239   : > { %19854 = vmatmul.mubr.msk.bf16.gmra.mrb[44].mxu1 %vm1963_vm3, %v17340_v23  ;;  %v24170_v23 = vld [vmem:[%s22742_s13 + $0xf8] sm:$0xf]  ;;  %v9882_v17 = vsel %vm23271_vm7, %v9880_v55, %v9881_v22  ;;  %v9897_v55 = vrot.slane %v18022_v28, 5  ;;  %v24268_v28 = vld [vmem:[%s28850_s1 + $0xc] sm:$0xf] }
 0x23a   : > { %20438 = vmatmul.mubr.msk.bf16.gmra.mrb[108].mxu0 %vm1963_vm3, %v18272_v63  ;;  %19857 = vmatprep.mubr.msk.bf16.mxu1 %vm1963_vm3, %v17341_v40  ;;  %v24173_v63 = vld [vmem:[%s22742_s13 + $0xfc] sm:$0xf]  ;;  %v22231_v40 = vld [vmem:[%s22742_s13 + $0x104] sm:$0xf] }
 0x23b   : > { %20441 = vmatprep.mubr.msk.bf16.mxu0 %vm1963_vm3, %v18273_v41  ;;  %28913 = vst [vmem:[#allocation7_spill] sm:$0xff] %v24173_v63  ;;  %v17342_v27 = vcombine.low %v24170_v23, %v24173_v63  ;;  %v24179_v41 = vld [vmem:[%s22742_s13 + $0x108] sm:$0xf]  ;;  %v18021_v63 = vld [vmem:[%s22742_s13 + $0x28c] sm:$0xf]  ;;  %21876 = vmatprep.subr.msk.bf16.mxu1 %vm2156_vm0, %v24268_v28 }
 0x23c   : > { %28914 = vst [vmem:[#allocation8_spill] sm:$0xff] %v24179_v41  ;;  %v17343_v61 = vcombine.low %v22231_v40, %v24179_v41  ;;  %v24203_v40 = vld [vmem:[%s22742_s13 + $0x110] sm:$0xf]  ;;  %v9891_v41 = vrot.slane %v18020_v62, 5  ;;  %v24227_v62 = vld [vmem:[%s22742_s13 + $0x120] sm:$0xf] }
 0x23d   : > { %28915 = vst [vmem:[#allocation9_spill] sm:$0xff] %v24227_v62 }
 0x23e   : > { %v9892_v7 = vsel %vm23271_vm7, %v9890_v14, %v9891_v41 }
 0x241   : > { %19858 = vmatmul.mubr.msk.bf16.gmra.mrb[48].mxu1 %vm1963_vm3, %v17342_v27  ;;  %v18183_v27 = vld [vmem:[%s22742_s13 + $0x280] sm:$0xe] }
 0x242   : > { %20442 = vmatmul.mubr.msk.bf16.gmra.mrb[112].mxu0 %vm1963_vm3, %v18274_v20  ;;  %19861 = vmatprep.mubr.msk.bf16.mxu1 %vm1963_vm3, %v17343_v61  ;;  %v24200_v20 = vld [vmem:[%s22742_s13 + $0x10c] sm:$0xf]  ;;  %v18276_v61 = vcombine.low %v9869_v13, %v9872_v16  ;;  %v18215_v10 = vrot.slane %v18183_v27, 9  ;;  %v9885_v13 = vsel %vm23271_vm7, %v9883_v32, %v9884_v0  ;;  %v9894_v16 = vrot.slane %v18021_v63, 5  ;;  %v24230_v27 = vld [vmem:[%s22742_s13 + $0x124] sm:$0xf] }
 0x243   : > { %20445 = vmatprep.mubr.msk.bf16.mxu0 %vm1963_vm3, %v18275_v46  ;;  %v17344_v24 = vcombine.low %v24200_v20, %v24203_v40  ;;  %v24209_v46 = vld [vmem:[%s22742_s13 + $0x11c] sm:$0xf]  ;;  %28916 = vst [vmem:[#allocation10_spill] sm:$0xff] %v24230_v27  ;;  %v18278_v22 = vcombine.low %v9882_v17, %v9885_v13  ;;  %v22243_v13 = vld [vmem:[%s22742_s13 + $0x140] sm:$0xf] }
 0x244   : > { %v17345_v29 = vcombine.low %v22235_v3, %v24209_v46  ;;  %v9889_v25 = vsel %vm23271_vm7, %v18215_v10, %v9888_v33  ;;  %v24236_v3 = vld [vmem:[%s22742_s13 + $0x130] sm:$0xf]  ;;  %v24251_v10 = vld [vmem:[%s22742_s13 + $0x138] sm:$0xf] }
 0x245   : > { %28917 = vst [vmem:[#allocation11_spill] sm:$0xff] %v24236_v3  ;;  %v18279_v33 = vcombine.low %v9889_v25, %v9892_v7  ;;  %28919 = vst [vmem:[#allocation13_spill] sm:$0xff] %v24251_v10  ;;  %v24257_v25 = vld [vmem:[%s22742_s13 + $0x144] sm:$0xf]  ;;  %v21958_v7 = vld [vmem:[%s22742_s13 + $0x28] sm:$0xff]  }
 0x246   : > { %28920 = vst [vmem:[#allocation14_spill] sm:$0xff] %v24257_v25 }
 0x249   : > { %19862 = vmatmul.mubr.msk.bf16.gmra.mrb[52].mxu1 %vm1963_vm3, %v17344_v24  ;;  %v17346_v24 = vcombine.low %v24227_v62, %v24230_v27  ;;  %v22021_v62 = vld [vmem:[%s22742_s13 + $0x168] sm:$0xff]  }
 0x24a   : > { %20446 = vmatmul.mubr.msk.bf16.gmra.mrb[116].mxu0 %vm1963_vm3, %v18276_v61  ;;  %19865 = vmatprep.mubr.msk.bf16.mxu1 %vm1963_vm3, %v17345_v29  ;;  %v22239_v61 = vld [vmem:[%s22742_s13 + $0x12c] sm:$0xf]  ;;  %v9893_v29 = vrot.slane %v9891_v41, 4  ;;  %v24248_v41 = vld [vmem:[%s22742_s13 + $0x134] sm:$0xf] }
 0x24b   : > { %20449 = vmatprep.mubr.msk.bf16.mxu0 %vm1963_vm3, %v18277_v49  ;;  %v17347_v63 = vcombine.low %v22239_v61, %v24236_v3  ;;  %v9896_v49 = vrot.slane %v9894_v16, 4  ;;  %28918 = vst [vmem:[#allocation12_spill] sm:$0xff] %v24248_v41  ;;  %v17348_v14 = vcombine.low %v24248_v41, %v24251_v10  ;;  %v22308_v10 = vld [vmem:[%s22742_s13 + $0x274] sm:$0xf]  ;;  %v3892_v3 = vrot.slane %v23849_v37, 5 }
 0x24c   : > { %v9895_v32 = vsel %vm23271_vm7, %v9893_v29, %v9894_v16  ;;  %v17349_v16 = vcombine.low %v22243_v13, %v24257_v25  ;;  %v24283_v29 = vld [vmem:[%s22742_s13 + $0x158] sm:$0xf]  ;;  %v22251_v13 = vld [vmem:[%s22742_s13 + $0x168] sm:$0xf]  ;;  %v3879_v25 = vrot.slane %v23811_v8, 5 }
 0x24d   : > { %v9898_v0 = vsel %vm23271_vm7, %v9896_v49, %v9897_v55  ;;  %28923 = vst [vmem:[#allocation17_spill] sm:$0xff] %v24283_v29  ;;  %v14235_v55 = vsel %vm2156_vm0, %v23790_v51, 0 }
 0x24e   : > { %v18280_v17 = vcombine.low %v9895_v32, %v9898_v0  ;;  %v21962_v32 = vld [vmem:[%s22742_s13 + $0x3c] sm:$0xff]  }
 0x24f   : > { %v24294_v0 = vld [vmem:[%s22742_s13 + $0x15c] sm:$0xf] }
 0x250   : > { %28924 = vst [vmem:[#allocation18_spill] sm:$0xff] %v24294_v0 }
 0x251   : > { %19866 = vmatmul.mubr.msk.bf16.gmra.mrb[56].mxu1 %vm1963_vm3, %v17346_v24  ;;  %v24273_v24 = vld [vmem:[%s22742_s13 + $0x148] sm:$0xf] }
 0x252   : > { %20450 = vmatmul.mubr.msk.bf16.gmra.mrb[120].mxu0 %vm1963_vm3, %v18278_v22  ;;  %19869 = vmatprep.mubr.msk.bf16.mxu1 %vm1963_vm3, %v17347_v63  ;;  %28921 = vst [vmem:[#allocation15_spill] sm:$0xff] %v24273_v24  ;;  %v24276_v22 = vld [vmem:[%s22742_s13 + $0x14c] sm:$0xf]  ;;  %v21960_v63 = vld [vmem:[%s22742_s13 + $0x30] sm:$0xff]  }
 0x253   : > { %20453 = vmatprep.mubr.msk.bf16.mxu0 %vm1963_vm3, %v18279_v33  ;;  %28922 = vst [vmem:[#allocation16_spill] sm:$0xff] %v24276_v22  ;;  %v17350_v61 = vcombine.low %v24273_v24, %v24276_v22  ;;  %v22247_v33 = vld [vmem:[%s22742_s13 + $0x154] sm:$0xf] }
 0x254   : > { %v17351_v49 = vcombine.low %v22247_v33, %v24283_v29  ;;  %v22254_v33 = vld [vmem:[%s22742_s13 + $0x174] sm:$0xf] }
 0x255   : > { %v22018_v22 = vld [vmem:[%s22742_s13 + $0x154] sm:$0xff]  }
 0x259   : > { %19870 = vmatmul.mubr.msk.bf16.gmra.mrb[60].mxu1 %vm1963_vm3, %v17348_v14  ;;  %v24297_v14 = vld [vmem:[%s22742_s13 + $0x160] sm:$0xf] }
 0x25a   : > { %20454 = vmatmul.mubr.msk.bf16.gmra.mrb[124].mxu0 %vm1963_vm3, %v18280_v17  ;;  %19873 = vmatprep.mubr.msk.bf16.mxu1 %vm1963_vm3, %v17349_v16  ;;  %28925 = vst [vmem:[#allocation19_spill] sm:$0xff] %v24297_v14  ;;  %v17352_v51 = vcombine.low %v24294_v0, %v24297_v14  ;;  %v21964_v17 = vld [vmem:[%s22742_s13 + $0x44] sm:$0xff]   ;;  %v24304_v16 = vld [vmem:[%s22742_s13 + $0x16c] sm:$0xf] }
 0x25b   : > { %20459 = vmatprep.mubr.msk.bf16.mxu0 %vm1963_vm3, %v21958_v7  ;;  %28926 = vst [vmem:[#allocation20_spill] sm:$0xff] %v24304_v16  ;;  %v17353_v7 = vcombine.low %v22251_v13, %v24304_v16  ;;  %v22256_v13 = vld [vmem:[%s22742_s13 + $0x180] sm:$0xf]  ;;  %v22016_v0 = vld [vmem:[%s22742_s13 + $0x148] sm:$0xff]  }
 0x261   : > { %19874 = vmatmul.mubr.msk.bf16.gmra.mrb[64].mxu1 %vm1963_vm3, %v17350_v61  ;;  %v21966_v61 = vld [vmem:[%s22742_s13 + $0x50] sm:$0xff]  }
 0x262   : > { %20460 = vmatmul.mubr.msk.bf16.vlgmr.msra.gmra.mrb[0].mxu0 %vm1963_vm3, %v21960_v63  ;;  %19877 = vmatprep.mubr.msk.bf16.mxu1 %vm1963_vm3, %v17351_v49  ;;  %v22253_v63 = vld [vmem:[%s22742_s13 + $0x170] sm:$0xf] }
 0x263   : > { %20588 = vmatpush3.bf16.msra.mxu0 %v14235_v55  ;;  %20463 = vmatprep.mubr.msk.bf16.mxu0 %vm1963_vm3, %v21962_v32  ;;  %v17354_v49 = vcombine.low %v22253_v63, %v22254_v33  ;;  %v21968_v55 = vld [vmem:[%s22742_s13 + $0x58] sm:$0xff]   ;;  %v21972_v63 = vld [vmem:[%s22742_s13 + $0x6c] sm:$0xff]  }
 0x264   : > { %v22255_v32 = vld [vmem:[%s22742_s13 + $0x17c] sm:$0xf]  ;;  %v22259_v33 = vld [vmem:[%s22742_s13 + $0x190] sm:$0xf] }
 0x265   : > { %v17355_v16 = vcombine.low %v22255_v32, %v22256_v13  ;;  %v22260_v32 = vld [vmem:[%s22742_s13 + $0x194] sm:$0xf] }
 0x266   : > { %v17357_v13 = vcombine.low %v22259_v33, %v22260_v32  ;;  %v22264_v33 = vld [vmem:[%s22742_s13 + $0x1a8] sm:$0xf] }
 0x269   : > { %19878 = vmatmul.mubr.msk.bf16.gmra.mrb[68].mxu1 %vm1963_vm3, %v17352_v51  ;;  %v21970_v51 = vld [vmem:[%s22742_s13 + $0x64] sm:$0xff]  }
 0x26a   : > { %20464 = vmatmul.mubr.msk.bf16.gmra.mrb[4].mxu0 %vm1963_vm3, %v21964_v17  ;;  %19881 = vmatprep.mubr.msk.bf16.mxu1 %vm1963_vm3, %v17353_v7  ;;  %v22257_v17 = vld [vmem:[%s22742_s13 + $0x184] sm:$0xf]  ;;  %v22258_v7 = vld [vmem:[%s22742_s13 + $0x188] sm:$0xf] }
 0x26b   : > { %20467 = vmatprep.mubr.msk.bf16.mxu0 %vm1963_vm3, %v21966_v61  ;;  %v17356_v61 = vcombine.low %v22257_v17, %v22258_v7  ;;  %v21976_v17 = vld [vmem:[%s22742_s13 + $0x80] sm:$0xff]  }
 0x26c   : > { %v22263_v7 = vld [vmem:[%s22742_s13 + $0x1a4] sm:$0xf] }
 0x26d   : > { %v17359_v32 = vcombine.low %v22263_v7, %v22264_v33  ;;  %v22268_v7 = vld [vmem:[%s22742_s13 + $0x1bc] sm:$0xf] }
 0x271   : > { %19882 = vmatmul.mubr.msk.bf16.gmra.mrb[72].mxu1 %vm1963_vm3, %v17354_v49  ;;  %v21974_v49 = vld [vmem:[%s22742_s13 + $0x78] sm:$0xff]  }
 0x272   : > { %20468 = vmatmul.mubr.msk.bf16.gmra.mrb[8].mxu0 %vm1963_vm3, %v21968_v55  ;;  %19885 = vmatprep.mubr.msk.bf16.mxu1 %vm1963_vm3, %v17355_v16  ;;  %v22261_v16 = vld [vmem:[%s22742_s13 + $0x198] sm:$0xf]  ;;  %v22262_v55 = vld [vmem:[%s22742_s13 + $0x19c] sm:$0xf] }
 0x273   : > { %20471 = vmatprep.mubr.msk.bf16.mxu0 %vm1963_vm3, %v21970_v51  ;;  %v17358_v51 = vcombine.low %v22261_v16, %v22262_v55  ;;  %v21980_v16 = vld [vmem:[%s22742_s13 + $0x94] sm:$0xff]  }
 0x274   : > { %v22267_v55 = vld [vmem:[%s22742_s13 + $0x1b8] sm:$0xf] }
 0x275   : > { %v17361_v33 = vcombine.low %v22267_v55, %v22268_v7  ;;  %v22272_v55 = vld [vmem:[%s22742_s13 + $0x1d0] sm:$0xf] }
 0x279   : > { %19886 = vmatmul.mubr.msk.bf16.gmra.mrb[76].mxu1 %vm1963_vm3, %v17356_v61  ;;  %v21978_v61 = vld [vmem:[%s22742_s13 + $0x8c] sm:$0xff]  }
 0x27a   : > { %20472 = vmatmul.mubr.msk.bf16.gmra.mrb[12].mxu0 %vm1963_vm3, %v21972_v63  ;;  %19889 = vmatprep.mubr.msk.bf16.mxu1 %vm1963_vm3, %v17357_v13  ;;  %v22265_v63 = vld [vmem:[%s22742_s13 + $0x1ac] sm:$0xf]  ;;  %v22266_v13 = vld [vmem:[%s22742_s13 + $0x1b0] sm:$0xf] }
 0x27b   : > { %20475 = vmatprep.mubr.msk.bf16.mxu0 %vm1963_vm3, %v21974_v49  ;;  %v17360_v49 = vcombine.low %v22265_v63, %v22266_v13  ;;  %v21984_v63 = vld [vmem:[%s22742_s13 + $0xa8] sm:$0xff]  }
 0x27c   : > { %v22271_v13 = vld [vmem:[%s22742_s13 + $0x1cc] sm:$0xf] }
 0x27d   : > { %v17363_v7 = vcombine.low %v22271_v13, %v22272_v55  ;;  %v22276_v13 = vld [vmem:[%s22742_s13 + $0x1e4] sm:$0xf] }
 0x281   : > { %19890 = vmatmul.mubr.msk.bf16.gmra.mrb[80].mxu1 %vm1963_vm3, %v17358_v51  ;;  %v21982_v51 = vld [vmem:[%s22742_s13 + $0xa0] sm:$0xff]  }
 0x282   : > { %20476 = vmatmul.mubr.msk.bf16.gmra.mrb[16].mxu0 %vm1963_vm3, %v21976_v17  ;;  %19893 = vmatprep.mubr.msk.bf16.mxu1 %vm1963_vm3, %v17359_v32  ;;  %v22269_v17 = vld [vmem:[%s22742_s13 + $0x1c0] sm:$0xf]  ;;  %v22270_v32 = vld [vmem:[%s22742_s13 + $0x1c4] sm:$0xf] }
 0x283   : > { %20479 = vmatprep.mubr.msk.bf16.mxu0 %vm1963_vm3, %v21978_v61  ;;  %v17362_v61 = vcombine.low %v22269_v17, %v22270_v32  ;;  %v21988_v17 = vld [vmem:[%s22742_s13 + $0xbc] sm:$0xff]  }
 0x284   : > { %v22275_v32 = vld [vmem:[%s22742_s13 + $0x1e0] sm:$0xf] }
 0x285   : > { %v17365_v55 = vcombine.low %v22275_v32, %v22276_v13  ;;  %v22280_v32 = vld [vmem:[%s22742_s13 + $0x1f8] sm:$0xf] }
 0x289   : > { %19894 = vmatmul.mubr.msk.bf16.gmra.mrb[84].mxu1 %vm1963_vm3, %v17360_v49  ;;  %v21986_v49 = vld [vmem:[%s22742_s13 + $0xb4] sm:$0xff]  }
 0x28a   : > { %20480 = vmatmul.mubr.msk.bf16.gmra.mrb[20].mxu0 %vm1963_vm3, %v21980_v16  ;;  %19897 = vmatprep.mubr.msk.bf16.mxu1 %vm1963_vm3, %v17361_v33  ;;  %v22273_v16 = vld [vmem:[%s22742_s13 + $0x1d4] sm:$0xf]  ;;  %v22274_v33 = vld [vmem:[%s22742_s13 + $0x1d8] sm:$0xf] }
 0x28b   : > { %20483 = vmatprep.mubr.msk.bf16.mxu0 %vm1963_vm3, %v21982_v51  ;;  %v17364_v51 = vcombine.low %v22273_v16, %v22274_v33  ;;  %v21992_v16 = vld [vmem:[%s22742_s13 + $0xd0] sm:$0xff]  }
 0x28c   : > { %v22279_v33 = vld [vmem:[%s22742_s13 + $0x1f4] sm:$0xf] }
 0x28d   : > { %v17367_v13 = vcombine.low %v22279_v33, %v22280_v32  ;;  %v22284_v33 = vld [vmem:[%s22742_s13 + $0x20c] sm:$0xf] }
 0x291   : > { %19898 = vmatmul.mubr.msk.bf16.gmra.mrb[88].mxu1 %vm1963_vm3, %v17362_v61  ;;  %v21990_v61 = vld [vmem:[%s22742_s13 + $0xc8] sm:$0xff]  }
 0x292   : > { %20484 = vmatmul.mubr.msk.bf16.gmra.mrb[24].mxu0 %vm1963_vm3, %v21984_v63  ;;  %19901 = vmatprep.mubr.msk.bf16.mxu1 %vm1963_vm3, %v17363_v7  ;;  %v22277_v63 = vld [vmem:[%s22742_s13 + $0x1e8] sm:$0xf]  ;;  %v22278_v7 = vld [vmem:[%s22742_s13 + $0x1ec] sm:$0xf] }
 0x293   : > { %20487 = vmatprep.mubr.msk.bf16.mxu0 %vm1963_vm3, %v21986_v49  ;;  %v17366_v49 = vcombine.low %v22277_v63, %v22278_v7  ;;  %v21996_v63 = vld [vmem:[%s22742_s13 + $0xe4] sm:$0xff]  }
 0x294   : > { %v22283_v7 = vld [vmem:[%s22742_s13 + $0x208] sm:$0xf] }
 0x295   : > { %v17369_v32 = vcombine.low %v22283_v7, %v22284_v33  ;;  %v22288_v7 = vld [vmem:[%s22742_s13 + $0x220] sm:$0xf] }
 0x299   : > { %19902 = vmatmul.mubr.msk.bf16.gmra.mrb[92].mxu1 %vm1963_vm3, %v17364_v51  ;;  %v21994_v51 = vld [vmem:[%s22742_s13 + $0xdc] sm:$0xff]  }
 0x29a   : > { %20488 = vmatmul.mubr.msk.bf16.gmra.mrb[28].mxu0 %vm1963_vm3, %v21988_v17  ;;  %19905 = vmatprep.mubr.msk.bf16.mxu1 %vm1963_vm3, %v17365_v55  ;;  %v22281_v17 = vld [vmem:[%s22742_s13 + $0x1fc] sm:$0xf]  ;;  %v22282_v55 = vld [vmem:[%s22742_s13 + $0x200] sm:$0xf] }
 0x29b   : > { %20491 = vmatprep.mubr.msk.bf16.mxu0 %vm1963_vm3, %v21990_v61  ;;  %v17368_v61 = vcombine.low %v22281_v17, %v22282_v55  ;;  %v22000_v17 = vld [vmem:[%s22742_s13 + $0xf8] sm:$0xff]  }
 0x29c   : > { %v22287_v55 = vld [vmem:[%s22742_s13 + $0x21c] sm:$0xf] }
 0x29d   : > { %v17371_v33 = vcombine.low %v22287_v55, %v22288_v7  ;;  %v22292_v55 = vld [vmem:[%s22742_s13 + $0x234] sm:$0xf] }
 0x2a1   : > { %19906 = vmatmul.mubr.msk.bf16.gmra.mrb[96].mxu1 %vm1963_vm3, %v17366_v49  ;;  %v21998_v49 = vld [vmem:[%s22742_s13 + $0xf0] sm:$0xff]  }
 0x2a2   : > { %20492 = vmatmul.mubr.msk.bf16.gmra.mrb[32].mxu0 %vm1963_vm3, %v21992_v16  ;;  %19909 = vmatprep.mubr.msk.bf16.mxu1 %vm1963_vm3, %v17367_v13  ;;  %v22285_v16 = vld [vmem:[%s22742_s13 + $0x210] sm:$0xf]  ;;  %v22286_v13 = vld [vmem:[%s22742_s13 + $0x214] sm:$0xf] }
 0x2a3   : > { %20495 = vmatprep.mubr.msk.bf16.mxu0 %vm1963_vm3, %v21994_v51  ;;  %v17370_v51 = vcombine.low %v22285_v16, %v22286_v13  ;;  %v22004_v16 = vld [vmem:[%s22742_s13 + $0x10c] sm:$0xff]  }
 0x2a4   : > { %v22291_v13 = vld [vmem:[%s22742_s13 + $0x230] sm:$0xf] }
 0x2a5   : > { %v17373_v7 = vcombine.low %v22291_v13, %v22292_v55  ;;  %v22296_v13 = vld [vmem:[%s22742_s13 + $0x248] sm:$0xf] }
 0x2a9   : > { %19910 = vmatmul.mubr.msk.bf16.gmra.mrb[100].mxu1 %vm1963_vm3, %v17368_v61  ;;  %v22002_v61 = vld [vmem:[%s22742_s13 + $0x104] sm:$0xff]  }
 0x2aa   : > { %20496 = vmatmul.mubr.msk.bf16.gmra.mrb[36].mxu0 %vm1963_vm3, %v21996_v63  ;;  %19913 = vmatprep.mubr.msk.bf16.mxu1 %vm1963_vm3, %v17369_v32  ;;  %v22289_v63 = vld [vmem:[%s22742_s13 + $0x224] sm:$0xf]  ;;  %v22290_v32 = vld [vmem:[%s22742_s13 + $0x228] sm:$0xf] }
 0x2ab   : > { %20499 = vmatprep.mubr.msk.bf16.mxu0 %vm1963_vm3, %v21998_v49  ;;  %v17372_v49 = vcombine.low %v22289_v63, %v22290_v32  ;;  %v22008_v63 = vld [vmem:[%s22742_s13 + $0x120] sm:$0xff]  }
 0x2ac   : > { %v22295_v32 = vld [vmem:[%s22742_s13 + $0x244] sm:$0xf] }
 0x2ad   : > { %v17375_v55 = vcombine.low %v22295_v32, %v22296_v13  ;;  %v22300_v32 = vld [vmem:[%s22742_s13 + $0x25c] sm:$0xf]  ;;  %v22014_v13 = vld [vmem:[%s22742_s13 + $0x140] sm:$0xff]  }
 0x2b1   : > { %19914 = vmatmul.mubr.msk.bf16.gmra.mrb[104].mxu1 %vm1963_vm3, %v17370_v51  ;;  %v22006_v51 = vld [vmem:[%s22742_s13 + $0x118] sm:$0xff]  }
 0x2b2   : > { %20500 = vmatmul.mubr.msk.bf16.gmra.mrb[40].mxu0 %vm1963_vm3, %v22000_v17  ;;  %19917 = vmatprep.mubr.msk.bf16.mxu1 %vm1963_vm3, %v17371_v33  ;;  %v22293_v17 = vld [vmem:[%s22742_s13 + $0x238] sm:$0xf]  ;;  %v22294_v33 = vld [vmem:[%s22742_s13 + $0x23c] sm:$0xf] }
 0x2b3   : > { %20503 = vmatprep.mubr.msk.bf16.mxu0 %vm1963_vm3, %v22002_v61  ;;  %v17374_v61 = vcombine.low %v22293_v17, %v22294_v33  ;;  %v22012_v17 = vld [vmem:[%s22742_s13 + $0x134] sm:$0xff]  }
 0x2b4   : > { %v22299_v33 = vld [vmem:[%s22742_s13 + $0x258] sm:$0xf] }
 0x2b9   : > { %19918 = vmatmul.mubr.msk.bf16.gmra.mrb[108].mxu1 %vm1963_vm3, %v17372_v49  ;;  %v22010_v49 = vld [vmem:[%s22742_s13 + $0x12c] sm:$0xff]  }
 0x2ba   : > { %20504 = vmatmul.mubr.msk.bf16.gmra.mrb[44].mxu0 %vm1963_vm3, %v22004_v16  ;;  %19921 = vmatprep.mubr.msk.bf16.mxu1 %vm1963_vm3, %v17373_v7  ;;  %v22297_v16 = vld [vmem:[%s22742_s13 + $0x24c] sm:$0xf]  ;;  %v22298_v7 = vld [vmem:[%s22742_s13 + $0x250] sm:$0xf] }
 0x2bb   : > { %20507 = vmatprep.mubr.msk.bf16.mxu0 %vm1963_vm3, %v22006_v51  ;;  %v17376_v51 = vcombine.low %v22297_v16, %v22298_v7  ;;  %v22302_v16 = vld [vmem:[%s22742_s13 + $0x260] sm:$0xf]  ;;  %v22303_v7 = vld [vmem:[%s22742_s13 + $0x264] sm:$0xf] }
 0x2bc   : > { %v17378_v14 = vcombine.low %v22302_v16, %v22303_v7  ;;  %v3885_v16 = vrot.slane %v23843_v34, 5  ;;  %v22306_v7 = vld [vmem:[%s22742_s13 + $0x10] sm:$0x1] }
 0x2c1   : > { %19922 = vmatmul.mubr.msk.bf16.gmra.mrb[112].mxu1 %vm1963_vm3, %v17374_v61  ;;  %v17377_v61 = vcombine.low %v22299_v33, %v22300_v32  ;;  %v22304_v33 = vld [vmem:[%s22742_s13 + $0x26c] sm:$0xf]  ;;  %v22305_v32 = vld [vmem:[%s22742_s13 + $0x270] sm:$0xf] }
 0x2c2   : > { %20508 = vmatmul.mubr.msk.bf16.gmra.mrb[48].mxu0 %vm1963_vm3, %v22008_v63  ;;  %19925 = vmatprep.mubr.msk.bf16.mxu1 %vm1963_vm3, %v17375_v55  ;;  %v22301_v63 = vld [vmem:[%s22742_s13 + $0x4] sm:$0xf]  ;;  %v17379_v29 = vcombine.low %v22304_v33, %v22305_v32  ;;  %v3887_v33 = vrot.slane %v3885_v16, 4 }
 0x2c3   : > { %20511 = vmatprep.mubr.msk.bf16.mxu0 %vm1963_vm3, %v22010_v49  ;;  %v3866_v55 = vrot.slane %v22301_v63, 5  ;;  %v3765_v49 = vld [vmem:[%s22742_s13] sm:$0xe]  ;;  %v3882_v63 = vrot.slane %v23840_v58, 5  ;;  %v22307_v32 = vld [vmem:[%s22742_s13 + $0x24] sm:$0x1] }
 0x2c5   : > { %v3868_v24 = vrot.slane %v3866_v55, 4 }
 0x2c9   : > { %19926 = vmatmul.mubr.msk.bf16.gmra.mrb[116].mxu1 %vm1963_vm3, %v17376_v51  ;;  %v3869_v51 = vrot.slane %v23798_v57, 5  ;;  %v3875_v57 = vrot.slane %v22306_v7, 5  ;;  %v3888_v7 = vrot.slane %v22307_v32, 5 }
 0x2ca   : > { %20512 = vmatmul.mubr.msk.bf16.gmra.mrb[52].mxu0 %vm1963_vm3, %v22012_v17  ;;  %19929 = vmatprep.mubr.msk.bf16.mxu1 %vm1963_vm3, %v17377_v61  ;;  %v17445_v17 = vrot.slane %v3765_v49, 9  ;;  %v3872_v61 = vrot.slane %v23801_v48, 5  ;;  %v3884_v49 = vrot.slane %v3882_v63, 4 }
 0x2cb   : > { %20515 = vmatprep.mubr.msk.bf16.mxu0 %vm1963_vm3, %v22014_v13  ;;  %v3766_v13 = vld [vmem:[%s22742_s13 + $0x14] sm:$0xe]  ;;  %v3871_v48 = vrot.slane %v3869_v51, 4  ;;  %v3870_v58 = vsel %vm23271_vm7, %v3868_v24, %v3869_v51  ;;  %v24476_v37 = vsel %vm23271_vm7, %v3887_v33, %v3888_v7 }
 0x2cc   : > { %v3867_v8 = vsel %vm23271_vm7, %v17445_v17, %v3866_v55  ;;  %v3874_v34 = vrot.slane %v3872_v61, 4  ;;  %v3767_v55 = vld [vmem:[%s22742_s13 + $0x28] sm:$0xe] }
 0x2cd   : > { %v17478_v27 = vcombine.low %v3867_v8, %v3870_v58  ;;  %v3873_v17 = vsel %vm23271_vm7, %v3871_v48, %v3872_v61  ;;  %v17447_v61 = vrot.slane %v3767_v55, 9  ;;  %v3905_v48 = vrot.slane %v23879_v5, 5  ;;  %v24489_v8 = vld [vmem:[%s28850_s1 + $0x20] sm:$0xf]  ;;  %v22310_v5 = vld [vmem:[%s22742_s13 + $0x38] sm:$0x1] }
 0x2ce   : > { %v3876_v24 = vsel %vm23271_vm7, %v3874_v34, %v3875_v57  ;;  %v3894_v57 = vrot.slane %v3892_v3, 4  ;;  %21882 = vmatprep.subr.msk.bf16.mxu0 %vm2156_vm0, %v24489_v8  ;;  %v3769_v34 = vld [vmem:[%s22742_s13 + $0x50] sm:$0xe]  ;;  %v22311_v55 = vld [vmem:[%s22742_s13 + $0x4c] sm:$0x1] }
 0x2cf   : > { %v24507_v33 = vsel %vm23271_vm7, %v17447_v61, %v3892_v3  ;;  %v3931_v3 = vrot.slane %v23939_v2, 5 }
 0x2d1   : > { %19930 = vmatmul.mubr.msk.bf16.gmra.mrb[120].mxu1 %vm1963_vm3, %v17378_v14  ;;  %v17446_v14 = vrot.slane %v3766_v13, 9 }
 0x2d2   : > { %20516 = vmatmul.mubr.msk.bf16.gmra.mrb[56].mxu0 %vm1963_vm3, %v22016_v0  ;;  %19933 = vmatprep.mubr.msk.bf16.mxu1 %vm1963_vm3, %v17379_v29  ;;  %v3881_v0 = vrot.slane %v3879_v25, 4  ;;  %v22309_v29 = vld [vmem:[%s22742_s13 + $0x278] sm:$0xf] }
 0x2d3   : > { %20519 = vmatprep.mubr.msk.bf16.mxu0 %vm1963_vm3, %v22018_v22  ;;  %v17380_v41 = vcombine.low %v22308_v10, %v22309_v29  ;;  %v22020_v22 = vld [vmem:[%s22742_s13 + $0x15c] sm:$0xff]   ;;  %v3880_v51 = vsel %vm23271_vm7, %v17446_v14, %v3879_v25  ;;  %v24472_v10 = vsel %vm23271_vm7, %v3884_v49, %v3885_v16  ;;  %v3895_v25 = vrot.slane %v23870_v60, 5  ;;  %v22022_v49 = vld [vmem:[%s22742_s13 + $0x170] sm:$0xff]  }
 0x2d4   : > { %v3883_v13 = vsel %vm23271_vm7, %v3881_v0, %v3882_v63  ;;  %v3898_v63 = vrot.slane %v23873_v59, 5  ;;  %v17479_v16 = vcombine.low %v3873_v17, %v3876_v24  ;;  %v5986_v60 = vsel %vm2156_vm0, %v24268_v28, 0 }
 0x2d5   : > { %v17480_v58 = vcombine.low %v3880_v51, %v3883_v13  ;;  %v3918_v14 = vrot.slane %v23909_v53, 5  ;;  %v3921_v28 = vrot.slane %v23930_v52, 5  ;;  %v3924_v0 = vrot.slane %v23933_v54, 5  ;;  %v22023_v52 = vld [vmem:[%s22742_s13 + $0x17c] sm:$0xff]  }
 0x2d6   : > { %v3897_v32 = vrot.slane %v3895_v25, 4  ;;  %v3900_v7 = vrot.slane %v3898_v63, 4  ;;  %v3914_v17 = vrot.slane %v22311_v55, 5  ;;  %v17449_v54 = vrot.slane %v3769_v34, 9  ;;  %v22312_v51 = vld [vmem:[%s22742_s13 + $0x60] sm:$0x1] }
 0x2d7   : > { %v3927_v13 = vrot.slane %v22312_v51, 5  ;;  %v3920_v61 = vrot.slane %v3918_v14, 4  ;;  %v3926_v59 = vrot.slane %v3924_v0, 4  ;;  %v3937_v55 = vrot.slane %v23963_v31, 5 }
 0x2d8   : > { %v24525_v34 = vsel %vm23271_vm7, %v3897_v32, %v3898_v63 }
 0x2d9   : > { %19934 = vmatmul.mubr.msk.bf16.gmra.mrb[124].mxu1 %vm1963_vm3, %v17380_v41  ;;  %v3908_v41 = vrot.slane %v23900_v19, 5  ;;  %v3901_v19 = vrot.slane %v22310_v5, 5  ;;  %v3923_v5 = vrot.slane %v3921_v28, 4 }
 0x2da   : > { %20520 = vmatmul.mubr.msk.bf16.gmra.mrb[60].mxu0 %vm1963_vm3, %v22020_v22  ;;  %19939 = vmatprep.mubr.msk.bf16.mxu1 %vm1963_vm3, %v17478_v27  ;;  %v3768_v27 = vld [vmem:[%s22742_s13 + $0x3c] sm:$0xe]  ;;  %v3907_v22 = vrot.slane %v3905_v48, 4 }
 0x2db   : > { %20523 = vmatprep.mubr.msk.bf16.mxu0 %vm1963_vm3, %v22021_v62  ;;  %v3911_v62 = vrot.slane %v23903_v18, 5  ;;  %v24511_v18 = vsel %vm23271_vm7, %v3894_v57, %v3895_v25  ;;  %v17448_v29 = vrot.slane %v3768_v27, 9  ;;  %v3910_v53 = vrot.slane %v3908_v41, 4  ;;  %v3770_v57 = vld [vmem:[%s22742_s13 + $0x64] sm:$0xe] }
 0x2dc   : > { %v3934_v25 = vrot.slane %v23960_v30, 5  ;;  %v17482_v27 = vcombine.low %v24507_v33, %v24511_v18  ;;  %v24529_v2 = vsel %vm23271_vm7, %v3900_v7, %v3901_v19  ;;  %v24564_v19 = vsel %vm23271_vm7, %v3923_v5, %v3924_v0  ;;  %v22024_v33 = vld [vmem:[%s22742_s13 + $0x184] sm:$0xff]  }
 0x2dd   : > { %v3913_v24 = vrot.slane %v3911_v62, 4  ;;  %v24535_v30 = vsel %vm23271_vm7, %v17448_v29, %v3905_v48  ;;  %v24543_v63 = vsel %vm23271_vm7, %v3910_v53, %v3911_v62  ;;  %v24552_v48 = vsel %vm23271_vm7, %v17449_v54, %v3918_v14  ;;  %v3771_v53 = vld [vmem:[%s22742_s13 + $0x78] sm:$0xe]  ;;  %v22317_v54 = vld [vmem:[%s22742_s13 + $0xb0] sm:$0x1] }
 0x2de   : > { %v24560_v62 = vsel %vm23271_vm7, %v3920_v61, %v3921_v28  ;;  %v24568_v14 = vsel %vm23271_vm7, %v3926_v59, %v3927_v13  ;;  %v17483_v18 = vcombine.low %v24525_v34, %v24529_v2  ;;  %v3939_v7 = vrot.slane %v3937_v55, 4  ;;  %v22314_v28 = vld [vmem:[%s22742_s13 + $0x74] sm:$0x1] }
 0x2df   : > { %v24548_v31 = vsel %vm23271_vm7, %v3913_v24, %v3914_v17  ;;  %v3940_v29 = vrot.slane %v22314_v28, 5  ;;  %v3944_v59 = vrot.slane %v23969_v35, 5  ;;  %v3947_v17 = vrot.slane %v23990_v56, 5  ;;  %v3772_v35 = vld [vmem:[%s22742_s13 + $0x8c] sm:$0xe] }
 0x2e0   : > { %v17485_v0 = vcombine.low %v24543_v63, %v24548_v31  ;;  %v3960_v61 = vrot.slane %v24020_v38, 5  ;;  %v3963_v5 = vrot.slane %v24023_v39, 5  ;;  %v3970_v38 = vrot.slane %v24029_v36, 5 }
 0x2e1   : > { %19940 = vmatmul.mubr.msk.bf16.vlgmr.msra.gmra.mrb[0].mxu1 %vm1963_vm3, %v17479_v16  ;;  %v24539_v16 = vsel %vm23271_vm7, %v3907_v22, %v3908_v41  ;;  %v3933_v41 = vrot.slane %v3931_v3, 4  ;;  %v22025_v22 = vld [vmem:[%s22742_s13 + $0x190] sm:$0xff]   ;;  %v3946_v39 = vrot.slane %v3944_v59, 4  ;;  %v3976_v36 = vrot.slane %v24053_v21, 5 }
 0x2e2   : > { %20524 = vmatmul.mubr.msk.bf16.gmra.mrb[64].mxu0 %vm1963_vm3, %v22022_v49  ;;  %20068 = vmatpush3.bf16.msra.mxu1 %v5986_v60  ;;  %v17450_v60 = vrot.slane %v3770_v57, 9  ;;  %v3936_v49 = vrot.slane %v3934_v25, 4  ;;  %v17484_v32 = vcombine.low %v24535_v30, %v24539_v16  ;;  %v28927_v57 = vcombine.low %v24472_v10, %v24476_v37 }
 0x2e3   : > { %19943 = vmatprep.mubr.msk.bf16.mxu1 %vm1963_vm3, %v17480_v58  ;;  %20527 = vmatprep.mubr.msk.bf16.mxu0 %vm1963_vm3, %v22023_v52  ;;  %v22313_v58 = vld [vmem:[%s28850_s1 + $0x10] sm:$0xf]  ;;  %v3950_v52 = vrot.slane %v23993_v4, 5  ;;  %v24593_v13 = vsel %vm23271_vm7, %v3933_v41, %v3934_v25  ;;  %v3957_v4 = vrot.slane %v23999_v11, 5  ;;  %v17451_v25 = vrot.slane %v3771_v53, 9  ;;  %v22026_v53 = vld [vmem:[%s22742_s13 + $0x198] sm:$0xff]  }
 0x2e4   : > { %21878 = vmatprep.subr.msk.bf16.mxu1 %vm2156_vm0, %v22313_v58  ;;  %v24589_v51 = vsel %vm23271_vm7, %v17450_v60, %v3931_v3  ;;  %v24598_v56 = vsel %vm23271_vm7, %v3936_v49, %v3937_v55  ;;  %v24610_v3 = vsel %vm23271_vm7, %v3939_v7, %v3940_v29  ;;  %v22315_v55 = vld [vmem:[%s22742_s13 + $0x88] sm:$0x1]  ;;  %v3773_v11 = vld [vmem:[%s22742_s13 + $0xa0] sm:$0xe]  ;;  %v3949_v10 = vrot.slane %v3947_v17, 4 }
 0x2e5   : > { %v3953_v60 = vrot.slane %v22315_v55, 5  ;;  %v3952_v37 = vrot.slane %v3950_v52, 4  ;;  %v17452_v41 = vrot.slane %v3772_v35, 9  ;;  %v22316_v49 = vld [vmem:[%s22742_s13 + $0x9c] sm:$0x1]  ;;  %v3973_v7 = vrot.slane %v24050_v1, 5 }
 0x2e6   : > { %v3959_v28 = vrot.slane %v3957_v4, 4  ;;  %v3962_v29 = vrot.slane %v3960_v61, 4  ;;  %v24627_v35 = vsel %vm23271_vm7, %v17451_v25, %v3944_v59  ;;  %v3972_v55 = vrot.slane %v3970_v38, 4  ;;  %v22027_v1 = vld [vmem:[%s22742_s13 + $0x1a4] sm:$0xff]   ;;  %v3774_v25 = vld [vmem:[%s22742_s13 + $0xb4] sm:$0xe] }
 0x2e7   : > { %v24633_v21 = vsel %vm23271_vm7, %v3946_v39, %v3947_v17  ;;  %v24637_v58 = vsel %vm23271_vm7, %v3949_v10, %v3950_v52  ;;  %v24645_v59 = vsel %vm23271_vm7, %v17452_v41, %v3957_v4  ;;  %v3979_v24 = vrot.slane %v22317_v54, 5  ;;  %v22318_v41 = vld [vmem:[%s22742_s13 + $0xc4] sm:$0x1] }
 0x2e8   : > { %v3986_v17 = vrot.slane %v24080_v50, 5  ;;  %v24652_v39 = vsel %vm23271_vm7, %v3959_v28, %v3960_v61  ;;  %v24656_v52 = vsel %vm23271_vm7, %v3962_v29, %v3963_v5  ;;  %v24673_v50 = vsel %vm23271_vm7, %v3972_v55, %v3973_v7  ;;  %v3776_v28 = vld [vmem:[%s22742_s13 + $0xdc] sm:$0xe] }
 0x2e9   : > { %19944 = vmatmul.mubr.msk.bf16.gmra.mrb[4].mxu1 %vm1963_vm3, %v28927_v57  ;;  %v3975_v57 = vrot.slane %v3973_v7, 4  ;;  %v17454_v54 = vrot.slane %v3774_v25, 9  ;;  %v4002_v10 = vrot.slane %v24113_v26, 5  ;;  %v22028_v7 = vld [vmem:[%s22742_s13 + $0x1ac] sm:$0xff]   ;;  %v4009_v29 = vrot.slane %v24119_v47, 5 }
 0x2ea   : > { %20528 = vmatmul.mubr.msk.bf16.gmra.mrb[68].mxu0 %vm1963_vm3, %v22024_v33  ;;  %19947 = vmatprep.mubr.msk.bf16.mxu1 %vm1963_vm3, %v17482_v27  ;;  %v3966_v33 = vrot.slane %v22316_v49, 5  ;;  %v3965_v27 = vrot.slane %v3963_v5, 4  ;;  %v3983_v49 = vrot.slane %v24059_v6, 5  ;;  %v3978_v6 = vrot.slane %v3976_v36, 4  ;;  %v22319_v25 = vld [vmem:[%s22742_s13 + $0xd8] sm:$0x1] }
 0x2eb   : > { %20531 = vmatprep.mubr.msk.bf16.mxu0 %vm1963_vm3, %v22025_v22  ;;  %v17453_v22 = vrot.slane %v3773_v11, 9  ;;  %v24641_v11 = vsel %vm23271_vm7, %v3952_v37, %v3953_v60  ;;  %v3989_v5 = vrot.slane %v24083_v44, 5  ;;  %v24689_v44 = vsel %vm23271_vm7, %v3975_v57, %v3976_v36  ;;  %v22323_v47 = vld [vmem:[%s22742_s13 + $0x128] sm:$0x1] }
 0x2ec   : > { %v24660_v60 = vsel %vm23271_vm7, %v3965_v27, %v3966_v33  ;;  %v3985_v61 = vrot.slane %v3983_v49, 4  ;;  %v24693_v30 = vsel %vm23271_vm7, %v3978_v6, %v3979_v24  ;;  %v3988_v16 = vrot.slane %v3986_v17, 4  ;;  %v22029_v27 = vld [vmem:[%s22742_s13 + $0x1b8] sm:$0xff]  }
 0x2ed   : > { %v24664_v4 = vsel %vm23271_vm7, %v17453_v22, %v3970_v38  ;;  %v3999_v38 = vrot.slane %v24110_v43, 5  ;;  %v3992_v33 = vrot.slane %v22318_v41, 5  ;;  %v24707_v24 = vsel %vm23271_vm7, %v17454_v54, %v3983_v49 }
 0x2ee   : > { %v24711_v26 = vsel %vm23271_vm7, %v3985_v61, %v3986_v17  ;;  %v3991_v36 = vrot.slane %v3989_v5, 4  ;;  %v24720_v49 = vsel %vm23271_vm7, %v3988_v16, %v3989_v5  ;;  %v4005_v6 = vrot.slane %v22319_v25, 5  ;;  %v3777_v16 = vld [vmem:[%s22742_s13 + $0xf0] sm:$0xe] }
 0x2ef   : > { %v4001_v55 = vrot.slane %v3999_v38, 4  ;;  %v4012_v17 = vrot.slane %v24140_v15, 5  ;;  %v17456_v54 = vrot.slane %v3776_v28, 9  ;;  %v4015_v61 = vrot.slane %v24143_v42, 5  ;;  %v28928_v42 = vld [vmem:[#allocation7_spill] sm:$0xff] }
 0x2f0   : > { %v24735_v15 = vsel %vm23271_vm7, %v3991_v36, %v3992_v33  ;;  %v4011_v5 = vrot.slane %v4009_v29, 4  ;;  %v4025_v41 = vrot.slane %v24170_v23, 5  ;;  %v4028_v28 = vrot.slane %v28928_v42, 5 }
 0x2f1   : > { %19948 = vmatmul.mubr.msk.bf16.gmra.mrb[8].mxu1 %vm1963_vm3, %v17483_v18  ;;  %v3996_v18 = vrot.slane %v24089_v12, 5  ;;  %v24755_v23 = vsel %vm23271_vm7, %v4001_v55, %v4002_v10  ;;  %v4057_v22 = vrot.slane %v22323_v47, 5 }
 0x2f2   : > { %20532 = vmatmul.mubr.msk.bf16.gmra.mrb[72].mxu0 %vm1963_vm3, %v22026_v53  ;;  %19951 = vmatprep.mubr.msk.bf16.mxu1 %vm1963_vm3, %v17484_v32  ;;  %v3775_v32 = vld [vmem:[%s22742_s13 + $0xc8] sm:$0xe]  ;;  %v24771_v55 = vsel %vm23271_vm7, %v4011_v5, %v4012_v17  ;;  %v4030_v25 = vrot.slane %v4028_v28, 4 }
 0x2f3   : > { %20535 = vmatprep.mubr.msk.bf16.mxu0 %vm1963_vm3, %v22027_v1  ;;  %v17455_v53 = vrot.slane %v3775_v32, 9  ;;  %v3998_v57 = vrot.slane %v3996_v18, 4  ;;  %v4004_v1 = vrot.slane %v4002_v10, 4  ;;  %v4022_v32 = vrot.slane %v24149_v45, 5  ;;  %v22030_v10 = vld [vmem:[%s22742_s13 + $0x1c0] sm:$0xff]  }
 0x2f4   : > { %v28929_v45 = vcombine.low %v24552_v48, %v24560_v62  ;;  %v4014_v62 = vrot.slane %v4012_v17, 4  ;;  %v18604_v17 = vld [vmem:[%s22742_s13 + $0x30] sm:$0xf] }
 0x2f5   : > { %v24747_v63 = vsel %vm23271_vm7, %v17455_v53, %v3996_v18  ;;  %v24751_v31 = vsel %vm23271_vm7, %v3998_v57, %v3999_v38  ;;  %v24759_v48 = vsel %vm23271_vm7, %v4004_v1, %v4005_v6  ;;  %v28930_v18 = vld [vmem:[#allocation8_spill] sm:$0xff]  ;;  %v24766_v38 = vsel %vm23271_vm7, %v17456_v54, %v4009_v29  ;;  %v22321_v6 = vld [vmem:[%s22742_s13 + $0x100] sm:$0x1] }
 0x2f6   : > { %v4035_v36 = vrot.slane %v28930_v18, 5  ;;  %v17457_v53 = vrot.slane %v3777_v16, 9  ;;  %v4024_v57 = vrot.slane %v4022_v32, 4  ;;  %v4027_v1 = vrot.slane %v4025_v41, 4  ;;  %v22033_v29 = vld [vmem:[%s22742_s13 + $0x1e0] sm:$0xff]  }
 0x2f7   : > { %v4031_v42 = vrot.slane %v22321_v6, 5  ;;  %v4038_v16 = vrot.slane %v24200_v20, 5  ;;  %v24784_v5 = vsel %vm23271_vm7, %v4014_v62, %v4015_v61  ;;  %v4041_v6 = vrot.slane %v24203_v40, 5  ;;  %v18602_v62 = vld [vmem:[%s22742_s13 + $0x28] sm:$0xf] }
 0x2f8   : > { %v4037_v18 = vrot.slane %v4035_v36, 4  ;;  %v24795_v20 = vsel %vm23271_vm7, %v17457_v53, %v4022_v32  ;;  %v28931_v40 = vcombine.low %v24564_v19, %v24568_v14  ;;  %v28933_v19 = vcombine.low %v24589_v51, %v24593_v13 }
 0x2f9   : > { %19952 = vmatmul.mubr.msk.bf16.gmra.mrb[12].mxu1 %vm1963_vm3, %v17485_v0  ;;  %v22320_v0 = vld [vmem:[%s22742_s13 + $0xec] sm:$0x1]  ;;  %v24813_v32 = vsel %vm23271_vm7, %v4030_v25, %v4031_v42  ;;  %v28934_v25 = vld [vmem:[#allocation10_spill] sm:$0xff]  ;;  %v4043_v13 = vrot.slane %v4041_v6, 4  ;;  %v12460_v34 = vshll.u32 %v18604_v17, 16 }
 0x2fa   : > { %20536 = vmatmul.mubr.msk.bf16.gmra.mrb[76].mxu0 %vm1963_vm3, %v22028_v7  ;;  %19955 = vmatprep.mubr.msk.bf16.mxu1 %vm1963_vm3, %v28929_v45  ;;  %v4018_v33 = vrot.slane %v22320_v0, 5  ;;  %v3778_v7 = vld [vmem:[%s22742_s13 + $0x104] sm:$0xe]  ;;  %v22031_v45 = vld [vmem:[%s22742_s13 + $0x1cc] sm:$0xff]   ;;  %v4054_v42 = vrot.slane %v28934_v25, 5  ;;  %v24832_v51 = vsel %vm23271_vm7, %v4037_v18, %v4038_v16 }
 0x2fb   : > { %20539 = vmatprep.mubr.msk.bf16.mxu0 %vm1963_vm3, %v22029_v27  ;;  %v4017_v27 = vrot.slane %v4015_v61, 4  ;;  %v17458_v54 = vrot.slane %v3778_v7, 9  ;;  %v24799_v61 = vsel %vm23271_vm7, %v4024_v57, %v4025_v41  ;;  %v28932_v41 = vld [vmem:[#allocation9_spill] sm:$0xff]  ;;  %v18603_v57 = vld [vmem:[%s22742_s13 + $0x2c] sm:$0xf]  ;;  %28935 = vst [vmem:[#allocation7_spill] sm:$0xff] %v24832_v51 }
 0x2fc   : > { %v4051_v53 = vrot.slane %v28932_v41, 5  ;;  %v12450_v41 = vshll.u32 %v18603_v57, 16  ;;  %v3780_v25 = vld [vmem:[%s22742_s13 + $0x12c] sm:$0xe]  ;;  %v12464_v51 = vshrl.u32 %v18604_v17, 16  ;;  %v28942_v17 = vcombine.low %v24627_v35, %v24633_v21  ;;  %v28946_v21 = vld [vmem:[#allocation14_spill] sm:$0xff] }
 0x2fd   : > { %v24791_v7 = vsel %vm23271_vm7, %v4017_v27, %v4018_v33  ;;  %v24809_v33 = vsel %vm23271_vm7, %v4027_v1, %v4028_v28  ;;  %v4048_v27 = vrot.slane %v24209_v46, 5  ;;  %v24825_v14 = vsel %vm23271_vm7, %v17458_v54, %v4035_v36  ;;  %v3779_v46 = vld [vmem:[%s22742_s13 + $0x118] sm:$0xe]  ;;  %v3781_v35 = vld [vmem:[%s22742_s13 + $0x140] sm:$0xe] }
 0x2fe   : > { %v4040_v28 = vrot.slane %v4038_v16, 4  ;;  %v17459_v0 = vrot.slane %v3779_v46, 9  ;;  %v4053_v18 = vrot.slane %v4051_v53, 4  ;;  %v4056_v54 = vrot.slane %v4054_v42, 4  ;;  %v28937_v46 = vld [vmem:[#allocation11_spill] sm:$0xff] }
 0x2ff   : > { %v4050_v16 = vrot.slane %v4048_v27, 4  ;;  %v4061_v43 = vrot.slane %v28937_v46, 5  ;;  %v24856_v2 = vrot.slane %v12450_v41, 5 }
 0x300   : > { %v24847_v36 = vsel %vm23271_vm7, %v4040_v28, %v4041_v6  ;;  %v28938_v6 = vcombine.low %v24598_v56, %v24610_v3  ;;  %v24865_v47 = vsel %vm23271_vm7, %v17459_v0, %v4048_v27  ;;  %v24882_v56 = vsel %vm23271_vm7, %v4056_v54, %v4057_v22  ;;  %v28944_v0 = vld [vmem:[#allocation12_spill] sm:$0xff] }
 0x301   : > { %19956 = vmatmul.mubr.msk.bf16.gmra.mrb[16].mxu1 %vm1963_vm3, %v28931_v40  ;;  %v12441_v40 = vshrl.u32 %v18602_v62, 16  ;;  %28939 = vst [vmem:[#allocation9_spill] sm:$0xff] %v24865_v47  ;;  %v24869_v28 = vsel %vm23271_vm7, %v4050_v16, %v4051_v53  ;;  %28943 = vst [vmem:[#allocation21_spill] sm:$0xff] %v24882_v56  ;;  %v17460_v3 = vrot.slane %v3780_v25, 9  ;;  %v4064_v27 = vrot.slane %v28944_v0, 5  ;;  %v28945_v53 = vld [vmem:[#allocation13_spill] sm:$0xff] }
 0x302   : > { %20540 = vmatmul.mubr.msk.bf16.gmra.mrb[80].mxu0 %vm1963_vm3, %v22030_v10  ;;  %19959 = vmatprep.mubr.msk.bf16.mxu1 %vm1963_vm3, %v28933_v19  ;;  %v22322_v10 = vld [vmem:[%s22742_s13 + $0x114] sm:$0x1]  ;;  %v12454_v19 = vshrl.u32 %v18603_v57, 16  ;;  %28940 = vst [vmem:[#allocation10_spill] sm:$0xff] %v24869_v28  ;;  %v12462_v54 = vrot.slane %v12460_v34, 5  ;;  %v22034_v16 = vld [vmem:[%s22742_s13 + $0x1e8] sm:$0xff]  }
 0x303   : > { %20543 = vmatprep.mubr.msk.bf16.mxu0 %vm1963_vm3, %v22031_v45  ;;  %v4044_v1 = vrot.slane %v22322_v10, 5  ;;  %v12444_v45 = vshll.u32 %v18602_v62, 16  ;;  %v22032_v10 = vld [vmem:[%s22742_s13 + $0x1d4] sm:$0xff]   ;;  %v12443_v12 = vrot.slane %v12441_v40, 4  ;;  %v4074_v40 = vrot.slane %v28946_v21, 5  ;;  %v28948_v0 = vld [vmem:[#allocation16_spill] sm:$0xff] }
 0x304   : > { %v12456_v62 = vrot.slane %v12454_v19, 4  ;;  %v4063_v19 = vrot.slane %v4061_v43, 4  ;;  %v18605_v25 = vld [vmem:[%s22742_s13 + $0x34] sm:$0xf]  ;;  %v4066_v34 = vrot.slane %v4064_v27, 4 }
 0x305   : > { %v24852_v57 = vsel %vm23271_vm7, %v4043_v13, %v4044_v1  ;;  %v12446_v37 = vrot.slane %v12444_v45, 5  ;;  %v24873_v1 = vsel %vm23271_vm7, %v4053_v18, %v4054_v42  ;;  %v4067_v42 = vrot.slane %v28945_v53, 5  ;;  %v28947_v45 = vld [vmem:[#allocation15_spill] sm:$0xff]  ;;  %v22035_v21 = vld [vmem:[%s22742_s13 + $0x1f4] sm:$0xff]  }
 0x306   : > { %28936 = vst [vmem:[#allocation8_spill] sm:$0xff] %v24852_v57  ;;  %28941 = vst [vmem:[#allocation11_spill] sm:$0xff] %v24873_v1  ;;  %v4077_v41 = vrot.slane %v28947_v45, 5  ;;  %v12457_v22 = vor.u32 %v12456_v62, %v24856_v2  ;;  %v4080_v53 = vrot.slane %v28948_v0, 5  ;;  %v18607_v62 = vld [vmem:[%s22742_s13 + $0x3c] sm:$0xf] }
 0x307   : > { %v4076_v45 = vrot.slane %v4074_v40, 4  ;;  %v12470_v28 = vshll.u32 %v18605_v25, 16  ;;  %v12474_v56 = vshrl.u32 %v18605_v25, 16  ;;  %v18608_v1 = vld [vmem:[%s22742_s13 + $0x40] sm:$0xf]  ;;  %v12485_v47 = vshrl.u32 %v18607_v62, 16 }
 0x308   : > { %v4079_v13 = vrot.slane %v4077_v41, 4  ;;  %v12458_v0 = vrot.slane %v12457_v22, 4  ;;  %v12488_v57 = vshll.u32 %v18607_v62, 16  ;;  %v28954_v22 = vld [vmem:[#allocation17_spill] sm:$0xff]  ;;  %v22326_v62 = vld [vmem:[%s22742_s13 + $0x164] sm:$0x1] }
 0x309   : > { %19960 = vmatmul.mubr.msk.bf16.gmra.mrb[20].mxu1 %vm1963_vm3, %v28938_v6  ;;  %v22324_v6 = vld [vmem:[%s22742_s13 + $0x13c] sm:$0x1] }
 0x30a   : > { %20544 = vmatmul.mubr.msk.bf16.gmra.mrb[84].mxu0 %vm1963_vm3, %v22032_v10  ;;  %19963 = vmatprep.mubr.msk.bf16.mxu1 %vm1963_vm3, %v28942_v17  ;;  %v12466_v10 = vrot.slane %v12464_v51, 4  ;;  %v4070_v17 = vrot.slane %v22324_v6, 5  ;;  %v17461_v51 = vrot.slane %v3781_v35, 9  ;;  %v24908_v6 = vsel %vm23271_vm7, %v4063_v19, %v4064_v27  ;;  %v22325_v35 = vld [vmem:[%s22742_s13 + $0x150] sm:$0x1] }
 0x30b   : > { %20547 = vmatprep.mubr.msk.bf16.mxu0 %vm1963_vm3, %v22033_v29  ;;  %v12447_v29 = vor.u32 %v12446_v37, %v12443_v12  ;;  %v24903_v37 = vsel %vm23271_vm7, %v17460_v3, %v4061_v43  ;;  %v4069_v12 = vrot.slane %v4067_v42, 4  ;;  %v28949_v43 = vcombine.low %v24637_v58, %v24641_v11 }
 0x30c   : > { %v12467_v46 = vor.u32 %v12466_v10, %v12462_v54  ;;  %v4082_v3 = vrot.slane %v4080_v53, 4  ;;  %v28950_v27 = vcombine.low %v24645_v59, %v24652_v39  ;;  %v24924_v58 = vsel %vm23271_vm7, %v4066_v34, %v4067_v42  ;;  %v18606_v34 = vld [vmem:[%s22742_s13 + $0x38] sm:$0x1] }
 0x30d   : > { %v12448_v18 = vrot.slane %v12447_v29, 4  ;;  %v4083_v29 = vrot.slane %v22325_v35, 5  ;;  %28951 = vst [vmem:[#allocation12_spill] sm:$0xff] %v24924_v58  ;;  %v24928_v11 = vsel %vm23271_vm7, %v4069_v12, %v4070_v17  ;;  %v24932_v19 = vsel %vm23271_vm7, %v17461_v51, %v4074_v40  ;;  %v3782_v17 = vld [vmem:[%s22742_s13 + $0x154] sm:$0xe]  ;;  %v22036_v51 = vld [vmem:[%s22742_s13 + $0x1fc] sm:$0xff]  }
 0x30e   : > { %28952 = vst [vmem:[#allocation13_spill] sm:$0xff] %v24928_v11  ;;  %28953 = vst [vmem:[#allocation14_spill] sm:$0xff] %v24932_v19  ;;  %v4087_v10 = vrot.slane %v28954_v22, 5  ;;  %v24937_v59 = vsel %vm23271_vm7, %v4076_v45, %v4077_v41  ;;  %v24944_v25 = vsel %vm23271_vm7, %v4079_v13, %v4080_v53  ;;  %v12463_v40 = vsel %vm22764_vm4, %v12458_v0, %v12462_v54  ;;  %v22037_v53 = vld [vmem:[%s22742_s13 + $0x208] sm:$0xff]   ;;  %v28959_v45 = vld [vmem:[#allocation18_spill] sm:$0xff] }
 0x30f   : > { %28955 = vst [vmem:[#allocation15_spill] sm:$0xff] %v24937_v59  ;;  %v12453_v42 = vsel %vm22764_vm4, %v12448_v18, %v24856_v2  ;;  %28957 = vst [vmem:[#allocation16_spill] sm:$0xff] %v24944_v25  ;;  %v12476_v41 = vrot.slane %v12474_v56, 4  ;;  %v12494_v12 = vshll.u32 %v18608_v1, 16  ;;  %v24957_v2 = vsel %vm23271_vm7, %v4082_v3, %v4083_v29  ;;  %v18609_v56 = vld [vmem:[%s22742_s13 + $0x44] sm:$0xf] }
 0x310   : > { %28958 = vst [vmem:[#allocation17_spill] sm:$0xff] %v24957_v2  ;;  %v12487_v13 = vrot.slane %v12485_v47, 4  ;;  %v12490_v18 = vrot.slane %v12488_v57, 5  ;;  %v17462_v54 = vrot.slane %v3782_v17, 9  ;;  %v4090_v0 = vrot.slane %v28959_v45, 5  ;;  %v28962_v35 = vld [vmem:[#allocation19_spill] sm:$0xff] }
 0x311   : > { %19964 = vmatmul.mubr.msk.bf16.gmra.mrb[24].mxu1 %vm1963_vm3, %v28949_v43  ;;  %v24968_v47 = vcombine.low %v12453_v42, %v12463_v40  ;;  %v12480_v57 = vshll.u32 %v18606_v34, 16  ;;  %v24978_v22 = vrot.slane %v12494_v12, 5  ;;  %v18612_v17 = vld [vmem:[%s22742_s13 + $0x50] sm:$0xf]  ;;  %v28961_v45 = vcombine.low %v24656_v52, %v24660_v60  ;;  %v18613_v43 = vld [vmem:[%s22742_s13 + $0x54] sm:$0xf] }
 0x312   : > { %20548 = vmatmul.mubr.msk.bf16.gmra.mrb[88].mxu0 %vm1963_vm3, %v22034_v16  ;;  %19967 = vmatprep.mubr.msk.bf16.mxu1 %vm1963_vm3, %v28950_v27  ;;  %v24946_v16 = vrot.slane %v12470_v28, 5  ;;  %v12498_v28 = vshrl.u32 %v18608_v1, 16  ;;  %v18610_v1 = vld [vmem:[%s22742_s13 + $0x48] sm:$0xf]  ;;  %v12491_v42 = vor.u32 %v12490_v18, %v12487_v13  ;;  %v12504_v34 = vshll.u32 %v18609_v56, 16 }
 0x313   : > { %20551 = vmatprep.mubr.msk.bf16.mxu0 %vm1963_vm3, %v22035_v21  ;;  %v24951_v21 = vrot.slane %v12467_v46, 4  ;;  %v4089_v46 = vrot.slane %v4087_v10, 4  ;;  %28960 = vst [vmem:[#allocation6_spill] sm:$0xff] %v24968_v47  ;;  %v4093_v3 = vrot.slane %v28962_v35, 5  ;;  %v24995_v52 = vsel %vm23271_vm7, %v17462_v54, %v4087_v10  ;;  %v22039_v10 = vld [vmem:[%s22742_s13 + $0x21c] sm:$0xff]   ;;  %v28966_v25 = vld [vmem:[#allocation20_spill] sm:$0xff] }
 0x314   : > { %v12477_v27 = vor.u32 %v12476_v41, %v24946_v16  ;;  %v12500_v40 = vrot.slane %v12498_v28, 4  ;;  %v28963_v41 = vcombine.low %v24664_v4, %v24673_v50  ;;  %28964 = vst [vmem:[#allocation18_spill] sm:$0xff] %v24995_v52  ;;  %v12508_v12 = vshrl.u32 %v18609_v56, 16  ;;  %v18615_v11 = vld [vmem:[%s22742_s13 + $0x5c] sm:$0xf] }
 0x315   : > { %v24999_v60 = vsel %vm23271_vm7, %v4089_v46, %v4090_v0  ;;  %v12482_v13 = vrot.slane %v12480_v57, 5  ;;  %v12518_v18 = vshrl.u32 %v18610_v1, 16  ;;  %v12529_v4 = vshrl.u32 %v18612_v17, 16  ;;  %v3783_v54 = vld [vmem:[%s22742_s13 + $0x168] sm:$0xe] }
 0x316   : > { %28965 = vst [vmem:[#allocation19_spill] sm:$0xff] %v24999_v60  ;;  %v12532_v50 = vshll.u32 %v18612_v17, 16  ;;  %v12478_v28 = vrot.slane %v12477_v27, 4  ;;  %v4092_v35 = vrot.slane %v4090_v0, 4  ;;  %v12501_v46 = vor.u32 %v12500_v40, %v24978_v22  ;;  %v18611_v17 = vld [vmem:[%s22742_s13 + $0x4c] sm:$0x1] }
 0x317   : > { %v4095_v56 = vrot.slane %v4093_v3, 4  ;;  %v4096_v57 = vrot.slane %v22326_v62, 5  ;;  %v12492_v29 = vrot.slane %v12491_v42, 4  ;;  %v12506_v2 = vrot.slane %v12504_v34, 5 }
 0x318   : > { %v12510_v27 = vrot.slane %v12508_v12, 4  ;;  %v4100_v47 = vrot.slane %v28966_v25, 5  ;;  %v12531_v59 = vrot.slane %v12529_v4, 4  ;;  %v12534_v19 = vrot.slane %v12532_v50, 5 }
 0x319   : > { %19968 = vmatmul.mubr.msk.bf16.gmra.mrb[28].mxu1 %vm1963_vm3, %v28961_v45  ;;  %v12542_v45 = vshrl.u32 %v18613_v43, 16  ;;  %v28967_v62 = vcombine.low %v24689_v44, %v24693_v30  ;;  %v12483_v25 = vsel %vm22764_vm4, %v12478_v28, %v12482_v13  ;;  %v12502_v42 = vrot.slane %v12501_v46, 4  ;;  %v22327_v28 = vld [vmem:[%s22742_s13 + $0x170] sm:$0xf] }
 0x31a   : > { %20552 = vmatmul.mubr.msk.bf16.gmra.mrb[92].mxu0 %vm1963_vm3, %v22036_v51  ;;  %19971 = vmatprep.mubr.msk.bf16.mxu1 %vm1963_vm3, %v28963_v41  ;;  %v12514_v51 = vshll.u32 %v18610_v1, 16  ;;  %v22038_v41 = vld [vmem:[%s22742_s13 + $0x210] sm:$0xff]   ;;  %v18614_v1 = vld [vmem:[%s22742_s13 + $0x58] sm:$0xf]  ;;  %v25025_v34 = vsel %vm23271_vm7, %v4092_v35, %v4093_v3  ;;  %v25029_v12 = vsel %vm23271_vm7, %v4095_v56, %v4096_v57  ;;  %v28968_v44 = vcombine.low %v24707_v24, %v24711_v26 }
 0x31b   : > { %20555 = vmatprep.mubr.msk.bf16.mxu0 %vm1963_vm3, %v22037_v53  ;;  %v12538_v53 = vshll.u32 %v18613_v43, 16  ;;  %v12520_v43 = vrot.slane %v12518_v18, 4  ;;  %v12544_v40 = vrot.slane %v12542_v45, 4  ;;  %v12548_v52 = vshll.u32 %v18614_v1, 16 }
 0x31c   : > { %v25009_v0 = vrot.slane %v12514_v51, 5  ;;  %v12552_v58 = vshrl.u32 %v18614_v1, 16  ;;  %v12511_v30 = vor.u32 %v12510_v27, %v12506_v2  ;;  %v12524_v51 = vshll.u32 %v18611_v17, 16  ;;  %v18616_v27 = vld [vmem:[%s22742_s13 + $0x60] sm:$0x1] }
 0x31d   : > { %v25014_v60 = vrot.slane %v12538_v53, 5  ;;  %v12558_v13 = vshll.u32 %v18615_v11, 16  ;;  %v12562_v18 = vshrl.u32 %v18615_v11, 16  ;;  %v17463_v4 = vrot.slane %v3783_v54, 9 }
 0x31e   : > { %v12521_v3 = vor.u32 %v12520_v43, %v25009_v0  ;;  %v4102_v50 = vrot.slane %v4100_v47, 4  ;;  %v4103_v35 = vrot.slane %v22327_v28, 5  ;;  %v12535_v53 = vor.u32 %v12534_v19, %v12531_v59 }
 0x31f   : > { %v12545_v24 = vor.u32 %v12544_v40, %v25014_v60  ;;  %v25039_v26 = vrot.slane %v12548_v52, 5  ;;  %v12554_v45 = vrot.slane %v12552_v58, 4  ;;  %v28969_v11 = vsel %vm22764_vm4, %v24951_v21, %v24946_v16  ;;  %v18617_v52 = vld [vmem:[%s22742_s13 + $0x64] sm:$0xf]  ;;  %v18618_v16 = vld [vmem:[%s22742_s13 + $0x68] sm:$0xf] }
 0x320   : > { %v25048_v54 = vcombine.low %v28969_v11, %v12483_v25  ;;  %v12497_v19 = vsel %vm22764_vm4, %v12492_v29, %v24978_v22  ;;  %v12507_v59 = vsel %vm22764_vm4, %v12502_v42, %v12506_v2  ;;  %v12512_v46 = vrot.slane %v12511_v30, 4  ;;  %v22328_v2 = vld [vmem:[%s22742_s13 + $0x174] sm:$0xf]  ;;  %v22330_v11 = vld [vmem:[%s22742_s13 + $0x180] sm:$0xf] }
 0x321   : > { %19972 = vmatmul.mubr.msk.bf16.gmra.mrb[32].mxu1 %vm1963_vm3, %v28967_v62  ;;  %v12526_v56 = vrot.slane %v12524_v51, 5  ;;  %v25058_v57 = vrot.slane %v12558_v13, 5  ;;  %v12564_v1 = vrot.slane %v12562_v18, 4  ;;  %v12522_v21 = vrot.slane %v12521_v3, 4 }
 0x322   : > { %20556 = vmatmul.mubr.msk.bf16.gmra.mrb[96].mxu0 %vm1963_vm3, %v22038_v41  ;;  %19975 = vmatprep.mubr.msk.bf16.mxu1 %vm1963_vm3, %v28968_v44  ;;  %v22040_v41 = vld [vmem:[%s22742_s13 + $0x224] sm:$0xff]   ;;  %v25063_v17 = vsel %vm23271_vm7, %v17463_v4, %v4100_v47  ;;  %v25067_v29 = vsel %vm23271_vm7, %v4102_v50, %v4103_v35  ;;  %v4106_v22 = vrot.slane %v22328_v2, 5  ;;  %v25071_v43 = vcombine.low %v12497_v19, %v12507_v59  ;;  %v22329_v50 = vld [vmem:[%s22742_s13 + $0x178] sm:$0x1] }
 0x323   : > { %20559 = vmatprep.mubr.msk.bf16.mxu0 %vm1963_vm3, %v22039_v10  ;;  %v22041_v10 = vld [vmem:[%s22742_s13 + $0x230] sm:$0xff]   ;;  %v12536_v40 = vrot.slane %v12535_v53, 4  ;;  %v12546_v62 = vrot.slane %v12545_v24, 4  ;;  %v12555_v25 = vor.u32 %v12554_v45, %v25039_v26  ;;  %v28970_v42 = vcombine.low %v24720_v49, %v24735_v15  ;;  %v18619_v53 = vld [vmem:[%s22742_s13 + $0x6c] sm:$0xf]  ;;  %v22042_v24 = vld [vmem:[%s22742_s13 + $0x238] sm:$0xff]  }
 0x324   : > { %v12573_v47 = vshrl.u32 %v18617_v52, 16  ;;  %v12576_v44 = vshll.u32 %v18617_v52, 16  ;;  %v12582_v30 = vshll.u32 %v18618_v16, 16  ;;  %v12586_v51 = vshrl.u32 %v18618_v16, 16 }
 0x325   : > { %v28971_v13 = vcombine.low %v24747_v63, %v24751_v31  ;;  %v12517_v49 = vsel %vm22764_vm4, %v12512_v46, %v25009_v0  ;;  %v12565_v18 = vor.u32 %v12564_v1, %v25058_v57  ;;  %v12568_v3 = vshll.u32 %v18616_v27, 16  ;;  %v22043_v1 = vld [vmem:[%s22742_s13 + $0x244] sm:$0xff]  }
 0x326   : > { %v12527_v4 = vsel %vm22764_vm4, %v12522_v21, %v12526_v56  ;;  %v4105_v63 = vrot.slane %v4103_v35, 4  ;;  %v4108_v31 = vrot.slane %v4106_v22, 4  ;;  %v4109_v28 = vrot.slane %v22329_v50, 5  ;;  %v18620_v56 = vld [vmem:[%s22742_s13 + $0x70] sm:$0xf] }
 0x327   : > { %v12541_v0 = vsel %vm22764_vm4, %v12536_v40, %v25014_v60  ;;  %v12551_v45 = vsel %vm22764_vm4, %v12546_v62, %v25039_v26  ;;  %v4113_v19 = vrot.slane %v22330_v11, 5  ;;  %v12575_v35 = vrot.slane %v12573_v47, 4  ;;  %v22044_v11 = vld [vmem:[%s22742_s13 + $0x24c] sm:$0xff]  }
 0x328   : > { %v12578_v59 = vrot.slane %v12576_v44, 5  ;;  %v25103_v52 = vrot.slane %v12582_v30, 5  ;;  %v12588_v46 = vrot.slane %v12586_v51, 4  ;;  %v12566_v16 = vrot.slane %v12565_v18, 4  ;;  %v18622_v51 = vld [vmem:[%s22742_s13 + $0x78] sm:$0xf] }
 0x329   : > { %19976 = vmatmul.mubr.msk.bf16.gmra.mrb[36].mxu1 %vm1963_vm3, %v28970_v42  ;;  %v12570_v21 = vrot.slane %v12568_v3, 5  ;;  %v12592_v60 = vshll.u32 %v18619_v53, 16  ;;  %v12596_v2 = vshrl.u32 %v18619_v53, 16  ;;  %v25107_v27 = vcombine.low %v12517_v49, %v12527_v4  ;;  %v22331_v42 = vld [vmem:[%s22742_s13 + $0x184] sm:$0xf] }
 0x32a   : > { %20560 = vmatmul.mubr.msk.bf16.gmra.mrb[100].mxu0 %vm1963_vm3, %v22040_v41  ;;  %19979 = vmatprep.mubr.msk.bf16.mxu1 %vm1963_vm3, %v28971_v13  ;;  %v12556_v41 = vrot.slane %v12555_v25, 4  ;;  %v25111_v26 = vsel %vm23271_vm7, %v4105_v63, %v4106_v22  ;;  %v25115_v40 = vsel %vm23271_vm7, %v4108_v31, %v4109_v28  ;;  %v25117_v25 = vcombine.low %v12541_v0, %v12551_v45  ;;  %v18623_v4 = vld [vmem:[%s22742_s13 + $0x7c] sm:$0xf]  ;;  %v22332_v31 = vld [vmem:[%s22742_s13 + $0x188] sm:$0xf] }
 0x32b   : > { %20563 = vmatprep.mubr.msk.bf16.mxu0 %vm1963_vm3, %v22041_v10  ;;  %v3784_v10 = vld [vmem:[%s22742_s13 + $0x17c] sm:$0xe]  ;;  %v4116_v47 = vrot.slane %v22331_v42, 5  ;;  %v12602_v44 = vshll.u32 %v18620_v56, 16  ;;  %v12606_v30 = vshrl.u32 %v18620_v56, 16  ;;  %v28972_v13 = vcombine.low %v24755_v23, %v24759_v48 }
 0x32c   : > { %v17464_v62 = vrot.slane %v3784_v10, 9  ;;  %v12561_v22 = vsel %vm22764_vm4, %v12556_v41, %v25058_v57  ;;  %v4115_v49 = vrot.slane %v4113_v19, 4  ;;  %v12579_v18 = vor.u32 %v12578_v59, %v12575_v35  ;;  %v22045_v56 = vld [vmem:[%s22742_s13 + $0x258] sm:$0xff]  }
 0x32d   : > { %v12589_v3 = vor.u32 %v12588_v46, %v25103_v52  ;;  %v28973_v63 = vcombine.low %v24766_v38, %v24771_v55  ;;  %v12571_v23 = vsel %vm22764_vm4, %v12566_v16, %v12570_v21  ;;  %v12594_v48 = vrot.slane %v12592_v60, 5  ;;  %v22333_v21 = vld [vmem:[%s22742_s13 + $0x18c] sm:$0x1] }
 0x32e   : > { %v4119_v57 = vrot.slane %v22332_v31, 5  ;;  %v12598_v50 = vrot.slane %v12596_v2, 4  ;;  %v25143_v53 = vsel %vm23271_vm7, %v17464_v62, %v4113_v19  ;;  %v12617_v38 = vshrl.u32 %v18622_v51, 16  ;;  %v18624_v62 = vld [vmem:[%s22742_s13 + $0x80] sm:$0xf] }
 0x32f   : > { %v12620_v55 = vshll.u32 %v18622_v51, 16  ;;  %v25146_v0 = vrot.slane %v12602_v44, 5  ;;  %v12608_v45 = vrot.slane %v12606_v30, 4  ;;  %v12626_v41 = vshll.u32 %v18623_v4, 16  ;;  %v3785_v44 = vld [vmem:[%s22742_s13 + $0x190] sm:$0xe] }
 0x330   : > { %v12630_v10 = vshrl.u32 %v18623_v4, 16  ;;  %v25149_v35 = vcombine.low %v12561_v22, %v12571_v23  ;;  %v12580_v59 = vrot.slane %v12579_v18, 4  ;;  %v12590_v46 = vrot.slane %v12589_v3, 4  ;;  %v22334_v30 = vld [vmem:[%s22742_s13 + $0x194] sm:$0xf] }
 0x331   : > { %19980 = vmatmul.mubr.msk.bf16.gmra.mrb[40].mxu1 %vm1963_vm3, %v28972_v13  ;;  %v4118_v19 = vrot.slane %v4116_v47, 4  ;;  %v4121_v16 = vrot.slane %v4119_v57, 4  ;;  %v4122_v60 = vrot.slane %v22333_v21, 5  ;;  %v12599_v2 = vor.u32 %v12598_v50, %v12594_v48  ;;  %v22335_v3 = vld [vmem:[%s22742_s13 + $0x198] sm:$0xf] }
 0x332   : > { %20564 = vmatmul.mubr.msk.bf16.gmra.mrb[104].mxu0 %vm1963_vm3, %v22042_v24  ;;  %19983 = vmatprep.mubr.msk.bf16.mxu1 %vm1963_vm3, %v28973_v63  ;;  %v18621_v24 = vld [vmem:[%s22742_s13 + $0x74] sm:$0x1]  ;;  %v4126_v51 = vrot.slane %v22334_v30, 5  ;;  %v12619_v13 = vrot.slane %v12617_v38, 4  ;;  %v12622_v22 = vrot.slane %v12620_v55, 5  ;;  %v12609_v18 = vor.u32 %v12608_v45, %v25146_v0 }
 0x333   : > { %20567 = vmatprep.mubr.msk.bf16.mxu0 %vm1963_vm3, %v22043_v1  ;;  %v25154_v1 = vsel %vm23271_vm7, %v4115_v49, %v4116_v47  ;;  %v12612_v42 = vshll.u32 %v18621_v24, 16  ;;  %v4129_v4 = vrot.slane %v22335_v3, 5  ;;  %v25162_v63 = vrot.slane %v12626_v41, 5  ;;  %v18625_v55 = vld [vmem:[%s22742_s13 + $0x84] sm:$0xf] }
 0x334   : > { %v12632_v47 = vrot.slane %v12630_v10, 4  ;;  %v28974_v49 = vcombine.low %v24784_v5, %v24791_v7  ;;  %v25171_v23 = vsel %vm2156_vm0, %v24489_v8, 0  ;;  %v12585_v31 = vsel %vm22764_vm4, %v12580_v59, %v25103_v52  ;;  %v22336_v45 = vld [vmem:[%s22742_s13 + $0x19c] sm:$0xf]  ;;  %v18626_v30 = vld [vmem:[%s22742_s13 + $0x88] sm:$0x1] }
 0x335   : > { %v12595_v50 = vsel %vm22764_vm4, %v12590_v46, %v12594_v48  ;;  %v25180_v38 = vsel %vm23271_vm7, %v4118_v19, %v4119_v57  ;;  %v28975_v5 = vcombine.low %v24795_v20, %v24799_v61  ;;  %v25189_v8 = vsel %vm23271_vm7, %v4121_v16, %v4122_v60  ;;  %v22046_v46 = vld [vmem:[%s22742_s13 + $0x260] sm:$0xff]   ;;  %v22047_v60 = vld [vmem:[%s22742_s13 + $0x26c] sm:$0xff]  }
 0x336   : > { %v25191_v7 = vrot.slane %v12599_v2, 4  ;;  %v17465_v52 = vrot.slane %v3785_v44, 9  ;;  %v12636_v48 = vshll.u32 %v18624_v62, 16  ;;  %v25194_v57 = vrot.slane %v12612_v42, 5  ;;  %v22337_v3 = vld [vmem:[%s22742_s13 + $0x1a0] sm:$0x1] }
 0x337   : > { %v12623_v24 = vor.u32 %v12622_v22, %v12619_v13  ;;  %v4132_v20 = vrot.slane %v22336_v45, 5  ;;  %v12640_v61 = vshrl.u32 %v18624_v62, 16  ;;  %v12610_v41 = vrot.slane %v12609_v18, 4  ;;  %v18627_v13 = vld [vmem:[%s22742_s13 + $0x8c] sm:$0xf] }
 0x338   : > { %v4128_v10 = vrot.slane %v4126_v51, 4  ;;  %v4131_v59 = vrot.slane %v4129_v4, 4  ;;  %v12646_v16 = vshll.u32 %v18625_v55, 16  ;;  %v12650_v21 = vshrl.u32 %v18625_v55, 16  ;;  %v22342_v2 = vld [vmem:[%s22742_s13 + $0x1b4] sm:$0x1] }
 0x339   : > { %19984 = vmatmul.mubr.msk.bf16.gmra.mrb[44].mxu1 %vm1963_vm3, %v28974_v49  ;;  %v12605_v62 = vsel %vm22764_vm4, %v25191_v7, %v25146_v0  ;;  %v25212_v42 = vsel %vm23271_vm7, %v17465_v52, %v4126_v51  ;;  %v12638_v44 = vrot.slane %v12636_v48, 5  ;;  %v12624_v22 = vrot.slane %v12623_v24, 4  ;;  %v3786_v7 = vld [vmem:[%s22742_s13 + $0x1a4] sm:$0xe]  ;;  %v18629_v52 = vld [vmem:[%s22742_s13 + $0x94] sm:$0xf] }
 0x33a   : > { %20568 = vmatmul.mubr.msk.bf16.gmra.mrb[108].mxu0 %vm1963_vm3, %v22044_v11  ;;  %19987 = vmatprep.mubr.msk.bf16.mxu1 %vm1963_vm3, %v28975_v5  ;;  %v12633_v11 = vor.u32 %v12632_v47, %v25162_v63  ;;  %v4134_v18 = vrot.slane %v4132_v20, 4  ;;  %v4135_v47 = vrot.slane %v22337_v3, 5  ;;  %v12642_v49 = vrot.slane %v12640_v61, 4  ;;  %v18630_v61 = vld [vmem:[%s22742_s13 + $0x98] sm:$0xf] }
 0x33b   : > { %20571 = vmatprep.mubr.msk.bf16.mxu0 %vm1963_vm3, %v22045_v56  ;;  %v25201_v56 = vcombine.low %v12585_v31, %v12595_v50  ;;  %v18628_v31 = vld [vmem:[%s22742_s13 + $0x90] sm:$0xf]  ;;  %v12615_v0 = vsel %vm22764_vm4, %v12610_v41, %v25194_v57  ;;  %v25223_v50 = vsel %vm23271_vm7, %v4128_v10, %v4129_v4  ;;  %v25227_v5 = vsel %vm23271_vm7, %v4131_v59, %v4132_v20  ;;  %v22338_v4 = vld [vmem:[%s22742_s13 + $0x1a8] sm:$0xf]  ;;  %v28977_v20 = vld [vmem:[#allocation7_spill] sm:$0xff] }
 0x33c   : > { %v12634_v51 = vrot.slane %v12633_v11, 4  ;;  %v28976_v48 = vcombine.low %v24809_v33, %v24813_v32  ;;  %v25236_v55 = vrot.slane %v12646_v16, 5  ;;  %v12652_v57 = vrot.slane %v12650_v21, 4 }
 0x33d   : > { %v12656_v24 = vshll.u32 %v18626_v30, 16  ;;  %v4139_v45 = vrot.slane %v22338_v4, 5  ;;  %v28978_v41 = vcombine.low %v24825_v14, %v28977_v20  ;;  %v12661_v33 = vshrl.u32 %v18627_v13, 16  ;;  %v22339_v20 = vld [vmem:[%s22742_s13 + $0x1ac] sm:$0xf] }
 0x33e   : > { %v12664_v32 = vshll.u32 %v18627_v13, 16  ;;  %v12670_v10 = vshll.u32 %v18628_v31, 16  ;;  %v12674_v11 = vshrl.u32 %v18628_v31, 16  ;;  %v12629_v59 = vsel %vm22764_vm4, %v12624_v22, %v25162_v63  ;;  %v22049_v22 = vld [vmem:[%s22742_s13 + $0x280] sm:$0xff]  }
 0x33f   : > { %v12643_v16 = vor.u32 %v12642_v49, %v12638_v44  ;;  %v17466_v14 = vrot.slane %v3786_v7, 9  ;;  %v12680_v21 = vshll.u32 %v18629_v52, 16  ;;  %v12684_v30 = vshrl.u32 %v18629_v52, 16 }
 0x340   : > { %v12690_v3 = vshll.u32 %v18630_v61, 16  ;;  %v12639_v13 = vsel %vm22764_vm4, %v12634_v51, %v12638_v44  ;;  %v12653_v31 = vor.u32 %v12652_v57, %v25236_v55  ;;  %v4141_v4 = vrot.slane %v4139_v45, 4  ;;  %v18632_v57 = vld [vmem:[%s22742_s13 + $0xa0] sm:$0xf] }
 0x341   : > { %19988 = vmatmul.mubr.msk.bf16.gmra.mrb[48].mxu1 %vm1963_vm3, %v28976_v48  ;;  %v22048_v48 = vld [vmem:[%s22742_s13 + $0x274] sm:$0xff]   ;;  %v4142_v63 = vrot.slane %v22339_v20, 5  ;;  %v25258_v49 = vrot.slane %v12670_v10, 5  ;;  %v12676_v7 = vrot.slane %v12674_v11, 4  ;;  %v25260_v52 = vcombine.low %v12605_v62, %v12615_v0  ;;  %v18633_v10 = vld [vmem:[%s22742_s13 + $0xa4] sm:$0xf] }
 0x342   : > { %20572 = vmatmul.mubr.msk.bf16.gmra.mrb[112].mxu0 %vm1963_vm3, %v22046_v46  ;;  %19991 = vmatprep.mubr.msk.bf16.mxu1 %vm1963_vm3, %v28978_v41  ;;  %v25250_v46 = vsel %vm23271_vm7, %v4134_v18, %v4135_v47  ;;  %v12663_v18 = vrot.slane %v12661_v33, 4  ;;  %v12666_v47 = vrot.slane %v12664_v32, 5  ;;  %v12644_v51 = vrot.slane %v12643_v16, 4  ;;  %v28980_v62 = vld [vmem:[#allocation8_spill] sm:$0xff] }
 0x343   : > { %20575 = vmatprep.mubr.msk.bf16.mxu0 %vm1963_vm3, %v22047_v60  ;;  %28979 = vst [vmem:[#allocation20_spill] sm:$0xff] %v25250_v46  ;;  %v12694_v60 = vshrl.u32 %v18630_v61, 16  ;;  %v25267_v41 = vrot.slane %v12680_v21, 5  ;;  %v12686_v20 = vrot.slane %v12684_v30, 4  ;;  %v25269_v33 = vrot.slane %v12690_v3, 5  ;;  %v28983_v3 = vld [vmem:[#allocation9_spill] sm:$0xff] }
 0x344   : > { %v28981_v0 = vcombine.low %v24847_v36, %v28980_v62  ;;  %v25277_v11 = vcombine.low %v12629_v59, %v12639_v13  ;;  %v12654_v44 = vrot.slane %v12653_v31, 4  ;;  %v12658_v16 = vrot.slane %v12656_v24, 5  ;;  %v18631_v30 = vld [vmem:[%s22742_s13 + $0x9c] sm:$0x1] }
 0x345   : > { %v12696_v32 = vrot.slane %v12694_v60, 4  ;;  %v25281_v21 = vsel %vm23271_vm7, %v17466_v14, %v4139_v45  ;;  %v28984_v61 = vld [vmem:[#allocation10_spill] sm:$0xff]  ;;  %v25291_v36 = vsel %vm23271_vm7, %v4141_v4, %v4142_v63  ;;  %v12667_v59 = vor.u32 %v12666_v47, %v12663_v18  ;;  %v22340_v45 = vld [vmem:[%s22742_s13 + $0x1b0] sm:$0xf]  ;;  %v22050_v47 = vld [vmem:[%s22742_s13 + $0x288] sm:$0xff]  }
 0x346   : > { %28982 = vst [vmem:[#allocation7_spill] sm:$0xff] %v25281_v21  ;;  %v28985_v60 = vcombine.low %v28983_v3, %v28984_v61  ;;  %28986 = vst [vmem:[#allocation8_spill] sm:$0xff] %v25291_v36  ;;  %v12677_v24 = vor.u32 %v12676_v7, %v25258_v49  ;;  %v4145_v14 = vrot.slane %v22340_v45, 5  ;;  %v12708_v13 = vshll.u32 %v18632_v57, 16  ;;  %v22051_v7 = vld [vmem:[%s22742_s13 + $0x294] sm:$0xff]   ;;  %v28987_v36 = vld [vmem:[#allocation11_spill] sm:$0xff] }
 0x347   : > { %v12714_v31 = vshll.u32 %v18633_v10, 16  ;;  %v12718_v61 = vshrl.u32 %v18633_v10, 16  ;;  %v12687_v62 = vor.u32 %v12686_v20, %v25267_v41  ;;  %v12697_v4 = vor.u32 %v12696_v32, %v25269_v33  ;;  %v3787_v3 = vld [vmem:[%s22742_s13 + $0x1b8] sm:$0xe]  ;;  %v28988_v21 = vld [vmem:[#allocation21_spill] sm:$0xff] }
 0x348   : > { %v12700_v18 = vshll.u32 %v18631_v30, 16  ;;  %v4144_v10 = vrot.slane %v4142_v63, 4  ;;  %v4147_v20 = vrot.slane %v4145_v14, 4  ;;  %v4148_v32 = vrot.slane %v22342_v2, 5  ;;  %v18634_v30 = vld [vmem:[%s22742_s13 + $0xa8] sm:$0xf] }
 0x349   : > { %19992 = vmatmul.mubr.msk.bf16.gmra.mrb[52].mxu1 %vm1963_vm3, %v28981_v0  ;;  %v12659_v0 = vsel %vm22764_vm4, %v12654_v44, %v12658_v16  ;;  %v12710_v28 = vrot.slane %v12708_v13, 5  ;;  %v25310_v15 = vrot.slane %v12714_v31, 5  ;;  %v12720_v44 = vrot.slane %v12718_v61, 4  ;;  %v18635_v16 = vld [vmem:[%s22742_s13 + $0xac] sm:$0xf] }
 0x34a   : > { %20576 = vmatmul.mubr.msk.bf16.gmra.mrb[116].mxu0 %vm1963_vm3, %v22048_v48  ;;  %19995 = vmatprep.mubr.msk.bf16.mxu1 %vm1963_vm3, %v28985_v60  ;;  %v12705_v48 = vshrl.u32 %v18632_v57, 16  ;;  %v22341_v60 = vld [vmem:[%s22742_s13 + $0x1bc] sm:$0xf]  ;;  %v12688_v58 = vrot.slane %v12687_v62, 4  ;;  %v12698_v46 = vrot.slane %v12697_v4, 4  ;;  %v12702_v57 = vrot.slane %v12700_v18, 5 }
 0x34b   : > { %20579 = vmatprep.mubr.msk.bf16.mxu0 %vm1963_vm3, %v22049_v22  ;;  %v12649_v22 = vsel %vm22764_vm4, %v12644_v51, %v25236_v55  ;;  %v4152_v45 = vrot.slane %v22341_v60, 5  ;;  %v12668_v55 = vrot.slane %v12667_v59, 4  ;;  %v12678_v51 = vrot.slane %v12677_v24, 4  ;;  %v22343_v59 = vld [vmem:[%s22742_s13 + $0x1c0] sm:$0xf] }
 0x34c   : > { %v12707_v19 = vrot.slane %v12705_v48, 4  ;;  %v17467_v63 = vrot.slane %v3787_v3, 9  ;;  %v28989_v60 = vcombine.low %v28987_v36, %v28988_v21  ;;  %v4155_v24 = vrot.slane %v22343_v59, 5  ;;  %v28991_v59 = vld [vmem:[#allocation12_spill] sm:$0xff] }
 0x34d   : > { %v4154_v2 = vrot.slane %v4152_v45, 4  ;;  %v12724_v48 = vshll.u32 %v18634_v30, 16  ;;  %v12728_v13 = vshrl.u32 %v18634_v30, 16  ;;  %v28990_v31 = vcombine.low %v24903_v37, %v24908_v6 }
 0x34e   : > { %v25324_v21 = vcombine.low %v12649_v22, %v12659_v0  ;;  %v25328_v36 = vsel %vm23271_vm7, %v4144_v10, %v4145_v14  ;;  %v12734_v61 = vshll.u32 %v18635_v16, 16  ;;  %v12738_v62 = vshrl.u32 %v18635_v16, 16  ;;  %v18637_v22 = vld [vmem:[%s22742_s13 + $0xb4] sm:$0xf] }
 0x34f   : > { %v12673_v4 = vsel %vm22764_vm4, %v12668_v55, %v25258_v49  ;;  %v25335_v37 = vsel %vm23271_vm7, %v4147_v20, %v4148_v32  ;;  %v12711_v6 = vor.u32 %v12710_v28, %v12707_v19  ;;  %v12721_v18 = vor.u32 %v12720_v44, %v25310_v15  ;;  %v18638_v28 = vld [vmem:[%s22742_s13 + $0xb8] sm:$0xf]  ;;  %v22052_v19 = vld [vmem:[%s22742_s13 + $0x29c] sm:$0xff]   ;;  %v18636_v20 = vld [vmem:[%s22742_s13 + $0xb0] sm:$0x1] }
 0x350   : > { %v12683_v14 = vsel %vm22764_vm4, %v12678_v51, %v25267_v41  ;;  %v12703_v49 = vsel %vm22764_vm4, %v12698_v46, %v12702_v57  ;;  %v25355_v0 = vsel %vm23271_vm7, %v4154_v2, %v4155_v24  ;;  %v12726_v10 = vrot.slane %v12724_v48, 5  ;;  %v22344_v41 = vld [vmem:[%s22742_s13 + $0x1c4] sm:$0xf]  ;;  %v18639_v2 = vld [vmem:[%s22742_s13 + $0xbc] sm:$0xf]  ;;  %v28992_v48 = vld [vmem:[#allocation13_spill] sm:$0xff] }
 0x351   : > { %19996 = vmatmul.mubr.msk.bf16.gmra.mrb[56].mxu1 %vm1963_vm3, %v28989_v60  ;;  %v4158_v3 = vrot.slane %v22344_v41, 5  ;;  %v12730_v55 = vrot.slane %v12728_v13, 4  ;;  %v12749_v51 = vshrl.u32 %v18637_v22, 16  ;;  %v12752_v46 = vshll.u32 %v18637_v22, 16  ;;  %v28994_v22 = vld [vmem:[#allocation14_spill] sm:$0xff] }
 0x352   : > { %20580 = vmatmul.mubr.msk.bf16.gmra.mrb[120].mxu0 %vm1963_vm3, %v22050_v47  ;;  %19999 = vmatprep.mubr.msk.bf16.mxu1 %vm1963_vm3, %v28990_v31  ;;  %v12693_v47 = vsel %vm22764_vm4, %v12688_v58, %v25269_v33  ;;  %v25358_v58 = vrot.slane %v12734_v61, 5  ;;  %v12740_v33 = vrot.slane %v12738_v62, 4  ;;  %v12712_v57 = vrot.slane %v12711_v6, 4  ;;  %v22345_v62 = vld [vmem:[%s22742_s13 + $0x1c8] sm:$0x1] }
 0x353   : > { %20583 = vmatprep.mubr.msk.bf16.mxu0 %vm1963_vm3, %v22051_v7  ;;  %v25349_v7 = vsel %vm23271_vm7, %v17467_v63, %v4152_v45  ;;  %v12722_v45 = vrot.slane %v12721_v18, 4  ;;  %v12758_v32 = vshll.u32 %v18638_v28, 16  ;;  %v12762_v30 = vshrl.u32 %v18638_v28, 16  ;;  %v18640_v18 = vld [vmem:[%s22742_s13 + $0xc0] sm:$0xf] }
 0x354   : > { %v25361_v44 = vcombine.low %v12673_v4, %v12683_v14  ;;  %v25365_v63 = vcombine.low %v12693_v47, %v12703_v49  ;;  %v28993_v13 = vcombine.low %v28991_v59, %v28992_v48  ;;  %v4157_v31 = vrot.slane %v4155_v24, 4  ;;  %v28995_v14 = vld [vmem:[#allocation15_spill] sm:$0xff]  ;;  %v28997_v49 = vld [vmem:[#allocation6_spill] sm:$0xff] }
 0x355   : > { %v4160_v61 = vrot.slane %v4158_v3, 4  ;;  %v4161_v4 = vrot.slane %v22345_v62, 5  ;;  %v12731_v6 = vor.u32 %v12730_v55, %v12726_v10  ;;  %v28996_v47 = vcombine.low %v28994_v22, %v28995_v14  ;;  %v3788_v62 = vld [vmem:[%s22742_s13 + $0x1cc] sm:$0xe] }
 0x356   : > { %v12741_v28 = vor.u32 %v12740_v33, %v25358_v58  ;;  %v12744_v41 = vshll.u32 %v18636_v20, 16  ;;  %v12754_v24 = vrot.slane %v12752_v46, 5  ;;  %v12717_v59 = vsel %vm22764_vm4, %v12712_v57, %v25310_v15 }
 0x357   : > { %v12727_v55 = vsel %vm22764_vm4, %v12722_v45, %v12726_v10  ;;  %v25389_v48 = vrot.slane %v12758_v32, 5  ;;  %v12768_v22 = vshll.u32 %v18639_v2, 16  ;;  %v12772_v14 = vshrl.u32 %v18639_v2, 16  ;;  %v22346_v10 = vld [vmem:[%s22742_s13 + $0x1d0] sm:$0xf] }
 0x358   : > { %v12778_v33 = vshll.u32 %v18640_v18, 16  ;;  %v25398_v15 = vsel %vm23271_vm7, %v4160_v61, %v4161_v4  ;;  %v12732_v46 = vrot.slane %v12731_v6, 4  ;;  %v4165_v57 = vrot.slane %v22346_v10, 5  ;;  %v22347_v32 = vld [vmem:[%s22742_s13 + $0x1d4] sm:$0xf] }
 0x359   : > { %20000 = vmatmul.mubr.msk.bf16.gmra.mrb[60].mxu1 %vm1963_vm3, %v28993_v13  ;;  %v12764_v13 = vrot.slane %v12762_v30, 4  ;;  %28999 = vst [vmem:[#allocation10_spill] sm:$0xff] %v25398_v15  ;;  %v12742_v45 = vrot.slane %v12741_v28, 4  ;;  %v12746_v20 = vrot.slane %v12744_v41, 5  ;;  %v4168_v30 = vrot.slane %v22347_v32, 5  ;;  %v29001_v32 = vld [vmem:[#allocation16_spill] sm:$0xff] }
 0x35a   : > { %20584 = vmatmul.mubr.msk.bf16.gmra.mrb[124].mxu0 %vm1963_vm3, %v22052_v19  ;;  %20003 = vmatprep.mubr.msk.bf16.mxu1 %vm1963_vm3, %v28996_v47  ;;  %v12751_v19 = vrot.slane %v12749_v51, 4  ;;  %v12782_v47 = vshrl.u32 %v18640_v18, 16  ;;  %v25394_v51 = vsel %vm23271_vm7, %v4157_v31, %v4158_v3  ;;  %v17468_v18 = vrot.slane %v3788_v62, 9  ;;  %v22348_v31 = vld [vmem:[%s22742_s13 + $0x1d8] sm:$0xf] }
 0x35b   : > { %20589 = vmatprep.mubr.msk.bf16.mxu0 %vm1963_vm3, %v28997_v49  ;;  %28998 = vst [vmem:[#allocation9_spill] sm:$0xff] %v25394_v51  ;;  %v25402_v49 = vcombine.low %v12717_v59, %v12727_v55  ;;  %v12765_v3 = vor.u32 %v12764_v13, %v25389_v48  ;;  %v4171_v60 = vrot.slane %v22348_v31, 5  ;;  %v18641_v61 = vld [vmem:[%s22742_s13 + $0xc4] sm:$0x1]  ;;  %v25407_v4 = vrot.slane %v12768_v22, 5 }
 0x35c   : > { %v12755_v2 = vor.u32 %v12754_v24, %v12751_v19  ;;  %v12774_v6 = vrot.slane %v12772_v14, 4  ;;  %v25409_v10 = vrot.slane %v12778_v33, 5  ;;  %v12784_v28 = vrot.slane %v12782_v47, 4  ;;  %v3789_v41 = vld [vmem:[%s22742_s13 + $0x1e0] sm:$0xe]  ;;  %v29002_v19 = vld [vmem:[#allocation17_spill] sm:$0xff] }
 0x35d   : > { %29000 = vst [vmem:[#allocation11_spill] sm:$0xff] %v25402_v49  ;;  %v29003_v24 = vcombine.low %v29001_v32, %v29002_v19  ;;  %v12737_v55 = vsel %vm22764_vm4, %v12732_v46, %v25358_v58  ;;  %v4167_v13 = vrot.slane %v4165_v57, 4  ;;  %v22349_v62 = vld [vmem:[%s22742_s13 + $0x1e4] sm:$0xf]  ;;  %v18642_v14 = vld [vmem:[%s22742_s13 + $0xc8] sm:$0xf] }
 0x35e   : > { %v4178_v22 = vrot.slane %v22349_v62, 5  ;;  %v29004_v33 = vld [vmem:[#allocation18_spill] sm:$0xff]  ;;  %v29005_v47 = vld [vmem:[#allocation19_spill] sm:$0xff]  ;;  %v12756_v32 = vrot.slane %v12755_v2, 4  ;;  %v4170_v19 = vrot.slane %v4168_v30, 4  ;;  %v12766_v46 = vrot.slane %v12765_v3, 4 }
 0x35f   : > { %v29006_v31 = vcombine.low %v29004_v33, %v29005_v47  ;;  %v18643_v58 = vld [vmem:[%s22742_s13 + $0xcc] sm:$0xf]  ;;  %v4173_v62 = vrot.slane %v4171_v60, 4  ;;  %v12788_v16 = vshll.u32 %v18641_v61, 16  ;;  %v12775_v15 = vor.u32 %v12774_v6, %v25407_v4  ;;  %v22351_v47 = vld [vmem:[%s22742_s13 + $0x1e8] sm:$0xf] }
 0x360   : > { %v12785_v33 = vor.u32 %v12784_v28, %v25409_v10  ;;  %v12796_v2 = vshll.u32 %v18642_v14, 16  ;;  %v12806_v51 = vshrl.u32 %v18643_v58, 16  ;;  %v25447_v3 = vsel %vm23271_vm7, %v4167_v13, %v4168_v30  ;;  %v18644_v30 = vld [vmem:[%s22742_s13 + $0xd0] sm:$0xf]  ;;  %v18645_v13 = vld [vmem:[%s22742_s13 + $0xd4] sm:$0xf] }
 0x361   : > { %20004 = vmatmul.mubr.msk.bf16.gmra.mrb[64].mxu1 %vm1963_vm3, %v29003_v24  ;;  %v22350_v24 = vld [vmem:[%s22742_s13 + $0x1dc] sm:$0x1]  ;;  %v25451_v61 = vsel %vm23271_vm7, %v4170_v19, %v4171_v60  ;;  %v12761_v6 = vsel %vm22764_vm4, %v12756_v32, %v25389_v48  ;;  %v12771_v28 = vsel %vm22764_vm4, %v12766_v46, %v25407_v4  ;;  %v29007_v4 = vcombine.low %v25025_v34, %v25029_v12 }
 0x362   : > { %20590 = vmatmul.mubr.msk.bf16.vlgmr.msra.gmra.mrb[0].mxu0 %vm1963_vm3, %v25048_v54  ;;  %20007 = vmatprep.mubr.msk.bf16.mxu1 %vm1963_vm3, %v29006_v31  ;;  %v12747_v54 = vsel %vm22764_vm4, %v12742_v45, %v12746_v20  ;;  %v4174_v59 = vrot.slane %v22350_v24, 5  ;;  %v4181_v31 = vrot.slane %v22351_v47, 5  ;;  %v12793_v45 = vshrl.u32 %v18642_v14, 16  ;;  %v18647_v19 = vld [vmem:[%s22742_s13 + $0xdc] sm:$0xf] }
 0x363   : > { %20718 = vmatpush3.bf16.msra.mxu0 %v25171_v23  ;;  %20593 = vmatprep.mubr.msk.bf16.mxu0 %vm1963_vm3, %v25071_v43  ;;  %v17469_v23 = vrot.slane %v3789_v41, 9  ;;  %v4180_v20 = vrot.slane %v4178_v22, 4  ;;  %v12802_v24 = vshll.u32 %v18643_v58, 16  ;;  %v25439_v49 = vcombine.low %v12737_v55, %v12747_v54 }
 0x364   : > { %v25443_v43 = vsel %vm23271_vm7, %v17468_v18, %v4165_v57  ;;  %v25461_v57 = vsel %vm23271_vm7, %v4173_v62, %v4174_v59  ;;  %v25463_v18 = vrot.slane %v12788_v16, 5  ;;  %v25466_v41 = vrot.slane %v12775_v15, 4 }
 0x365   : > { %v25468_v60 = vrot.slane %v12785_v33, 4  ;;  %v25472_v55 = vsel %vm23271_vm7, %v17469_v23, %v4178_v22  ;;  %v12795_v48 = vrot.slane %v12793_v45, 4  ;;  %v25483_v16 = vsel %vm23271_vm7, %v4180_v20, %v4181_v31  ;;  %v18648_v33 = vld [vmem:[%s22742_s13 + $0xe0] sm:$0xf]  ;;  %v18649_v20 = vld [vmem:[%s22742_s13 + $0xe4] sm:$0xf] }
 0x366   : > { %v12798_v15 = vrot.slane %v12796_v2, 5  ;;  %v25485_v59 = vrot.slane %v12802_v24, 5  ;;  %v12808_v22 = vrot.slane %v12806_v51, 4  ;;  %v29008_v14 = vcombine.low %v25063_v17, %v25067_v29 }
 0x367   : > { %v17524_v34 = vcombine.low %v25443_v43, %v25447_v3  ;;  %v12812_v12 = vshll.u32 %v18644_v30, 16  ;;  %v12816_v32 = vshrl.u32 %v18644_v30, 16  ;;  %v25497_v51 = vcombine.low %v12761_v6, %v12771_v28  ;;  %v18650_v6 = vld [vmem:[%s22742_s13 + $0xe8] sm:$0xf]  ;;  %v22353_v30 = vld [vmem:[%s22742_s13 + $0x1f0] sm:$0x1] }
 0x368   : > { %v17525_v17 = vcombine.low %v25451_v61, %v25461_v57  ;;  %v12822_v29 = vshll.u32 %v18645_v13, 16  ;;  %v12826_v58 = vshrl.u32 %v18645_v13, 16  ;;  %v12791_v46 = vsel %vm22764_vm4, %v25468_v60, %v25463_v18 }
 0x369   : > { %20008 = vmatmul.mubr.msk.bf16.gmra.mrb[68].mxu1 %vm1963_vm3, %v29007_v4  ;;  %v17526_v62 = vcombine.low %v25472_v55, %v25483_v16  ;;  %v4183_v23 = vrot.slane %v4181_v31, 4  ;;  %v12799_v47 = vor.u32 %v12798_v15, %v12795_v48  ;;  %v12809_v45 = vor.u32 %v12808_v22, %v25485_v59  ;;  %v18646_v4 = vld [vmem:[%s22742_s13 + $0xd8] sm:$0x1]  ;;  %v22368_v16 = vld [vmem:[%s22742_s13 + $0x23c] sm:$0xf] }
 0x36a   : > { %20594 = vmatmul.mubr.msk.bf16.gmra.mrb[4].mxu0 %vm1963_vm3, %v25107_v27  ;;  %20011 = vmatprep.mubr.msk.bf16.mxu1 %vm1963_vm3, %v29008_v14  ;;  %v22352_v27 = vld [vmem:[%s22742_s13 + $0x1ec] sm:$0xf]  ;;  %v12837_v2 = vshrl.u32 %v18647_v19, 16  ;;  %v12840_v24 = vshll.u32 %v18647_v19, 16  ;;  %v25515_v28 = vrot.slane %v12812_v12, 5  ;;  %v12818_v13 = vrot.slane %v12816_v32, 4 }
 0x36b   : > { %20597 = vmatprep.mubr.msk.bf16.mxu0 %vm1963_vm3, %v25117_v25  ;;  %v4184_v54 = vrot.slane %v22352_v27, 5  ;;  %v12781_v25 = vsel %vm22764_vm4, %v25466_v41, %v25409_v10  ;;  %v4187_v41 = vrot.slane %v22353_v30, 5  ;;  %v25519_v18 = vrot.slane %v12822_v29, 5 }
 0x36c   : > { %v12828_v60 = vrot.slane %v12826_v58, 4  ;;  %v12846_v14 = vshll.u32 %v18648_v33, 16  ;;  %v12850_v31 = vshrl.u32 %v18648_v33, 16  ;;  %v12856_v27 = vshll.u32 %v18649_v20, 16 }
 0x36d   : > { %v4186_v10 = vrot.slane %v4184_v54, 4  ;;  %v12860_v48 = vshrl.u32 %v18649_v20, 16  ;;  %v12866_v15 = vshll.u32 %v18650_v6, 16  ;;  %v12870_v22 = vshrl.u32 %v18650_v6, 16 }
 0x36e   : > { %v29009_v12 = vcombine.low %v25111_v26, %v25115_v40  ;;  %v25527_v32 = vrot.slane %v12799_v47, 4  ;;  %v25531_v19 = vsel %vm23271_vm7, %v4183_v23, %v4184_v54  ;;  %v12839_v29 = vrot.slane %v12837_v2, 4  ;;  %v3790_v47 = vld [vmem:[%s22742_s13 + $0x1f4] sm:$0xe] }
 0x36f   : > { %v12842_v58 = vrot.slane %v12840_v24, 5  ;;  %v29010_v33 = vcombine.low %v25143_v53, %v25154_v1  ;;  %v25539_v26 = vrot.slane %v12809_v45, 4  ;;  %v25543_v40 = vsel %vm23271_vm7, %v4186_v10, %v4187_v41  ;;  %v22354_v53 = vld [vmem:[%s22742_s13 + $0x1f8] sm:$0xf]  ;;  %v22355_v41 = vld [vmem:[%s22742_s13 + $0x1fc] sm:$0xf] }
 0x370   : > { %v12832_v54 = vshll.u32 %v18646_v4, 16  ;;  %v12829_v23 = vor.u32 %v12828_v60, %v25519_v18  ;;  %v4191_v1 = vrot.slane %v22354_v53, 5  ;;  %v25549_v20 = vrot.slane %v12846_v14, 5  ;;  %v18651_v60 = vld [vmem:[%s22742_s13 + $0xec] sm:$0x1] }
 0x371   : > { %20012 = vmatmul.mubr.msk.bf16.gmra.mrb[72].mxu1 %vm1963_vm3, %v29009_v12  ;;  %v25551_v45 = vrot.slane %v12856_v27, 5  ;;  %v12862_v2 = vrot.slane %v12860_v48, 4  ;;  %v25553_v24 = vrot.slane %v12866_v15, 5  ;;  %v12872_v6 = vrot.slane %v12870_v22, 4  ;;  %v18652_v48 = vld [vmem:[%s22742_s13 + $0xf0] sm:$0xf] }
 0x372   : > { %20598 = vmatmul.mubr.msk.bf16.gmra.mrb[8].mxu0 %vm1963_vm3, %v25149_v35  ;;  %20015 = vmatprep.mubr.msk.bf16.mxu1 %vm1963_vm3, %v29010_v33  ;;  %v12819_v35 = vor.u32 %v12818_v13, %v25515_v28  ;;  %v25555_v10 = vcombine.low %v12781_v25, %v12791_v46  ;;  %v12805_v30 = vsel %vm22764_vm4, %v25527_v32, %v25485_v59  ;;  %v4194_v13 = vrot.slane %v22355_v41, 5  ;;  %v22356_v46 = vld [vmem:[%s22742_s13 + $0x200] sm:$0xf]  ;;  %v18653_v32 = vld [vmem:[%s22742_s13 + $0xf4] sm:$0xf] }
 0x373   : > { %20601 = vmatprep.mubr.msk.bf16.mxu0 %vm1963_vm3, %v25201_v56  ;;  %v12852_v56 = vrot.slane %v12850_v31, 4  ;;  %v12843_v4 = vor.u32 %v12842_v58, %v12839_v29  ;;  %v12815_v14 = vsel %vm22764_vm4, %v25539_v26, %v25515_v28  ;;  %v17470_v25 = vrot.slane %v3790_v47, 9 }
 0x374   : > { %v4197_v27 = vrot.slane %v22356_v46, 5  ;;  %v12820_v15 = vrot.slane %v12819_v35, 4  ;;  %v12834_v22 = vrot.slane %v12832_v54, 5  ;;  %v4193_v12 = vrot.slane %v4191_v1, 4 }
 0x375   : > { %v12853_v59 = vor.u32 %v12852_v56, %v25549_v20  ;;  %v12830_v29 = vrot.slane %v12829_v23, 4  ;;  %v12863_v58 = vor.u32 %v12862_v2, %v25551_v45  ;;  %v12873_v33 = vor.u32 %v12872_v6, %v25553_v24 }
 0x376   : > { %v12876_v28 = vshll.u32 %v18651_v60, 16  ;;  %v29011_v26 = vcombine.low %v25180_v38, %v25189_v8  ;;  %v12844_v35 = vrot.slane %v12843_v4, 4  ;;  %v4196_v54 = vrot.slane %v4194_v13, 4  ;;  %v22357_v8 = vld [vmem:[%s22742_s13 + $0x204] sm:$0x1] }
 0x377   : > { %v12881_v47 = vshrl.u32 %v18652_v48, 16  ;;  %v12884_v53 = vshll.u32 %v18652_v48, 16  ;;  %v29012_v23 = vcombine.low %v25212_v42, %v25223_v50  ;;  %v4199_v38 = vrot.slane %v4197_v27, 4  ;;  %v22358_v50 = vld [vmem:[%s22742_s13 + $0x20c] sm:$0xf] }
 0x378   : > { %v4200_v56 = vrot.slane %v22357_v8, 5  ;;  %v12890_v2 = vshll.u32 %v18653_v32, 16  ;;  %v12894_v6 = vshrl.u32 %v18653_v32, 16  ;;  %v25593_v41 = vsel %vm23271_vm7, %v17470_v25, %v4191_v1  ;;  %v3791_v32 = vld [vmem:[%s22742_s13 + $0x208] sm:$0xe] }
 0x379   : > { %20016 = vmatmul.mubr.msk.bf16.gmra.mrb[76].mxu1 %vm1963_vm3, %v29011_v26  ;;  %v12854_v42 = vrot.slane %v12853_v59, 4  ;;  %v4204_v4 = vrot.slane %v22358_v50, 5  ;;  %v12864_v60 = vrot.slane %v12863_v58, 4  ;;  %v12874_v46 = vrot.slane %v12873_v33, 4  ;;  %v18654_v1 = vld [vmem:[%s22742_s13 + $0xf8] sm:$0xf] }
 0x37a   : > { %20602 = vmatmul.mubr.msk.bf16.gmra.mrb[12].mxu0 %vm1963_vm3, %v25260_v52  ;;  %20019 = vmatprep.mubr.msk.bf16.mxu1 %vm1963_vm3, %v29012_v23  ;;  %v12825_v52 = vsel %vm22764_vm4, %v12820_v15, %v25519_v18  ;;  %v12878_v48 = vrot.slane %v12876_v28, 5  ;;  %v12835_v26 = vsel %vm22764_vm4, %v12830_v29, %v12834_v22  ;;  %v25605_v18 = vsel %vm23271_vm7, %v4196_v54, %v4197_v27  ;;  %v22359_v33 = vld [vmem:[%s22742_s13 + $0x210] sm:$0xf]  ;;  %v29016_v8 = vld [vmem:[#allocation8_spill] sm:$0xff] }
 0x37b   : > { %20605 = vmatprep.mubr.msk.bf16.mxu0 %vm1963_vm3, %v25277_v11  ;;  %v25598_v11 = vsel %vm23271_vm7, %v4193_v12, %v4194_v13  ;;  %v12883_v25 = vrot.slane %v12881_v47, 4  ;;  %v12886_v15 = vrot.slane %v12884_v53, 5  ;;  %v12849_v13 = vsel %vm22764_vm4, %v12844_v35, %v25549_v20  ;;  %v29013_v53 = vld [vmem:[#allocation20_spill] sm:$0xff] }
 0x37c   : > { %v25613_v12 = vsel %vm23271_vm7, %v4199_v38, %v4200_v56  ;;  %v25615_v59 = vrot.slane %v12890_v2, 5  ;;  %v12896_v58 = vrot.slane %v12894_v6, 4  ;;  %v12859_v27 = vsel %vm22764_vm4, %v12854_v42, %v25551_v45  ;;  %v29015_v38 = vld [vmem:[#allocation7_spill] sm:$0xff]  ;;  %v22360_v6 = vld [vmem:[%s22742_s13 + $0x214] sm:$0xf] }
 0x37d   : > { %v17471_v22 = vrot.slane %v3791_v32, 9  ;;  %v4206_v29 = vrot.slane %v4204_v4, 4  ;;  %v4207_v28 = vrot.slane %v22359_v33, 5  ;;  %v25621_v54 = vcombine.low %v12805_v30, %v12815_v14  ;;  %v18655_v14 = vld [vmem:[%s22742_s13 + $0xfc] sm:$0xf] }
 0x37e   : > { %v12869_v20 = vsel %vm22764_vm4, %v12864_v60, %v25553_v24  ;;  %v12879_v35 = vsel %vm22764_vm4, %v12874_v46, %v12878_v48  ;;  %v12900_v47 = vshll.u32 %v18654_v1, 16  ;;  %v29014_v23 = vcombine.low %v25227_v5, %v29013_v53  ;;  %v18657_v42 = vld [vmem:[%s22742_s13 + $0x104] sm:$0xf]  ;;  %v18656_v46 = vld [vmem:[%s22742_s13 + $0x100] sm:$0x1] }
 0x37f   : > { %v25634_v45 = vcombine.low %v12825_v52, %v12835_v26  ;;  %v12887_v24 = vor.u32 %v12886_v15, %v12883_v25  ;;  %v29017_v56 = vcombine.low %v29015_v38, %v29016_v8  ;;  %v25645_v5 = vcombine.low %v12849_v13, %v12859_v27  ;;  %v18658_v32 = vld [vmem:[%s22742_s13 + $0x108] sm:$0xf]  ;;  %v22361_v33 = vld [vmem:[%s22742_s13 + $0x218] sm:$0x1] }
 0x380   : > { %v12897_v2 = vor.u32 %v12896_v58, %v25615_v59  ;;  %v4210_v52 = vrot.slane %v22360_v6, 5  ;;  %v25652_v50 = vcombine.low %v12869_v20, %v12879_v35  ;;  %v25656_v60 = vsel %vm23271_vm7, %v17471_v22, %v4204_v4  ;;  %v18659_v58 = vld [vmem:[%s22742_s13 + $0x10c] sm:$0xf] }
 0x381   : > { %20020 = vmatmul.mubr.msk.bf16.gmra.mrb[80].mxu1 %vm1963_vm3, %v29014_v23  ;;  %v12904_v48 = vshrl.u32 %v18654_v1, 16  ;;  %v12902_v26 = vrot.slane %v12900_v47, 5  ;;  %v4209_v25 = vrot.slane %v4207_v28, 4  ;;  %v12910_v15 = vshll.u32 %v18655_v14, 16  ;;  %v18660_v23 = vld [vmem:[%s22742_s13 + $0x110] sm:$0xf] }
 0x382   : > { %20606 = vmatmul.mubr.msk.bf16.gmra.mrb[16].mxu0 %vm1963_vm3, %v25324_v21  ;;  %20023 = vmatprep.mubr.msk.bf16.mxu1 %vm1963_vm3, %v29017_v56  ;;  %v12914_v13 = vshrl.u32 %v18655_v14, 16  ;;  %v12888_v27 = vrot.slane %v12887_v24, 4  ;;  %v4213_v20 = vrot.slane %v22361_v33, 5  ;;  %v12925_v35 = vshrl.u32 %v18657_v42, 16 }
 0x383   : > { %20609 = vmatprep.mubr.msk.bf16.mxu0 %vm1963_vm3, %v25361_v44  ;;  %v25660_v44 = vsel %vm23271_vm7, %v4206_v29, %v4207_v28  ;;  %v12928_v53 = vshll.u32 %v18657_v42, 16  ;;  %v12898_v4 = vrot.slane %v12897_v2, 4  ;;  %v4212_v22 = vrot.slane %v4210_v52, 4 }
 0x384   : > { %v12934_v38 = vshll.u32 %v18658_v32, 16  ;;  %v12938_v8 = vshrl.u32 %v18658_v32, 16  ;;  %v12906_v29 = vrot.slane %v12904_v48, 4  ;;  %v12920_v56 = vshll.u32 %v18656_v46, 16 }
 0x385   : > { %v12944_v6 = vshll.u32 %v18659_v58, 16  ;;  %v12948_v1 = vshrl.u32 %v18659_v58, 16  ;;  %v25667_v47 = vrot.slane %v12910_v15, 5  ;;  %v12916_v28 = vrot.slane %v12914_v13, 4  ;;  %v18661_v58 = vld [vmem:[%s22742_s13 + $0x114] sm:$0x1] }
 0x386   : > { %v12954_v14 = vshll.u32 %v18660_v23, 16  ;;  %v12958_v21 = vshrl.u32 %v18660_v23, 16  ;;  %v29018_v24 = vcombine.low %v25328_v36, %v25335_v37  ;;  %v25679_v42 = vsel %vm23271_vm7, %v4209_v25, %v4210_v52  ;;  %v29020_v36 = vld [vmem:[#allocation11_spill] sm:$0xff]  ;;  %v3792_v52 = vld [vmem:[%s22742_s13 + $0x21c] sm:$0xe] }
 0x387   : > { %v12927_v46 = vrot.slane %v12925_v35, 4  ;;  %v12930_v48 = vrot.slane %v12928_v53, 5  ;;  %v29019_v32 = vcombine.low %v25349_v7, %v25355_v0  ;;  %v12893_v37 = vsel %vm22764_vm4, %v12888_v27, %v25615_v59 }
 0x388   : > { %v25693_v25 = vrot.slane %v12934_v38, 5  ;;  %v12940_v15 = vrot.slane %v12938_v8, 4  ;;  %v25697_v7 = vsel %vm23271_vm7, %v4212_v22, %v4213_v20  ;;  %v12907_v0 = vor.u32 %v12906_v29, %v12902_v26  ;;  %v22363_v20 = vld [vmem:[%s22742_s13 + $0x224] sm:$0xf]  ;;  %v18662_v8 = vld [vmem:[%s22742_s13 + $0x118] sm:$0xf] }
 0x389   : > { %20024 = vmatmul.mubr.msk.bf16.gmra.mrb[84].mxu1 %vm1963_vm3, %v29018_v24  ;;  %v25699_v13 = vrot.slane %v12944_v6, 5  ;;  %v12950_v33 = vrot.slane %v12948_v1, 4  ;;  %v12917_v59 = vor.u32 %v12916_v28, %v25667_v47  ;;  %v25703_v27 = vrot.slane %v12920_v56, 5  ;;  %v22364_v1 = vld [vmem:[%s22742_s13 + $0x228] sm:$0xf] }
 0x38a   : > { %20610 = vmatmul.mubr.msk.bf16.gmra.mrb[20].mxu0 %vm1963_vm3, %v25365_v63  ;;  %20027 = vmatprep.mubr.msk.bf16.mxu1 %vm1963_vm3, %v29019_v32  ;;  %v12903_v63 = vsel %vm22764_vm4, %v12898_v4, %v12902_v26  ;;  %v25705_v35 = vrot.slane %v12954_v14, 5  ;;  %v12960_v53 = vrot.slane %v12958_v21, 4  ;;  %v17472_v23 = vrot.slane %v3792_v52, 9  ;;  %v22362_v4 = vld [vmem:[%s22742_s13 + $0x220] sm:$0xf] }
 0x38b   : > { %20613 = vmatprep.mubr.msk.bf16.mxu0 %vm1963_vm3, %v29020_v36  ;;  %v4217_v38 = vrot.slane %v22362_v4, 5  ;;  %v4220_v22 = vrot.slane %v22363_v20, 5  ;;  %v12931_v26 = vor.u32 %v12930_v48, %v12927_v46  ;;  %v25710_v29 = vcombine.low %v12893_v37, %v12903_v63  ;;  %v3793_v32 = vld [vmem:[%s22742_s13 + $0x230] sm:$0xe]  ;;  %v22365_v36 = vld [vmem:[%s22742_s13 + $0x234] sm:$0xf] }
 0x38c   : > { %v12941_v6 = vor.u32 %v12940_v15, %v25693_v25  ;;  %v4223_v56 = vrot.slane %v22364_v1, 5  ;;  %v12964_v28 = vshll.u32 %v18661_v58, 16  ;;  %v12908_v14 = vrot.slane %v12907_v0, 4  ;;  %v18663_v48 = vld [vmem:[%s22742_s13 + $0x11c] sm:$0xf]  ;;  %v29021_v15 = vld [vmem:[#allocation9_spill] sm:$0xff] }
 0x38d   : > { %v12951_v24 = vor.u32 %v12950_v33, %v25699_v13  ;;  %v4230_v52 = vrot.slane %v22365_v36, 5  ;;  %v12918_v4 = vrot.slane %v12917_v59, 4  ;;  %v12961_v46 = vor.u32 %v12960_v53, %v25705_v35  ;;  %v29022_v20 = vld [vmem:[#allocation10_spill] sm:$0xff]  ;;  %v22366_v21 = vld [vmem:[%s22742_s13 + $0x22c] sm:$0x1] }
 0x38e   : > { %v12969_v37 = vshrl.u32 %v18662_v8, 16  ;;  %v12972_v63 = vshll.u32 %v18662_v8, 16  ;;  %v29023_v1 = vcombine.low %v29021_v15, %v29022_v20  ;;  %v4219_v0 = vrot.slane %v4217_v38, 4 }
 0x38f   : > { %v12932_v58 = vrot.slane %v12931_v26, 4  ;;  %v4222_v33 = vrot.slane %v4220_v22, 4  ;;  %v4226_v36 = vrot.slane %v22366_v21, 5  ;;  %v12942_v59 = vrot.slane %v12941_v6, 4 }
 0x390   : > { %v4225_v53 = vrot.slane %v4223_v56, 4  ;;  %v12966_v8 = vrot.slane %v12964_v28, 5  ;;  %v17473_v15 = vrot.slane %v3793_v32, 9  ;;  %v12952_v20 = vrot.slane %v12951_v24, 4  ;;  %v18664_v28 = vld [vmem:[%s22742_s13 + $0x120] sm:$0xf] }
 0x391   : > { %20028 = vmatmul.mubr.msk.bf16.gmra.mrb[88].mxu1 %vm1963_vm3, %v29023_v1  ;;  %v22367_v1 = vld [vmem:[%s22742_s13 + $0x238] sm:$0xf]  ;;  %v12978_v2 = vshll.u32 %v18663_v48, 16  ;;  %v12962_v21 = vrot.slane %v12961_v46, 4  ;;  %v12971_v30 = vrot.slane %v12969_v37, 4  ;;  %v12974_v31 = vrot.slane %v12972_v63, 5 }
 0x392   : > { %20614 = vmatmul.mubr.msk.bf16.gmra.mrb[24].mxu0 %vm1963_vm3, %v25439_v49  ;;  %20031 = vmatprep.mubr.msk.bf16.mxu1 %vm1963_vm3, %v17524_v34  ;;  %v4232_v49 = vrot.slane %v4230_v52, 4  ;;  %v4233_v26 = vrot.slane %v22367_v1, 5  ;;  %v12982_v43 = vshrl.u32 %v18663_v48, 16  ;;  %v12913_v3 = vsel %vm22764_vm4, %v12908_v14, %v25667_v47  ;;  %v18668_v37 = vld [vmem:[%s22742_s13 + $0x130] sm:$0xf] }
 0x393   : > { %20617 = vmatprep.mubr.msk.bf16.mxu0 %vm1963_vm3, %v25497_v51  ;;  %v12923_v34 = vsel %vm22764_vm4, %v12918_v4, %v25703_v27  ;;  %v25743_v51 = vsel %vm23271_vm7, %v17472_v23, %v4217_v38  ;;  %v25747_v6 = vsel %vm23271_vm7, %v4219_v0, %v4220_v22  ;;  %v12937_v24 = vsel %vm22764_vm4, %v12932_v58, %v25693_v25  ;;  %v18665_v38 = vld [vmem:[%s22742_s13 + $0x124] sm:$0xf] }
 0x394   : > { %v12947_v47 = vsel %vm22764_vm4, %v12942_v59, %v25699_v13  ;;  %v25758_v27 = vsel %vm23271_vm7, %v4222_v33, %v4223_v56  ;;  %v25762_v23 = vsel %vm23271_vm7, %v4225_v53, %v4226_v36  ;;  %v12957_v22 = vsel %vm22764_vm4, %v12952_v20, %v25705_v35  ;;  %v22369_v33 = vld [vmem:[%s22742_s13 + $0x240] sm:$0x1]  ;;  %v18669_v59 = vld [vmem:[%s22742_s13 + $0x134] sm:$0xf]  ;;  %v3794_v1 = vld [vmem:[%s22742_s13 + $0x244] sm:$0xe] }
 0x395   : > { %v25770_v25 = vsel %vm23271_vm7, %v17473_v15, %v4230_v52  ;;  %v25774_v13 = vsel %vm23271_vm7, %v4232_v49, %v4233_v26  ;;  %v25776_v14 = vrot.slane %v12978_v2, 5  ;;  %v12967_v56 = vsel %vm22764_vm4, %v12962_v21, %v12966_v8  ;;  %v18670_v49 = vld [vmem:[%s22742_s13 + $0x138] sm:$0xf] }
 0x396   : > { %v12975_v32 = vor.u32 %v12974_v31, %v12971_v30  ;;  %v12984_v4 = vrot.slane %v12982_v43, 4  ;;  %v12988_v46 = vshll.u32 %v18664_v28, 16  ;;  %v4235_v35 = vrot.slane %v4233_v26, 4  ;;  %v18667_v30 = vld [vmem:[%s22742_s13 + $0x12c] sm:$0xf] }
 0x397   : > { %v12992_v2 = vshrl.u32 %v18664_v28, 16  ;;  %v12998_v52 = vshll.u32 %v18665_v38, 16  ;;  %v13002_v48 = vshrl.u32 %v18665_v38, 16  ;;  %v25792_v61 = vcombine.low %v12913_v3, %v12923_v34  ;;  %v22370_v28 = vld [vmem:[%s22742_s13 + $0x248] sm:$0xf] }
 0x398   : > { %v17532_v57 = vcombine.low %v25743_v51, %v25747_v6  ;;  %v25800_v31 = vcombine.low %v12957_v22, %v12967_v56  ;;  %v17534_v55 = vcombine.low %v25770_v25, %v25774_v13  ;;  %v25808_v63 = vrot.slane %v12975_v32, 4 }
 0x399   : > { %20032 = vmatmul.mubr.msk.bf16.gmra.mrb[92].mxu1 %vm1963_vm3, %v17525_v17  ;;  %v25796_v17 = vcombine.low %v12937_v24, %v12947_v47  ;;  %v12985_v0 = vor.u32 %v12984_v4, %v25776_v14  ;;  %v12990_v58 = vrot.slane %v12988_v46, 5  ;;  %v4239_v36 = vrot.slane %v22369_v33, 5 }
 0x39a   : > { %20618 = vmatmul.mubr.msk.bf16.gmra.mrb[28].mxu0 %vm1963_vm3, %v25555_v10  ;;  %20035 = vmatprep.mubr.msk.bf16.mxu1 %vm1963_vm3, %v17526_v62  ;;  %v17533_v10 = vcombine.low %v25758_v27, %v25762_v23  ;;  %v4236_v62 = vrot.slane %v22368_v16, 5  ;;  %v12994_v8 = vrot.slane %v12992_v2, 4  ;;  %v25817_v15 = vrot.slane %v12998_v52, 5  ;;  %v22379_v23 = vld [vmem:[%s22742_s13 + $0x274] sm:$0xf] }
 0x39b   : > { %20621 = vmatprep.mubr.msk.bf16.mxu0 %vm1963_vm3, %v25621_v54  ;;  %v18666_v54 = vld [vmem:[%s22742_s13 + $0x128] sm:$0x1]  ;;  %v13004_v20 = vrot.slane %v13002_v48, 4  ;;  %v13013_v26 = vshrl.u32 %v18667_v30, 16  ;;  %v13016_v21 = vshll.u32 %v18667_v30, 16  ;;  %v13022_v43 = vshll.u32 %v18668_v37, 16 }
 0x39c   : > { %v25815_v53 = vsel %vm23271_vm7, %v4235_v35, %v4236_v62  ;;  %v13026_v3 = vshrl.u32 %v18668_v37, 16  ;;  %v4238_v34 = vrot.slane %v4236_v62, 4  ;;  %v4243_v24 = vrot.slane %v22370_v28, 5  ;;  %v22371_v48 = vld [vmem:[%s22742_s13 + $0x24c] sm:$0xf] }
 0x39d   : > { %v13032_v47 = vshll.u32 %v18669_v59, 16  ;;  %v13036_v38 = vshrl.u32 %v18669_v59, 16  ;;  %v12986_v22 = vrot.slane %v12985_v0, 4  ;;  %v13008_v56 = vshll.u32 %v18666_v54, 16  ;;  %v22372_v0 = vld [vmem:[%s22742_s13 + $0x250] sm:$0xf] }
 0x39e   : > { %v13042_v32 = vshll.u32 %v18670_v49, 16  ;;  %v13046_v4 = vshrl.u32 %v18670_v49, 16  ;;  %v29024_v46 = vcombine.low %v25531_v19, %v25543_v40  ;;  %v12995_v35 = vor.u32 %v12994_v8, %v12990_v58 }
 0x39f   : > { %v13005_v2 = vor.u32 %v13004_v20, %v25817_v15  ;;  %v17474_v52 = vrot.slane %v3794_v1, 9  ;;  %v4246_v16 = vrot.slane %v22371_v48, 5  ;;  %v29025_v62 = vcombine.low %v25593_v41, %v25598_v11 }
 0x3a0   : > { %v13015_v19 = vrot.slane %v13013_v26, 4  ;;  %v13018_v40 = vrot.slane %v13016_v21, 5  ;;  %v25836_v54 = vrot.slane %v13022_v43, 5  ;;  %v4245_v30 = vrot.slane %v4243_v24, 4  ;;  %v18671_v21 = vld [vmem:[%s22742_s13 + $0x13c] sm:$0x1] }
 0x3a1   : > { %20036 = vmatmul.mubr.msk.bf16.gmra.mrb[96].mxu1 %vm1963_vm3, %v29024_v46  ;;  %v25838_v37 = vrot.slane %v13032_v47, 5  ;;  %v4249_v33 = vrot.slane %v22372_v0, 5  ;;  %v13038_v59 = vrot.slane %v13036_v38, 4  ;;  %v12981_v41 = vsel %vm22764_vm4, %v25808_v63, %v25776_v14 }
 0x3a2   : > { %20622 = vmatmul.mubr.msk.bf16.gmra.mrb[32].mxu0 %vm1963_vm3, %v25634_v45  ;;  %20039 = vmatprep.mubr.msk.bf16.mxu1 %vm1963_vm3, %v29025_v62  ;;  %v13028_v45 = vrot.slane %v13026_v3, 4  ;;  %v25847_v11 = vsel %vm23271_vm7, %v4238_v34, %v4239_v36  ;;  %v13048_v8 = vrot.slane %v13046_v4, 4  ;;  %v12991_v20 = vsel %vm22764_vm4, %v12986_v22, %v12990_v58  ;;  %v18672_v3 = vld [vmem:[%s22742_s13 + $0x140] sm:$0xf]  ;;  %v22373_v58 = vld [vmem:[%s22742_s13 + $0x254] sm:$0x1] }
 0x3a3   : > { %20625 = vmatprep.mubr.msk.bf16.mxu0 %vm1963_vm3, %v25645_v5  ;;  %v25849_v5 = vrot.slane %v13042_v32, 5  ;;  %v12996_v49 = vrot.slane %v12995_v35, 4  ;;  %v13006_v1 = vrot.slane %v13005_v2, 4  ;;  %v13010_v26 = vrot.slane %v13008_v56, 5  ;;  %v18673_v4 = vld [vmem:[%s22742_s13 + $0x144] sm:$0xf] }
 0x3a4   : > { %v25856_v43 = vsel %vm23271_vm7, %v17474_v52, %v4243_v24  ;;  %v13019_v14 = vor.u32 %v13018_v40, %v13015_v19  ;;  %v13029_v63 = vor.u32 %v13028_v45, %v25836_v54  ;;  %v4248_v36 = vrot.slane %v4246_v16, 4  ;;  %v18674_v62 = vld [vmem:[%s22742_s13 + $0x148] sm:$0xf]  ;;  %v22374_v40 = vld [vmem:[%s22742_s13 + $0x25c] sm:$0xf] }
 0x3a5   : > { %v25862_v34 = vsel %vm23271_vm7, %v4245_v30, %v4246_v16  ;;  %v4251_v28 = vrot.slane %v4249_v33, 4  ;;  %v4252_v47 = vrot.slane %v22373_v58, 5  ;;  %v13039_v38 = vor.u32 %v13038_v59, %v25838_v37  ;;  %v22375_v58 = vld [vmem:[%s22742_s13 + $0x260] sm:$0xf] }
 0x3a6   : > { %v25866_v22 = vcombine.low %v12981_v41, %v12991_v20  ;;  %v17535_v24 = vcombine.low %v25815_v53, %v25847_v11  ;;  %v13049_v56 = vor.u32 %v13048_v8, %v25849_v5  ;;  %v13052_v32 = vshll.u32 %v18671_v21, 16 }
 0x3a7   : > { %v29026_v46 = vcombine.low %v25605_v18, %v25613_v12  ;;  %v13001_v35 = vsel %vm22764_vm4, %v12996_v49, %v25817_v15  ;;  %v13011_v2 = vsel %vm22764_vm4, %v13006_v1, %v13010_v26  ;;  %v13057_v52 = vshrl.u32 %v18672_v3, 16  ;;  %v18675_v49 = vld [vmem:[%s22742_s13 + $0x14c] sm:$0xf] }
 0x3a8   : > { %v13060_v48 = vshll.u32 %v18672_v3, 16  ;;  %v29027_v16 = vcombine.low %v25656_v60, %v25660_v44  ;;  %v17536_v18 = vcombine.low %v25856_v43, %v25862_v34  ;;  %v13020_v12 = vrot.slane %v13019_v14, 4  ;;  %v3795_v44 = vld [vmem:[%s22742_s13 + $0x258] sm:$0xe] }
 0x3a9   : > { %20040 = vmatmul.mubr.msk.bf16.gmra.mrb[100].mxu1 %vm1963_vm3, %v29026_v46  ;;  %v25893_v15 = vsel %vm23271_vm7, %v4248_v36, %v4249_v33  ;;  %v25898_v19 = vsel %vm23271_vm7, %v4251_v28, %v4252_v47  ;;  %v13040_v60 = vrot.slane %v13039_v38, 4  ;;  %v13066_v45 = vshll.u32 %v18673_v4, 16  ;;  %v18677_v36 = vld [vmem:[%s22742_s13 + $0x154] sm:$0xf] }
 0x3aa   : > { %20626 = vmatmul.mubr.msk.bf16.gmra.mrb[36].mxu0 %vm1963_vm3, %v25652_v50  ;;  %20043 = vmatprep.mubr.msk.bf16.mxu1 %vm1963_vm3, %v29027_v16  ;;  %v13030_v50 = vrot.slane %v13029_v63, 4  ;;  %v25902_v30 = vcombine.low %v13001_v35, %v13011_v2  ;;  %v13050_v0 = vrot.slane %v13049_v56, 4  ;;  %v13054_v59 = vrot.slane %v13052_v32, 5 }
 0x3ab   : > { %20629 = vmatprep.mubr.msk.bf16.mxu0 %vm1963_vm3, %v25710_v29  ;;  %v4256_v29 = vrot.slane %v22374_v40, 5  ;;  %v13070_v41 = vshrl.u32 %v18673_v4, 16  ;;  %v13059_v33 = vrot.slane %v13057_v52, 4  ;;  %v13062_v8 = vrot.slane %v13060_v48, 5 }
 0x3ac   : > { %v13076_v20 = vshll.u32 %v18674_v62, 16  ;;  %v13080_v1 = vshrl.u32 %v18674_v62, 16  ;;  %v13025_v26 = vsel %vm22764_vm4, %v13020_v12, %v25836_v54  ;;  %v13035_v21 = vsel %vm22764_vm4, %v13030_v50, %v25838_v37  ;;  %v18678_v54 = vld [vmem:[%s22742_s13 + $0x158] sm:$0xf]  ;;  %v22376_v62 = vld [vmem:[%s22742_s13 + $0x264] sm:$0xf] }
 0x3ad   : > { %v17537_v14 = vcombine.low %v25893_v15, %v25898_v19  ;;  %v17475_v63 = vrot.slane %v3795_v44, 9  ;;  %v13045_v3 = vsel %vm22764_vm4, %v13040_v60, %v25849_v5  ;;  %v4258_v28 = vrot.slane %v4256_v29, 4 }
 0x3ae   : > { %v4259_v47 = vrot.slane %v22375_v58, 5  ;;  %v25918_v38 = vrot.slane %v13066_v45, 5  ;;  %v13055_v56 = vsel %vm22764_vm4, %v13050_v0, %v13054_v59  ;;  %v13072_v37 = vrot.slane %v13070_v41, 4  ;;  %v18680_v45 = vld [vmem:[%s22742_s13 + $0x160] sm:$0xf] }
 0x3af   : > { %v13086_v32 = vshll.u32 %v18675_v49, 16  ;;  %v13090_v4 = vshrl.u32 %v18675_v49, 16  ;;  %v29028_v46 = vcombine.low %v25679_v42, %v25697_v7  ;;  %v25929_v5 = vcombine.low %v13025_v26, %v13035_v21  ;;  %v18676_v42 = vld [vmem:[%s22742_s13 + $0x150] sm:$0x1]  ;;  %v22377_v59 = vld [vmem:[%s22742_s13 + $0x268] sm:$0x1] }
 0x3b0   : > { %v13063_v35 = vor.u32 %v13062_v8, %v13059_v33  ;;  %v25931_v2 = vrot.slane %v13076_v20, 5  ;;  %v13082_v52 = vrot.slane %v13080_v1, 4  ;;  %v13101_v7 = vshrl.u32 %v18677_v36, 16  ;;  %v3796_v8 = vld [vmem:[%s22742_s13 + $0x26c] sm:$0xe] }
 0x3b1   : > { %20044 = vmatmul.mubr.msk.bf16.gmra.mrb[104].mxu1 %vm1963_vm3, %v29028_v46  ;;  %v13110_v48 = vshll.u32 %v18678_v54, 16  ;;  %v13114_v16 = vshrl.u32 %v18678_v54, 16  ;;  %v25940_v12 = vcombine.low %v13045_v3, %v13055_v56  ;;  %v25944_v50 = vsel %vm23271_vm7, %v17475_v63, %v4256_v29  ;;  %v22378_v54 = vld [vmem:[%s22742_s13 + $0x270] sm:$0xf] }
 0x3b2   : > { %20630 = vmatmul.mubr.msk.bf16.gmra.mrb[40].mxu0 %vm1963_vm3, %v25792_v61  ;;  %20047 = vmatprep.mubr.msk.bf16.mxu1 %vm1963_vm3, %v17532_v57  ;;  %v13104_v61 = vshll.u32 %v18677_v36, 16  ;;  %v25948_v51 = vsel %vm23271_vm7, %v4258_v28, %v4259_v47  ;;  %v4261_v6 = vrot.slane %v4259_v47, 4  ;;  %v18679_v57 = vld [vmem:[%s22742_s13 + $0x15c] sm:$0xf]  ;;  %v4262_v60 = vrot.slane %v22376_v62, 5 }
 0x3b3   : > { %20633 = vmatprep.mubr.msk.bf16.mxu0 %vm1963_vm3, %v25796_v17  ;;  %v13073_v17 = vor.u32 %v13072_v37, %v25918_v38  ;;  %v25953_v44 = vrot.slane %v13086_v32, 5  ;;  %v13092_v40 = vrot.slane %v13090_v4, 4  ;;  %v25956_v0 = vrot.slane %v13063_v35, 4  ;;  %v18682_v35 = vld [vmem:[%s22742_s13 + $0x168] sm:$0xf] }
 0x3b4   : > { %v4265_v29 = vrot.slane %v22377_v59, 5  ;;  %v13083_v41 = vor.u32 %v13082_v52, %v25931_v2  ;;  %v13096_v33 = vshll.u32 %v18676_v42, 16  ;;  %v13103_v20 = vrot.slane %v13101_v7, 4  ;;  %v18681_v7 = vld [vmem:[%s22742_s13 + $0x164] sm:$0x1] }
 0x3b5   : > { %v13106_v49 = vrot.slane %v13104_v61, 5  ;;  %v25961_v1 = vrot.slane %v13110_v48, 5  ;;  %v13116_v26 = vrot.slane %v13114_v16, 4  ;;  %v13120_v21 = vshll.u32 %v18679_v57, 16 }
 0x3b6   : > { %v13124_v63 = vshrl.u32 %v18679_v57, 16  ;;  %v13130_v36 = vshll.u32 %v18680_v45, 16  ;;  %v13134_v3 = vshrl.u32 %v18680_v45, 16  ;;  %v25963_v28 = vrot.slane %v13073_v17, 4  ;;  %v22380_v45 = vld [vmem:[%s22742_s13 + $0x278] sm:$0xf] }
 0x3b7   : > { %v25967_v58 = vsel %vm23271_vm7, %v4261_v6, %v4262_v60  ;;  %v13093_v47 = vor.u32 %v13092_v40, %v25953_v44  ;;  %v4269_v56 = vrot.slane %v22378_v54, 5  ;;  %v13069_v37 = vsel %vm22764_vm4, %v25956_v0, %v25918_v38  ;;  %v18683_v38 = vld [vmem:[%s22742_s13 + $0x16c] sm:$0xf] }
 0x3b8   : > { %v4264_v32 = vrot.slane %v4262_v60, 4  ;;  %v25981_v4 = vrot.slane %v13096_v33, 5  ;;  %v17476_v46 = vrot.slane %v3796_v8, 9  ;;  %v13084_v27 = vrot.slane %v13083_v41, 4 }
 0x3b9   : > { %20048 = vmatmul.mubr.msk.bf16.gmra.mrb[108].mxu1 %vm1963_vm3, %v17533_v10  ;;  %v4272_v10 = vrot.slane %v22379_v23, 5  ;;  %v13117_v52 = vor.u32 %v13116_v26, %v25961_v1  ;;  %v13122_v42 = vrot.slane %v13120_v21, 5  ;;  %v13126_v61 = vrot.slane %v13124_v63, 4  ;;  %v22381_v63 = vld [vmem:[%s22742_s13 + $0x27c] sm:$0x1] }
 0x3ba   : > { %20634 = vmatmul.mubr.msk.bf16.gmra.mrb[44].mxu0 %vm1963_vm3, %v25800_v31  ;;  %20051 = vmatprep.mubr.msk.bf16.mxu1 %vm1963_vm3, %v17534_v55  ;;  %v13107_v31 = vor.u32 %v13106_v49, %v13103_v20  ;;  %v25994_v48 = vrot.slane %v13130_v36, 5  ;;  %v13136_v16 = vrot.slane %v13134_v3, 4  ;;  %v13094_v25 = vrot.slane %v13093_v47, 4  ;;  %v18684_v49 = vld [vmem:[%s22742_s13 + $0x170] sm:$0xf] }
 0x3bb   : > { %20637 = vmatprep.mubr.msk.bf16.mxu0 %vm1963_vm3, %v25866_v22  ;;  %v4271_v13 = vrot.slane %v4269_v56, 4  ;;  %v13145_v55 = vshrl.u32 %v18682_v35, 16  ;;  %v13148_v6 = vshll.u32 %v18682_v35, 16  ;;  %v13079_v22 = vsel %vm22764_vm4, %v25963_v28, %v25931_v2  ;;  %v18685_v47 = vld [vmem:[%s22742_s13 + $0x174] sm:$0xf] }
 0x3bc   : > { %v26002_v57 = vsel %vm23271_vm7, %v4264_v32, %v4265_v29  ;;  %v13154_v17 = vshll.u32 %v18683_v38, 16  ;;  %v13158_v62 = vshrl.u32 %v18683_v38, 16  ;;  %v13108_v60 = vrot.slane %v13107_v31, 4 }
 0x3bd   : > { %v13118_v40 = vrot.slane %v13117_v52, 4  ;;  %v4275_v0 = vrot.slane %v22380_v45, 5  ;;  %v13140_v59 = vshll.u32 %v18681_v7, 16  ;;  %v13089_v41 = vsel %vm22764_vm4, %v13084_v27, %v25953_v44  ;;  %v18686_v27 = vld [vmem:[%s22742_s13 + $0x178] sm:$0x1] }
 0x3be   : > { %v26010_v2 = vsel %vm23271_vm7, %v17476_v46, %v4269_v56  ;;  %v13127_v33 = vor.u32 %v13126_v61, %v13122_v42  ;;  %v13137_v29 = vor.u32 %v13136_v16, %v25994_v48  ;;  %v13099_v8 = vsel %vm22764_vm4, %v13094_v25, %v25981_v4  ;;  %v18689_v61 = vld [vmem:[%s22742_s13 + $0x184] sm:$0xf]  ;;  %v18690_v16 = vld [vmem:[%s22742_s13 + $0x188] sm:$0xf] }
 0x3bf   : > { %v26018_v20 = vsel %vm23271_vm7, %v4271_v13, %v4272_v10  ;;  %v13147_v26 = vrot.slane %v13145_v55, 4  ;;  %v13150_v21 = vrot.slane %v13148_v6, 5  ;;  %v4274_v44 = vrot.slane %v4272_v10, 4  ;;  %v18687_v10 = vld [vmem:[%s22742_s13 + $0x17c] sm:$0xf] }
 0x3c0   : > { %v4278_v36 = vrot.slane %v22381_v63, 5  ;;  %v26028_v3 = vrot.slane %v13154_v17, 5  ;;  %v13160_v28 = vrot.slane %v13158_v62, 4  ;;  %v13113_v53 = vsel %vm22764_vm4, %v13108_v60, %v25961_v1  ;;  %v18693_v60 = vld [vmem:[%s22742_s13 + $0x194] sm:$0xf] }
 0x3c1   : > { %20052 = vmatmul.mubr.msk.bf16.gmra.mrb[112].mxu1 %vm1963_vm3, %v17535_v24  ;;  %v13123_v11 = vsel %vm22764_vm4, %v13118_v40, %v13122_v42  ;;  %v4277_v24 = vrot.slane %v4275_v0, 4  ;;  %v26044_v54 = vrot.slane %v13127_v33, 4  ;;  %v26046_v43 = vrot.slane %v13137_v29, 4  ;;  %v18694_v29 = vld [vmem:[%s22742_s13 + $0x198] sm:$0xf] }
 0x3c2   : > { %20638 = vmatmul.mubr.msk.bf16.gmra.mrb[48].mxu0 %vm1963_vm3, %v25902_v30  ;;  %20055 = vmatprep.mubr.msk.bf16.mxu1 %vm1963_vm3, %v17536_v18  ;;  %v26042_v30 = vrot.slane %v13140_v59, 5  ;;  %v13164_v34 = vshll.u32 %v18684_v49, 16  ;;  %v13168_v18 = vshrl.u32 %v18684_v49, 16  ;;  %v18791_v56 = vcombine.low %v13069_v37, %v13079_v22  ;;  %v18692_v22 = vld [vmem:[%s22742_s13 + $0x190] sm:$0xf] }
 0x3c3   : > { %20641 = vmatprep.mubr.msk.bf16.mxu0 %vm1963_vm3, %v25929_v5  ;;  %v17538_v5 = vcombine.low %v25944_v50, %v25948_v51  ;;  %v13151_v32 = vor.u32 %v13150_v21, %v13147_v26  ;;  %v13174_v1 = vshll.u32 %v18685_v47, 16  ;;  %v17539_v4 = vcombine.low %v25967_v58, %v26002_v57  ;;  %v18688_v58 = vld [vmem:[%s22742_s13 + $0x180] sm:$0xf] }
 0x3c4   : > { %v17540_v46 = vcombine.low %v26010_v2, %v26018_v20  ;;  %v13161_v35 = vor.u32 %v13160_v28, %v26028_v3  ;;  %v13178_v23 = vshrl.u32 %v18685_v47, 16  ;;  %v18792_v31 = vcombine.low %v13089_v41, %v13099_v8 }
 0x3c5   : > { %v18793_v52 = vcombine.low %v13113_v53, %v13123_v11  ;;  %v26059_v50 = vsel %vm23271_vm7, %v4274_v44, %v4275_v0  ;;  %v26063_v51 = vsel %vm23271_vm7, %v4277_v24, %v4278_v36  ;;  %v13133_v37 = vsel %vm22764_vm4, %v26044_v54, %v25994_v48 }
 0x3c6   : > { %v13143_v38 = vsel %vm22764_vm4, %v26046_v43, %v26042_v30  ;;  %v13166_v42 = vrot.slane %v13164_v34, 5  ;;  %v13170_v7 = vrot.slane %v13168_v18, 4  ;;  %v13152_v25 = vrot.slane %v13151_v32, 4 }
 0x3c7   : > { %v26076_v13 = vrot.slane %v13174_v1, 5  ;;  %v13184_v55 = vshll.u32 %v18686_v27, 16  ;;  %v13189_v6 = vshrl.u32 %v18687_v10, 16  ;;  %v13162_v48 = vrot.slane %v13161_v35, 4  ;;  %v18695_v27 = vld [vmem:[%s22742_s13 + $0x19c] sm:$0xf] }
 0x3c8   : > { %v13180_v57 = vrot.slane %v13178_v23, 4  ;;  %v13192_v17 = vshll.u32 %v18687_v10, 16  ;;  %v13198_v62 = vshll.u32 %v18688_v58, 16  ;;  %v13202_v40 = vshrl.u32 %v18688_v58, 16 }
 0x3c9   : > { %20056 = vmatmul.mubr.msk.bf16.gmra.mrb[116].mxu1 %vm1963_vm3, %v17537_v14  ;;  %v13208_v45 = vshll.u32 %v18689_v61, 16  ;;  %v13212_v0 = vshrl.u32 %v18689_v61, 16  ;;  %v13218_v59 = vshll.u32 %v18690_v16, 16  ;;  %v13171_v15 = vor.u32 %v13170_v7, %v13166_v42 }
 0x3ca   : > { %20642 = vmatmul.mubr.msk.bf16.gmra.mrb[52].mxu0 %vm1963_vm3, %v25940_v12  ;;  %20059 = vmatprep.mubr.msk.bf16.mxu1 %vm1963_vm3, %v17538_v5  ;;  %v13222_v19 = vshrl.u32 %v18690_v16, 16  ;;  %v13233_v14 = vshrl.u32 %v18692_v22, 16  ;;  %v13236_v41 = vshll.u32 %v18692_v22, 16  ;;  %v13157_v12 = vsel %vm22764_vm4, %v13152_v25, %v26028_v3  ;;  %v18691_v3 = vld [vmem:[%s22742_s13 + $0x18c] sm:$0x1] }
 0x3cb   : > { %20645 = vmatprep.mubr.msk.bf16.mxu0 %vm1963_vm3, %v18791_v56  ;;  %v13191_v33 = vrot.slane %v13189_v6, 4  ;;  %v13242_v8 = vshll.u32 %v18693_v60, 16  ;;  %v13246_v49 = vshrl.u32 %v18693_v60, 16  ;;  %v13167_v26 = vsel %vm22764_vm4, %v13162_v48, %v13166_v42  ;;  %v18698_v42 = vld [vmem:[%s22742_s13 + $0x1a8] sm:$0xf] }
 0x3cc   : > { %v13181_v21 = vor.u32 %v13180_v57, %v26076_v13  ;;  %v13194_v44 = vrot.slane %v13192_v17, 5  ;;  %v26095_v63 = vrot.slane %v13198_v62, 5  ;;  %v13204_v36 = vrot.slane %v13202_v40, 4 }
 0x3cd   : > { %v26097_v28 = vrot.slane %v13208_v45, 5  ;;  %v13214_v47 = vrot.slane %v13212_v0, 4  ;;  %v26099_v53 = vrot.slane %v13218_v59, 5  ;;  %v13224_v11 = vrot.slane %v13222_v19, 4  ;;  %v18696_v0 = vld [vmem:[%s22742_s13 + $0x1a0] sm:$0x1] }
 0x3ce   : > { %v13235_v24 = vrot.slane %v13233_v14, 4  ;;  %v13238_v30 = vrot.slane %v13236_v41, 5  ;;  %v13252_v54 = vshll.u32 %v18694_v29, 16  ;;  %v17541_v43 = vcombine.low %v26059_v50, %v26063_v51  ;;  %v18699_v14 = vld [vmem:[%s22742_s13 + $0x1ac] sm:$0xf] }
 0x3cf   : > { %v26104_v34 = vrot.slane %v13242_v8, 5  ;;  %v13248_v18 = vrot.slane %v13246_v49, 4  ;;  %v13256_v5 = vshrl.u32 %v18694_v29, 16  ;;  %v18794_v56 = vcombine.low %v13133_v37, %v13143_v38 }
 0x3d0   : > { %v13172_v32 = vrot.slane %v13171_v15, 4  ;;  %v13186_v1 = vrot.slane %v13184_v55, 5  ;;  %v13195_v35 = vor.u32 %v13194_v44, %v13191_v33  ;;  %v18795_v23 = vcombine.low %v13157_v12, %v13167_v26  ;;  %v22053_v55 = vld [vmem:[%s22742_s13 + $0x14] sm:$0xff]   ;;  %v18700_v26 = vld [vmem:[%s22742_s13 + $0x1b0] sm:$0xf] }
 0x3d1   : > { %20060 = vmatmul.mubr.msk.bf16.gmra.mrb[120].mxu1 %vm1963_vm3, %v17539_v4  ;;  %v13182_v10 = vrot.slane %v13181_v21, 4  ;;  %v13205_v50 = vor.u32 %v13204_v36, %v26095_v63  ;;  %v13228_v4 = vshll.u32 %v18691_v3, 16  ;;  %v13215_v51 = vor.u32 %v13214_v47, %v26097_v28  ;;  %v18702_v47 = vld [vmem:[%s22742_s13 + $0x1b8] sm:$0xf]  ;;  %v18703_v3 = vld [vmem:[%s22742_s13 + $0x1bc] sm:$0xf] }
 0x3d2   : > { %20646 = vmatmul.mubr.msk.bf16.gmra.mrb[56].mxu0 %vm1963_vm3, %v18792_v31  ;;  %20063 = vmatprep.mubr.msk.bf16.mxu1 %vm1963_vm3, %v17540_v46  ;;  %v18697_v31 = vld [vmem:[%s22742_s13 + $0x1a4] sm:$0xf]  ;;  %v13225_v58 = vor.u32 %v13224_v11, %v26099_v53  ;;  %v13239_v37 = vor.u32 %v13238_v30, %v13235_v24  ;;  %v13254_v38 = vrot.slane %v13252_v54, 5  ;;  %v13249_v2 = vor.u32 %v13248_v18, %v26104_v34  ;;  %v22054_v54 = vld [vmem:[%s22742_s13 + $0x1c] sm:$0xff]  }
 0x3d3   : > { %20649 = vmatprep.mubr.msk.bf16.mxu0 %vm1963_vm3, %v18793_v52  ;;  %v13258_v20 = vrot.slane %v13256_v5, 4  ;;  %v13262_v46 = vshll.u32 %v18695_v27, 16  ;;  %v13266_v52 = vshrl.u32 %v18695_v27, 16  ;;  %v13177_v7 = vsel %vm22764_vm4, %v13172_v32, %v26076_v13 }
 0x3d4   : > { %v13196_v61 = vrot.slane %v13195_v35, 4  ;;  %v13277_v16 = vshrl.u32 %v18697_v31, 16  ;;  %v13280_v25 = vshll.u32 %v18697_v31, 16  ;;  %v13187_v6 = vsel %vm22764_vm4, %v13182_v10, %v13186_v1 }
 0x3d5   : > { %v13206_v22 = vrot.slane %v13205_v50, 4  ;;  %v13286_v48 = vshll.u32 %v18698_v42, 16  ;;  %v13290_v57 = vshrl.u32 %v18698_v42, 16  ;;  %v13216_v17 = vrot.slane %v13215_v51, 4  ;;  %v18705_v42 = vld [vmem:[%s22742_s13 + $0x1c4] sm:$0xf] }
 0x3d6   : > { %v13226_v62 = vrot.slane %v13225_v58, 4  ;;  %v13230_v60 = vrot.slane %v13228_v4, 5  ;;  %v13240_v40 = vrot.slane %v13239_v37, 4  ;;  %v13250_v45 = vrot.slane %v13249_v2, 4  ;;  %v18701_v37 = vld [vmem:[%s22742_s13 + $0x1b4] sm:$0x1] }
 0x3d7   : > { %v13259_v59 = vor.u32 %v13258_v20, %v13254_v38  ;;  %v26127_v13 = vrot.slane %v13262_v46, 5  ;;  %v13268_v15 = vrot.slane %v13266_v52, 4  ;;  %v18796_v19 = vcombine.low %v13177_v7, %v13187_v6  ;;  %v18707_v7 = vld [vmem:[%s22742_s13 + $0x1cc] sm:$0xf] }
 0x3d8   : > { %v13279_v41 = vrot.slane %v13277_v16, 4  ;;  %v13282_v12 = vrot.slane %v13280_v25, 5  ;;  %v13201_v33 = vsel %vm22764_vm4, %v13196_v61, %v26095_v63  ;;  %v13211_v29 = vsel %vm22764_vm4, %v13206_v22, %v26097_v28  ;;  %v29029_v61 = vld [vmem:[#allocation5_spill] sm:$0xff] }
 0x3d9   : > { %20064 = vmatmul.mubr.msk.bf16.gmra.mrb[124].mxu1 %vm1963_vm3, %v17541_v43  ;;  %v26140_v8 = vrot.slane %v13286_v48, 5  ;;  %v13292_v49 = vrot.slane %v13290_v57, 4  ;;  %v13221_v21 = vsel %vm22764_vm4, %v13216_v17, %v26099_v53  ;;  %v13231_v44 = vsel %vm22764_vm4, %v13226_v62, %v13230_v60  ;;  %v18708_v22 = vld [vmem:[%s22742_s13 + $0x1d0] sm:$0xf] }
 0x3da   : > { %20650 = vmatmul.mubr.msk.bf16.gmra.mrb[60].mxu0 %vm1963_vm3, %v18794_v56  ;;  %20069 = vmatprep.mubr.msk.bf16.mxu1 %vm1963_vm3, %v22053_v55  ;;  %v13245_v63 = vsel %vm22764_vm4, %v13240_v40, %v26104_v34  ;;  %v13272_v36 = vshll.u32 %v18696_v0, 16  ;;  %v13255_v28 = vsel %vm22764_vm4, %v13250_v45, %v13254_v38  ;;  %v26155_v11 = vrot.slane %v13259_v59, 4  ;;  %v22055_v34 = vld [vmem:[%s22742_s13 + $0x28] sm:$0xff]   ;;  %v18704_v38 = vld [vmem:[%s22742_s13 + $0x1c0] sm:$0xf]  ;;  %v22056_v59 = vld [vmem:[%s22742_s13 + $0x30] sm:$0xff]  }
 0x3db   : > { %20653 = vmatprep.mubr.msk.bf16.mxu0 %vm1963_vm3, %v18795_v23  ;;  %v13269_v24 = vor.u32 %v13268_v15, %v26127_v13  ;;  %v13296_v30 = vshll.u32 %v18699_v14, 16  ;;  %v13283_v53 = vor.u32 %v13282_v12, %v13279_v41  ;;  %v13300_v43 = vshrl.u32 %v18699_v14, 16  ;;  %v22057_v12 = vld [vmem:[%s22742_s13 + $0x3c] sm:$0xff]  }
 0x3dc   : > { %v13306_v18 = vshll.u32 %v18700_v26, 16  ;;  %v13310_v5 = vshrl.u32 %v18700_v26, 16  ;;  %v13293_v56 = vor.u32 %v13292_v49, %v26140_v8  ;;  %v13321_v32 = vshrl.u32 %v18702_v47, 16 }
 0x3dd   : > { %v13324_v1 = vshll.u32 %v18702_v47, 16  ;;  %v13330_v35 = vshll.u32 %v18703_v3, 16  ;;  %v18797_v27 = vcombine.low %v13201_v33, %v13211_v29  ;;  %v18798_v23 = vcombine.low %v13221_v21, %v13231_v44  ;;  %v18706_v47 = vld [vmem:[%s22742_s13 + $0x1c8] sm:$0x1] }
 0x3de   : > { %v13274_v10 = vrot.slane %v13272_v36, 5  ;;  %v13334_v50 = vshrl.u32 %v18703_v3, 16  ;;  %v18799_v4 = vcombine.low %v13245_v63, %v13255_v28  ;;  %v13265_v31 = vsel %vm22764_vm4, %v26155_v11, %v26127_v13 }
 0x3df   : > { %v13270_v51 = vrot.slane %v13269_v24, 4  ;;  %v13298_v58 = vrot.slane %v13296_v30, 5  ;;  %v13284_v2 = vrot.slane %v13283_v53, 4  ;;  %v13302_v20 = vrot.slane %v13300_v43, 4 }
 0x3e0   : > { %v26170_v46 = vrot.slane %v13306_v18, 5  ;;  %v13312_v52 = vrot.slane %v13310_v5, 4  ;;  %v13294_v16 = vrot.slane %v13293_v56, 4  ;;  %v13323_v25 = vrot.slane %v13321_v32, 4 }
 0x3e1   : > { %20070 = vmatmul.mubr.msk.bf16.vlgmr.msra.gmra.mrb[0].mxu1 %vm1963_vm3, %v22054_v54  ;;  %v13326_v55 = vrot.slane %v13324_v1, 5  ;;  %v26175_v6 = vrot.slane %v13330_v35, 5  ;;  %v13336_v48 = vrot.slane %v13334_v50, 4  ;;  %v13340_v57 = vshll.u32 %v18704_v38, 16 }
 0x3e2   : > { %20654 = vmatmul.mubr.msk.bf16.gmra.mrb[64].mxu0 %vm1963_vm3, %v18796_v19  ;;  %20848 = vmatpush3.bf16.msra.mxu1 %v29029_v61  ;;  %v13344_v17 = vshrl.u32 %v18704_v38, 16  ;;  %v13350_v62 = vshll.u32 %v18705_v42, 16  ;;  %v13275_v60 = vsel %vm22764_vm4, %v13270_v51, %v13274_v10  ;;  %v13354_v40 = vshrl.u32 %v18705_v42, 16  ;;  %v18709_v19 = vld [vmem:[%s22742_s13 + $0x1d4] sm:$0xf] }
 0x3e3   : > { %20073 = vmatprep.mubr.msk.bf16.mxu1 %vm1963_vm3, %v22055_v34  ;;  %20657 = vmatprep.mubr.msk.bf16.mxu0 %vm1963_vm3, %v18797_v27  ;;  %v13365_v45 = vshrl.u32 %v18707_v7, 16  ;;  %v13368_v0 = vshll.u32 %v18707_v7, 16  ;;  %v13303_v13 = vor.u32 %v13302_v20, %v13298_v58  ;;  %v13316_v15 = vshll.u32 %v18701_v37, 16  ;;  %v18710_v34 = vld [vmem:[%s22742_s13 + $0x1d8] sm:$0xf] }
 0x3e4   : > { %v13374_v14 = vshll.u32 %v18708_v22, 16  ;;  %v13378_v41 = vshrl.u32 %v18708_v22, 16  ;;  %v13289_v33 = vsel %vm22764_vm4, %v13284_v2, %v26140_v8  ;;  %v13299_v29 = vsel %vm22764_vm4, %v13294_v16, %v13298_v58  ;;  %v18712_v27 = vld [vmem:[%s22742_s13 + $0x1e0] sm:$0xf]  ;;  %v18713_v58 = vld [vmem:[%s22742_s13 + $0x1e4] sm:$0xf] }
 0x3e5   : > { %v13313_v49 = vor.u32 %v13312_v52, %v26170_v46  ;;  %v13327_v26 = vor.u32 %v13326_v55, %v13323_v25  ;;  %v13337_v21 = vor.u32 %v13336_v48, %v26175_v6  ;;  %v26191_v44 = vrot.slane %v13340_v57, 5  ;;  %v22059_v2 = vld [vmem:[%s22742_s13 + $0x50] sm:$0xff]  }
 0x3e6   : > { %v13346_v63 = vrot.slane %v13344_v17, 4  ;;  %v26193_v36 = vrot.slane %v13350_v62, 5  ;;  %v13356_v3 = vrot.slane %v13354_v40, 4  ;;  %v13367_v28 = vrot.slane %v13365_v45, 4 }
 0x3e7   : > { %v13370_v11 = vrot.slane %v13368_v0, 5  ;;  %v13384_v24 = vshll.u32 %v18709_v19, 16  ;;  %v26198_v8 = vrot.slane %v13374_v14, 5  ;;  %v13380_v30 = vrot.slane %v13378_v41, 4  ;;  %v18715_v41 = vld [vmem:[%s22742_s13 + $0x1ec] sm:$0xf] }
 0x3e8   : > { %v13388_v54 = vshrl.u32 %v18709_v19, 16  ;;  %v18800_v53 = vcombine.low %v13265_v31, %v13275_v60  ;;  %v13304_v43 = vrot.slane %v13303_v13, 4  ;;  %v13314_v18 = vrot.slane %v13313_v49, 4  ;;  %v18711_v60 = vld [vmem:[%s22742_s13 + $0x1dc] sm:$0x1] }
 0x3e9   : > { %20074 = vmatmul.mubr.msk.bf16.gmra.mrb[4].mxu1 %vm1963_vm3, %v22056_v59  ;;  %v13318_v5 = vrot.slane %v13316_v15, 5  ;;  %v18801_v56 = vcombine.low %v13289_v33, %v13299_v29  ;;  %v13328_v32 = vrot.slane %v13327_v26, 4  ;;  %v13338_v1 = vrot.slane %v13337_v21, 4  ;;  %v18714_v15 = vld [vmem:[%s22742_s13 + $0x1e8] sm:$0xf]  ;;  %v22060_v21 = vld [vmem:[%s22742_s13 + $0x58] sm:$0xff]  }
 0x3ea   : > { %20658 = vmatmul.mubr.msk.bf16.gmra.mrb[68].mxu0 %vm1963_vm3, %v18798_v23  ;;  %20077 = vmatprep.mubr.msk.bf16.mxu1 %vm1963_vm3, %v22057_v12  ;;  %v13360_v35 = vshll.u32 %v18706_v47, 16  ;;  %v13347_v23 = vor.u32 %v13346_v63, %v26191_v44  ;;  %v13357_v10 = vor.u32 %v13356_v3, %v26193_v36  ;;  %v13371_v50 = vor.u32 %v13370_v11, %v13367_v28  ;;  %v18717_v26 = vld [vmem:[%s22742_s13 + $0x1f4] sm:$0xf]  ;;  %v18718_v28 = vld [vmem:[%s22742_s13 + $0x1f8] sm:$0xf]  ;;  %v22061_v11 = vld [vmem:[%s22742_s13 + $0x64] sm:$0xff]  }
 0x3eb   : > { %20661 = vmatprep.mubr.msk.bf16.mxu0 %vm1963_vm3, %v18799_v4  ;;  %v13386_v51 = vrot.slane %v13384_v24, 5  ;;  %v22058_v4 = vld [vmem:[%s22742_s13 + $0x44] sm:$0xff]   ;;  %v13381_v31 = vor.u32 %v13380_v30, %v26198_v8  ;;  %v13390_v37 = vrot.slane %v13388_v54, 4  ;;  %v13394_v38 = vshll.u32 %v18710_v34, 16 }
 0x3ec   : > { %v13398_v42 = vshrl.u32 %v18710_v34, 16  ;;  %v13309_v20 = vsel %vm22764_vm4, %v13304_v43, %v26170_v46  ;;  %v13319_v52 = vsel %vm22764_vm4, %v13314_v18, %v13318_v5  ;;  %v13409_v7 = vshrl.u32 %v18712_v27, 16 }
 0x3ed   : > { %v13412_v61 = vshll.u32 %v18712_v27, 16  ;;  %v13333_v16 = vsel %vm22764_vm4, %v13328_v32, %v26175_v6  ;;  %v13362_v25 = vrot.slane %v13360_v35, 5  ;;  %v13418_v55 = vshll.u32 %v18713_v58, 16 }
 0x3ee   : > { %v13422_v22 = vshrl.u32 %v18713_v58, 16  ;;  %v13343_v48 = vsel %vm22764_vm4, %v13338_v1, %v26191_v44  ;;  %v13348_v57 = vrot.slane %v13347_v23, 4  ;;  %v13358_v17 = vrot.slane %v13357_v10, 4  ;;  %v18719_v23 = vld [vmem:[%s22742_s13 + $0x1fc] sm:$0xf] }
 0x3ef   : > { %v13372_v46 = vrot.slane %v13371_v50, 4  ;;  %v13382_v62 = vrot.slane %v13381_v31, 4  ;;  %v13391_v40 = vor.u32 %v13390_v37, %v13386_v51  ;;  %v26224_v6 = vrot.slane %v13394_v38, 5  ;;  %v18720_v10 = vld [vmem:[%s22742_s13 + $0x200] sm:$0xf] }
 0x3f0   : > { %v13400_v45 = vrot.slane %v13398_v42, 4  ;;  %v13411_v0 = vrot.slane %v13409_v7, 4  ;;  %v13414_v59 = vrot.slane %v13412_v61, 5  ;;  %v18802_v13 = vcombine.low %v13309_v20, %v13319_v52  ;;  %v18722_v31 = vld [vmem:[%s22742_s13 + $0x208] sm:$0xf] }
 0x3f1   : > { %20078 = vmatmul.mubr.msk.bf16.gmra.mrb[8].mxu1 %vm1963_vm3, %v22058_v4  ;;  %v26229_v19 = vrot.slane %v13418_v55, 5  ;;  %v13424_v14 = vrot.slane %v13422_v22, 4  ;;  %v18803_v12 = vcombine.low %v13333_v16, %v13343_v48  ;;  %v13353_v33 = vsel %vm22764_vm4, %v13348_v57, %v26193_v36  ;;  %v18723_v20 = vld [vmem:[%s22742_s13 + $0x20c] sm:$0xf]  ;;  %v18716_v52 = vld [vmem:[%s22742_s13 + $0x1f0] sm:$0x1] }
 0x3f2   : > { %20662 = vmatmul.mubr.msk.bf16.gmra.mrb[72].mxu0 %vm1963_vm3, %v18800_v53  ;;  %20081 = vmatprep.mubr.msk.bf16.mxu1 %vm1963_vm3, %v22059_v2  ;;  %v13363_v29 = vsel %vm22764_vm4, %v13358_v17, %v13362_v25  ;;  %v13404_v49 = vshll.u32 %v18711_v60, 16  ;;  %v13377_v44 = vsel %vm22764_vm4, %v13372_v46, %v26198_v8  ;;  %v13387_v63 = vsel %vm22764_vm4, %v13382_v62, %v13386_v51  ;;  %v22062_v55 = vld [vmem:[%s22742_s13 + $0x6c] sm:$0xff]   ;;  %v22063_v46 = vld [vmem:[%s22742_s13 + $0x78] sm:$0xff]  }
 0x3f3   : > { %20665 = vmatprep.mubr.msk.bf16.mxu0 %vm1963_vm3, %v18801_v56  ;;  %v26244_v47 = vrot.slane %v13391_v40, 4  ;;  %v13401_v3 = vor.u32 %v13400_v45, %v26224_v6  ;;  %v13415_v36 = vor.u32 %v13414_v59, %v13411_v0  ;;  %v13428_v24 = vshll.u32 %v18714_v15, 16 }
 0x3f4   : > { %v13432_v30 = vshrl.u32 %v18714_v15, 16  ;;  %v13438_v54 = vshll.u32 %v18715_v41, 16  ;;  %v13425_v53 = vor.u32 %v13424_v14, %v26229_v19  ;;  %v13442_v43 = vshrl.u32 %v18715_v41, 16  ;;  %v18724_v15 = vld [vmem:[%s22742_s13 + $0x210] sm:$0xf] }
 0x3f5   : > { %v13453_v18 = vshrl.u32 %v18717_v26, 16  ;;  %v13456_v8 = vshll.u32 %v18717_v26, 16  ;;  %v18804_v5 = vcombine.low %v13353_v33, %v13363_v29  ;;  %v13462_v34 = vshll.u32 %v18718_v28, 16  ;;  %v18725_v29 = vld [vmem:[%s22742_s13 + $0x214] sm:$0xf] }
 0x3f6   : > { %v13466_v56 = vshrl.u32 %v18718_v28, 16  ;;  %v18805_v32 = vcombine.low %v13377_v44, %v13387_v63  ;;  %v13397_v1 = vsel %vm22764_vm4, %v26244_v47, %v26224_v6  ;;  %v13402_v35 = vrot.slane %v13401_v3, 4 }
 0x3f7   : > { %v13406_v27 = vrot.slane %v13404_v49, 5  ;;  %v13416_v50 = vrot.slane %v13415_v36, 4  ;;  %v13430_v51 = vrot.slane %v13428_v24, 5  ;;  %v13434_v58 = vrot.slane %v13432_v30, 4  ;;  %v18721_v49 = vld [vmem:[%s22742_s13 + $0x204] sm:$0x1] }
 0x3f8   : > { %v26260_v4 = vrot.slane %v13438_v54, 5  ;;  %v13426_v37 = vrot.slane %v13425_v53, 4  ;;  %v13444_v38 = vrot.slane %v13442_v43, 4  ;;  %v13455_v42 = vrot.slane %v13453_v18, 4 }
 0x3f9   : > { %20082 = vmatmul.mubr.msk.bf16.gmra.mrb[12].mxu1 %vm1963_vm3, %v22060_v21  ;;  %v13458_v2 = vrot.slane %v13456_v8, 5  ;;  %v26265_v7 = vrot.slane %v13462_v34, 5  ;;  %v13468_v61 = vrot.slane %v13466_v56, 4  ;;  %v13472_v16 = vshll.u32 %v18719_v23, 16  ;;  %v18727_v8 = vld [vmem:[%s22742_s13 + $0x21c] sm:$0xf] }
 0x3fa   : > { %20666 = vmatmul.mubr.msk.bf16.gmra.mrb[76].mxu0 %vm1963_vm3, %v18802_v13  ;;  %20085 = vmatprep.mubr.msk.bf16.mxu1 %vm1963_vm3, %v22061_v11  ;;  %v13476_v25 = vshrl.u32 %v18719_v23, 16  ;;  %v13482_v22 = vshll.u32 %v18720_v10, 16  ;;  %v13486_v48 = vshrl.u32 %v18720_v10, 16  ;;  %v13497_v57 = vshrl.u32 %v18722_v31, 16  ;;  %v22065_v23 = vld [vmem:[%s22742_s13 + $0x8c] sm:$0xff]  }
 0x3fb   : > { %20669 = vmatprep.mubr.msk.bf16.mxu0 %vm1963_vm3, %v18803_v12  ;;  %v13500_v17 = vshll.u32 %v18722_v31, 16  ;;  %v13407_v62 = vsel %vm22764_vm4, %v13402_v35, %v13406_v27  ;;  %v13435_v60 = vor.u32 %v13434_v58, %v13430_v51  ;;  %v13506_v40 = vshll.u32 %v18723_v20, 16  ;;  %v18728_v27 = vld [vmem:[%s22742_s13 + $0x220] sm:$0xf]  ;;  %v18726_v58 = vld [vmem:[%s22742_s13 + $0x218] sm:$0x1] }
 0x3fc   : > { %v13510_v6 = vshrl.u32 %v18723_v20, 16  ;;  %v13421_v45 = vsel %vm22764_vm4, %v13416_v50, %v26229_v19  ;;  %v13431_v0 = vsel %vm22764_vm4, %v13426_v37, %v13430_v51  ;;  %v13445_v59 = vor.u32 %v13444_v38, %v26260_v4 }
 0x3fd   : > { %v13448_v13 = vshll.u32 %v18716_v52, 16  ;;  %v13459_v14 = vor.u32 %v13458_v2, %v13455_v42  ;;  %v13469_v41 = vor.u32 %v13468_v61, %v26265_v7  ;;  %v26279_v12 = vrot.slane %v13472_v16, 5 }
 0x3fe   : > { %v13478_v33 = vrot.slane %v13476_v25, 4  ;;  %v26285_v19 = vrot.slane %v13482_v22, 5  ;;  %v13488_v26 = vrot.slane %v13486_v48, 4  ;;  %v13499_v21 = vrot.slane %v13497_v57, 4  ;;  %v18729_v22 = vld [vmem:[%s22742_s13 + $0x224] sm:$0xf] }
 0x3ff   : > { %v13502_v44 = vrot.slane %v13500_v17, 5  ;;  %v26289_v63 = vrot.slane %v13506_v40, 5  ;;  %v13512_v47 = vrot.slane %v13510_v6, 4  ;;  %v13516_v3 = vshll.u32 %v18724_v15, 16 }
 0x400   : > { %v13520_v28 = vshrl.u32 %v18724_v15, 16  ;;  %v18806_v11 = vcombine.low %v13397_v1, %v13407_v62  ;;  %v13436_v36 = vrot.slane %v13435_v60, 4  ;;  %v13526_v24 = vshll.u32 %v18725_v29, 16  ;;  %v18730_v62 = vld [vmem:[%s22742_s13 + $0x228] sm:$0xf]  ;;  %v22066_v15 = vld [vmem:[%s22742_s13 + $0x94] sm:$0xff]  }
 0x401   : > { %20086 = vmatmul.mubr.msk.bf16.gmra.mrb[16].mxu1 %vm1963_vm3, %v22062_v55  ;;  %v13530_v30 = vshrl.u32 %v18725_v29, 16  ;;  %v18807_v54 = vcombine.low %v13421_v45, %v13431_v0  ;;  %v13446_v53 = vrot.slane %v13445_v59, 4  ;;  %v13450_v43 = vrot.slane %v13448_v13, 5 }
 0x402   : > { %20670 = vmatmul.mubr.msk.bf16.gmra.mrb[80].mxu0 %vm1963_vm3, %v18804_v5  ;;  %20089 = vmatprep.mubr.msk.bf16.mxu1 %vm1963_vm3, %v22063_v46  ;;  %v13492_v18 = vshll.u32 %v18721_v49, 16  ;;  %v22064_v5 = vld [vmem:[%s22742_s13 + $0x80] sm:$0xff]   ;;  %v13460_v34 = vrot.slane %v13459_v14, 4  ;;  %v13470_v56 = vrot.slane %v13469_v41, 4  ;;  %v13489_v35 = vor.u32 %v13488_v26, %v26285_v19 }
 0x403   : > { %20673 = vmatprep.mubr.msk.bf16.mxu0 %vm1963_vm3, %v18805_v32  ;;  %v13479_v32 = vor.u32 %v13478_v33, %v26279_v12  ;;  %v13503_v10 = vor.u32 %v13502_v44, %v13499_v21  ;;  %v13513_v1 = vor.u32 %v13512_v47, %v26289_v63  ;;  %v26298_v50 = vrot.slane %v13516_v3, 5  ;;  %v22067_v33 = vld [vmem:[%s22742_s13 + $0xa0] sm:$0xff]   ;;  %v18732_v44 = vld [vmem:[%s22742_s13 + $0x230] sm:$0xf] }
 0x404   : > { %v13522_v51 = vrot.slane %v13520_v28, 4  ;;  %v26301_v31 = vrot.slane %v13526_v24, 5  ;;  %v13532_v37 = vrot.slane %v13530_v30, 4  ;;  %v13541_v38 = vshrl.u32 %v18727_v8, 16 }
 0x405   : > { %v13544_v42 = vshll.u32 %v18727_v8, 16  ;;  %v13441_v2 = vsel %vm22764_vm4, %v13436_v36, %v26260_v4  ;;  %v13451_v20 = vsel %vm22764_vm4, %v13446_v53, %v13450_v43  ;;  %v13550_v52 = vshll.u32 %v18728_v27, 16 }
 0x406   : > { %v13554_v61 = vshrl.u32 %v18728_v27, 16  ;;  %v13465_v16 = vsel %vm22764_vm4, %v13460_v34, %v26265_v7  ;;  %v13475_v25 = vsel %vm22764_vm4, %v13470_v56, %v26279_v12  ;;  %v13480_v55 = vrot.slane %v13479_v32, 4  ;;  %v18734_v32 = vld [vmem:[%s22742_s13 + $0x238] sm:$0xf] }
 0x407   : > { %v13494_v4 = vrot.slane %v13492_v18, 5  ;;  %v13490_v48 = vrot.slane %v13489_v35, 4  ;;  %v13504_v57 = vrot.slane %v13503_v10, 4  ;;  %v13514_v17 = vrot.slane %v13513_v1, 4 }
 0x408   : > { %v13536_v46 = vshll.u32 %v18726_v58, 16  ;;  %v13523_v7 = vor.u32 %v13522_v51, %v26298_v50  ;;  %v13533_v60 = vor.u32 %v13532_v37, %v26301_v31  ;;  %v13543_v40 = vrot.slane %v13541_v38, 4  ;;  %v18737_v58 = vld [vmem:[%s22742_s13 + $0x244] sm:$0xf]  ;;  %v22068_v37 = vld [vmem:[%s22742_s13 + $0xa8] sm:$0xff]  }
 0x409   : > { %20090 = vmatmul.mubr.msk.bf16.gmra.mrb[20].mxu1 %vm1963_vm3, %v22064_v5  ;;  %v13546_v6 = vrot.slane %v13544_v42, 5  ;;  %v26322_v45 = vrot.slane %v13550_v52, 5  ;;  %v13556_v0 = vrot.slane %v13554_v61, 4  ;;  %v13560_v59 = vshll.u32 %v18729_v22, 16  ;;  %v22069_v52 = vld [vmem:[%s22742_s13 + $0xb4] sm:$0xff]  }
 0x40a   : > { %20674 = vmatmul.mubr.msk.bf16.gmra.mrb[84].mxu0 %vm1963_vm3, %v18806_v11  ;;  %20093 = vmatprep.mubr.msk.bf16.mxu1 %vm1963_vm3, %v22065_v23  ;;  %v13564_v13 = vshrl.u32 %v18729_v22, 16  ;;  %v18808_v14 = vcombine.low %v13441_v2, %v13451_v20  ;;  %v13570_v41 = vshll.u32 %v18730_v62, 16  ;;  %v13574_v12 = vshrl.u32 %v18730_v62, 16  ;;  %v18735_v23 = vld [vmem:[%s22742_s13 + $0x23c] sm:$0xf] }
 0x40b   : > { %20677 = vmatprep.mubr.msk.bf16.mxu0 %vm1963_vm3, %v18807_v54  ;;  %v18809_v29 = vcombine.low %v13465_v16, %v13475_v25  ;;  %v13485_v49 = vsel %vm22764_vm4, %v13480_v55, %v26285_v19  ;;  %v13495_v26 = vsel %vm22764_vm4, %v13490_v48, %v13494_v4  ;;  %v13509_v21 = vsel %vm22764_vm4, %v13504_v57, %v26289_v63  ;;  %v18733_v54 = vld [vmem:[%s22742_s13 + $0x234] sm:$0xf]  ;;  %v18731_v63 = vld [vmem:[%s22742_s13 + $0x22c] sm:$0x1]  ;;  %v18738_v20 = vld [vmem:[%s22742_s13 + $0x248] sm:$0xf] }
 0x40c   : > { %v13519_v47 = vsel %vm22764_vm4, %v13514_v17, %v26298_v50  ;;  %v26338_v3 = vrot.slane %v13523_v7, 4  ;;  %v26340_v28 = vrot.slane %v13533_v60, 4  ;;  %v26342_v11 = vrot.slane %v13536_v46, 5  ;;  %v18739_v62 = vld [vmem:[%s22742_s13 + $0x24c] sm:$0xf] }
 0x40d   : > { %v13547_v36 = vor.u32 %v13546_v6, %v13543_v40  ;;  %v13557_v19 = vor.u32 %v13556_v0, %v26322_v45  ;;  %v26345_v24 = vrot.slane %v13560_v59, 5  ;;  %v13566_v30 = vrot.slane %v13564_v13, 4 }
 0x40e   : > { %v26351_v53 = vrot.slane %v13570_v41, 5  ;;  %v13576_v43 = vrot.slane %v13574_v12, 4  ;;  %v13585_v18 = vshrl.u32 %v18732_v44, 16  ;;  %v13588_v8 = vshll.u32 %v18732_v44, 16  ;;  %v18736_v12 = vld [vmem:[%s22742_s13 + $0x240] sm:$0x1] }
 0x40f   : > { %v18810_v5 = vcombine.low %v13485_v49, %v13495_v26  ;;  %v18811_v34 = vcombine.low %v13509_v21, %v13519_v47  ;;  %v13529_v56 = vsel %vm22764_vm4, %v26338_v3, %v26301_v31  ;;  %v13594_v35 = vshll.u32 %v18733_v54, 16  ;;  %v22070_v47 = vld [vmem:[%s22742_s13 + $0xbc] sm:$0xff]  }
 0x410   : > { %v13598_v27 = vshrl.u32 %v18733_v54, 16  ;;  %v13539_v10 = vsel %vm22764_vm4, %v26340_v28, %v26342_v11  ;;  %v13548_v1 = vrot.slane %v13547_v36, 4  ;;  %v13567_v50 = vor.u32 %v13566_v30, %v26345_v24 }
 0x411   : > { %20094 = vmatmul.mubr.msk.bf16.gmra.mrb[24].mxu1 %vm1963_vm3, %v22066_v15  ;;  %v13580_v51 = vshll.u32 %v18731_v63, 16  ;;  %v13558_v38 = vrot.slane %v13557_v19, 4  ;;  %v13577_v31 = vor.u32 %v13576_v43, %v26351_v53  ;;  %v13587_v42 = vrot.slane %v13585_v18, 4  ;;  %v18740_v19 = vld [vmem:[%s22742_s13 + $0x250] sm:$0xf] }
 0x412   : > { %20678 = vmatmul.mubr.msk.bf16.gmra.mrb[88].mxu0 %vm1963_vm3, %v18808_v14  ;;  %20097 = vmatprep.mubr.msk.bf16.mxu1 %vm1963_vm3, %v22067_v33  ;;  %v13590_v2 = vrot.slane %v13588_v8, 5  ;;  %v13604_v61 = vshll.u32 %v18734_v32, 16  ;;  %v13608_v16 = vshrl.u32 %v18734_v32, 16  ;;  %v13614_v25 = vshll.u32 %v18735_v23, 16  ;;  %v18742_v18 = vld [vmem:[%s22742_s13 + $0x258] sm:$0xf] }
 0x413   : > { %20681 = vmatprep.mubr.msk.bf16.mxu0 %vm1963_vm3, %v18809_v29  ;;  %v13618_v55 = vshrl.u32 %v18735_v23, 16  ;;  %v26371_v4 = vrot.slane %v13594_v35, 5  ;;  %v13600_v22 = vrot.slane %v13598_v27, 4  ;;  %v13629_v48 = vshrl.u32 %v18737_v58, 16  ;;  %v18743_v27 = vld [vmem:[%s22742_s13 + $0x25c] sm:$0xf] }
 0x414   : > { %v13632_v57 = vshll.u32 %v18737_v58, 16  ;;  %v13553_v17 = vsel %vm22764_vm4, %v13548_v1, %v26322_v45  ;;  %v13568_v46 = vrot.slane %v13567_v50, 4  ;;  %v13638_v7 = vshll.u32 %v18738_v20, 16 }
 0x415   : > { %v13642_v60 = vshrl.u32 %v18738_v20, 16  ;;  %v13563_v40 = vsel %vm22764_vm4, %v13558_v38, %v26345_v24  ;;  %v13578_v6 = vrot.slane %v13577_v31, 4  ;;  %v13582_v0 = vrot.slane %v13580_v51, 5  ;;  %v22071_v24 = vld [vmem:[%s22742_s13 + $0xc8] sm:$0xff]   ;;  %v18744_v38 = vld [vmem:[%s22742_s13 + $0x260] sm:$0xf] }
 0x416   : > { %v13591_v59 = vor.u32 %v13590_v2, %v13587_v42  ;;  %v13606_v45 = vrot.slane %v13604_v61, 5  ;;  %v13610_v13 = vrot.slane %v13608_v16, 4  ;;  %v26384_v15 = vrot.slane %v13614_v25, 5 }
 0x417   : > { %v13620_v14 = vrot.slane %v13618_v55, 4  ;;  %v13601_v41 = vor.u32 %v13600_v22, %v26371_v4  ;;  %v13631_v33 = vrot.slane %v13629_v48, 4  ;;  %v13634_v29 = vrot.slane %v13632_v57, 5  ;;  %v18741_v22 = vld [vmem:[%s22742_s13 + $0x254] sm:$0x1] }
 0x418   : > { %v13648_v49 = vshll.u32 %v18739_v62, 16  ;;  %v26388_v26 = vrot.slane %v13638_v7, 5  ;;  %v13644_v21 = vrot.slane %v13642_v60, 4  ;;  %v13652_v44 = vshrl.u32 %v18739_v62, 16  ;;  %v22073_v62 = vld [vmem:[%s22742_s13 + $0xdc] sm:$0xff]  }
 0x419   : > { %20098 = vmatmul.mubr.msk.bf16.gmra.mrb[28].mxu1 %vm1963_vm3, %v22068_v37  ;;  %v18812_v3 = vcombine.low %v13529_v56, %v13539_v10  ;;  %v18813_v28 = vcombine.low %v13553_v17, %v13563_v40  ;;  %v13573_v11 = vsel %vm22764_vm4, %v13568_v46, %v26351_v53  ;;  %v13583_v36 = vsel %vm22764_vm4, %v13578_v6, %v13582_v0  ;;  %v18747_v6 = vld [vmem:[%s22742_s13 + $0x26c] sm:$0xf] }
 0x41a   : > { %20682 = vmatmul.mubr.msk.bf16.gmra.mrb[92].mxu0 %vm1963_vm3, %v18810_v5  ;;  %20101 = vmatprep.mubr.msk.bf16.mxu1 %vm1963_vm3, %v22069_v52  ;;  %v13592_v30 = vrot.slane %v13591_v59, 4  ;;  %v13611_v54 = vor.u32 %v13610_v13, %v13606_v45  ;;  %v13621_v63 = vor.u32 %v13620_v14, %v26384_v15  ;;  %v13624_v43 = vshll.u32 %v18736_v12, 16  ;;  %v22072_v52 = vld [vmem:[%s22742_s13 + $0xd0] sm:$0xff]  }
 0x41b   : > { %20685 = vmatprep.mubr.msk.bf16.mxu0 %vm1963_vm3, %v18811_v34  ;;  %v13602_v8 = vrot.slane %v13601_v41, 4  ;;  %v13635_v5 = vor.u32 %v13634_v29, %v13631_v33  ;;  %v26400_v34 = vrot.slane %v13648_v49, 5  ;;  %v13645_v56 = vor.u32 %v13644_v21, %v26388_v26  ;;  %v18748_v14 = vld [vmem:[%s22742_s13 + $0x270] sm:$0xf] }
 0x41c   : > { %v13654_v53 = vrot.slane %v13652_v44, 4  ;;  %v13658_v32 = vshll.u32 %v18740_v19, 16  ;;  %v13662_v35 = vshrl.u32 %v18740_v19, 16  ;;  %v18814_v23 = vcombine.low %v13573_v11, %v13583_v36 }
 0x41d   : > { %v13673_v10 = vshrl.u32 %v18742_v18, 16  ;;  %v13676_v1 = vshll.u32 %v18742_v18, 16  ;;  %v13597_v50 = vsel %vm22764_vm4, %v13592_v30, %v26371_v4  ;;  %v13612_v51 = vrot.slane %v13611_v54, 4  ;;  %v18745_v4 = vld [vmem:[%s22742_s13 + $0x264] sm:$0xf] }
 0x41e   : > { %v13622_v58 = vrot.slane %v13621_v63, 4  ;;  %v13626_v37 = vrot.slane %v13624_v43, 5  ;;  %v13607_v31 = vsel %vm22764_vm4, %v13602_v8, %v13606_v45  ;;  %v13636_v42 = vrot.slane %v13635_v5, 4  ;;  %v22074_v30 = vld [vmem:[%s22742_s13 + $0xe4] sm:$0xff]   ;;  %v22075_v63 = vld [vmem:[%s22742_s13 + $0xf0] sm:$0xff]  }
 0x41f   : > { %v13682_v2 = vshll.u32 %v18743_v27, 16  ;;  %v13686_v20 = vshrl.u32 %v18743_v27, 16  ;;  %v13646_v61 = vrot.slane %v13645_v56, 4  ;;  %v13655_v16 = vor.u32 %v13654_v53, %v26400_v34  ;;  %v18749_v5 = vld [vmem:[%s22742_s13 + $0x274] sm:$0xf] }
 0x420   : > { %v26416_v25 = vrot.slane %v13658_v32, 5  ;;  %v13664_v55 = vrot.slane %v13662_v35, 4  ;;  %v13675_v48 = vrot.slane %v13673_v10, 4  ;;  %v13678_v57 = vrot.slane %v13676_v1, 5  ;;  %v18750_v35 = vld [vmem:[%s22742_s13 + $0x278] sm:$0xf] }
 0x421   : > { %20102 = vmatmul.mubr.msk.bf16.gmra.mrb[32].mxu1 %vm1963_vm3, %v22070_v47  ;;  %v13692_v17 = vshll.u32 %v18744_v38, 16  ;;  %v13696_v46 = vshrl.u32 %v18744_v38, 16  ;;  %v18815_v7 = vcombine.low %v13597_v50, %v13607_v31  ;;  %v13617_v60 = vsel %vm22764_vm4, %v13612_v51, %v26384_v15  ;;  %v18752_v27 = vld [vmem:[%s22742_s13 + $0x280] sm:$0xf]  ;;  %v18753_v51 = vld [vmem:[%s22742_s13 + $0x284] sm:$0xf] }
 0x422   : > { %20686 = vmatmul.mubr.msk.bf16.gmra.mrb[96].mxu0 %vm1963_vm3, %v18812_v3  ;;  %20105 = vmatprep.mubr.msk.bf16.mxu1 %vm1963_vm3, %v22071_v24  ;;  %v13627_v40 = vsel %vm22764_vm4, %v13622_v58, %v13626_v37  ;;  %v26427_v0 = vrot.slane %v13682_v2, 5  ;;  %v13688_v59 = vrot.slane %v13686_v20, 4  ;;  %v13702_v45 = vshll.u32 %v18745_v4, 16 }
 0x423   : > { %20689 = vmatprep.mubr.msk.bf16.mxu0 %vm1963_vm3, %v18813_v28  ;;  %v13706_v13 = vshrl.u32 %v18745_v4, 16  ;;  %v13641_v41 = vsel %vm22764_vm4, %v13636_v42, %v26388_v26  ;;  %v13651_v12 = vsel %vm22764_vm4, %v13646_v61, %v26400_v34  ;;  %v13665_v15 = vor.u32 %v13664_v55, %v26416_v25  ;;  %v18746_v26 = vld [vmem:[%s22742_s13 + $0x268] sm:$0x1] }
 0x424   : > { %v13668_v33 = vshll.u32 %v18741_v22, 16  ;;  %v26439_v29 = vrot.slane %v13655_v16, 4  ;;  %v13679_v49 = vor.u32 %v13678_v57, %v13675_v48  ;;  %v26441_v21 = vrot.slane %v13692_v17, 5 }
 0x425   : > { %v13698_v44 = vrot.slane %v13696_v46, 4  ;;  %v13717_v47 = vshrl.u32 %v18747_v6, 16  ;;  %v13720_v3 = vshll.u32 %v18747_v6, 16  ;;  %v13726_v28 = vshll.u32 %v18748_v14, 16 }
 0x426   : > { %v13730_v11 = vshrl.u32 %v18748_v14, 16  ;;  %v13689_v36 = vor.u32 %v13688_v59, %v26427_v0  ;;  %v26447_v19 = vrot.slane %v13702_v45, 5  ;;  %v13708_v24 = vrot.slane %v13706_v13, 4  ;;  %v22076_v45 = vld [vmem:[%s22742_s13 + $0xf8] sm:$0xff]   ;;  %v18754_v14 = vld [vmem:[%s22742_s13 + $0x288] sm:$0xf] }
 0x427   : > { %v18816_v54 = vcombine.low %v13617_v60, %v13627_v40  ;;  %v18817_v43 = vcombine.low %v13641_v41, %v13651_v12  ;;  %v13666_v18 = vrot.slane %v13665_v15, 4  ;;  %v13670_v8 = vrot.slane %v13668_v33, 5  ;;  %v22077_v15 = vld [vmem:[%s22742_s13 + $0x104] sm:$0xff]  }
 0x428   : > { %v13661_v34 = vsel %vm22764_vm4, %v26439_v29, %v26416_v25  ;;  %v13680_v56 = vrot.slane %v13679_v49, 4  ;;  %v13699_v53 = vor.u32 %v13698_v44, %v26441_v21  ;;  %v13712_v32 = vshll.u32 %v18746_v26, 16  ;;  %v18755_v44 = vld [vmem:[%s22742_s13 + $0x28c] sm:$0xf] }
 0x429   : > { %20106 = vmatmul.mubr.msk.bf16.gmra.mrb[36].mxu1 %vm1963_vm3, %v22072_v52  ;;  %v13722_v10 = vrot.slane %v13720_v3, 5  ;;  %v26459_v1 = vrot.slane %v13726_v28, 5  ;;  %v13732_v50 = vrot.slane %v13730_v11, 4  ;;  %v13690_v58 = vrot.slane %v13689_v36, 4 }
 0x42a   : > { %20690 = vmatmul.mubr.msk.bf16.gmra.mrb[100].mxu0 %vm1963_vm3, %v18814_v23  ;;  %20109 = vmatprep.mubr.msk.bf16.mxu1 %vm1963_vm3, %v22073_v62  ;;  %v13719_v23 = vrot.slane %v13717_v47, 4  ;;  %v13709_v37 = vor.u32 %v13708_v24, %v26447_v19  ;;  %v13736_v38 = vshll.u32 %v18749_v5, 16  ;;  %v13740_v31 = vshrl.u32 %v18749_v5, 16  ;;  %v18757_v24 = vld [vmem:[%s22742_s13 + $0x294] sm:$0xf] }
 0x42b   : > { %20693 = vmatprep.mubr.msk.bf16.mxu0 %vm1963_vm3, %v18815_v7  ;;  %v13746_v42 = vshll.u32 %v18750_v35, 16  ;;  %v13750_v2 = vshrl.u32 %v18750_v35, 16  ;;  %v13761_v20 = vshrl.u32 %v18752_v27, 16  ;;  %v13764_v52 = vshll.u32 %v18752_v27, 16  ;;  %v18751_v7 = vld [vmem:[%s22742_s13 + $0x27c] sm:$0x1] }
 0x42c   : > { %v13671_v61 = vsel %vm22764_vm4, %v13666_v18, %v13670_v8  ;;  %v13685_v16 = vsel %vm22764_vm4, %v13680_v56, %v26427_v0  ;;  %v13770_v25 = vshll.u32 %v18753_v51, 16  ;;  %v13774_v55 = vshrl.u32 %v18753_v51, 16  ;;  %v22078_v51 = vld [vmem:[%s22742_s13 + $0x10c] sm:$0xff]  }
 0x42d   : > { %v13700_v4 = vrot.slane %v13699_v53, 4  ;;  %v13714_v22 = vrot.slane %v13712_v32, 5  ;;  %v13723_v48 = vor.u32 %v13722_v10, %v13719_v23  ;;  %v13733_v57 = vor.u32 %v13732_v50, %v26459_v1 }
 0x42e   : > { %v13695_v17 = vsel %vm22764_vm4, %v13690_v58, %v26441_v21  ;;  %v13710_v46 = vrot.slane %v13709_v37, 4  ;;  %v13738_v62 = vrot.slane %v13736_v38, 5  ;;  %v13742_v60 = vrot.slane %v13740_v31, 4  ;;  %v22079_v31 = vld [vmem:[%s22742_s13 + $0x118] sm:$0xff]  }
 0x42f   : > { %v26477_v40 = vrot.slane %v13746_v42, 5  ;;  %v13752_v6 = vrot.slane %v13750_v2, 4  ;;  %v13763_v0 = vrot.slane %v13761_v20, 4  ;;  %v13766_v59 = vrot.slane %v13764_v52, 5  ;;  %v18756_v2 = vld [vmem:[%s22742_s13 + $0x290] sm:$0x1] }
 0x430   : > { %v18818_v13 = vcombine.low %v13661_v34, %v13671_v61  ;;  %v26481_v41 = vrot.slane %v13770_v25, 5  ;;  %v13776_v12 = vrot.slane %v13774_v55, 4  ;;  %v18819_v33 = vcombine.low %v13685_v16, %v13695_v17  ;;  %v18759_v20 = vld [vmem:[%s22742_s13 + $0x29c] sm:$0xf]  ;;  %v18760_v55 = vld [vmem:[%s22742_s13 + $0x2a0] sm:$0xf] }
 0x431   : > { %20110 = vmatmul.mubr.msk.bf16.gmra.mrb[40].mxu1 %vm1963_vm3, %v22074_v30  ;;  %v13724_v29 = vrot.slane %v13723_v48, 4  ;;  %v13734_v49 = vrot.slane %v13733_v57, 4  ;;  %v13756_v21 = vshll.u32 %v18751_v7, 16  ;;  %v13705_v26 = vsel %vm22764_vm4, %v13700_v4, %v26447_v19  ;;  %v18758_v30 = vld [vmem:[%s22742_s13 + $0x298] sm:$0xf] }
 0x432   : > { %20694 = vmatmul.mubr.msk.bf16.gmra.mrb[104].mxu0 %vm1963_vm3, %v18816_v54  ;;  %20113 = vmatprep.mubr.msk.bf16.mxu1 %vm1963_vm3, %v22075_v63  ;;  %v13715_v47 = vsel %vm22764_vm4, %v13710_v46, %v13714_v22  ;;  %v13743_v3 = vor.u32 %v13742_v60, %v13738_v62  ;;  %v13753_v28 = vor.u32 %v13752_v6, %v26477_v40  ;;  %v13780_v36 = vshll.u32 %v18754_v14, 16 }
 0x433   : > { %20697 = vmatprep.mubr.msk.bf16.mxu0 %vm1963_vm3, %v18817_v43  ;;  %v13767_v11 = vor.u32 %v13766_v59, %v13763_v0  ;;  %v13777_v54 = vor.u32 %v13776_v12, %v26481_v41  ;;  %v13784_v63 = vshrl.u32 %v18754_v14, 16  ;;  %v13790_v43 = vshll.u32 %v18755_v44, 16 }
 0x434   : > { %v13794_v19 = vshrl.u32 %v18755_v44, 16  ;;  %v18820_v18 = vcombine.low %v13705_v26, %v13715_v47  ;;  %v13729_v8 = vsel %vm22764_vm4, %v13724_v29, %v26459_v1  ;;  %v13739_v5 = vsel %vm22764_vm4, %v13734_v49, %v13738_v62 }
 0x435   : > { %v13758_v34 = vrot.slane %v13756_v21, 5  ;;  %v13805_v56 = vshrl.u32 %v18757_v24, 16  ;;  %v13808_v53 = vshll.u32 %v18757_v24, 16  ;;  %v13814_v32 = vshll.u32 %v18758_v30, 16 }
 0x436   : > { %v13818_v35 = vshrl.u32 %v18758_v30, 16  ;;  %v13744_v27 = vrot.slane %v13743_v3, 4  ;;  %v13754_v23 = vrot.slane %v13753_v28, 4  ;;  %v13768_v10 = vrot.slane %v13767_v11, 4  ;;  %v18761_v3 = vld [vmem:[%s22742_s13 + $0x2a4] sm:$0x1] }
 0x437   : > { %v13782_v50 = vrot.slane %v13780_v36, 5  ;;  %v13778_v58 = vrot.slane %v13777_v54, 4  ;;  %v13786_v37 = vrot.slane %v13784_v63, 4  ;;  %v13792_v1 = vrot.slane %v13790_v43, 5  ;;  %v22382_v43 = vld [vmem:[%s22742_s13 + $0x2c] sm:$0xf] }
 0x438   : > { %v13796_v38 = vrot.slane %v13794_v19, 4  ;;  %v18821_v42 = vcombine.low %v13729_v8, %v13739_v5  ;;  %v13807_v52 = vrot.slane %v13805_v56, 4  ;;  %v13810_v61 = vrot.slane %v13808_v53, 5  ;;  %v22082_v56 = vld [vmem:[%s22742_s13 + $0x134] sm:$0xff]  }
 0x439   : > { %20114 = vmatmul.mubr.msk.bf16.gmra.mrb[44].mxu1 %vm1963_vm3, %v22076_v45  ;;  %v13816_v16 = vrot.slane %v13814_v32, 5  ;;  %v13820_v25 = vrot.slane %v13818_v35, 4  ;;  %v13749_v4 = vsel %vm22764_vm4, %v13744_v27, %v26477_v40  ;;  %v13759_v22 = vsel %vm22764_vm4, %v13754_v23, %v13758_v34  ;;  %v18891_v34 = vld [vmem:[%s22742_s13 + $0x28] sm:$0xe]  ;;  %v22083_v32 = vld [vmem:[%s22742_s13 + $0x140] sm:$0xff]  }
 0x43a   : > { %20698 = vmatmul.mubr.msk.bf16.gmra.mrb[108].mxu0 %vm1963_vm3, %v18818_v13  ;;  %20117 = vmatprep.mubr.msk.bf16.mxu1 %vm1963_vm3, %v22077_v15  ;;  %v13773_v48 = vsel %vm22764_vm4, %v13768_v10, %v26481_v41  ;;  %v13783_v57 = vsel %vm22764_vm4, %v13778_v58, %v13782_v50  ;;  %v13787_v17 = vor.u32 %v13786_v37, %v13782_v50  ;;  %v13800_v62 = vshll.u32 %v18756_v2, 16  ;;  %v22080_v13 = vld [vmem:[%s22742_s13 + $0x120] sm:$0xff]   ;;  %v22384_v58 = vld [vmem:[%s22742_s13 + $0x30] sm:$0xf] }
 0x43b   : > { %20701 = vmatprep.mubr.msk.bf16.mxu0 %vm1963_vm3, %v18819_v33  ;;  %v13797_v46 = vor.u32 %v13796_v38, %v13792_v1  ;;  %v13824_v7 = vshll.u32 %v18759_v20, 16  ;;  %v13828_v60 = vshrl.u32 %v18759_v20, 16  ;;  %v13834_v40 = vshll.u32 %v18760_v55, 16  ;;  %v22081_v33 = vld [vmem:[%s22742_s13 + $0x12c] sm:$0xff]  }
 0x43c   : > { %v13838_v6 = vshrl.u32 %v18760_v55, 16  ;;  %v13811_v0 = vor.u32 %v13810_v61, %v13807_v52  ;;  %v13821_v59 = vor.u32 %v13820_v25, %v13816_v16  ;;  %v18822_v45 = vcombine.low %v13749_v4, %v13759_v22  ;;  %v22387_v4 = vld [vmem:[%s22742_s13 + $0x164] sm:$0x1] }
 0x43d   : > { %v18823_v14 = vcombine.low %v13773_v48, %v13783_v57  ;;  %v13788_v41 = vrot.slane %v13787_v17, 4  ;;  %v13798_v12 = vrot.slane %v13797_v46, 4  ;;  %v13802_v15 = vrot.slane %v13800_v62, 5  ;;  %v18892_v57 = vld [vmem:[%s22742_s13 + $0x3c] sm:$0xe]  ;;  %v22084_v17 = vld [vmem:[%s22742_s13 + $0x148] sm:$0xff]  }
 0x43e   : > { %v13826_v29 = vrot.slane %v13824_v7, 5  ;;  %v13830_v49 = vrot.slane %v13828_v60, 4  ;;  %v13836_v21 = vrot.slane %v13834_v40, 5  ;;  %v13840_v44 = vrot.slane %v13838_v6, 4  ;;  %v22388_v7 = vld [vmem:[%s22742_s13 + $0x38] sm:$0x1] }
 0x43f   : > { %v13812_v26 = vrot.slane %v13811_v0, 4  ;;  %v13822_v47 = vrot.slane %v13821_v59, 4  ;;  %v13793_v28 = vsel %vm22764_vm4, %v13788_v41, %v13792_v1  ;;  %v13803_v11 = vsel %vm22764_vm4, %v13798_v12, %v13802_v15  ;;  %v22389_v40 = vld [vmem:[%s22742_s13 + $0x44] sm:$0xf]  ;;  %v22085_v0 = vld [vmem:[%s22742_s13 + $0x154] sm:$0xff]  }
 0x440   : > { %v13831_v36 = vor.u32 %v13830_v49, %v13826_v29  ;;  %v13841_v24 = vor.u32 %v13840_v44, %v13836_v21  ;;  %v13844_v30 = vshll.u32 %v18761_v3, 16  ;;  %v15104_v19 = vrot.slane %v22382_v43, 5  ;;  %v18893_v15 = vld [vmem:[%s22742_s13 + $0x50] sm:$0xe]  ;;  %v22392_v49 = vld [vmem:[%s22742_s13 + $0x15c] sm:$0xf] }
 0x441   : > { %20118 = vmatmul.mubr.msk.bf16.gmra.mrb[48].mxu1 %vm1963_vm3, %v22078_v51  ;;  %v13817_v54 = vsel %vm22764_vm4, %v13812_v26, %v13816_v16  ;;  %v13827_v63 = vsel %vm22764_vm4, %v13822_v47, %v13826_v29  ;;  %v18824_v53 = vcombine.low %v13793_v28, %v13803_v11  ;;  %v18923_v50 = vrot.slane %v18891_v34, 9  ;;  %v22386_v16 = vld [vmem:[%s22742_s13 + $0x40] sm:$0xf]  ;;  %v22395_v34 = vld [vmem:[%s22742_s13 + $0x5c] sm:$0xf] }
 0x442   : > { %20702 = vmatmul.mubr.msk.bf16.gmra.mrb[112].mxu0 %vm1963_vm3, %v18820_v18  ;;  %20121 = vmatprep.mubr.msk.bf16.mxu1 %vm1963_vm3, %v22079_v31  ;;  %v22383_v18 = vld [vmem:[%s22742_s13 + $0x160] sm:$0xf]  ;;  %v18825_v35 = vcombine.low %v13817_v54, %v13827_v63  ;;  %v13832_v27 = vrot.slane %v13831_v36, 4  ;;  %v13842_v23 = vrot.slane %v13841_v24, 4  ;;  %v13846_v10 = vrot.slane %v13844_v30, 5 }
 0x443   : > { %20705 = vmatprep.mubr.msk.bf16.mxu0 %vm1963_vm3, %v18821_v42  ;;  %v7555_v8 = vshll.u32 %v22383_v18, 16  ;;  %v7559_v5 = vshrl.u32 %v22383_v18, 16  ;;  %v15106_v51 = vrot.slane %v15104_v19, 4  ;;  %v15107_v37 = vrot.slane %v22384_v58, 5  ;;  %v22385_v31 = vld [vmem:[%s22742_s13 + $0x34] sm:$0xf] }
 0x444   : > { %v15110_v42 = vrot.slane %v22385_v31, 5  ;;  %v13837_v2 = vsel %vm22764_vm4, %v13832_v27, %v13836_v21  ;;  %v13847_v20 = vsel %vm22764_vm4, %v13842_v23, %v13846_v10  ;;  %v15105_v52 = vsel %vm23271_vm7, %v18923_v50, %v15104_v19  ;;  %v22393_v36 = vld [vmem:[%s22742_s13 + $0x4c] sm:$0x1]  ;;  %v22396_v23 = vld [vmem:[%s22742_s13 + $0x60] sm:$0x1] }
 0x445   : > { %v26543_v1 = vrot.slane %v7555_v8, 5  ;;  %v7561_v38 = vrot.slane %v7559_v5, 4  ;;  %v15108_v61 = vsel %vm23271_vm7, %v15106_v51, %v15107_v37  ;;  %v15117_v25 = vrot.slane %v22386_v16, 5  ;;  %v22394_v8 = vld [vmem:[%s22742_s13 + $0x58] sm:$0xf]  ;;  %v22087_v50 = vld [vmem:[%s22742_s13 + $0x168] sm:$0xff]  }
 0x446   : > { %v7565_v22 = vshll.u32 %v22387_v4, 16  ;;  %v15109_v48 = vrot.slane %v15107_v37, 4  ;;  %v18826_v46 = vcombine.low %v13837_v2, %v13847_v20  ;;  %v15112_v62 = vrot.slane %v15110_v42, 4  ;;  %v22397_v2 = vld [vmem:[%s22742_s13 + $0x68] sm:$0xf] }
 0x447   : > { %v7562_v55 = vor.u32 %v7561_v38, %v26543_v1  ;;  %v15113_v60 = vrot.slane %v22388_v7, 5  ;;  %v15120_v6 = vrot.slane %v22389_v40, 5  ;;  %v18956_v59 = vcombine.low %v15105_v52, %v15108_v61  ;;  %v22398_v52 = vld [vmem:[%s22742_s13 + $0x6c] sm:$0xf]  ;;  %v22399_v16 = vld [vmem:[%s22742_s13 + $0x70] sm:$0xf] }
 0x448   : > { %v15119_v41 = vrot.slane %v15117_v25, 4  ;;  %v7567_v12 = vrot.slane %v7565_v22, 5  ;;  %v7545_v21 = vshll.u32 %v22392_v49, 16  ;;  %v7549_v44 = vshrl.u32 %v22392_v49, 16 }
 0x449   : > { %20122 = vmatmul.mubr.msk.bf16.gmra.mrb[52].mxu1 %vm1963_vm3, %v22080_v13  ;;  %v7563_v26 = vrot.slane %v7562_v55, 4  ;;  %v15111_v47 = vsel %vm23271_vm7, %v15109_v48, %v15110_v42  ;;  %v15114_v3 = vsel %vm23271_vm7, %v15112_v62, %v15113_v60  ;;  %v15122_v28 = vrot.slane %v15120_v6, 4  ;;  %v18894_v42 = vld [vmem:[%s22742_s13 + $0x64] sm:$0xe]  ;;  %v22401_v62 = vld [vmem:[%s22742_s13 + $0x80] sm:$0xf] }
 0x44a   : > { %20706 = vmatmul.mubr.msk.bf16.gmra.mrb[116].mxu0 %vm1963_vm3, %v18822_v45  ;;  %20125 = vmatprep.mubr.msk.bf16.mxu1 %vm1963_vm3, %v22081_v33  ;;  %v22390_v45 = vld [vmem:[%s22742_s13 + $0x48] sm:$0xf]  ;;  %v22391_v33 = vld [vmem:[%s22742_s13 + $0x54] sm:$0xf]  ;;  %v15126_v24 = vrot.slane %v22393_v36, 5  ;;  %v26579_v30 = vrot.slane %v7545_v21, 5  ;;  %v15121_v43 = vsel %vm23271_vm7, %v15119_v41, %v15120_v6 }
 0x44b   : > { %20709 = vmatprep.mubr.msk.bf16.mxu0 %vm1963_vm3, %v18823_v14  ;;  %v15123_v13 = vrot.slane %v22390_v45, 5  ;;  %v18924_v14 = vrot.slane %v18892_v57, 9  ;;  %v15130_v29 = vrot.slane %v22391_v33, 5  ;;  %v7551_v54 = vrot.slane %v7549_v44, 4  ;;  %v18895_v57 = vld [vmem:[%s22742_s13 + $0x78] sm:$0xe] }
 0x44c   : > { %v18925_v19 = vrot.slane %v18893_v15, 9  ;;  %v15133_v5 = vrot.slane %v22394_v8, 5  ;;  %v15139_v10 = vrot.slane %v22396_v23, 5  ;;  %v7568_v38 = vsel %vm22764_vm4, %v7563_v26, %v7567_v12  ;;  %v22402_v60 = vld [vmem:[%s22742_s13 + $0x84] sm:$0xf]  ;;  %v22088_v12 = vld [vmem:[%s22742_s13 + $0x170] sm:$0xff]  }
 0x44d   : > { %v15125_v11 = vrot.slane %v15123_v13, 4  ;;  %v15118_v63 = vsel %vm23271_vm7, %v18924_v14, %v15117_v25  ;;  %v15132_v18 = vrot.slane %v15130_v29, 4  ;;  %v26591_v27 = vsel %vm23271_vm7, %v15122_v28, %v15123_v13  ;;  %v22403_v14 = vld [vmem:[%s22742_s13 + $0x74] sm:$0x1]  ;;  %v18896_v28 = vld [vmem:[%s22742_s13 + $0x8c] sm:$0xe] }
 0x44e   : > { %v18958_v51 = vcombine.low %v15118_v63, %v15121_v43  ;;  %v26603_v31 = vsel %vm23271_vm7, %v18925_v19, %v15130_v29  ;;  %v15143_v20 = vrot.slane %v22397_v2, 5  ;;  %v15146_v61 = vrot.slane %v22398_v52, 5  ;;  %v22406_v63 = vld [vmem:[%s22742_s13 + $0x94] sm:$0xf]  ;;  %v22407_v19 = vld [vmem:[%s22742_s13 + $0x98] sm:$0xf] }
 0x44f   : > { %v26597_v58 = vsel %vm23271_vm7, %v15125_v11, %v15126_v24  ;;  %v15149_v25 = vrot.slane %v22399_v16, 5  ;;  %v26611_v55 = vsel %vm23271_vm7, %v15132_v18, %v15133_v5  ;;  %v15135_v4 = vrot.slane %v15133_v5, 4  ;;  %v22089_v11 = vld [vmem:[%s22742_s13 + $0x17c] sm:$0xff]   ;;  %v22405_v24 = vld [vmem:[%s22742_s13 + $0x90] sm:$0xf] }
 0x450   : > { %v15159_v7 = vrot.slane %v22401_v62, 5  ;;  %v15162_v40 = vrot.slane %v22402_v60, 5  ;;  %v15148_v45 = vrot.slane %v15146_v61, 4  ;;  %v15152_v41 = vrot.slane %v22403_v14, 5  ;;  %v22409_v23 = vld [vmem:[%s22742_s13 + $0xa8] sm:$0xf] }
 0x451   : > { %20126 = vmatmul.mubr.msk.bf16.gmra.mrb[56].mxu1 %vm1963_vm3, %v22082_v56  ;;  %v15136_v56 = vrot.slane %v22395_v34, 5  ;;  %v15151_v13 = vrot.slane %v15149_v25, 4  ;;  %v18960_v15 = vcombine.low %v26603_v31, %v26611_v55  ;;  %v18927_v49 = vrot.slane %v18895_v57, 9  ;;  %v22411_v31 = vld [vmem:[%s22742_s13 + $0x9c] sm:$0x1] }
 0x452   : > { %20710 = vmatmul.mubr.msk.bf16.gmra.mrb[120].mxu0 %vm1963_vm3, %v18824_v53  ;;  %20129 = vmatprep.mubr.msk.bf16.mxu1 %vm1963_vm3, %v22083_v32  ;;  %v7552_v53 = vor.u32 %v7551_v54, %v26579_v30  ;;  %v22086_v32 = vld [vmem:[%s22742_s13 + $0x15c] sm:$0xff]   ;;  %v15161_v44 = vrot.slane %v15159_v7, 4  ;;  %v15164_v26 = vrot.slane %v15162_v40, 4  ;;  %v15169_v54 = vrot.slane %v22405_v24, 5  ;;  %v18898_v62 = vld [vmem:[%s22742_s13 + $0xb4] sm:$0xe] }
 0x453   : > { %20713 = vmatprep.mubr.msk.bf16.mxu0 %vm1963_vm3, %v18825_v35  ;;  %v18957_v35 = vcombine.low %v15111_v47, %v15114_v3  ;;  %v15138_v22 = vrot.slane %v15136_v56, 4  ;;  %v26634_v33 = vsel %vm23271_vm7, %v15135_v4, %v15136_v56  ;;  %v22404_v47 = vld [vmem:[%s22742_s13 + $0x88] sm:$0x1]  ;;  %v15172_v43 = vrot.slane %v22406_v63, 5  ;;  %v18897_v56 = vld [vmem:[%s22742_s13 + $0xa0] sm:$0xe] }
 0x454   : > { %v7553_v37 = vrot.slane %v7552_v53, 4  ;;  %v15165_v3 = vrot.slane %v22404_v47, 5  ;;  %v15175_v18 = vrot.slane %v22407_v19, 5  ;;  %v26656_v5 = vsel %vm23271_vm7, %v15148_v45, %v15149_v25  ;;  %v22408_v53 = vld [vmem:[%s22742_s13 + $0xa4] sm:$0xf] }
 0x455   : > { %v26638_v29 = vsel %vm23271_vm7, %v15138_v22, %v15139_v10  ;;  %v26660_v34 = vsel %vm23271_vm7, %v15151_v13, %v15152_v41  ;;  %v15185_v10 = vrot.slane %v22409_v23, 5  ;;  %v15171_v2 = vrot.slane %v15169_v54, 4  ;;  %v22412_v4 = vld [vmem:[%s22742_s13 + $0xb8] sm:$0xf]  ;;  %v22091_v13 = vld [vmem:[%s22742_s13 + $0x190] sm:$0xff]  }
 0x456   : > { %v7558_v48 = vsel %vm22764_vm4, %v7553_v37, %v26543_v1  ;;  %v18959_v1 = vcombine.low %v26591_v27, %v26597_v58  ;;  %v18928_v27 = vrot.slane %v18896_v28, 9  ;;  %v26678_v37 = vsel %vm23271_vm7, %v15161_v44, %v15162_v40  ;;  %v22090_v40 = vld [vmem:[%s22742_s13 + $0x184] sm:$0xff]   ;;  %v22416_v28 = vld [vmem:[%s22742_s13 + $0xcc] sm:$0xf]  ;;  %v22417_v63 = vld [vmem:[%s22742_s13 + $0xd0] sm:$0xf] }
 0x457   : > { %v26622_v6 = vcombine.low %v7558_v48, %v7568_v38  ;;  %v26682_v38 = vsel %vm23271_vm7, %v15164_v26, %v15165_v3  ;;  %v15177_v52 = vrot.slane %v15175_v18, 4  ;;  %v18961_v16 = vcombine.low %v26634_v33, %v26638_v29  ;;  %v22418_v19 = vld [vmem:[%s22742_s13 + $0xd4] sm:$0xf] }
 0x458   : > { %v15195_v22 = vrot.slane %v22412_v4, 5  ;;  %v15187_v48 = vrot.slane %v15185_v10, 4  ;;  %v26704_v45 = vsel %vm23271_vm7, %v18928_v27, %v15169_v54  ;;  %v26709_v14 = vsel %vm23271_vm7, %v15171_v2, %v15172_v43  ;;  %v18899_v54 = vld [vmem:[%s22742_s13 + $0xc8] sm:$0xe]  ;;  %v22420_v27 = vld [vmem:[%s22742_s13 + $0xe0] sm:$0xf] }
 0x459   : > { %20130 = vmatmul.mubr.msk.bf16.gmra.mrb[60].mxu1 %vm1963_vm3, %v22084_v17  ;;  %v22400_v17 = vld [vmem:[%s22742_s13 + $0x7c] sm:$0xf]  ;;  %29030 = vst [vmem:[#allocation21_spill] sm:$0xff] %v26622_v6  ;;  %v18930_v29 = vrot.slane %v18898_v62, 9  ;;  %v15221_v23 = vrot.slane %v22420_v27, 5 }
 0x45a   : > { %20714 = vmatmul.mubr.msk.bf16.gmra.mrb[124].mxu0 %vm1963_vm3, %v18826_v46  ;;  %20133 = vmatprep.mubr.msk.bf16.mxu1 %vm1963_vm3, %v22085_v0  ;;  %v15156_v46 = vrot.slane %v22400_v17, 5  ;;  %v18926_v0 = vrot.slane %v18894_v42, 9  ;;  %v15178_v42 = vrot.slane %v22411_v31, 5  ;;  %v22413_v17 = vld [vmem:[%s22742_s13 + $0xb0] sm:$0x1] }
 0x45b   : > { %20719 = vmatprep.mubr.msk.bf16.mxu0 %vm1963_vm3, %v18956_v59  ;;  %v15145_v59 = vrot.slane %v15143_v20, 4  ;;  %v26758_v31 = vsel %vm23271_vm7, %v18930_v29, %v15195_v22  ;;  %v22422_v2 = vld [vmem:[%s22742_s13 + $0xe8] sm:$0xf] }
 0x45c   : > { %v15158_v21 = vrot.slane %v15156_v46, 4  ;;  %v26645_v36 = vsel %vm23271_vm7, %v18926_v0, %v15143_v20  ;;  %v15174_v20 = vrot.slane %v15172_v43, 4  ;;  %v15211_v43 = vrot.slane %v22417_v63, 5  ;;  %v22428_v27 = vld [vmem:[%s22742_s13 + $0x108] sm:$0xf] }
 0x45d   : > { %v26652_v8 = vsel %vm23271_vm7, %v15145_v59, %v15146_v61  ;;  %v18929_v61 = vrot.slane %v18897_v56, 9  ;;  %v18965_v59 = vcombine.low %v26678_v37, %v26682_v38  ;;  %v22419_v56 = vld [vmem:[%s22742_s13 + $0xc4] sm:$0x1]  ;;  %v22436_v38 = vld [vmem:[%s22742_s13 + $0x130] sm:$0xf] }
 0x45e   : > { %v26674_v58 = vsel %vm23271_vm7, %v15158_v21, %v15159_v7  ;;  %v18962_v25 = vcombine.low %v26645_v36, %v26652_v8  ;;  %v22414_v7 = vld [vmem:[%s22742_s13 + $0xbc] sm:$0xf]  ;;  %v26713_v41 = vsel %vm23271_vm7, %v15174_v20, %v15175_v18  ;;  %v22415_v21 = vld [vmem:[%s22742_s13 + $0xc0] sm:$0xf]  ;;  %v18966_v36 = vcombine.low %v26704_v45, %v26709_v14  ;;  %v18904_v14 = vld [vmem:[%s22742_s13 + $0x12c] sm:$0xe] }
 0x45f   : > { %v15198_v60 = vrot.slane %v22414_v7, 5  ;;  %v15201_v44 = vrot.slane %v22415_v21, 5  ;;  %v15214_v18 = vrot.slane %v22418_v19, 5  ;;  %v15227_v20 = vrot.slane %v22422_v2, 5  ;;  %v22425_v21 = vld [vmem:[%s22742_s13 + $0xec] sm:$0x1] }
 0x460   : > { %v15213_v4 = vrot.slane %v15211_v43, 4  ;;  %v15223_v7 = vrot.slane %v15221_v23, 4  ;;  %v22097_v37 = vld [vmem:[%s22742_s13 + $0x1cc] sm:$0xff]  }
 0x461   : > { %20134 = vmatmul.mubr.msk.bf16.gmra.mrb[64].mxu1 %vm1963_vm3, %v22086_v32  ;;  %v15182_v32 = vrot.slane %v22408_v53, 5  ;;  %v15200_v3 = vrot.slane %v15198_v60, 4  ;;  %v15204_v53 = vrot.slane %v22419_v56, 5 }
 0x462   : > { %20720 = vmatmul.mubr.msk.bf16.vlgmr.msra.gmra.mrb[0].mxu0 %vm1963_vm3, %v18957_v35  ;;  %20137 = vmatprep.mubr.msk.bf16.mxu1 %vm1963_vm3, %v22087_v50  ;;  %v26666_v35 = vsel %vm23271_vm7, %v18927_v49, %v15156_v46  ;;  %v22410_v50 = vld [vmem:[%s22742_s13 + $0xac] sm:$0xf]  ;;  %v15191_v46 = vrot.slane %v22413_v17, 5  ;;  %v15197_v49 = vrot.slane %v15195_v22, 4  ;;  %v15216_v22 = vrot.slane %v15214_v18, 4 }
 0x463   : > { %20723 = vmatprep.mubr.msk.bf16.mxu0 %vm1963_vm3, %v18958_v51  ;;  %v15188_v51 = vrot.slane %v22410_v50, 5  ;;  %v15184_v55 = vrot.slane %v15182_v32, 4  ;;  %v18964_v0 = vcombine.low %v26666_v35, %v26674_v58 }
 0x465   : > { %v15190_v57 = vrot.slane %v15188_v51, 4  ;;  %v26725_v33 = vsel %vm23271_vm7, %v15184_v55, %v15185_v10  ;;  %v26730_v26 = vsel %vm23271_vm7, %v15187_v48, %v15188_v51  ;;  %v22421_v10 = vld [vmem:[%s22742_s13 + $0xe4] sm:$0xf]  ;;  %v22092_v55 = vld [vmem:[%s22742_s13 + $0x198] sm:$0xff]   ;;  %v22445_v51 = vld [vmem:[%s22742_s13 + $0x150] sm:$0x1] }
 0x466   : > { %v15224_v50 = vrot.slane %v22421_v10, 5  ;;  %v22423_v48 = vld [vmem:[%s22742_s13 + $0xd8] sm:$0x1]  ;;  %v15247_v10 = vrot.slane %v22428_v27, 5  ;;  %v15295_v8 = vrot.slane %v22445_v51, 5 }
 0x467   : > { %v26734_v47 = vsel %vm23271_vm7, %v15190_v57, %v15191_v46  ;;  %v15217_v57 = vrot.slane %v22423_v48, 5  ;;  %v22093_v46 = vld [vmem:[%s22742_s13 + $0x1a4] sm:$0xff]   ;;  %v22094_v48 = vld [vmem:[%s22742_s13 + $0x1ac] sm:$0xff]  }
 0x469   : > { %20138 = vmatmul.mubr.msk.bf16.gmra.mrb[68].mxu1 %vm1963_vm3, %v22088_v12  ;;  %v26717_v12 = vsel %vm23271_vm7, %v15177_v52, %v15178_v42  ;;  %v26762_v42 = vsel %vm23271_vm7, %v15197_v49, %v15198_v60  ;;  %v26767_v52 = vsel %vm23271_vm7, %v15200_v3, %v15201_v44  ;;  %v15226_v60 = vrot.slane %v15224_v50, 4  ;;  %v22426_v3 = vld [vmem:[%s22742_s13 + $0xf8] sm:$0xf] }
 0x46a   : > { %20724 = vmatmul.mubr.msk.bf16.gmra.mrb[4].mxu0 %vm1963_vm3, %v18959_v1  ;;  %20141 = vmatprep.mubr.msk.bf16.mxu1 %vm1963_vm3, %v22089_v11  ;;  %v18963_v1 = vcombine.low %v26656_v5, %v26660_v34  ;;  %v15208_v11 = vrot.slane %v22416_v28, 5  ;;  %v15229_v49 = vrot.slane %v15227_v20, 4  ;;  %v15237_v28 = vrot.slane %v22426_v3, 5 }
 0x46b   : > { %20727 = vmatprep.mubr.msk.bf16.mxu0 %vm1963_vm3, %v18960_v15  ;;  %v26721_v15 = vsel %vm23271_vm7, %v18929_v61, %v15182_v32  ;;  %v18900_v32 = vld [vmem:[%s22742_s13 + $0xdc] sm:$0xe]  ;;  %v15203_v61 = vrot.slane %v15201_v44, 4  ;;  %v15230_v44 = vrot.slane %v22425_v21, 5  ;;  %v26817_v5 = vsel %vm23271_vm7, %v15223_v7, %v15224_v50 }
 0x46c   : > { %v18932_v17 = vrot.slane %v18900_v32, 9  ;;  %v26821_v34 = vsel %vm23271_vm7, %v15226_v60, %v15227_v20  ;;  %v15239_v35 = vrot.slane %v15237_v28, 4  ;;  %v15249_v20 = vrot.slane %v15247_v10, 4  ;;  %v22433_v60 = vld [vmem:[%s22742_s13 + $0x120] sm:$0xf] }
 0x46d   : > { %v26781_v19 = vsel %vm23271_vm7, %v15203_v61, %v15204_v53  ;;  %v26799_v53 = vsel %vm23271_vm7, %v15213_v4, %v15214_v18  ;;  %v18902_v61 = vld [vmem:[%s22742_s13 + $0x104] sm:$0xe]  ;;  %v22429_v18 = vld [vmem:[%s22742_s13 + $0x100] sm:$0x1]  ;;  %v22431_v4 = vld [vmem:[%s22742_s13 + $0x110] sm:$0xf]  ;;  %v29032_v51 = vcombine.low %v26721_v15, %v26725_v33 }
 0x46e   : > { %v18936_v21 = vrot.slane %v18904_v14, 9 }
 0x471   : > { %20142 = vmatmul.mubr.msk.bf16.gmra.mrb[72].mxu1 %vm1963_vm3, %v22090_v40  ;;  %v18901_v40 = vld [vmem:[%s22742_s13 + $0xf0] sm:$0xe] }
 0x472   : > { %20728 = vmatmul.mubr.msk.bf16.gmra.mrb[8].mxu0 %vm1963_vm3, %v18961_v16  ;;  %20145 = vmatprep.mubr.msk.bf16.mxu1 %vm1963_vm3, %v22091_v13  ;;  %v18931_v16 = vrot.slane %v18899_v54, 9  ;;  %v22424_v13 = vld [vmem:[%s22742_s13 + $0xf4] sm:$0xf]  ;;  %v22427_v54 = vld [vmem:[%s22742_s13 + $0xfc] sm:$0xf]  ;;  %v18933_v2 = vrot.slane %v18901_v40, 9 }
 0x473   : > { %20731 = vmatprep.mubr.msk.bf16.mxu0 %vm1963_vm3, %v18962_v25  ;;  %v15210_v25 = vrot.slane %v15208_v11, 4  ;;  %v15234_v29 = vrot.slane %v22424_v13, 5  ;;  %v15240_v63 = vrot.slane %v22427_v54, 5  ;;  %v15263_v40 = vrot.slane %v22433_v60, 5  ;;  %v22095_v13 = vld [vmem:[%s22742_s13 + $0x1b8] sm:$0xff]  }
 0x474   : > { %v26785_v56 = vsel %vm23271_vm7, %v18931_v16, %v15208_v11  ;;  %v26803_v11 = vsel %vm23271_vm7, %v15216_v22, %v15217_v57  ;;  %v26826_v16 = vsel %vm23271_vm7, %v15229_v49, %v15230_v44  ;;  %v15253_v22 = vrot.slane %v22431_v4, 5  ;;  %v18903_v54 = vld [vmem:[%s22742_s13 + $0x118] sm:$0xe]  ;;  %v18906_v57 = vld [vmem:[%s22742_s13 + $0x154] sm:$0xe] }
 0x475   : > { %v26789_v32 = vsel %vm23271_vm7, %v15210_v25, %v15211_v43  ;;  %v26807_v43 = vsel %vm23271_vm7, %v18932_v17, %v15221_v23  ;;  %v15243_v23 = vrot.slane %v22429_v18, 5  ;;  %v15242_v58 = vrot.slane %v15240_v63, 4 }
 0x476   : > { %v26846_v44 = vsel %vm23271_vm7, %v18933_v2, %v15234_v29  ;;  %v26855_v27 = vsel %vm23271_vm7, %v15239_v35, %v15240_v63  ;;  %v15255_v2 = vrot.slane %v15253_v22, 4  ;;  %v22435_v63 = vld [vmem:[%s22742_s13 + $0x124] sm:$0xf] }
 0x479   : > { %20146 = vmatmul.mubr.msk.bf16.gmra.mrb[76].mxu1 %vm1963_vm3, %v22092_v55  ;;  %v18934_v55 = vrot.slane %v18902_v61, 9  ;;  %v26859_v61 = vsel %vm23271_vm7, %v15242_v58, %v15243_v23  ;;  %v18935_v23 = vrot.slane %v18903_v54, 9  ;;  %v15265_v58 = vrot.slane %v15263_v40, 4 }
 0x47a   : > { %20732 = vmatmul.mubr.msk.bf16.gmra.mrb[12].mxu0 %vm1963_vm3, %v18963_v1  ;;  %20149 = vmatprep.mubr.msk.bf16.mxu1 %vm1963_vm3, %v22093_v46  ;;  %v15236_v1 = vrot.slane %v15234_v29, 4  ;;  %v22432_v46 = vld [vmem:[%s22742_s13 + $0x11c] sm:$0xf] }
 0x47b   : > { %20735 = vmatprep.mubr.msk.bf16.mxu0 %vm1963_vm3, %v18964_v0  ;;  %v22430_v0 = vld [vmem:[%s22742_s13 + $0x10c] sm:$0xf]  ;;  %v15260_v7 = vrot.slane %v22432_v46, 5  ;;  %v26864_v29 = vsel %vm23271_vm7, %v18934_v55, %v15247_v10  ;;  %v17943_v10 = vld [vmem:[%s22742_s13 + $0x154] sm:$0xf] }
 0x47c   : > { %v15250_v25 = vrot.slane %v22430_v0, 5  ;;  %v26850_v3 = vsel %vm23271_vm7, %v15236_v1, %v15237_v28  ;;  %v22434_v0 = vld [vmem:[%s22742_s13 + $0x114] sm:$0x1]  ;;  %v15266_v1 = vrot.slane %v22435_v63, 5  ;;  %v22442_v46 = vld [vmem:[%s22742_s13 + $0x14c] sm:$0xf] }
 0x47d   : > { %v15256_v4 = vrot.slane %v22434_v0, 5  ;;  %v15262_v35 = vrot.slane %v15260_v7, 4  ;;  %v7526_v24 = vshrl.u32 %v17943_v10, 16 }
 0x47e   : > { %v15252_v18 = vrot.slane %v15250_v25, 4  ;;  %v26868_v28 = vsel %vm23271_vm7, %v15249_v20, %v15250_v25  ;;  %v22437_v25 = vld [vmem:[%s22742_s13 + $0x134] sm:$0xf]  ;;  %v22438_v20 = vld [vmem:[%s22742_s13 + $0x138] sm:$0xf]  ;;  %v15268_v63 = vrot.slane %v15266_v1, 4 }
 0x47f   : > { %v15276_v55 = vrot.slane %v22437_v25, 5  ;;  %v26899_v0 = vsel %vm23271_vm7, %v15255_v2, %v15256_v4  ;;  %v26916_v4 = vsel %vm23271_vm7, %v15265_v58, %v15266_v1  ;;  %v22443_v2 = vld [vmem:[%s22742_s13 + $0x158] sm:$0xf]  ;;  %v7529_v1 = vshll.u32 %v17943_v10, 16 }
 0x480   : > { %v26892_v45 = vsel %vm23271_vm7, %v15252_v18, %v15253_v22  ;;  %v15292_v22 = vrot.slane %v22442_v46, 5  ;;  %v22096_v18 = vld [vmem:[%s22742_s13 + $0x1c0] sm:$0xff]   ;;  %v29031_v58 = vcombine.low %v26713_v41, %v26717_v12 }
 0x481   : > { %20150 = vmatmul.mubr.msk.bf16.gmra.mrb[80].mxu1 %vm1963_vm3, %v22094_v48  ;;  %v15279_v48 = vrot.slane %v22438_v20, 5  ;;  %v18905_v20 = vld [vmem:[%s22742_s13 + $0x140] sm:$0xe]  ;;  %v15278_v49 = vrot.slane %v15276_v55, 4 }
 0x482   : > { %20736 = vmatmul.mubr.msk.bf16.gmra.mrb[16].mxu0 %vm1963_vm3, %v18965_v59  ;;  %20153 = vmatprep.mubr.msk.bf16.mxu1 %vm1963_vm3, %v22095_v13  ;;  %v15273_v59 = vrot.slane %v22436_v38, 5  ;;  %v22440_v13 = vld [vmem:[%s22742_s13 + $0x148] sm:$0xf]  ;;  %v18937_v50 = vrot.slane %v18905_v20, 9  ;;  %v18938_v20 = vrot.slane %v18906_v57, 9 }
 0x483   : > { %20739 = vmatprep.mubr.msk.bf16.mxu0 %vm1963_vm3, %v18966_v36  ;;  %v22439_v36 = vld [vmem:[%s22742_s13 + $0x144] sm:$0xf]  ;;  %v15289_v54 = vrot.slane %v22440_v13, 5  ;;  %v22441_v38 = vld [vmem:[%s22742_s13 + $0x128] sm:$0x1]  ;;  %v26912_v13 = vsel %vm23271_vm7, %v15262_v35, %v15263_v40  ;;  %v15281_v17 = vrot.slane %v15279_v48, 4  ;;  %v26948_v57 = vsel %vm23271_vm7, %v15278_v49, %v15279_v48 }
 0x484   : > { %v15286_v60 = vrot.slane %v22439_v36, 5  ;;  %v15269_v25 = vrot.slane %v22441_v38, 5  ;;  %v26908_v36 = vsel %vm23271_vm7, %v18935_v23, %v15260_v7  ;;  %v15299_v38 = vrot.slane %v22443_v2, 5  ;;  %v22444_v7 = vld [vmem:[%s22742_s13 + $0x13c] sm:$0x1]  ;;  %29033 = vst [vmem:[#allocation12_spill] sm:$0xff] %v26948_v57 }
 0x485   : > { %v15275_v46 = vrot.slane %v15273_v59, 4  ;;  %v15282_v23 = vrot.slane %v22444_v7, 5  ;;  %v15291_v40 = vrot.slane %v15289_v54, 4  ;;  %v15294_v35 = vrot.slane %v15292_v22, 4  ;;  %v22446_v7 = vld [vmem:[%s22742_s13 + $0x15c] sm:$0xf] }
 0x486   : > { %v15288_v62 = vrot.slane %v15286_v60, 4  ;;  %v26930_v14 = vsel %vm23271_vm7, %v15268_v63, %v15269_v25  ;;  %v15301_v2 = vrot.slane %v15299_v38, 4  ;;  %v15302_v6 = vrot.slane %v22446_v7, 5  ;;  %v22098_v48 = vld [vmem:[%s22742_s13 + $0x1d4] sm:$0xff]  }
 0x487   : > { %v26940_v41 = vsel %vm23271_vm7, %v18936_v21, %v15273_v59  ;;  %v26944_v12 = vsel %vm23271_vm7, %v15275_v46, %v15276_v55  ;;  %v26952_v10 = vsel %vm23271_vm7, %v15281_v17, %v15282_v23  ;;  %v26956_v15 = vsel %vm23271_vm7, %v18937_v50, %v15286_v60  ;;  %v22448_v60 = vld [vmem:[%s22742_s13 + $0x158] sm:$0xf] }
 0x488   : > { %29034 = vst [vmem:[#allocation13_spill] sm:$0xff] %v26952_v10  ;;  %29035 = vst [vmem:[#allocation14_spill] sm:$0xff] %v26956_v15  ;;  %v26960_v33 = vsel %vm23271_vm7, %v15288_v62, %v15289_v54  ;;  %v26964_v21 = vsel %vm23271_vm7, %v15291_v40, %v15292_v22  ;;  %v26968_v49 = vsel %vm23271_vm7, %v15294_v35, %v15295_v8  ;;  %v7528_v59 = vrot.slane %v7526_v24, 4  ;;  %v22099_v8 = vld [vmem:[%s22742_s13 + $0x1e0] sm:$0xff]   ;;  %v22100_v22 = vld [vmem:[%s22742_s13 + $0x1e8] sm:$0xff]  }
 0x489   : > { %20154 = vmatmul.mubr.msk.bf16.gmra.mrb[84].mxu1 %vm1963_vm3, %v22096_v18  ;;  %29036 = vst [vmem:[#allocation15_spill] sm:$0xff] %v26960_v33  ;;  %29037 = vst [vmem:[#allocation6_spill] sm:$0xff] %v26964_v21  ;;  %v7531_v55 = vrot.slane %v7529_v1, 5  ;;  %v26974_v50 = vsel %vm23271_vm7, %v18938_v20, %v15299_v38  ;;  %v26978_v62 = vsel %vm23271_vm7, %v15301_v2, %v15302_v6  ;;  %v7535_v54 = vshll.u32 %v22448_v60, 16  ;;  %v17948_v38 = vld [vmem:[%s22742_s13 + $0x168] sm:$0xf] }
 0x48a   : > { %20740 = vmatmul.mubr.msk.bf16.gmra.mrb[20].mxu0 %vm1963_vm3, %v29031_v58  ;;  %20157 = vmatprep.mubr.msk.bf16.mxu1 %vm1963_vm3, %v22097_v37  ;;  %29038 = vst [vmem:[#allocation16_spill] sm:$0xff] %v26968_v49  ;;  %v22447_v37 = vld [vmem:[%s22742_s13 + $0x160] sm:$0xf]  ;;  %29039 = vst [vmem:[#allocation17_spill] sm:$0xff] %v26974_v50  ;;  %v7539_v63 = vshrl.u32 %v22448_v60, 16  ;;  %v15304_v35 = vrot.slane %v15302_v6, 4 }
 0x48b   : > { %20743 = vmatprep.mubr.msk.bf16.mxu0 %vm1963_vm3, %v29032_v51  ;;  %v15305_v17 = vrot.slane %v22447_v37, 5  ;;  %29040 = vst [vmem:[#allocation18_spill] sm:$0xff] %v26978_v62  ;;  %v22449_v20 = vld [vmem:[%s22742_s13 + $0x164] sm:$0x1]  ;;  %v7532_v7 = vor.u32 %v7531_v55, %v7528_v59  ;;  %v29041_v51 = vcombine.low %v26730_v26, %v26734_v47  ;;  %v27005_v37 = vrot.slane %v7535_v54, 5  ;;  %v22101_v25 = vld [vmem:[%s22742_s13 + $0x1f4] sm:$0xff]  }
 0x48c   : > { %v15308_v2 = vrot.slane %v22449_v20, 5  ;;  %v7541_v6 = vrot.slane %v7539_v63, 4  ;;  %v7570_v60 = vshrl.u32 %v17948_v38, 16  ;;  %v7573_v40 = vshll.u32 %v17948_v38, 16  ;;  %v18907_v59 = vld [vmem:[%s22742_s13 + $0x168] sm:$0xe] }
 0x48d   : > { %v15307_v58 = vrot.slane %v15305_v17, 4  ;;  %v29042_v20 = vcombine.low %v26758_v31, %v26762_v42  ;;  %v22450_v55 = vld [vmem:[%s22742_s13 + $0x16c] sm:$0xf]  ;;  %v27017_v63 = vsel %vm23271_vm7, %v15304_v35, %v15305_v17  ;;  %v22453_v31 = vld [vmem:[%s22742_s13 + $0x174] sm:$0xf]  ;;  %v27025_v23 = vrot.slane %v7532_v7, 4 }
 0x48e   : > { %v7579_v26 = vshll.u32 %v22450_v55, 16  ;;  %v7583_v47 = vshrl.u32 %v22450_v55, 16  ;;  %29043 = vst [vmem:[#allocation19_spill] sm:$0xff] %v27017_v63  ;;  %v7599_v42 = vshll.u32 %v22453_v31, 16  ;;  %v22454_v55 = vld [vmem:[%s22742_s13 + $0x170] sm:$0xf]  ;;  %v7542_v17 = vor.u32 %v7541_v6, %v27005_v37 }
 0x48f   : > { %v27023_v1 = vsel %vm23271_vm7, %v15307_v58, %v15308_v2  ;;  %v15315_v46 = vrot.slane %v22454_v55, 5  ;;  %v22455_v18 = vld [vmem:[%s22742_s13 + $0x174] sm:$0xf]  ;;  %v18939_v35 = vrot.slane %v18907_v59, 9  ;;  %v7572_v24 = vrot.slane %v7570_v60, 4  ;;  %v22103_v63 = vld [vmem:[%s22742_s13 + $0x208] sm:$0xff]  }
 0x490   : > { %29044 = vst [vmem:[#allocation20_spill] sm:$0xff] %v27023_v1  ;;  %v7585_v62 = vrot.slane %v7583_v47, 4  ;;  %v27038_v55 = vrot.slane %v7599_v42, 5  ;;  %v27051_v42 = vrot.slane %v7542_v17, 4  ;;  %v22458_v17 = vld [vmem:[%s22742_s13 + $0x184] sm:$0xf] }
 0x491   : > { %20158 = vmatmul.mubr.msk.bf16.gmra.mrb[88].mxu1 %vm1963_vm3, %v22098_v48  ;;  %v22451_v48 = vld [vmem:[%s22742_s13 + $0x170] sm:$0xf]  ;;  %v15317_v60 = vrot.slane %v15315_v46, 4  ;;  %v22462_v33 = vld [vmem:[%s22742_s13 + $0x18c] sm:$0x1] }
 0x492   : > { %20744 = vmatmul.mubr.msk.bf16.gmra.mrb[24].mxu0 %vm1963_vm3, %v29041_v51  ;;  %20161 = vmatprep.mubr.msk.bf16.mxu1 %vm1963_vm3, %v22099_v8  ;;  %v7589_v54 = vshll.u32 %v22451_v48, 16  ;;  %v7593_v51 = vshrl.u32 %v22451_v48, 16  ;;  %v22452_v8 = vld [vmem:[%s22742_s13 + $0x16c] sm:$0xf]  ;;  %v15318_v48 = vrot.slane %v22455_v18, 5 }
 0x493   : > { %20747 = vmatprep.mubr.msk.bf16.mxu0 %vm1963_vm3, %v29042_v20  ;;  %v15312_v38 = vrot.slane %v22452_v8, 5  ;;  %v7603_v20 = vshrl.u32 %v22453_v31, 16  ;;  %v7575_v8 = vrot.slane %v7573_v40, 5  ;;  %v27032_v31 = vrot.slane %v7579_v26, 5  ;;  %v22456_v26 = vld [vmem:[%s22742_s13 + $0x178] sm:$0x1] }
 0x494   : > { %v27034_v58 = vrot.slane %v7589_v54, 5  ;;  %v7595_v2 = vrot.slane %v7593_v51, 4  ;;  %v15320_v59 = vrot.slane %v15318_v48, 4  ;;  %v15321_v47 = vrot.slane %v22456_v26, 5  ;;  %v17953_v54 = vld [vmem:[%s22742_s13 + $0x17c] sm:$0xf] }
 0x495   : > { %v15314_v18 = vrot.slane %v15312_v38, 4  ;;  %v7605_v6 = vrot.slane %v7603_v20, 4  ;;  %v29045_v51 = vcombine.low %v26767_v52, %v26781_v19  ;;  %v27055_v20 = vsel %vm23271_vm7, %v18939_v35, %v15312_v38  ;;  %v22457_v40 = vld [vmem:[%s22742_s13 + $0x180] sm:$0xf]  ;;  %v18908_v19 = vld [vmem:[%s22742_s13 + $0x17c] sm:$0xe] }
 0x496   : > { %v7576_v7 = vor.u32 %v7575_v8, %v7572_v24  ;;  %v15325_v1 = vrot.slane %v22457_v40, 5  ;;  %v7586_v52 = vor.u32 %v7585_v62, %v27032_v31  ;;  %v15328_v26 = vrot.slane %v22458_v17, 5  ;;  %v22459_v35 = vld [vmem:[%s22742_s13 + $0x178] sm:$0x1] }
 0x497   : > { %v7596_v38 = vor.u32 %v7595_v2, %v27034_v58  ;;  %v7609_v24 = vshll.u32 %v22459_v35, 16  ;;  %v7614_v40 = vshrl.u32 %v17953_v54, 16  ;;  %v27076_v62 = vsel %vm23271_vm7, %v15317_v60, %v15318_v48  ;;  %v22102_v35 = vld [vmem:[%s22742_s13 + $0x1fc] sm:$0xff]  }
 0x498   : > { %v7587_v50 = vrot.slane %v7586_v52, 4  ;;  %v15330_v60 = vrot.slane %v15328_v26, 4  ;;  %v29047_v52 = vcombine.low %v26799_v53, %v26803_v11 }
 0x499   : > { %20162 = vmatmul.mubr.msk.bf16.gmra.mrb[92].mxu1 %vm1963_vm3, %v22100_v22  ;;  %v29046_v22 = vcombine.low %v26785_v56, %v26789_v32  ;;  %v7606_v56 = vor.u32 %v7605_v6, %v27038_v55  ;;  %v22460_v32 = vld [vmem:[%s22742_s13 + $0x188] sm:$0xf]  ;;  %v18940_v6 = vrot.slane %v18908_v19, 9  ;;  %v7597_v49 = vrot.slane %v7596_v38, 4  ;;  %v22464_v38 = vld [vmem:[%s22742_s13 + $0x194] sm:$0xf] }
 0x49a   : > { %20748 = vmatmul.mubr.msk.bf16.gmra.mrb[28].mxu0 %vm1963_vm3, %v29045_v51  ;;  %20165 = vmatprep.mubr.msk.bf16.mxu1 %vm1963_vm3, %v22101_v25  ;;  %v27070_v25 = vsel %vm23271_vm7, %v15314_v18, %v15315_v46  ;;  %v15331_v8 = vrot.slane %v22460_v32, 5  ;;  %v7617_v51 = vshll.u32 %v17953_v54, 16  ;;  %v7548_v46 = vsel %vm22764_vm4, %v27051_v42, %v26579_v30 }
 0x49b   : > { %20751 = vmatprep.mubr.msk.bf16.mxu0 %vm1963_vm3, %v29046_v22  ;;  %v22461_v22 = vld [vmem:[%s22742_s13 + $0x180] sm:$0xf]  ;;  %v7577_v18 = vrot.slane %v7576_v7, 4  ;;  %v15327_v32 = vrot.slane %v15325_v1, 4  ;;  %v7611_v48 = vrot.slane %v7609_v24, 5  ;;  %v7607_v54 = vrot.slane %v7606_v56, 4 }
 0x49c   : > { %v7623_v2 = vshll.u32 %v22461_v22, 16  ;;  %v7627_v17 = vshrl.u32 %v22461_v22, 16  ;;  %v15333_v21 = vrot.slane %v15331_v8, 4  ;;  %v15334_v22 = vrot.slane %v22462_v33, 5  ;;  %v22463_v7 = vld [vmem:[%s22742_s13 + $0x184] sm:$0xf] }
 0x49d   : > { %v7616_v15 = vrot.slane %v7614_v40, 4  ;;  %v7619_v10 = vrot.slane %v7617_v51, 5  ;;  %v7633_v42 = vshll.u32 %v22463_v7, 16  ;;  %v27096_v19 = vsel %vm23271_vm7, %v15320_v59, %v15321_v47  ;;  %v22465_v59 = vld [vmem:[%s22742_s13 + $0x188] sm:$0xf] }
 0x49e   : > { %v27086_v57 = vrot.slane %v7623_v2, 5  ;;  %v7629_v30 = vrot.slane %v7627_v17, 4  ;;  %v27100_v33 = vsel %vm23271_vm7, %v18940_v6, %v15325_v1  ;;  %v15338_v24 = vrot.slane %v22464_v38, 5  ;;  %v18909_v1 = vld [vmem:[%s22742_s13 + $0x190] sm:$0xe] }
 0x49f   : > { %v7637_v56 = vshrl.u32 %v22463_v7, 16  ;;  %v29048_v40 = vcombine.low %v26807_v43, %v26817_v5  ;;  %v7582_v53 = vsel %vm22764_vm4, %v7577_v18, %v27032_v31  ;;  %v27113_v11 = vsel %vm23271_vm7, %v15327_v32, %v15328_v26  ;;  %v22105_v32 = vld [vmem:[%s22742_s13 + $0x21c] sm:$0xff]   ;;  %v17958_v7 = vld [vmem:[%s22742_s13 + $0x190] sm:$0xf] }
 0x4a0   : > { %v7643_v47 = vshll.u32 %v22465_v59, 16  ;;  %v7592_v43 = vsel %vm22764_vm4, %v7587_v50, %v27034_v58  ;;  %v7602_v5 = vsel %vm22764_vm4, %v7597_v49, %v27038_v55  ;;  %v7612_v31 = vsel %vm22764_vm4, %v7607_v54, %v7611_v48  ;;  %v22104_v50 = vld [vmem:[%s22742_s13 + $0x210] sm:$0xff]   ;;  %v22466_v55 = vld [vmem:[%s22742_s13 + $0x198] sm:$0xf] }
 0x4a1   : > { %20166 = vmatmul.mubr.msk.bf16.gmra.mrb[96].mxu1 %vm1963_vm3, %v22102_v35  ;;  %v27127_v26 = vsel %vm23271_vm7, %v15330_v60, %v15331_v8  ;;  %v27131_v51 = vsel %vm23271_vm7, %v15333_v21, %v15334_v22  ;;  %v7620_v2 = vor.u32 %v7619_v10, %v7616_v15  ;;  %v7630_v17 = vor.u32 %v7629_v30, %v27086_v57 }
 0x4a2   : > { %20752 = vmatmul.mubr.msk.bf16.gmra.mrb[32].mxu0 %vm1963_vm3, %v29047_v52  ;;  %20169 = vmatprep.mubr.msk.bf16.mxu1 %vm1963_vm3, %v22103_v63  ;;  %v7647_v63 = vshrl.u32 %v22465_v59, 16  ;;  %v27134_v35 = vrot.slane %v7633_v42, 5  ;;  %v18941_v58 = vrot.slane %v18909_v1, 9  ;;  %v15340_v49 = vrot.slane %v15338_v24, 4  ;;  %v22467_v42 = vld [vmem:[%s22742_s13 + $0x18c] sm:$0x1] }
 0x4a3   : > { %20755 = vmatprep.mubr.msk.bf16.mxu0 %vm1963_vm3, %v29048_v40  ;;  %v15341_v18 = vrot.slane %v22466_v55, 5  ;;  %v7639_v6 = vrot.slane %v7637_v56, 4  ;;  %v29049_v21 = vsel %vm22764_vm4, %v27025_v23, %v27005_v37  ;;  %v27148_v15 = vrot.slane %v7643_v47, 5  ;;  %v22468_v59 = vld [vmem:[%s22742_s13 + $0x194] sm:$0xf] }
 0x4a4   : > { %v27144_v8 = vcombine.low %v29049_v21, %v7548_v46  ;;  %v7649_v48 = vrot.slane %v7647_v63, 4  ;;  %v27152_v54 = vcombine.low %v7582_v53, %v7592_v43  ;;  %v27156_v30 = vcombine.low %v7602_v5, %v7612_v31  ;;  %v22469_v5 = vld [vmem:[%s22742_s13 + $0x198] sm:$0xf]  ;;  %v22474_v23 = vld [vmem:[%s22742_s13 + $0x1a8] sm:$0xf] }
 0x4a5   : > { %v27161_v37 = vrot.slane %v7620_v2, 4  ;;  %v27163_v46 = vrot.slane %v7630_v17, 4  ;;  %v7653_v52 = vshll.u32 %v22467_v42, 16  ;;  %v29050_v38 = vcombine.low %v26821_v34, %v26826_v16  ;;  %v22107_v42 = vld [vmem:[%s22742_s13 + $0x230] sm:$0xff]  }
 0x4a6   : > { %v27173_v56 = vsel %vm23271_vm7, %v18941_v58, %v15338_v24  ;;  %v27177_v40 = vsel %vm23271_vm7, %v15340_v49, %v15341_v18  ;;  %v7640_v53 = vor.u32 %v7639_v6, %v27134_v35  ;;  %v29051_v1 = vcombine.low %v26846_v44, %v26850_v3  ;;  %v22106_v44 = vld [vmem:[%s22742_s13 + $0x224] sm:$0xff]   ;;  %v22470_v58 = vld [vmem:[%s22742_s13 + $0x19c] sm:$0xf] }
 0x4a7   : > { %v7650_v34 = vor.u32 %v7649_v48, %v27148_v15  ;;  %v7658_v16 = vshrl.u32 %v17958_v7, 16  ;;  %v7661_v24 = vshll.u32 %v17958_v7, 16  ;;  %v7667_v47 = vshll.u32 %v22468_v59, 16  ;;  %v17963_v7 = vld [vmem:[%s22742_s13 + $0x1a4] sm:$0xf] }
 0x4a8   : > { %v27187_v63 = vrot.slane %v15341_v18, 4  ;;  %v7671_v43 = vshrl.u32 %v22468_v59, 16  ;;  %v7677_v31 = vshll.u32 %v22469_v5, 16  ;;  %v7681_v2 = vshrl.u32 %v22469_v5, 16  ;;  %v22471_v18 = vld [vmem:[%s22742_s13 + $0x1a0] sm:$0x1] }
 0x4a9   : > { %20170 = vmatmul.mubr.msk.bf16.gmra.mrb[100].mxu1 %vm1963_vm3, %v22104_v50  ;;  %v7626_v3 = vsel %vm22764_vm4, %v27161_v37, %v27086_v57  ;;  %v7636_v17 = vsel %vm22764_vm4, %v27163_v46, %v27134_v35  ;;  %v7655_v50 = vrot.slane %v7653_v52, 5  ;;  %v15344_v49 = vrot.slane %v22470_v58, 5  ;;  %v18910_v52 = vld [vmem:[%s22742_s13 + $0x1a4] sm:$0xe]  ;;  %v22473_v59 = vld [vmem:[%s22742_s13 + $0x1a8] sm:$0xf] }
 0x4aa   : > { %20756 = vmatmul.mubr.msk.bf16.gmra.mrb[36].mxu0 %vm1963_vm3, %v29050_v38  ;;  %20173 = vmatprep.mubr.msk.bf16.mxu1 %vm1963_vm3, %v22105_v32  ;;  %v7641_v55 = vrot.slane %v7640_v53, 4  ;;  %v15347_v6 = vrot.slane %v22471_v18, 5  ;;  %v22472_v32 = vld [vmem:[%s22742_s13 + $0x19c] sm:$0xf]  ;;  %v7651_v57 = vrot.slane %v7650_v34, 4  ;;  %v7660_v37 = vrot.slane %v7658_v16, 4 }
 0x4ab   : > { %20759 = vmatprep.mubr.msk.bf16.mxu0 %vm1963_vm3, %v29051_v1  ;;  %v7687_v21 = vshll.u32 %v22472_v32, 16  ;;  %v7691_v48 = vshrl.u32 %v22472_v32, 16  ;;  %v7663_v38 = vrot.slane %v7661_v24, 5  ;;  %v27204_v1 = vrot.slane %v7667_v47, 5 }
 0x4ac   : > { %v7673_v35 = vrot.slane %v7671_v43, 4  ;;  %v27206_v46 = vrot.slane %v7677_v31, 5  ;;  %v15351_v5 = vrot.slane %v22473_v59, 5  ;;  %v7683_v53 = vrot.slane %v7681_v2, 4  ;;  %v22475_v2 = vld [vmem:[%s22742_s13 + $0x1ac] sm:$0xf] }
 0x4ad   : > { %v7702_v58 = vshrl.u32 %v17963_v7, 16  ;;  %v7705_v18 = vshll.u32 %v17963_v7, 16  ;;  %v7711_v22 = vshll.u32 %v22474_v23, 16  ;;  %v7715_v32 = vshrl.u32 %v22474_v23, 16 }
 0x4ae   : > { %v29052_v34 = vcombine.low %v26855_v27, %v26859_v61  ;;  %v7646_v16 = vsel %vm22764_vm4, %v7641_v55, %v27148_v15  ;;  %v15346_v24 = vrot.slane %v15344_v49, 4  ;;  %v27219_v47 = vrot.slane %v7687_v21, 5 }
 0x4af   : > { %v7693_v43 = vrot.slane %v7691_v48, 4  ;;  %v29053_v23 = vcombine.low %v26864_v29, %v26868_v28  ;;  %v7656_v27 = vsel %vm22764_vm4, %v7651_v57, %v7655_v50  ;;  %v7664_v61 = vor.u32 %v7663_v38, %v7660_v37  ;;  %v22476_v48 = vld [vmem:[%s22742_s13 + $0x1a0] sm:$0x1]  ;;  %v22108_v37 = vld [vmem:[%s22742_s13 + $0x238] sm:$0xff]  }
 0x4b0   : > { %v18942_v31 = vrot.slane %v18910_v52, 9  ;;  %v7674_v15 = vor.u32 %v7673_v35, %v27204_v1  ;;  %v15353_v55 = vrot.slane %v15351_v5, 4  ;;  %v7684_v21 = vor.u32 %v7683_v53, %v27206_v46  ;;  %v22477_v53 = vld [vmem:[%s22742_s13 + $0x1b0] sm:$0xf] }
 0x4b1   : > { %20174 = vmatmul.mubr.msk.bf16.gmra.mrb[104].mxu1 %vm1963_vm3, %v22106_v44  ;;  %v15354_v44 = vrot.slane %v22475_v2, 5  ;;  %v7697_v7 = vshll.u32 %v22476_v48, 16  ;;  %v7704_v28 = vrot.slane %v7702_v58, 4  ;;  %v27234_v59 = vrot.slane %v7711_v22, 5  ;;  %v22109_v2 = vld [vmem:[%s22742_s13 + $0x244] sm:$0xff]  }
 0x4b2   : > { %20760 = vmatmul.mubr.msk.bf16.gmra.mrb[40].mxu0 %vm1963_vm3, %v29052_v34  ;;  %20177 = vmatprep.mubr.msk.bf16.mxu1 %vm1963_vm3, %v22107_v42  ;;  %v7707_v42 = vrot.slane %v7705_v18, 5  ;;  %v7717_v50 = vrot.slane %v7715_v32, 4  ;;  %v27239_v38 = vcombine.low %v7626_v3, %v7636_v17  ;;  %v7694_v52 = vor.u32 %v7693_v43, %v27219_v47  ;;  %v22479_v48 = vld [vmem:[%s22742_s13 + $0x1ac] sm:$0xf] }
 0x4b3   : > { %20763 = vmatprep.mubr.msk.bf16.mxu0 %vm1963_vm3, %v29053_v23  ;;  %v15357_v34 = vrot.slane %v22477_v53, 5  ;;  %v27248_v58 = vcombine.low %v7646_v16, %v7656_v27  ;;  %v27253_v22 = vsel %vm23271_vm7, %v27187_v63, %v15344_v49  ;;  %v27257_v3 = vsel %vm23271_vm7, %v15346_v24, %v15347_v6 }
 0x4b4   : > { %v27232_v29 = vpop.f32.mrb[0].mxu1  ;;  %v7665_v17 = vrot.slane %v7664_v61, 4  ;;  %v7675_v32 = vrot.slane %v7674_v15, 4  ;;  %v27263_v43 = vsel %vm23271_vm7, %v18942_v31, %v15351_v5  ;;  %v27267_v16 = vsel %vm23271_vm7, %v15353_v55, %v15354_v44  ;;  %v22478_v15 = vld [vmem:[%s22742_s13 + $0x1b4] sm:$0x1] }
 0x4b5   : > { %29054 = vst [vmem:[#allocation7_spill] sm:$0xff] %v27232_v29  ;;  %v27236_v57 = vpop.f32.mrb[1].mxu1  ;;  %v7699_v63 = vrot.slane %v7697_v7, 5  ;;  %v7685_v49 = vrot.slane %v7684_v21, 4  ;;  %v15356_v27 = vrot.slane %v15354_v44, 4  ;;  %v7708_v6 = vor.u32 %v7707_v42, %v7704_v28 }
 0x4b6   : > { %29055 = vst [vmem:[#allocation8_spill] sm:$0xff] %v27236_v57  ;;  %v27245_v23 = vpop.f32.mrb[2].mxu1  ;;  %v7718_v24 = vor.u32 %v7717_v50, %v27234_v59  ;;  %v29058_v61 = vcombine.low %v26892_v45, %v26899_v0  ;;  %v7695_v5 = vrot.slane %v7694_v52, 4  ;;  %v15359_v31 = vrot.slane %v15357_v34, 4  ;;  %v18911_v0 = vld [vmem:[%s22742_s13 + $0x1b8] sm:$0xe] }
 0x4b7   : > { %29056 = vst [vmem:[#allocation11_spill] sm:$0xff] %v27245_v23  ;;  %v27259_v18 = vpop.f32.mrb[3].mxu1  ;;  %v15360_v55 = vrot.slane %v22478_v15, 5  ;;  %v7721_v21 = vshll.u32 %v22479_v48, 16  ;;  %v29059_v44 = vcombine.low %v26908_v36, %v26912_v13  ;;  %v7670_v45 = vsel %vm22764_vm4, %v7665_v17, %v27204_v1  ;;  %v22480_v28 = vld [vmem:[%s22742_s13 + $0x1bc] sm:$0xf] }
 0x4b8   : > { %29057 = vst [vmem:[#allocation9_spill] sm:$0xff] %v27259_v18  ;;  %v15364_v42 = vrot.slane %v22480_v28, 5  ;;  %v7725_v50 = vshrl.u32 %v22479_v48, 16  ;;  %v22481_v13 = vld [vmem:[%s22742_s13 + $0x1b0] sm:$0xf]  ;;  %v7690_v1 = vsel %vm22764_vm4, %v7685_v49, %v27219_v47  ;;  %v27302_v17 = vsel %vm23271_vm7, %v15356_v27, %v15357_v34  ;;  %v22111_v34 = vld [vmem:[%s22742_s13 + $0x258] sm:$0xff]  }
 0x4b9   : > { %20178 = vmatmul.mubr.msk.bf16.gmra.mrb[108].mxu1 %vm1963_vm3, %v22108_v37  ;;  %v7680_v37 = vsel %vm22764_vm4, %v7675_v32, %v27206_v46  ;;  %v7731_v52 = vshll.u32 %v22481_v13, 16  ;;  %v7735_v53 = vshrl.u32 %v22481_v13, 16  ;;  %v7709_v46 = vrot.slane %v7708_v6, 4  ;;  %v22110_v48 = vld [vmem:[%s22742_s13 + $0x24c] sm:$0xff]   ;;  %v22482_v36 = vld [vmem:[%s22742_s13 + $0x1c0] sm:$0xf] }
 0x4ba   : > { %20764 = vmatmul.mubr.msk.bf16.gmra.mrb[44].mxu0 %vm1963_vm3, %v29058_v61  ;;  %20181 = vmatprep.mubr.msk.bf16.mxu1 %vm1963_vm3, %v22109_v2  ;;  %v7719_v32 = vrot.slane %v7718_v24, 4  ;;  %v17968_v61 = vld [vmem:[%s22742_s13 + $0x1b8] sm:$0xf]  ;;  %v27312_v28 = vsel %vm23271_vm7, %v15359_v31, %v15360_v55  ;;  %v7723_v13 = vrot.slane %v7721_v21, 5  ;;  %v18943_v47 = vrot.slane %v18911_v0, 9 }
 0x4bb   : > { %20767 = vmatprep.mubr.msk.bf16.mxu0 %vm1963_vm3, %v29059_v44  ;;  %v7700_v44 = vsel %vm22764_vm4, %v7695_v5, %v7699_v63  ;;  %v15366_v27 = vrot.slane %v15364_v42, 4  ;;  %v15367_v6 = vrot.slane %v22482_v36, 5  ;;  %v7727_v24 = vrot.slane %v7725_v50, 4  ;;  %v22483_v7 = vld [vmem:[%s22742_s13 + $0x1b4] sm:$0x1] }
 0x4bc   : > { %v27295_v2 = vpop.f32.mrb[4].mxu1  ;;  %v7741_v35 = vshll.u32 %v22483_v7, 16  ;;  %v27321_v10 = vrot.slane %v7731_v52, 5  ;;  %v7737_v63 = vrot.slane %v7735_v53, 4  ;;  %v7746_v5 = vshrl.u32 %v17968_v61, 16  ;;  %v22114_v23 = vld [vmem:[%s22742_s13 + $0x274] sm:$0xff]  }
 0x4bd   : > { %29060 = vst [vmem:[#allocation10_spill] sm:$0xff] %v27295_v2  ;;  %v27305_v15 = vpop.f32.mrb[5].mxu1  ;;  %v7749_v31 = vshll.u32 %v17968_v61, 16  ;;  %v27323_v55 = vcombine.low %v7670_v45, %v7680_v37  ;;  %v7714_v0 = vsel %vm22764_vm4, %v7709_v46, %v27234_v59  ;;  %v7724_v50 = vsel %vm22764_vm4, %v7719_v32, %v7723_v13  ;;  %v22484_v36 = vld [vmem:[%s22742_s13 + $0x1bc] sm:$0xf] }
 0x4be   : > { %29061 = vst [vmem:[#allocation5_spill] sm:$0xff] %v27305_v15  ;;  %v27314_v49 = vpop.f32.mrb[6].mxu1  ;;  %v29064_v7 = vcombine.low %v26916_v4, %v26930_v14  ;;  %v27337_v45 = vcombine.low %v7690_v1, %v7700_v44  ;;  %v27341_v37 = vsel %vm23271_vm7, %v18943_v47, %v15364_v42  ;;  %v7755_v59 = vshll.u32 %v22484_v36, 16  ;;  %v22485_v44 = vld [vmem:[%s22742_s13 + $0x1c0] sm:$0xf] }
 0x4bf   : > { %29062 = vst [vmem:[#allocation22_spill] sm:$0xff] %v27314_v49  ;;  %v27319_v60 = vpop.f32.mrb[7].mxu1  ;;  %v7759_v52 = vshrl.u32 %v22484_v36, 16  ;;  %v29065_v53 = vcombine.low %v26940_v41, %v26944_v12  ;;  %v27351_v4 = vsel %vm23271_vm7, %v15366_v27, %v15367_v6  ;;  %v7728_v14 = vor.u32 %v7727_v24, %v7723_v13  ;;  %v17973_v41 = vld [vmem:[%s22742_s13 + $0x1cc] sm:$0xf]  ;;  %v22112_v24 = vld [vmem:[%s22742_s13 + $0x260] sm:$0xff]  }
 0x4c0   : > { %29063 = vst [vmem:[#allocation23_spill] sm:$0xff] %v27319_v60  ;;  %29066 = vst [vmem:[#allocation24_spill] sm:$0xff] %v27351_v4  ;;  %v27353_v42 = vrot.slane %v7741_v35, 5  ;;  %v27355_v1 = vrot.slane %v15367_v6, 4  ;;  %v27357_v46 = vcombine.low %v7714_v0, %v7724_v50  ;;  %v7738_v32 = vor.u32 %v7737_v63, %v27321_v10  ;;  %v22113_v36 = vld [vmem:[%s22742_s13 + $0x26c] sm:$0xff]  }
 0x4c1   : > { %20182 = vmatmul.mubr.msk.bf16.gmra.mrb[112].mxu1 %vm1963_vm3, %v22110_v48  ;;  %v7748_v61 = vrot.slane %v7746_v5, 4  ;;  %v7751_v48 = vrot.slane %v7749_v31, 5  ;;  %v7765_v47 = vshll.u32 %v22485_v44, 16  ;;  %v7769_v13 = vshrl.u32 %v22485_v44, 16  ;;  %v22487_v5 = vld [vmem:[%s22742_s13 + $0x1c4] sm:$0xf] }
 0x4c2   : > { %20768 = vmatmul.mubr.msk.bf16.gmra.mrb[48].mxu0 %vm1963_vm3, %v29064_v7  ;;  %20185 = vmatprep.mubr.msk.bf16.mxu1 %vm1963_vm3, %v22111_v34  ;;  %v22486_v34 = vld [vmem:[%s22742_s13 + $0x1c4] sm:$0xf]  ;;  %v15370_v31 = vrot.slane %v22487_v5, 5  ;;  %v27371_v0 = vrot.slane %v7755_v59, 5  ;;  %v7761_v50 = vrot.slane %v7759_v52, 4  ;;  %v7739_v60 = vrot.slane %v7738_v32, 4 }
 0x4c3   : > { %20771 = vmatprep.mubr.msk.bf16.mxu0 %vm1963_vm3, %v29065_v53  ;;  %v7775_v35 = vshll.u32 %v22486_v34, 16  ;;  %v7779_v27 = vshrl.u32 %v22486_v34, 16  ;;  %v7729_v53 = vrot.slane %v7728_v14, 4  ;;  %v22488_v44 = vld [vmem:[%s22742_s13 + $0x1c8] sm:$0x1]  ;;  %v7790_v34 = vshrl.u32 %v17973_v41, 16 }
 0x4c4   : > { %v27361_v12 = vpop.f32.mrb[8].mxu1  ;;  %v15373_v21 = vrot.slane %v22488_v44, 5  ;;  %v7752_v63 = vor.u32 %v7751_v48, %v7748_v61  ;;  %v22489_v49 = vld [vmem:[%s22742_s13 + $0x1d0] sm:$0xf]  ;;  %v27380_v15 = vrot.slane %v7765_v47, 5  ;;  %v15372_v32 = vrot.slane %v15370_v31, 4 }
 0x4c5   : > { %29067 = vst [vmem:[#allocation25_spill] sm:$0xff] %v27361_v12  ;;  %v27365_v6 = vpop.f32.mrb[9].mxu1  ;;  %v7793_v12 = vshll.u32 %v17973_v41, 16  ;;  %v7799_v5 = vshll.u32 %v22489_v49, 16  ;;  %v7803_v59 = vshrl.u32 %v22489_v49, 16  ;;  %v27383_v2 = vrot.slane %v7775_v35, 5 }
 0x4c6   : > { %29068 = vst [vmem:[#allocation26_spill] sm:$0xff] %v27365_v6  ;;  %v27373_v7 = vpop.f32.mrb[10].mxu1  ;;  %v18912_v52 = vld [vmem:[%s22742_s13 + $0x1cc] sm:$0xe]  ;;  %v7781_v14 = vrot.slane %v7779_v27, 4  ;;  %v29072_v44 = vld [vmem:[#allocation13_spill] sm:$0xff]  ;;  %v7762_v61 = vor.u32 %v7761_v50, %v27371_v0 }
 0x4c7   : > { %29069 = vst [vmem:[#allocation27_spill] sm:$0xff] %v27373_v7  ;;  %v27377_v6 = vpop.f32.mrb[11].mxu1  ;;  %v7771_v7 = vrot.slane %v7769_v13, 4  ;;  %v29071_v41 = vld [vmem:[#allocation12_spill] sm:$0xff]  ;;  %v22490_v48 = vld [vmem:[%s22742_s13 + $0x1d0] sm:$0xf] }
 0x4c8   : > { %29070 = vst [vmem:[#allocation28_spill] sm:$0xff] %v27377_v6  ;;  %v29073_v18 = vcombine.low %v29071_v41, %v29072_v44  ;;  %v15377_v49 = vrot.slane %v22490_v48, 5  ;;  %v22491_v47 = vld [vmem:[%s22742_s13 + $0x1d4] sm:$0xf]  ;;  %v29074_v13 = vld [vmem:[#allocation14_spill] sm:$0xff]  ;;  %v29075_v35 = vld [vmem:[#allocation15_spill] sm:$0xff]  ;;  %v7744_v48 = vsel %vm22764_vm4, %v7739_v60, %v27353_v42  ;;  %v27418_v60 = vsel %vm23271_vm7, %v27355_v1, %v15370_v31 }
 0x4c9   : > { %20186 = vmatmul.mubr.msk.bf16.gmra.mrb[116].mxu1 %vm1963_vm3, %v22112_v24  ;;  %v15380_v6 = vrot.slane %v22491_v47, 5  ;;  %v29076_v27 = vcombine.low %v29074_v13, %v29075_v35  ;;  %v7734_v24 = vsel %vm22764_vm4, %v7729_v53, %v27321_v10  ;;  %v7792_v50 = vrot.slane %v7790_v34, 4  ;;  %v22495_v29 = vld [vmem:[%s22742_s13 + $0x1e4] sm:$0xf] }
 0x4ca   : > { %20772 = vmatmul.mubr.msk.bf16.gmra.mrb[52].mxu0 %vm1963_vm3, %v29073_v18  ;;  %20189 = vmatprep.mubr.msk.bf16.mxu1 %vm1963_vm3, %v22113_v36  ;;  %v22492_v18 = vld [vmem:[%s22742_s13 + $0x1d8] sm:$0xf]  ;;  %v7795_v44 = vrot.slane %v7793_v12, 5  ;;  %v18944_v47 = vrot.slane %v18912_v52, 9  ;;  %v27405_v36 = vrot.slane %v7799_v5, 5  ;;  %v7805_v13 = vrot.slane %v7803_v59, 4 }
 0x4cb   : > { %20775 = vmatprep.mubr.msk.bf16.mxu0 %vm1963_vm3, %v29076_v27  ;;  %v15383_v41 = vrot.slane %v22492_v18, 5  ;;  %v7753_v27 = vrot.slane %v7752_v63, 4  ;;  %v7772_v10 = vor.u32 %v7771_v7, %v27380_v15  ;;  %v7782_v53 = vor.u32 %v7781_v14, %v27383_v2  ;;  %v22493_v18 = vld [vmem:[%s22742_s13 + $0x1c8] sm:$0x1]  ;;  %v22115_v7 = vld [vmem:[%s22742_s13 + $0x280] sm:$0xff]  }
 0x4cc   : > { %v27407_v35 = vpop.f32.mrb[12].mxu1  ;;  %v7785_v34 = vshll.u32 %v22493_v18, 16  ;;  %v7763_v42 = vrot.slane %v7762_v61, 4  ;;  %v15379_v5 = vrot.slane %v15377_v49, 4  ;;  %v15382_v59 = vrot.slane %v15380_v6, 4 }
 0x4cd   : > { %29077 = vst [vmem:[#allocation12_spill] sm:$0xff] %v27407_v35  ;;  %v27412_v12 = vpop.f32.mrb[13].mxu1  ;;  %v27425_v52 = vsel %vm23271_vm7, %v15372_v32, %v15373_v21  ;;  %v15385_v14 = vrot.slane %v15383_v41, 4  ;;  %v22494_v18 = vld [vmem:[%s22742_s13 + $0x1dc] sm:$0x1]  ;;  %v7796_v35 = vor.u32 %v7795_v44, %v7792_v50  ;;  %v27430_v1 = vcombine.low %v7734_v24, %v7744_v48  ;;  %v29082_v48 = vld [vmem:[#allocation16_spill] sm:$0xff] }
 0x4ce   : > { %29078 = vst [vmem:[#allocation13_spill] sm:$0xff] %v27412_v12  ;;  %v27420_v63 = vpop.f32.mrb[14].mxu1  ;;  %v15386_v12 = vrot.slane %v22494_v18, 5  ;;  %v27434_v31 = vsel %vm23271_vm7, %v18944_v47, %v15377_v49  ;;  %v7806_v61 = vor.u32 %v7805_v13, %v27405_v36  ;;  %v15390_v4 = vrot.slane %v22495_v29, 5  ;;  %v29081_v24 = vld [vmem:[#allocation6_spill] sm:$0xff]  ;;  %v29085_v13 = vld [vmem:[#allocation17_spill] sm:$0xff] }
 0x4cf   : > { %29079 = vst [vmem:[#allocation14_spill] sm:$0xff] %v27420_v63  ;;  %v27428_v57 = vpop.f32.mrb[15].mxu1  ;;  %v18913_v63 = vld [vmem:[%s22742_s13 + $0x1e0] sm:$0xe]  ;;  %v7758_v21 = vsel %vm22764_vm4, %v7753_v27, %v27371_v0  ;;  %v7773_v32 = vrot.slane %v7772_v10, 4  ;;  %v7783_v50 = vrot.slane %v7782_v53, 4  ;;  %v29083_v18 = vcombine.low %v29081_v24, %v29082_v48 }
 0x4d0   : > { %29080 = vst [vmem:[#allocation15_spill] sm:$0xff] %v27428_v57  ;;  %v7787_v44 = vrot.slane %v7785_v34, 5  ;;  %v7768_v49 = vsel %vm22764_vm4, %v7763_v42, %v27380_v15  ;;  %v27452_v29 = vsel %vm23271_vm7, %v15379_v5, %v15380_v6  ;;  %v27456_v0 = vsel %vm23271_vm7, %v15382_v59, %v15383_v41  ;;  %v22496_v47 = vld [vmem:[%s22742_s13 + $0x1d4] sm:$0xf]  ;;  %v29086_v27 = vld [vmem:[#allocation18_spill] sm:$0xff] }
 0x4d1   : > { %20190 = vmatmul.mubr.msk.bf16.gmra.mrb[120].mxu1 %vm1963_vm3, %v22114_v23  ;;  %29084 = vst [vmem:[#allocation6_spill] sm:$0xff] %v27456_v0  ;;  %v7809_v23 = vshll.u32 %v22496_v47, 16  ;;  %v29087_v10 = vcombine.low %v29085_v13, %v29086_v27  ;;  %v27466_v15 = vsel %vm23271_vm7, %v15385_v14, %v15386_v12  ;;  %v7797_v6 = vrot.slane %v7796_v35, 4  ;;  %v22497_v59 = vld [vmem:[%s22742_s13 + $0x1e8] sm:$0xf]  ;;  %v29105_v0 = vld [vmem:[#allocation21_spill] sm:$0xff] }
 0x4d2   : > { %20776 = vmatmul.mubr.msk.bf16.gmra.mrb[56].mxu0 %vm1963_vm3, %v29083_v18  ;;  %20193 = vmatprep.mubr.msk.bf16.mxu1 %vm1963_vm3, %v22115_v7  ;;  %29088 = vst [vmem:[#allocation16_spill] sm:$0xff] %v27466_v15  ;;  %v18945_v53 = vrot.slane %v18913_v63, 9  ;;  %v7813_v34 = vshrl.u32 %v22496_v47, 16  ;;  %v7807_v42 = vrot.slane %v7806_v61, 4  ;;  %v15392_v5 = vrot.slane %v15390_v4, 4  ;;  %v22116_v18 = vld [vmem:[%s22742_s13 + $0x288] sm:$0xff]  }
 0x4d3   : > { %20779 = vmatprep.mubr.msk.bf16.mxu0 %vm1963_vm3, %v29087_v10  ;;  %v15393_v7 = vrot.slane %v22497_v59, 5  ;;  %v27473_v48 = vcombine.low %v7758_v21, %v7768_v49  ;;  %v7778_v35 = vsel %vm22764_vm4, %v7773_v32, %v27383_v2  ;;  %v7788_v63 = vsel %vm22764_vm4, %v7783_v50, %v7787_v44  ;;  %v17978_v14 = vld [vmem:[%s22742_s13 + $0x1e0] sm:$0xf]  ;;  %v22498_v49 = vld [vmem:[%s22742_s13 + $0x1d8] sm:$0xf] }
 0x4d4   : > { %v27471_v24 = vpop.f32.mrb[16].mxu1  ;;  %v7811_v21 = vrot.slane %v7809_v23, 5  ;;  %v7819_v13 = vshll.u32 %v22498_v49, 16  ;;  %v7823_v27 = vshrl.u32 %v22498_v49, 16  ;;  %v7802_v2 = vsel %vm22764_vm4, %v7797_v6, %v27405_v36  ;;  %v22499_v44 = vld [vmem:[%s22742_s13 + $0x1dc] sm:$0x1] }
 0x4d5   : > { %29089 = vst [vmem:[#allocation17_spill] sm:$0xff] %v27471_v24  ;;  %v27483_v61 = vpop.f32.mrb[17].mxu1  ;;  %v27496_v32 = vsel %vm23271_vm7, %v18945_v53, %v15390_v4  ;;  %v7815_v50 = vrot.slane %v7813_v34, 4  ;;  %v7829_v59 = vshll.u32 %v22499_v44, 16  ;;  %v27505_v49 = vsel %vm23271_vm7, %v15392_v5, %v15393_v7  ;;  %v22500_v36 = vld [vmem:[%s22742_s13 + $0x1e4] sm:$0xf] }
 0x4d6   : > { %29090 = vst [vmem:[#allocation18_spill] sm:$0xff] %v27483_v61  ;;  %v27489_v10 = vpop.f32.mrb[18].mxu1  ;;  %29092 = vst [vmem:[#allocation30_spill] sm:$0xff] %v27496_v32  ;;  %v7812_v23 = vsel %vm22764_vm4, %v7807_v42, %v7811_v21  ;;  %v7834_v12 = vshrl.u32 %v17978_v14, 16  ;;  %v7837_v41 = vshll.u32 %v17978_v14, 16  ;;  %v7843_v6 = vshll.u32 %v22500_v36, 16 }
 0x4d7   : > { %29091 = vst [vmem:[#allocation29_spill] sm:$0xff] %v27489_v10  ;;  %v27499_v47 = vpop.f32.mrb[19].mxu1  ;;  %29094 = vst [vmem:[#allocation32_spill] sm:$0xff] %v27505_v49  ;;  %v7847_v10 = vshrl.u32 %v22500_v36, 16  ;;  %v22501_v4 = vld [vmem:[%s22742_s13 + $0x1e8] sm:$0xf]  ;;  %v27514_v42 = vcombine.low %v7778_v35, %v7788_v63  ;;  %v29099_v36 = vcombine.low %v27055_v20, %v27070_v25  ;;  %v27528_v63 = vcombine.low %v7802_v2, %v7812_v23 }
 0x4d8   : > { %29093 = vst [vmem:[#allocation31_spill] sm:$0xff] %v27499_v47  ;;  %v7853_v53 = vshll.u32 %v22501_v4, 16  ;;  %v7857_v34 = vshrl.u32 %v22501_v4, 16  ;;  %v29095_v44 = vld [vmem:[#allocation19_spill] sm:$0xff]  ;;  %v29096_v47 = vld [vmem:[#allocation20_spill] sm:$0xff]  ;;  %v27516_v5 = vrot.slane %v7819_v13, 5 }
 0x4d9   : > { %20194 = vmatmul.mubr.msk.bf16.gmra.mrb[124].mxu1 %vm1963_vm3, %v22116_v18  ;;  %v29097_v61 = vcombine.low %v29095_v44, %v29096_v47  ;;  %29098 = vst [vmem:[#allocation19_spill] sm:$0xff] %v27514_v42  ;;  %v22502_v24 = vld [vmem:[%s22742_s13 + $0x1ec] sm:$0xf]  ;;  %v7816_v18 = vor.u32 %v7815_v50, %v7811_v21  ;;  %v7825_v4 = vrot.slane %v7823_v27, 4  ;;  %v27525_v47 = vrot.slane %v7829_v59, 5  ;;  %29100 = vst [vmem:[#allocation20_spill] sm:$0xff] %v27528_v63 }
 0x4da   : > { %v7863_v14 = vshll.u32 %v22502_v24, 16  ;;  %v7867_v57 = vshrl.u32 %v22502_v24, 16  ;;  %20263 = vmatprep.mubr.msk.bf16.mxu1 %vm1963_vm3, %v27144_v8  ;;  %v17983_v35 = vld [vmem:[%s22742_s13 + $0x1f4] sm:$0xf]  ;;  %v7836_v24 = vrot.slane %v7834_v12, 4  ;;  %v7839_v44 = vrot.slane %v7837_v41, 5 }
 0x4db   : > { %20780 = vmatmul.mubr.msk.bf16.gmra.mrb[60].mxu0 %vm1963_vm3, %v29097_v61  ;;  %v15395_v61 = vrot.slane %v15393_v7, 4  ;;  %v27534_v20 = vrot.slane %v7843_v6, 5  ;;  %v7849_v25 = vrot.slane %v7847_v10, 4  ;;  %v27536_v21 = vrot.slane %v7853_v53, 5  ;;  %v22503_v6 = vld [vmem:[%s22742_s13 + $0x1ec] sm:$0xf] }
 0x4dc   : > { %20783 = vmatprep.mubr.msk.bf16.mxu0 %vm1963_vm3, %v29099_v36  ;;  %v27532_v8 = vpop.f32.mrb[20].mxu1  ;;  %v7859_v27 = vrot.slane %v7857_v34, 4  ;;  %v27540_v2 = vrot.slane %v7863_v14, 5  ;;  %v7869_v50 = vrot.slane %v7867_v57, 4  ;;  %v7878_v59 = vshrl.u32 %v17983_v35, 16 }
 0x4dd   : > { %29101 = vst [vmem:[#allocation33_spill] sm:$0xff] %v27532_v8  ;;  %v27538_v7 = vpop.f32.mrb[21].mxu1  ;;  %v7881_v12 = vshll.u32 %v17983_v35, 16  ;;  %v27544_v23 = vrot.slane %v7816_v18, 4  ;;  %v7826_v10 = vor.u32 %v7825_v4, %v27516_v5  ;;  %v15396_v53 = vrot.slane %v22503_v6, 5  ;;  %v29182_v39 = vld [vmem:[#allocation18_spill] sm:$0xff] }
 0x4de   : > { %29102 = vst [vmem:[#allocation34_spill] sm:$0xff] %v27538_v7  ;;  %v27542_v41 = vpop.f32.mrb[22].mxu1  ;;  %v22504_v34 = vld [vmem:[%s22742_s13 + $0x1f0] sm:$0x1]  ;;  %v7840_v14 = vor.u32 %v7839_v44, %v7836_v24  ;;  %v18914_v7 = vld [vmem:[%s22742_s13 + $0x1f4] sm:$0xe]  ;;  %v7850_v18 = vor.u32 %v7849_v25, %v27534_v20  ;;  %v7860_v4 = vor.u32 %v7859_v27, %v27536_v21  ;;  %v29106_v24 = vcombine.low %v27076_v62, %v27096_v19 }
 0x4df   : > { %29103 = vst [vmem:[#allocation35_spill] sm:$0xff] %v27542_v41  ;;  %v15399_v36 = vrot.slane %v22504_v34, 5  ;;  %v27549_v13 = vpop.f32.mrb[23].mxu1  ;;  %v22505_v57 = vld [vmem:[%s22742_s13 + $0x1f8] sm:$0xf]  ;;  %v7870_v44 = vor.u32 %v7869_v50, %v27540_v2  ;;  %v7883_v25 = vrot.slane %v7881_v12, 5  ;;  %v27574_v62 = vsel %vm23271_vm7, %v15395_v61, %v15396_v53 }
 0x4e0   : > { %29104 = vst [vmem:[#allocation36_spill] sm:$0xff] %v27549_v13  ;;  %v15403_v8 = vrot.slane %v22505_v57, 5  ;;  %v22506_v35 = vld [vmem:[%s22742_s13 + $0x1f8] sm:$0xf]  ;;  %v22507_v32 = vld [vmem:[%s22742_s13 + $0x1fc] sm:$0xf] }
 0x4e1   : > { %v7887_v49 = vshll.u32 %v22506_v35, 16  ;;  %v7891_v41 = vshrl.u32 %v22506_v35, 16  ;;  %v15406_v63 = vrot.slane %v22507_v32, 5  ;;  %v22508_v15 = vld [vmem:[%s22742_s13 + $0x1f0] sm:$0x1]  ;;  %20264 = vmatmul.mubr.msk.bf16.vlgmr.msra.gmra.mrb[64].mxu1 %vm1963_vm3, %v29105_v0  ;;  %v7880_v35 = vrot.slane %v7878_v59, 4 }
 0x4e2   : > { %v7873_v6 = vshll.u32 %v22508_v15, 16  ;;  %v22509_v34 = vld [vmem:[%s22742_s13 + $0x200] sm:$0xf]  ;;  %20267 = vmatprep.mubr.msk.bf16.mxu1 %vm1963_vm3, %v27152_v54  ;;  %v29107_v15 = vcombine.low %v27100_v33, %v27113_v11  ;;  %v7827_v0 = vrot.slane %v7826_v10, 4  ;;  %v15398_v19 = vrot.slane %v15396_v53, 4 }
 0x4e3   : > { %20784 = vmatmul.mubr.msk.bf16.gmra.mrb[64].mxu0 %vm1963_vm3, %v29106_v24  ;;  %v15409_v57 = vrot.slane %v22509_v34, 5  ;;  %v18946_v32 = vrot.slane %v18914_v7, 9  ;;  %v7841_v27 = vrot.slane %v7840_v14, 4  ;;  %v15405_v50 = vrot.slane %v15403_v8, 4  ;;  %v22510_v61 = vld [vmem:[%s22742_s13 + $0x204] sm:$0x1] }
 0x4e4   : > { %20787 = vmatprep.mubr.msk.bf16.mxu0 %vm1963_vm3, %v29107_v15  ;;  %v27576_v59 = vrot.slane %v7887_v49, 5  ;;  %v7893_v12 = vrot.slane %v7891_v41, 4  ;;  %v27578_v24 = vpop.f32.mrb[24].mxu1  ;;  %v7851_v54 = vrot.slane %v7850_v18, 4  ;;  %v7861_v34 = vrot.slane %v7860_v4, 4 }
 0x4e5   : > { %v7875_v33 = vrot.slane %v7873_v6, 5  ;;  %v15408_v11 = vrot.slane %v15406_v63, 4  ;;  %v27580_v10 = vpop.f32.mrb[25].mxu1  ;;  %v7871_v15 = vrot.slane %v7870_v44, 4  ;;  %v15411_v13 = vrot.slane %v15409_v57, 4 }
 0x4e6   : > { %v15412_v42 = vrot.slane %v22510_v61, 5  ;;  %v7884_v53 = vor.u32 %v7883_v25, %v7880_v35  ;;  %v27583_v7 = vpop.f32.mrb[26].mxu1  ;;  %v7822_v49 = vsel %vm22764_vm4, %v27544_v23, %v27516_v5  ;;  %v7832_v41 = vsel %vm22764_vm4, %v7827_v0, %v27525_v47  ;;  %v22511_v6 = vld [vmem:[%s22742_s13 + $0x1fc] sm:$0xf]  ;;  %v18915_v0 = vld [vmem:[%s22742_s13 + $0x208] sm:$0xe] }
 0x4e7   : > { %v27594_v14 = vsel %vm23271_vm7, %v15398_v19, %v15399_v36  ;;  %v27598_v18 = vsel %vm23271_vm7, %v18946_v32, %v15403_v8  ;;  %v27600_v4 = vpop.f32.mrb[27].mxu1  ;;  %v7846_v5 = vsel %vm22764_vm4, %v7841_v27, %v27534_v20  ;;  %v7894_v23 = vor.u32 %v7893_v12, %v27576_v59 }
 0x4e8   : > { %v7897_v47 = vshll.u32 %v22511_v6, 16  ;;  %v7901_v44 = vshrl.u32 %v22511_v6, 16  ;;  %v7856_v36 = vsel %vm22764_vm4, %v7851_v54, %v27536_v21  ;;  %v27612_v8 = vsel %vm23271_vm7, %v15405_v50, %v15406_v63  ;;  %v17988_v54 = vld [vmem:[%s22742_s13 + $0x208] sm:$0xf] }
 0x4e9   : > { %v7866_v35 = vsel %vm22764_vm4, %v7861_v34, %v27540_v2  ;;  %v27619_v20 = vsel %vm23271_vm7, %v15408_v11, %v15409_v57  ;;  %20268 = vmatmul.mubr.msk.bf16.gmra.mrb[68].mxu1 %vm1963_vm3, %v27156_v30  ;;  %v29108_v25 = vcombine.low %v27127_v26, %v27131_v51  ;;  %v7876_v63 = vsel %vm22764_vm4, %v7871_v15, %v7875_v33  ;;  %v22512_v57 = vld [vmem:[%s22742_s13 + $0x20c] sm:$0xf] }
 0x4ea   : > { %v27631_v21 = vsel %vm23271_vm7, %v15411_v13, %v15412_v42  ;;  %v7885_v2 = vrot.slane %v7884_v53, 4  ;;  %v15416_v19 = vrot.slane %v22512_v57, 5  ;;  %20271 = vmatprep.mubr.msk.bf16.mxu1 %vm1963_vm3, %v27239_v38  ;;  %v29109_v26 = vcombine.low %v27173_v56, %v27177_v40  ;;  %v22513_v42 = vld [vmem:[%s22742_s13 + $0x200] sm:$0xf] }
 0x4eb   : > { %20788 = vmatmul.mubr.msk.bf16.gmra.mrb[68].mxu0 %vm1963_vm3, %v29108_v25  ;;  %v27641_v51 = vcombine.low %v7822_v49, %v7832_v41  ;;  %v7907_v13 = vshll.u32 %v22513_v42, 16  ;;  %v7911_v32 = vshrl.u32 %v22513_v42, 16  ;;  %v7895_v50 = vrot.slane %v7894_v23, 4  ;;  %v22514_v49 = vld [vmem:[%s22742_s13 + $0x210] sm:$0xf] }
 0x4ec   : > { %20791 = vmatprep.mubr.msk.bf16.mxu0 %vm1963_vm3, %v29109_v26  ;;  %v7899_v38 = vrot.slane %v7897_v47, 5  ;;  %v7903_v12 = vrot.slane %v7901_v44, 4  ;;  %v27649_v56 = vpop.f32.mrb[28].mxu1  ;;  %v27651_v40 = vcombine.low %v7846_v5, %v7856_v36  ;;  %v27653_v34 = vcombine.low %v7866_v35, %v7876_v63  ;;  %v22515_v23 = vld [vmem:[%s22742_s13 + $0x204] sm:$0x1] }
 0x4ed   : > { %v18947_v11 = vrot.slane %v18915_v0, 9  ;;  %v27657_v15 = vpop.f32.mrb[29].mxu1  ;;  %v7890_v61 = vsel %vm22764_vm4, %v7885_v2, %v27576_v59  ;;  %v15418_v53 = vrot.slane %v15416_v19, 4  ;;  %v15419_v41 = vrot.slane %v22514_v49, 5  ;;  %v22516_v2 = vld [vmem:[%s22742_s13 + $0x20c] sm:$0xf] }
 0x4ee   : > { %29110 = vst [vmem:[#allocation21_spill] sm:$0xff] %v27657_v15  ;;  %v7917_v5 = vshll.u32 %v22515_v23, 16  ;;  %v27664_v6 = vpop.f32.mrb[30].mxu1  ;;  %v27666_v47 = vrot.slane %v7907_v13, 5  ;;  %v7913_v44 = vrot.slane %v7911_v32, 4  ;;  %v7922_v36 = vshrl.u32 %v17988_v54, 16 }
 0x4ef   : > { %29111 = vst [vmem:[#allocation37_spill] sm:$0xff] %v27664_v6  ;;  %v7925_v35 = vshll.u32 %v17988_v54, 16  ;;  %v27668_v25 = vpop.f32.mrb[31].mxu1  ;;  %v7900_v63 = vsel %vm22764_vm4, %v7895_v50, %v7899_v38  ;;  %v7904_v59 = vor.u32 %v7903_v12, %v7899_v38  ;;  %v7931_v0 = vshll.u32 %v22516_v2, 16  ;;  %v22517_v26 = vld [vmem:[%s22742_s13 + $0x210] sm:$0xf] }
 0x4f0   : > { %29112 = vst [vmem:[#allocation38_spill] sm:$0xff] %v27668_v25  ;;  %v7935_v57 = vshrl.u32 %v22516_v2, 16  ;;  %v7941_v42 = vshll.u32 %v22517_v26, 16  ;;  %v7945_v49 = vshrl.u32 %v22517_v26, 16  ;;  %v22518_v23 = vld [vmem:[%s22742_s13 + $0x214] sm:$0xf]  ;;  %v29113_v32 = vcombine.low %v27253_v22, %v27257_v3 }
 0x4f1   : > { %v7951_v33 = vshll.u32 %v22518_v23, 16  ;;  %v7955_v13 = vshrl.u32 %v22518_v23, 16  ;;  %20272 = vmatmul.mubr.msk.bf16.gmra.mrb[72].mxu1 %vm1963_vm3, %v27248_v58  ;;  %v27683_v50 = vsel %vm23271_vm7, %v18947_v11, %v15416_v19  ;;  %v27687_v38 = vsel %vm23271_vm7, %v15418_v53, %v15419_v41  ;;  %v17993_v53 = vld [vmem:[%s22742_s13 + $0x21c] sm:$0xf] }
 0x4f2   : > { %v27689_v12 = vrot.slane %v7917_v5, 5  ;;  %v15421_v54 = vrot.slane %v15419_v41, 4  ;;  %20275 = vmatprep.mubr.msk.bf16.mxu1 %vm1963_vm3, %v27323_v55  ;;  %v29114_v58 = vcombine.low %v27263_v43, %v27267_v16  ;;  %v27697_v22 = vcombine.low %v7890_v61, %v7900_v63  ;;  %v22519_v5 = vld [vmem:[%s22742_s13 + $0x214] sm:$0xf] }
 0x4f3   : > { %20792 = vmatmul.mubr.msk.bf16.gmra.mrb[72].mxu0 %vm1963_vm3, %v29113_v32  ;;  %v7914_v3 = vor.u32 %v7913_v44, %v27666_v47  ;;  %v7924_v19 = vrot.slane %v7922_v36, 4  ;;  %v7927_v11 = vrot.slane %v7925_v35, 5  ;;  %v27701_v2 = vrot.slane %v7904_v59, 4  ;;  %v22520_v59 = vld [vmem:[%s22742_s13 + $0x220] sm:$0xf] }
 0x4f4   : > { %20795 = vmatprep.mubr.msk.bf16.mxu0 %vm1963_vm3, %v29114_v58  ;;  %v15422_v41 = vrot.slane %v22519_v5, 5  ;;  %v27704_v26 = vrot.slane %v7931_v0, 5  ;;  %v7937_v55 = vrot.slane %v7935_v57, 4  ;;  %v27706_v23 = vpop.f32.mrb[32].mxu1  ;;  %v27708_v43 = vrot.slane %v7941_v42, 5 }
 0x4f5   : > { %29115 = vst [vmem:[#allocation39_spill] sm:$0xff] %v27706_v23  ;;  %v7947_v16 = vrot.slane %v7945_v49, 4  ;;  %v27710_v61 = vrot.slane %v7951_v33, 5  ;;  %v7957_v44 = vrot.slane %v7955_v13, 4  ;;  %v27712_v36 = vpop.f32.mrb[33].mxu1  ;;  %v7966_v35 = vshrl.u32 %v17993_v53, 16 }
 0x4f6   : > { %29116 = vst [vmem:[#allocation40_spill] sm:$0xff] %v27712_v36  ;;  %v7969_v63 = vshll.u32 %v17993_v53, 16  ;;  %v7975_v0 = vshll.u32 %v22520_v59, 16  ;;  %v7979_v32 = vshrl.u32 %v22520_v59, 16  ;;  %v27715_v57 = vpop.f32.mrb[34].mxu1  ;;  %v27717_v58 = vrot.slane %v7914_v3, 4 }
 0x4f7   : > { %29117 = vst [vmem:[#allocation41_spill] sm:$0xff] %v27715_v57  ;;  %v22521_v42 = vld [vmem:[%s22742_s13 + $0x218] sm:$0x1]  ;;  %v7928_v33 = vor.u32 %v7927_v11, %v7924_v19  ;;  %v22522_v5 = vld [vmem:[%s22742_s13 + $0x220] sm:$0xf]  ;;  %v27721_v27 = vpop.f32.mrb[35].mxu1  ;;  %v27725_v30 = vsel %vm23271_vm7, %v15421_v54, %v15422_v41  ;;  %v7938_v53 = vor.u32 %v7937_v55, %v27704_v26  ;;  %v7948_v6 = vor.u32 %v7947_v16, %v27708_v43 }
 0x4f8   : > { %v15425_v49 = vrot.slane %v22521_v42, 5  ;;  %v15429_v13 = vrot.slane %v22522_v5, 5  ;;  %29118 = vst [vmem:[#allocation42_spill] sm:$0xff] %v27721_v27  ;;  %v18916_v36 = vld [vmem:[%s22742_s13 + $0x21c] sm:$0xe]  ;;  %v15424_v25 = vrot.slane %v15422_v41, 4  ;;  %v7958_v19 = vor.u32 %v7957_v44, %v27710_v61 }
 0x4f9   : > { %v22523_v59 = vld [vmem:[%s22742_s13 + $0x224] sm:$0xf]  ;;  %v22524_v57 = vld [vmem:[%s22742_s13 + $0x218] sm:$0x1]  ;;  %v22525_v11 = vld [vmem:[%s22742_s13 + $0x228] sm:$0xf]  ;;  %20276 = vmatmul.mubr.msk.bf16.gmra.mrb[76].mxu1 %vm1963_vm3, %v27337_v45  ;;  %v29119_v54 = vcombine.low %v27302_v17, %v27312_v28  ;;  %v7910_v17 = vsel %vm22764_vm4, %v27701_v2, %v27666_v47  ;;  %v7920_v47 = vsel %vm22764_vm4, %v27717_v58, %v27689_v12 }
 0x4fa   : > { %v15432_v23 = vrot.slane %v22523_v59, 5  ;;  %v7961_v3 = vshll.u32 %v22524_v57, 16  ;;  %v15435_v42 = vrot.slane %v22525_v11, 5  ;;  %v7968_v55 = vrot.slane %v7966_v35, 4  ;;  %20279 = vmatprep.mubr.msk.bf16.mxu1 %vm1963_vm3, %v27357_v46  ;;  %v29120_v16 = vld [vmem:[#allocation24_spill] sm:$0xff] }
 0x4fb   : > { %20796 = vmatmul.mubr.msk.bf16.gmra.mrb[76].mxu0 %vm1963_vm3, %v29119_v54  ;;  %v7971_v5 = vrot.slane %v7969_v63, 5  ;;  %v27740_v59 = vrot.slane %v7975_v0, 5  ;;  %v7981_v41 = vrot.slane %v7979_v32, 4  ;;  %v29121_v44 = vcombine.low %v27341_v37, %v29120_v16  ;;  %v22526_v57 = vld [vmem:[%s22742_s13 + $0x22c] sm:$0x1] }
 0x4fc   : > { %v7929_v28 = vrot.slane %v7928_v33, 4  ;;  %v18948_v45 = vrot.slane %v18916_v36, 9  ;;  %v15431_v35 = vrot.slane %v15429_v13, 4  ;;  %v7939_v63 = vrot.slane %v7938_v53, 4  ;;  %v27753_v54 = vpop.f32.mrb[36].mxu1 }
 0x4fd   : > { %20799 = vmatprep.mubr.msk.bf16.mxu0 %vm1963_vm3, %v29121_v44  ;;  %v7963_v0 = vrot.slane %v7961_v3, 5  ;;  %v15434_v32 = vrot.slane %v15432_v23, 4  ;;  %v15438_v11 = vrot.slane %v22526_v57, 5  ;;  %29122 = vst [vmem:[#allocation24_spill] sm:$0xff] %v27753_v54  ;;  %v7949_v46 = vrot.slane %v7948_v6, 4  ;;  %v27756_v15 = vpop.f32.mrb[37].mxu1 }
 0x4fe   : > { %v7959_v27 = vrot.slane %v7958_v19, 4  ;;  %v15437_v37 = vrot.slane %v15435_v42, 4  ;;  %v22527_v16 = vld [vmem:[%s22742_s13 + $0x224] sm:$0xf]  ;;  %29123 = vst [vmem:[#allocation43_spill] sm:$0xff] %v27756_v15  ;;  %v7972_v2 = vor.u32 %v7971_v5, %v7968_v55  ;;  %v7982_v36 = vor.u32 %v7981_v41, %v27740_v59  ;;  %v27763_v53 = vpop.f32.mrb[38].mxu1 }
 0x4ff   : > { %v7985_v44 = vshll.u32 %v22527_v16, 16  ;;  %v7989_v33 = vshrl.u32 %v22527_v16, 16  ;;  %29124 = vst [vmem:[#allocation44_spill] sm:$0xff] %v27763_v53  ;;  %v27767_v6 = vsel %vm23271_vm7, %v15424_v25, %v15425_v49  ;;  %v7934_v3 = vsel %vm22764_vm4, %v7929_v28, %v27704_v26  ;;  %v27780_v58 = vpop.f32.mrb[39].mxu1  ;;  %v18917_v26 = vld [vmem:[%s22742_s13 + $0x230] sm:$0xe] }
 0x500   : > { %v27774_v19 = vsel %vm23271_vm7, %v18948_v45, %v15429_v13  ;;  %v27778_v12 = vsel %vm23271_vm7, %v15431_v35, %v15432_v23  ;;  %29125 = vst [vmem:[#allocation45_spill] sm:$0xff] %v27780_v58  ;;  %v7944_v25 = vsel %vm22764_vm4, %v7939_v63, %v27708_v43  ;;  %v27787_v49 = vsel %vm23271_vm7, %v15434_v32, %v15435_v42  ;;  %v22528_v55 = vld [vmem:[%s22742_s13 + $0x228] sm:$0xf]  ;;  %v22529_v35 = vld [vmem:[%s22742_s13 + $0x234] sm:$0xf] }
 0x501   : > { %v7995_v5 = vshll.u32 %v22528_v55, 16  ;;  %v7999_v13 = vshrl.u32 %v22528_v55, 16  ;;  %v7954_v23 = vsel %vm22764_vm4, %v7949_v46, %v27710_v61  ;;  %v7964_v41 = vsel %vm22764_vm4, %v7959_v27, %v7963_v0  ;;  %20280 = vmatmul.mubr.msk.bf16.gmra.mrb[80].mxu1 %vm1963_vm3, %v27430_v1  ;;  %v22530_v57 = vld [vmem:[%s22742_s13 + $0x238] sm:$0xf]  ;;  %v29134_v1 = vld [vmem:[#allocation16_spill] sm:$0xff] }
 0x502   : > { %v27798_v28 = vsel %vm23271_vm7, %v15437_v37, %v15438_v11  ;;  %v7987_v43 = vrot.slane %v7985_v44, 5  ;;  %v29126_v42 = vcombine.low %v27418_v60, %v27425_v52  ;;  %v7973_v45 = vrot.slane %v7972_v2, 4  ;;  %20283 = vmatprep.mubr.msk.bf16.mxu1 %vm1963_vm3, %v27473_v48  ;;  %v22531_v48 = vld [vmem:[%s22742_s13 + $0x22c] sm:$0x1]  ;;  %v22540_v54 = vld [vmem:[%s22742_s13 + $0x240] sm:$0x1] }
 0x503   : > { %v7983_v61 = vrot.slane %v7982_v36, 4  ;;  %v15442_v27 = vrot.slane %v22529_v35, 5  ;;  %v7991_v63 = vrot.slane %v7989_v33, 4  ;;  %v29127_v0 = vcombine.low %v27434_v31, %v27452_v29  ;;  %v17998_v31 = vld [vmem:[%s22742_s13 + $0x230] sm:$0xf] }
 0x504   : > { %20800 = vmatmul.mubr.msk.bf16.gmra.mrb[80].mxu0 %vm1963_vm3, %v29126_v42  ;;  %v27815_v52 = vcombine.low %v7910_v17, %v7920_v47  ;;  %v18949_v32 = vrot.slane %v18917_v26, 9  ;;  %v15445_v11 = vrot.slane %v22530_v57, 5  ;;  %v27820_v46 = vrot.slane %v7995_v5, 5  ;;  %v27824_v29 = vpop.f32.mrb[40].mxu1  ;;  %v29133_v17 = vld [vmem:[#allocation6_spill] sm:$0xff] }
 0x505   : > { %20803 = vmatprep.mubr.msk.bf16.mxu0 %vm1963_vm3, %v29127_v0  ;;  %v8001_v37 = vrot.slane %v7999_v13, 4  ;;  %v8005_v16 = vshll.u32 %v22531_v48, 16  ;;  %29128 = vst [vmem:[#allocation46_spill] sm:$0xff] %v27824_v29  ;;  %v27826_v44 = vcombine.low %v7934_v3, %v7944_v25  ;;  %v27830_v47 = vcombine.low %v7954_v23, %v7964_v41  ;;  %v27834_v36 = vpop.f32.mrb[41].mxu1  ;;  %v22532_v23 = vld [vmem:[%s22742_s13 + $0x234] sm:$0xf] }
 0x506   : > { %29129 = vst [vmem:[#allocation47_spill] sm:$0xff] %v27834_v36  ;;  %v7978_v33 = vsel %vm22764_vm4, %v7973_v45, %v27740_v59  ;;  %v7988_v26 = vsel %vm22764_vm4, %v7983_v61, %v7987_v43  ;;  %v15444_v3 = vrot.slane %v15442_v27, 4  ;;  %v7992_v25 = vor.u32 %v7991_v63, %v7987_v43  ;;  %v27841_v55 = vpop.f32.mrb[42].mxu1  ;;  %v22533_v43 = vld [vmem:[%s22742_s13 + $0x238] sm:$0xf] }
 0x507   : > { %29130 = vst [vmem:[#allocation48_spill] sm:$0xff] %v27841_v55  ;;  %v8010_v5 = vshrl.u32 %v17998_v31, 16  ;;  %v8013_v13 = vshll.u32 %v17998_v31, 16  ;;  %v8019_v41 = vshll.u32 %v22532_v23, 16  ;;  %v8023_v42 = vshrl.u32 %v22532_v23, 16  ;;  %v27844_v35 = vpop.f32.mrb[43].mxu1 }
 0x508   : > { %29131 = vst [vmem:[#allocation49_spill] sm:$0xff] %v27844_v35  ;;  %v27848_v0 = vsel %vm23271_vm7, %v18949_v32, %v15442_v27  ;;  %v8002_v59 = vor.u32 %v8001_v37, %v27820_v46  ;;  %v27851_v45 = vrot.slane %v8005_v16, 5  ;;  %v15447_v61 = vrot.slane %v15445_v11, 4  ;;  %v22534_v48 = vld [vmem:[%s22742_s13 + $0x23c] sm:$0xf]  ;;  %v29132_v23 = vld [vmem:[#allocation19_spill] sm:$0xff] }
 0x509   : > { %v8029_v63 = vshll.u32 %v22533_v43, 16  ;;  %v8033_v57 = vshrl.u32 %v22533_v43, 16  ;;  %v8039_v31 = vshll.u32 %v22534_v48, 16  ;;  %v8043_v2 = vshrl.u32 %v22534_v48, 16  ;;  %20284 = vmatmul.mubr.msk.bf16.gmra.mrb[84].mxu1 %vm1963_vm3, %v29132_v23  ;;  %v22535_v16 = vld [vmem:[%s22742_s13 + $0x23c] sm:$0xf] }
 0x50a   : > { %v29135_v60 = vcombine.low %v29133_v17, %v29134_v1  ;;  %v27861_v27 = vcombine.low %v7978_v33, %v7988_v26  ;;  %v27865_v32 = vsel %vm23271_vm7, %v15444_v3, %v15445_v11  ;;  %v27867_v37 = vrot.slane %v7992_v25, 4  ;;  %v29136_v48 = vld [vmem:[#allocation20_spill] sm:$0xff]  ;;  %v29137_v23 = vld [vmem:[#allocation30_spill] sm:$0xff]  ;;  %v18003_v11 = vld [vmem:[%s22742_s13 + $0x244] sm:$0xf] }
 0x50b   : > { %v15448_v43 = vrot.slane %v22535_v16, 5  ;;  %20287 = vmatprep.mubr.msk.bf16.mxu1 %vm1963_vm3, %v29136_v48  ;;  %v29138_v1 = vld [vmem:[#allocation32_spill] sm:$0xff]  ;;  %v8015_v33 = vrot.slane %v8013_v13, 5  ;;  %v27876_v26 = vrot.slane %v8019_v41, 5  ;;  %v8025_v35 = vrot.slane %v8023_v42, 4 }
 0x50c   : > { %20804 = vmatmul.mubr.msk.bf16.gmra.mrb[84].mxu0 %vm1963_vm3, %v29135_v60  ;;  %v29139_v17 = vcombine.low %v29137_v23, %v29138_v1  ;;  %v8012_v60 = vrot.slane %v8010_v5, 4  ;;  %v27879_v3 = vrot.slane %v8002_v59, 4  ;;  %v22536_v16 = vld [vmem:[%s22742_s13 + $0x240] sm:$0x1]  ;;  %v18918_v55 = vld [vmem:[%s22742_s13 + $0x244] sm:$0xe] }
 0x50d   : > { %v27883_v25 = vsel %vm23271_vm7, %v15447_v61, %v15448_v43  ;;  %v15451_v48 = vrot.slane %v22536_v16, 5  ;;  %v22537_v36 = vld [vmem:[%s22742_s13 + $0x248] sm:$0xf]  ;;  %v27888_v1 = vpop.f32.mrb[44].mxu1  ;;  %v27890_v5 = vrot.slane %v8029_v63, 5  ;;  %v8035_v13 = vrot.slane %v8033_v57, 4 }
 0x50e   : > { %20807 = vmatprep.mubr.msk.bf16.mxu0 %vm1963_vm3, %v29139_v17  ;;  %v15455_v23 = vrot.slane %v22537_v36, 5  ;;  %29140 = vst [vmem:[#allocation19_spill] sm:$0xff] %v27888_v1  ;;  %v27892_v41 = vrot.slane %v8039_v31, 5  ;;  %v8045_v42 = vrot.slane %v8043_v2, 4  ;;  %v27894_v59 = vpop.f32.mrb[45].mxu1  ;;  %v8054_v17 = vshrl.u32 %v18003_v11, 16 }
 0x50f   : > { %29141 = vst [vmem:[#allocation6_spill] sm:$0xff] %v27894_v59  ;;  %v8057_v61 = vshll.u32 %v18003_v11, 16  ;;  %v22538_v29 = vld [vmem:[%s22742_s13 + $0x248] sm:$0xf]  ;;  %v27897_v53 = vpop.f32.mrb[46].mxu1  ;;  %v15450_v36 = vrot.slane %v15448_v43, 4  ;;  %v8016_v1 = vor.u32 %v8015_v33, %v8012_v60  ;;  %v8026_v63 = vor.u32 %v8025_v35, %v27876_v26 }
 0x510   : > { %v8063_v58 = vshll.u32 %v22538_v29, 16  ;;  %v8067_v16 = vshrl.u32 %v22538_v29, 16  ;;  %v18950_v57 = vrot.slane %v18918_v55, 9  ;;  %v27900_v31 = vpop.f32.mrb[47].mxu1  ;;  %v7998_v2 = vsel %vm22764_vm4, %v27867_v37, %v27820_v46  ;;  %v22539_v11 = vld [vmem:[%s22742_s13 + $0x24c] sm:$0xf] }
 0x511   : > { %v15457_v59 = vrot.slane %v15455_v23, 4  ;;  %v15458_v15 = vrot.slane %v22539_v11, 5  ;;  %v8049_v29 = vshll.u32 %v22540_v54, 16  ;;  %v8008_v43 = vsel %vm22764_vm4, %v27879_v3, %v27851_v45  ;;  %v22541_v60 = vld [vmem:[%s22742_s13 + $0x250] sm:$0xf]  ;;  %20288 = vmatmul.mubr.msk.bf16.gmra.mrb[88].mxu1 %vm1963_vm3, %v27641_v51 }
 0x512   : > { %v8036_v35 = vor.u32 %v8035_v13, %v27890_v5  ;;  %v8046_v55 = vor.u32 %v8045_v42, %v27892_v41  ;;  %v15461_v33 = vrot.slane %v22541_v60, 5  ;;  %v29142_v46 = vcombine.low %v27574_v62, %v27594_v14  ;;  %20291 = vmatprep.mubr.msk.bf16.mxu1 %vm1963_vm3, %v27651_v40 }
 0x513   : > { %v8056_v54 = vrot.slane %v8054_v17, 4  ;;  %v8059_v37 = vrot.slane %v8057_v61, 5  ;;  %v27921_v11 = vrot.slane %v8063_v58, 5  ;;  %v8069_v45 = vrot.slane %v8067_v16, 4  ;;  %v22542_v17 = vld [vmem:[%s22742_s13 + $0x254] sm:$0x1] }
 0x514   : > { %20808 = vmatmul.mubr.msk.bf16.gmra.mrb[88].mxu0 %vm1963_vm3, %v29142_v46  ;;  %v29143_v3 = vcombine.low %v27598_v18, %v27612_v8  ;;  %v27931_v51 = vsel %vm23271_vm7, %v15450_v36, %v15451_v48  ;;  %v8017_v62 = vrot.slane %v8016_v1, 4  ;;  %v8027_v14 = vrot.slane %v8026_v63, 4  ;;  %v27942_v8 = vpop.f32.mrb[48].mxu1  ;;  %v22543_v1 = vld [vmem:[%s22742_s13 + $0x24c] sm:$0xf] }
 0x515   : > { %v27935_v58 = vsel %vm23271_vm7, %v18950_v57, %v15455_v23  ;;  %v27939_v13 = vsel %vm23271_vm7, %v15457_v59, %v15458_v15  ;;  %v8051_v40 = vrot.slane %v8049_v29, 5  ;;  %v15460_v42 = vrot.slane %v15458_v15, 4  ;;  %v27945_v63 = vpop.f32.mrb[49].mxu1 }
 0x516   : > { %20811 = vmatprep.mubr.msk.bf16.mxu0 %vm1963_vm3, %v29143_v3  ;;  %v15464_v18 = vrot.slane %v22542_v17, 5  ;;  %v8037_v61 = vrot.slane %v8036_v35, 4  ;;  %v8047_v48 = vrot.slane %v8046_v55, 4  ;;  %v15463_v16 = vrot.slane %v15461_v33, 4  ;;  %v27950_v15 = vpop.f32.mrb[50].mxu1 }
 0x517   : > { %v8073_v36 = vshll.u32 %v22543_v1, 16  ;;  %v8060_v57 = vor.u32 %v8059_v37, %v8056_v54  ;;  %v8070_v59 = vor.u32 %v8069_v45, %v27921_v11  ;;  %v8077_v29 = vshrl.u32 %v22543_v1, 16  ;;  %29144 = vst [vmem:[#allocation16_spill] sm:$0xff] %v27950_v15  ;;  %v22544_v55 = vld [vmem:[%s22742_s13 + $0x250] sm:$0xf]  ;;  %v27957_v17 = vpop.f32.mrb[51].mxu1 }
 0x518   : > { %v27952_v60 = vcombine.low %v7998_v2, %v8008_v43  ;;  %v8083_v46 = vshll.u32 %v22544_v55, 16  ;;  %v8087_v3 = vshrl.u32 %v22544_v55, 16  ;;  %29145 = vst [vmem:[#allocation20_spill] sm:$0xff] %v27957_v17  ;;  %v8022_v54 = vsel %vm22764_vm4, %v8017_v62, %v27876_v26  ;;  %v18008_v62 = vld [vmem:[%s22742_s13 + $0x258] sm:$0xf] }
 0x519   : > { %v8032_v37 = vsel %vm22764_vm4, %v8027_v14, %v27890_v5  ;;  %v27969_v43 = vsel %vm23271_vm7, %v15460_v42, %v15461_v33  ;;  %v8042_v45 = vsel %vm22764_vm4, %v8037_v61, %v27892_v41  ;;  %v8052_v1 = vsel %vm22764_vm4, %v8047_v48, %v8051_v40  ;;  %20292 = vmatmul.mubr.msk.bf16.gmra.mrb[92].mxu1 %vm1963_vm3, %v27653_v34  ;;  %v18919_v42 = vld [vmem:[%s22742_s13 + $0x258] sm:$0xe]  ;;  %v22545_v61 = vld [vmem:[%s22742_s13 + $0x25c] sm:$0xf] }
 0x51a   : > { %v27978_v26 = vsel %vm23271_vm7, %v15463_v16, %v15464_v18  ;;  %v8075_v5 = vrot.slane %v8073_v36, 5  ;;  %v29146_v33 = vcombine.low %v27619_v20, %v27631_v21  ;;  %v8061_v14 = vrot.slane %v8060_v57, 4  ;;  %20295 = vmatprep.mubr.msk.bf16.mxu1 %vm1963_vm3, %v27697_v22  ;;  %v22546_v20 = vld [vmem:[%s22742_s13 + $0x260] sm:$0xf] }
 0x51b   : > { %v8071_v41 = vrot.slane %v8070_v59, 4  ;;  %v15468_v40 = vrot.slane %v22545_v61, 5  ;;  %v8079_v48 = vrot.slane %v8077_v29, 4  ;;  %v29147_v18 = vcombine.low %v27683_v50, %v27687_v38  ;;  %v22547_v38 = vld [vmem:[%s22742_s13 + $0x254] sm:$0x1] }
 0x51c   : > { %20812 = vmatmul.mubr.msk.bf16.gmra.mrb[92].mxu0 %vm1963_vm3, %v29146_v33  ;;  %v27995_v34 = vcombine.low %v8022_v54, %v8032_v37  ;;  %v15471_v21 = vrot.slane %v22546_v20, 5  ;;  %v27998_v16 = vrot.slane %v8083_v46, 5  ;;  %v8089_v36 = vrot.slane %v8087_v3, 4  ;;  %v28004_v22 = vpop.f32.mrb[52].mxu1  ;;  %v22548_v54 = vld [vmem:[%s22742_s13 + $0x25c] sm:$0xf] }
 0x51d   : > { %20815 = vmatprep.mubr.msk.bf16.mxu0 %vm1963_vm3, %v29147_v18  ;;  %v28000_v57 = vcombine.low %v8042_v45, %v8052_v1  ;;  %v8098_v29 = vshrl.u32 %v18008_v62, 16  ;;  %v8101_v55 = vshll.u32 %v18008_v62, 16  ;;  %29148 = vst [vmem:[#allocation30_spill] sm:$0xff] %v28004_v22  ;;  %v18951_v50 = vrot.slane %v18919_v42, 9  ;;  %v28008_v46 = vpop.f32.mrb[53].mxu1 }
 0x51e   : > { %v8093_v33 = vshll.u32 %v22547_v38, 16  ;;  %v8107_v37 = vshll.u32 %v22548_v54, 16  ;;  %v8111_v61 = vshrl.u32 %v22548_v54, 16  ;;  %29149 = vst [vmem:[#allocation32_spill] sm:$0xff] %v28008_v46  ;;  %v8066_v3 = vsel %vm22764_vm4, %v8061_v14, %v27921_v11  ;;  %v28015_v18 = vpop.f32.mrb[54].mxu1 }
 0x51f   : > { %v8076_v45 = vsel %vm22764_vm4, %v8071_v41, %v8075_v5  ;;  %v15470_v1 = vrot.slane %v15468_v40, 4  ;;  %v8080_v62 = vor.u32 %v8079_v48, %v8075_v5  ;;  %29150 = vst [vmem:[#allocation50_spill] sm:$0xff] %v28015_v18  ;;  %v8090_v42 = vor.u32 %v8089_v36, %v27998_v16  ;;  %v22549_v38 = vld [vmem:[%s22742_s13 + $0x260] sm:$0xf]  ;;  %v28019_v54 = vpop.f32.mrb[55].mxu1 }
 0x520   : > { %v15473_v20 = vrot.slane %v15471_v21, 4  ;;  %v8117_v59 = vshll.u32 %v22549_v38, 16  ;;  %v8121_v2 = vshrl.u32 %v22549_v38, 16  ;;  %29151 = vst [vmem:[#allocation51_spill] sm:$0xff] %v28019_v54  ;;  %v8100_v35 = vrot.slane %v8098_v29, 4 }
 0x521   : > { %v8103_v23 = vrot.slane %v8101_v55, 5  ;;  %v22550_v11 = vld [vmem:[%s22742_s13 + $0x264] sm:$0xf]  ;;  %v28024_v5 = vsel %vm23271_vm7, %v18951_v50, %v15468_v40  ;;  %v28026_v41 = vrot.slane %v8093_v33, 5  ;;  %v28028_v48 = vrot.slane %v8107_v37, 5  ;;  %20296 = vmatmul.mubr.msk.bf16.gmra.mrb[96].mxu1 %vm1963_vm3, %v27815_v52 }
 0x522   : > { %v8127_v14 = vshll.u32 %v22550_v11, 16  ;;  %v8131_v46 = vshrl.u32 %v22550_v11, 16  ;;  %v8113_v36 = vrot.slane %v8111_v61, 4  ;;  %v29152_v29 = vcombine.low %v27725_v30, %v27767_v6  ;;  %v22551_v50 = vld [vmem:[%s22742_s13 + $0x264] sm:$0xf]  ;;  %20299 = vmatprep.mubr.msk.bf16.mxu1 %vm1963_vm3, %v27826_v44 }
 0x523   : > { %v28036_v55 = vcombine.low %v8066_v3, %v8076_v45  ;;  %v28040_v38 = vsel %vm23271_vm7, %v15470_v1, %v15471_v21  ;;  %v28042_v40 = vrot.slane %v8080_v62, 4  ;;  %v15474_v33 = vrot.slane %v22551_v50, 5  ;;  %v18013_v37 = vld [vmem:[%s22742_s13 + $0x26c] sm:$0xf]  ;;  %v22552_v52 = vld [vmem:[%s22742_s13 + $0x268] sm:$0x1] }
 0x524   : > { %20816 = vmatmul.mubr.msk.bf16.gmra.mrb[96].mxu0 %vm1963_vm3, %v29152_v29  ;;  %v29153_v30 = vcombine.low %v27774_v19, %v27778_v12  ;;  %v28052_v6 = vrot.slane %v8090_v42, 4  ;;  %v15477_v21 = vrot.slane %v22552_v52, 5  ;;  %v28055_v61 = vrot.slane %v8117_v59, 5  ;;  %v28063_v19 = vpop.f32.mrb[56].mxu1  ;;  %v18920_v42 = vld [vmem:[%s22742_s13 + $0x26c] sm:$0xe] }
 0x525   : > { %v8123_v3 = vrot.slane %v8121_v2, 4  ;;  %v28059_v45 = vsel %vm23271_vm7, %v15473_v20, %v15474_v33  ;;  %v8104_v1 = vor.u32 %v8103_v23, %v8100_v35  ;;  %v28061_v62 = vrot.slane %v8127_v14, 5  ;;  %29154 = vst [vmem:[#allocation52_spill] sm:$0xff] %v28063_v19  ;;  %v22553_v11 = vld [vmem:[%s22742_s13 + $0x270] sm:$0xf]  ;;  %v28068_v2 = vpop.f32.mrb[57].mxu1 }
 0x526   : > { %20819 = vmatprep.mubr.msk.bf16.mxu0 %vm1963_vm3, %v29153_v30  ;;  %v8133_v44 = vrot.slane %v8131_v46, 4  ;;  %v8114_v12 = vor.u32 %v8113_v36, %v28028_v48  ;;  %v15481_v59 = vrot.slane %v22553_v11, 5  ;;  %v8142_v29 = vshrl.u32 %v18013_v37, 16  ;;  %29155 = vst [vmem:[#allocation53_spill] sm:$0xff] %v28068_v2  ;;  %v22554_v46 = vld [vmem:[%s22742_s13 + $0x270] sm:$0xf] }
 0x527   : > { %v8145_v50 = vshll.u32 %v18013_v37, 16  ;;  %v15476_v35 = vrot.slane %v15474_v33, 4  ;;  %v8151_v20 = vshll.u32 %v22554_v46, 16  ;;  %v8155_v14 = vshrl.u32 %v22554_v46, 16  ;;  %v28075_v30 = vpop.f32.mrb[58].mxu1 }
 0x528   : > { %29156 = vst [vmem:[#allocation54_spill] sm:$0xff] %v28075_v30  ;;  %v22555_v37 = vld [vmem:[%s22742_s13 + $0x274] sm:$0xf]  ;;  %v8124_v11 = vor.u32 %v8123_v3, %v28055_v61  ;;  %v22556_v2 = vld [vmem:[%s22742_s13 + $0x268] sm:$0x1]  ;;  %v28084_v23 = vpop.f32.mrb[59].mxu1  ;;  %v8134_v46 = vor.u32 %v8133_v44, %v28061_v62  ;;  %v29158_v3 = vcombine.low %v27787_v49, %v27798_v28 }
 0x529   : > { %v15484_v52 = vrot.slane %v22555_v37, 5  ;;  %v8137_v19 = vshll.u32 %v22556_v2, 16  ;;  %29157 = vst [vmem:[#allocation55_spill] sm:$0xff] %v28084_v23  ;;  %v28086_v33 = vrot.slane %v8104_v1, 4  ;;  %v18952_v54 = vrot.slane %v18920_v42, 9  ;;  %20300 = vmatmul.mubr.msk.bf16.gmra.mrb[100].mxu1 %vm1963_vm3, %v27830_v47 }
 0x52a   : > { %v22557_v30 = vld [vmem:[%s22742_s13 + $0x278] sm:$0xf]  ;;  %v8115_v22 = vrot.slane %v8114_v12, 4  ;;  %v15483_v17 = vrot.slane %v15481_v59, 4  ;;  %v8144_v36 = vrot.slane %v8142_v29, 4  ;;  %v8147_v15 = vrot.slane %v8145_v50, 5  ;;  %20303 = vmatprep.mubr.msk.bf16.mxu1 %vm1963_vm3, %v27861_v27 }
 0x52b   : > { %v15487_v18 = vrot.slane %v22557_v30, 5  ;;  %v28096_v1 = vrot.slane %v8151_v20, 5  ;;  %v8157_v42 = vrot.slane %v8155_v14, 4  ;;  %v22558_v44 = vld [vmem:[%s22742_s13 + $0x274] sm:$0xf]  ;;  %v29159_v12 = vcombine.low %v27848_v0, %v27865_v32 }
 0x52c   : > { %20820 = vmatmul.mubr.msk.bf16.gmra.mrb[100].mxu0 %vm1963_vm3, %v29158_v3  ;;  %v8161_v2 = vshll.u32 %v22558_v44, 16  ;;  %v8165_v30 = vshrl.u32 %v22558_v44, 16  ;;  %v8125_v47 = vrot.slane %v8124_v11, 4  ;;  %v8139_v29 = vrot.slane %v8137_v19, 5  ;;  %v22559_v28 = vld [vmem:[%s22742_s13 + $0x27c] sm:$0x1] }
 0x52d   : > { %20823 = vmatprep.mubr.msk.bf16.mxu0 %vm1963_vm3, %v29159_v12  ;;  %v15486_v49 = vrot.slane %v15484_v52, 4  ;;  %v15490_v50 = vrot.slane %v22559_v28, 5  ;;  %v8135_v20 = vrot.slane %v8134_v46, 4  ;;  %v15489_v37 = vrot.slane %v15487_v18, 4  ;;  %v22560_v14 = vld [vmem:[%s22742_s13 + $0x278] sm:$0xf] }
 0x52e   : > { %v8171_v3 = vshll.u32 %v22560_v14, 16  ;;  %v8175_v23 = vshrl.u32 %v22560_v14, 16  ;;  %v28107_v44 = vpop.f32.mrb[60].mxu1  ;;  %v28111_v27 = vsel %vm23271_vm7, %v15476_v35, %v15477_v21  ;;  %v8110_v0 = vsel %vm22764_vm4, %v28086_v33, %v28028_v48  ;;  %v18921_v35 = vld [vmem:[%s22742_s13 + $0x280] sm:$0xe] }
 0x52f   : > { %v28119_v32 = vsel %vm23271_vm7, %v18952_v54, %v15481_v59  ;;  %v8148_v19 = vor.u32 %v8147_v15, %v8144_v36  ;;  %v28121_v11 = vpop.f32.mrb[61].mxu1  ;;  %v28125_v46 = vsel %vm23271_vm7, %v15483_v17, %v15484_v52  ;;  %v8158_v12 = vor.u32 %v8157_v42, %v28096_v1  ;;  %v22561_v59 = vld [vmem:[%s22742_s13 + $0x284] sm:$0xf] }
 0x530   : > { %v28128_v21 = vrot.slane %v8161_v2, 5  ;;  %v8167_v28 = vrot.slane %v8165_v30, 4  ;;  %v28131_v48 = vpop.f32.mrb[62].mxu1  ;;  %v8120_v15 = vsel %vm22764_vm4, %v8115_v22, %v28055_v61  ;;  %v8130_v54 = vsel %vm22764_vm4, %v8125_v47, %v28061_v62  ;;  %v22562_v30 = vld [vmem:[%s22742_s13 + $0x288] sm:$0xf] }
 0x531   : > { %v28141_v17 = vsel %vm23271_vm7, %v15486_v49, %v15487_v18  ;;  %v15494_v36 = vrot.slane %v22561_v59, 5  ;;  %v28144_v52 = vpop.f32.mrb[63].mxu1  ;;  %v8140_v33 = vsel %vm22764_vm4, %v8135_v20, %v8139_v29  ;;  %v28150_v42 = vsel %vm23271_vm7, %v15489_v37, %v15490_v50  ;;  %v22563_v47 = vld [vmem:[%s22742_s13 + $0x27c] sm:$0x1]  ;;  %20304 = vmatmul.mubr.msk.bf16.gmra.mrb[104].mxu1 %vm1963_vm3, %v27952_v60 }
 0x532   : > { %v28152_v22 = vrot.slane %v8171_v3, 5  ;;  %v8177_v61 = vrot.slane %v8175_v23, 4  ;;  %v28154_v2 = vrot.slane %v8148_v19, 4  ;;  %v18953_v62 = vrot.slane %v18921_v35, 9  ;;  %20307 = vmatprep.mubr.msk.bf16.mxu1 %vm1963_vm3, %v27995_v34 }
 0x533   : > { %v15497_v18 = vrot.slane %v22562_v30, 5  ;;  %v8181_v49 = vshll.u32 %v22563_v47, 16  ;;  %v29160_v29 = vcombine.low %v27883_v25, %v27931_v51  ;;  %v19012_v23 = vcombine.low %v28024_v5, %v28040_v38 }
 0x534   : > { %v29161_v50 = vsel %vm22764_vm4, %v28052_v6, %v28026_v41  ;;  %v29162_v20 = vsel %vm22764_vm4, %v28042_v40, %v27998_v16  ;;  %v28178_v25 = vrot.slane %v8158_v12, 4  ;;  %v8168_v51 = vor.u32 %v8167_v28, %v28128_v21  ;;  %v18018_v6 = vld [vmem:[%s22742_s13 + $0x280] sm:$0xf] }
 0x535   : > { %20824 = vmatmul.mubr.msk.bf16.gmra.mrb[104].mxu0 %vm1963_vm3, %v29160_v29  ;;  %v28176_v60 = vcombine.low %v29162_v20, %v29161_v50  ;;  %v29163_v5 = vcombine.low %v27935_v58, %v27939_v13  ;;  %v19013_v41 = vcombine.low %v28059_v45, %v28111_v27  ;;  %v28189_v38 = vcombine.low %v8110_v0, %v8120_v15  ;;  %v22564_v58 = vld [vmem:[%s22742_s13 + $0x28c] sm:$0xf]  ;;  %v20721_v3 = vpop.f32.mrb[0].mxu0  ;;  %v28204_v0 = vld [vmem:[%s28851_s2] ss:$0 sm:$0xff] }
 0x536   : > { %v19014_v16 = vcombine.low %v28119_v32, %v28125_v46  ;;  %v15496_v40 = vrot.slane %v15494_v36, 4  ;;  %v28194_v37 = vcombine.low %v8130_v54, %v8140_v33  ;;  %v19015_v34 = vcombine.low %v28141_v17, %v28150_v42  ;;  %v29164_v15 = vld [vmem:[#allocation7_spill] sm:$0xff]  ;;  %v15941_v59 = vpop.f32.mrb[1].mxu0 }
 0x537   : > { %20827 = vmatprep.mubr.msk.bf16.mxu0 %vm1963_vm3, %v29163_v5  ;;  %v8178_v14 = vor.u32 %v8177_v61, %v28152_v22  ;;  %v15500_v13 = vrot.slane %v22564_v58, 5  ;;  %v8154_v19 = vsel %vm22764_vm4, %v28154_v2, %v28096_v1  ;;  %v28212_v12 = vsel %vm23271_vm7, %v18953_v62, %v15494_v36  ;;  %v28222_v1 = vld [vmem:[%s28852_s3] ss:$0 sm:$0xff]  ;;  %v29165_v2 = vld [vmem:[#allocation8_spill] sm:$0xff]  ;;  %v20722_v62 = vpop.f32.mrb[2].mxu0 }
 0x538   : > { %v8183_v35 = vrot.slane %v8181_v49, 5  ;;  %v15499_v28 = vrot.slane %v15497_v18, 4  ;;  %v20849_v54 = vadd.f32 %v20721_v3, %v29164_v15  ;;  %v8164_v33 = vsel %vm22764_vm4, %v28178_v25, %v28128_v21  ;;  %v22565_v49 = vld [vmem:[%s22742_s13 + $0x290] sm:$0x1]  ;;  %v29166_v20 = vld [vmem:[#allocation11_spill] sm:$0xff] }
 0x539   : > { %v8169_v61 = vrot.slane %v8168_v51, 4  ;;  %v8186_v30 = vshrl.u32 %v18018_v6, 16  ;;  %v20850_v36 = vadd.f32 %v15941_v59, %v29165_v2  ;;  %v28227_v47 = vsel %vm23271_vm7, %v15496_v40, %v15497_v18  ;;  %v15944_v51 = vpop.f32.mrb[3].mxu0  ;;  %v29167_v15 = vld [vmem:[#allocation9_spill] sm:$0xff]  ;;  %v22566_v40 = vld [vmem:[%s22742_s13 + $0x284] sm:$0xf]  ;;  %20308 = vmatmul.mubr.msk.bf16.gmra.mrb[108].mxu1 %vm1963_vm3, %v28000_v57 }
 0x53a   : > { %v15503_v29 = vrot.slane %v22565_v49, 5  ;;  %v8189_v50 = vshll.u32 %v18018_v6, 16  ;;  %v16589_v21 = vmul.f32 %v20849_v54, %v28204_v0  ;;  %v20851_v25 = vadd.f32 %v20722_v62, %v29166_v20  ;;  %20311 = vmatprep.mubr.msk.bf16.mxu1 %vm1963_vm3, %v28036_v55  ;;  %v22567_v55 = vld [vmem:[%s22742_s13 + $0x288] sm:$0xf] }
 0x53b   : > { %v8179_v5 = vrot.slane %v8178_v14, 4  ;;  %v15502_v58 = vrot.slane %v15500_v13, 4  ;;  %v16587_v3 = vmul.f32 %v20850_v36, %v28204_v0  ;;  %v20852_v59 = vadd.f32 %v15944_v51, %v29167_v15 }
 0x53c   : > { %v28240_v18 = vsel %vm23271_vm7, %v15499_v28, %v15500_v13  ;;  %v8195_v6 = vshll.u32 %v22566_v40, 16  ;;  %v16724_v2 = vadd.f32 %v28222_v1, %v16589_v21  ;;  %v16590_v49 = vmul.f32 %v20851_v25, %v28204_v0 }
 0x53d   : > { %v29168_v14 = vcombine.low %v27969_v43, %v27978_v26  ;;  %v8174_v54 = vsel %vm22764_vm4, %v8169_v61, %v28152_v22  ;;  %v28254_v13 = vrot.slane %v8186_v30, 4  ;;  %v16722_v28 = vadd.f32 %v28222_v1, %v16587_v3  ;;  %v20725_v20 = vpop.f32.mrb[4].mxu0 }
 0x53e   : > { %v16588_v36 = vmul.f32 %v20852_v59, %v28204_v0  ;;  %v8191_v43 = vrot.slane %v8189_v50, 5  ;;  %v8199_v26 = vshrl.u32 %v22566_v40, 16  ;;  %v16852_v57 = vmax.f32 %v16724_v2, 0.0  ;;  %v29169_v50 = vld [vmem:[#allocation10_spill] sm:$0xff]  ;;  %v18922_v2 = vld [vmem:[%s22742_s13 + $0x294] sm:$0xe] }
 0x53f   : > { %20828 = vmatmul.mubr.msk.bf16.gmra.mrb[108].mxu0 %vm1963_vm3, %v29168_v14  ;;  %v16725_v62 = vadd.f32 %v28222_v1, %v16590_v49  ;;  %v8184_v22 = vsel %vm22764_vm4, %v8179_v5, %v8183_v35  ;;  %v28266_v61 = vsel %vm23271_vm7, %v15502_v58, %v15503_v29  ;;  %v16850_v30 = vmax.f32 %v16722_v28, 0.0  ;;  %v15957_v29 = vpop.f32.mrb[5].mxu0  ;;  %v29171_v14 = vld [vmem:[#allocation22_spill] sm:$0xff] }
 0x540   : > { %20831 = vmatprep.mubr.msk.bf16.mxu0 %vm1963_vm3, %v19012_v23  ;;  %v16723_v21 = vadd.f32 %v28222_v1, %v16588_v36  ;;  %v28269_v25 = vcombine.low %v8154_v19, %v8164_v33  ;;  %v8205_v23 = vshll.u32 %v22567_v55, 16  ;;  %16980 = vst [vmem:[%s28273_s29 + $0x10] sm:$0xff] %v16852_v57  ;;  %v20853_v51 = vadd.f32 %v20725_v20, %v29169_v50  ;;  %v29170_v33 = vld [vmem:[#allocation5_spill] sm:$0xff]  ;;  %v20726_v15 = vpop.f32.mrb[6].mxu0 }
 0x541   : > { %v16853_v35 = vmax.f32 %v16725_v62, 0.0  ;;  %v19016_v5 = vcombine.low %v28212_v12, %v28227_v47  ;;  %v28279_v58 = vrot.slane %v8195_v6, 5  ;;  %16978 = vst [vmem:[%s28273_s29] sm:$0xff] %v16850_v30  ;;  %v20854_v3 = vadd.f32 %v15957_v29, %v29170_v33  ;;  %v15960_v36 = vpop.f32.mrb[7].mxu0  ;;  %20312 = vmatmul.mubr.msk.bf16.gmra.mrb[112].mxu1 %vm1963_vm3, %v28176_v60  ;;  %v22569_v60 = vld [vmem:[%s22742_s13 + $0x28c] sm:$0xf] }
 0x542   : > { %v16851_v19 = vmax.f32 %v16723_v21, 0.0  ;;  %v28283_v59 = vcombine.low %v8174_v54, %v8184_v22  ;;  %v19017_v40 = vcombine.low %v28240_v18, %v28266_v61  ;;  %v16593_v49 = vmul.f32 %v20853_v51, %v28204_v0  ;;  %v29172_v54 = vld [vmem:[#allocation23_spill] sm:$0xff]  ;;  %20315 = vmatprep.mubr.msk.bf16.mxu1 %vm1963_vm3, %v28189_v38  ;;  %v22570_v29 = vld [vmem:[%s22742_s13 + $0x29c] sm:$0xf] }
 0x543   : > { %16981 = vst [vmem:[%s28273_s29 + $0x18] sm:$0xff] %v16853_v35  ;;  %v20855_v28 = vadd.f32 %v20726_v15, %v29171_v14  ;;  %v8192_v6 = vor.u32 %v8191_v43, %v28254_v13  ;;  %v8201_v57 = vrot.slane %v8199_v26, 4  ;;  %v16591_v62 = vmul.f32 %v20854_v3, %v28204_v0  ;;  %v22568_v43 = vld [vmem:[%s22742_s13 + $0x298] sm:$0xf]  ;;  %v29173_v15 = vld [vmem:[#allocation25_spill] sm:$0xff] }
 0x544   : > { %16979 = vst [vmem:[%s28273_s29 + $0x8] sm:$0xff] %v16851_v19  ;;  %v20856_v22 = vadd.f32 %v15960_v36, %v29172_v54  ;;  %v28295_v30 = vrot.slane %v8205_v23, 5  ;;  %v8209_v21 = vshrl.u32 %v22567_v55, 16  ;;  %v16728_v20 = vadd.f32 %v28222_v1, %v16593_v49 }
 0x545   : > { %v16594_v35 = vmul.f32 %v20855_v28, %v28204_v0  ;;  %v18954_v13 = vrot.slane %v18922_v2, 9  ;;  %v15507_v26 = vrot.slane %v22568_v43, 5  ;;  %v16726_v23 = vadd.f32 %v28222_v1, %v16591_v62  ;;  %v20729_v3 = vpop.f32.mrb[8].mxu0  ;;  %v22571_v28 = vld [vmem:[%s22742_s13 + $0x290] sm:$0x1]  ;;  %v29174_v62 = vld [vmem:[#allocation26_spill] sm:$0xff] }
 0x546   : > { %v16592_v55 = vmul.f32 %v20856_v22, %v28204_v0  ;;  %v8215_v45 = vshll.u32 %v22569_v60, 16  ;;  %v8219_v27 = vshrl.u32 %v22569_v60, 16  ;;  %v8202_v51 = vor.u32 %v8201_v57, %v28279_v58  ;;  %v15973_v49 = vpop.f32.mrb[9].mxu0 }
 0x547   : > { %20832 = vmatmul.mubr.msk.bf16.gmra.mrb[112].mxu0 %vm1963_vm3, %v19013_v41  ;;  %v16856_v41 = vmax.f32 %v16728_v20, 0.0  ;;  %v16729_v50 = vadd.f32 %v28222_v1, %v16594_v35  ;;  %v15510_v19 = vrot.slane %v22570_v29, 5  ;;  %v16854_v33 = vmax.f32 %v16726_v23, 0.0  ;;  %v20730_v22 = vpop.f32.mrb[10].mxu0 }
 0x548   : > { %20835 = vmatprep.mubr.msk.bf16.mxu0 %vm1963_vm3, %v19014_v16  ;;  %v16727_v38 = vadd.f32 %v28222_v1, %v16592_v55  ;;  %v8193_v32 = vrot.slane %v8192_v6, 4  ;;  %v8211_v46 = vrot.slane %v8209_v21, 4  ;;  %v20857_v2 = vadd.f32 %v20729_v3, %v29173_v15  ;;  %v29175_v21 = vld [vmem:[#allocation27_spill] sm:$0xff]  ;;  %v15976_v23 = vpop.f32.mrb[11].mxu0 }
 0x549   : > { %16984 = vst [vmem:[%s28273_s29 + $0x30] sm:$0xff] %v16856_v41  ;;  %v16857_v16 = vmax.f32 %v16729_v50, 0.0  ;;  %v15509_v14 = vrot.slane %v15507_v26, 4  ;;  %v8225_v36 = vshll.u32 %v22571_v28, 16  ;;  %16982 = vst [vmem:[%s28273_s29 + $0x20] sm:$0xff] %v16854_v33  ;;  %v20858_v54 = vadd.f32 %v15973_v49, %v29174_v62  ;;  %v29176_v50 = vld [vmem:[#allocation28_spill] sm:$0xff]  ;;  %20316 = vmatmul.mubr.msk.bf16.gmra.mrb[116].mxu1 %vm1963_vm3, %v28194_v37 }
 0x54a   : > { %v16855_v57 = vmax.f32 %v16727_v38, 0.0  ;;  %v28324_v20 = vrot.slane %v8215_v45, 5  ;;  %v8221_v35 = vrot.slane %v8219_v27, 4  ;;  %v16597_v6 = vmul.f32 %v20857_v2, %v28204_v0  ;;  %20319 = vmatprep.mubr.msk.bf16.mxu1 %vm1963_vm3, %v28269_v25  ;;  %v29177_v2 = vld [vmem:[#allocation12_spill] sm:$0xff] }
 0x54b   : > { %16985 = vst [vmem:[%s28273_s29 + $0x38] sm:$0xff] %v16857_v16  ;;  %v20859_v43 = vadd.f32 %v20730_v22, %v29175_v21  ;;  %v8203_v55 = vrot.slane %v8202_v51, 4  ;;  %v15508_v60 = vsel %vm23271_vm7, %v18954_v13, %v15507_v26  ;;  %v16595_v41 = vmul.f32 %v20858_v54, %v28204_v0  ;;  %v22572_v26 = vld [vmem:[%s22742_s13 + $0x2a0] sm:$0xf]  ;;  %v29179_v21 = vld [vmem:[#allocation14_spill] sm:$0xff] }
 0x54c   : > { %16983 = vst [vmem:[%s28273_s29 + $0x28] sm:$0xff] %v16855_v57  ;;  %v20860_v29 = vadd.f32 %v15976_v23, %v29176_v50  ;;  %v8198_v45 = vsel %vm22764_vm4, %v8193_v32, %v28279_v58  ;;  %v8212_v27 = vor.u32 %v8211_v46, %v28295_v30  ;;  %v16732_v33 = vadd.f32 %v28222_v1, %v16597_v6 }
 0x54d   : > { %v16598_v38 = vmul.f32 %v20859_v43, %v28204_v0  ;;  %v15511_v13 = vsel %vm23271_vm7, %v15509_v14, %v15510_v19  ;;  %v15513_v51 = vrot.slane %v22572_v26, 5  ;;  %v16730_v58 = vadd.f32 %v28222_v1, %v16595_v41  ;;  %v20733_v15 = vpop.f32.mrb[12].mxu0 }
 0x54e   : > { %v16596_v3 = vmul.f32 %v20860_v29, %v28204_v0  ;;  %v8222_v17 = vor.u32 %v8221_v35, %v28324_v20  ;;  %v8227_v42 = vrot.slane %v8225_v36, 5  ;;  %v16860_v37 = vmax.f32 %v16732_v33, 0.0  ;;  %v15989_v14 = vpop.f32.mrb[13].mxu0  ;;  %v22573_v36 = vld [vmem:[%s22742_s13 + $0x2a4] sm:$0x1] }
 0x54f   : > { %20836 = vmatmul.mubr.msk.bf16.gmra.mrb[116].mxu0 %vm1963_vm3, %v19015_v34  ;;  %v16733_v34 = vadd.f32 %v28222_v1, %v16598_v38  ;;  %v8208_v32 = vsel %vm22764_vm4, %v8203_v55, %v28295_v30  ;;  %v15512_v46 = vrot.slane %v15510_v19, 4  ;;  %v16858_v16 = vmax.f32 %v16730_v58, 0.0  ;;  %v29178_v30 = vld [vmem:[#allocation13_spill] sm:$0xff]  ;;  %v20734_v54 = vpop.f32.mrb[14].mxu0 }
 0x550   : > { %20839 = vmatprep.mubr.msk.bf16.mxu0 %vm1963_vm3, %v19016_v5  ;;  %v16731_v25 = vadd.f32 %v28222_v1, %v16596_v3  ;;  %v19018_v12 = vcombine.low %v15508_v60, %v15511_v13  ;;  %v8213_v47 = vrot.slane %v8212_v27, 4  ;;  %16988 = vst [vmem:[%s28273_s29 + $0x50] sm:$0xff] %v16860_v37  ;;  %v20861_v49 = vadd.f32 %v20733_v15, %v29177_v2  ;;  %v15992_v23 = vpop.f32.mrb[15].mxu0  ;;  %v29180_v60 = vld [vmem:[#allocation15_spill] sm:$0xff] }
 0x551   : > { %v16861_v5 = vmax.f32 %v16733_v34, 0.0  ;;  %v15515_v28 = vrot.slane %v15513_v51, 4  ;;  %v15516_v57 = vrot.slane %v22573_v36, 5  ;;  %16986 = vst [vmem:[%s28273_s29 + $0x40] sm:$0xff] %v16858_v16  ;;  %v20862_v19 = vadd.f32 %v15989_v14, %v29178_v30  ;;  %20320 = vmatmul.mubr.msk.bf16.gmra.mrb[120].mxu1 %vm1963_vm3, %v28283_v59  ;;  %v29183_v16 = vld [vmem:[#allocation29_spill] sm:$0xff] }
 0x552   : > { %v16859_v62 = vmax.f32 %v16731_v25, 0.0  ;;  %v18086_v22 = vcombine.low %v8198_v45, %v8208_v32  ;;  %v8223_v35 = vrot.slane %v8222_v17, 4  ;;  %v16601_v6 = vmul.f32 %v20861_v49, %v28204_v0 }
 0x553   : > { %16989 = vst [vmem:[%s28273_s29 + $0x58] sm:$0xff] %v16861_v5  ;;  %v20863_v43 = vadd.f32 %v20734_v54, %v29179_v21  ;;  %v16599_v55 = vmul.f32 %v20862_v19, %v28204_v0  ;;  %v20864_v41 = vadd.f32 %v15992_v23, %v29180_v60  ;;  %v8218_v50 = vsel %vm22764_vm4, %v8213_v47, %v28324_v20  ;;  %v29184_v47 = vld [vmem:[#allocation31_spill] sm:$0xff] }
 0x554   : > { %16987 = vst [vmem:[%s28273_s29 + $0x48] sm:$0xff] %v16859_v62  ;;  %v15514_v29 = vsel %vm23271_vm7, %v15512_v46, %v15513_v51  ;;  %v16736_v45 = vadd.f32 %v28222_v1, %v16601_v6  ;;  %v15517_v33 = vsel %vm23271_vm7, %v15515_v28, %v15516_v57  ;;  %20323 = vmatprep.mubr.msk.bf16.mxu1 %vm1963_vm3, %v18086_v22  ;;  %v29181_v51 = vld [vmem:[#allocation17_spill] sm:$0xff] }
 0x555   : > { %v16602_v27 = vmul.f32 %v20863_v43, %v28204_v0  ;;  %v16734_v20 = vadd.f32 %v28222_v1, %v16599_v55  ;;  %v16600_v38 = vmul.f32 %v20864_v41, %v28204_v0  ;;  %v8228_v59 = vsel %vm22764_vm4, %v8223_v35, %v8227_v42  ;;  %v29185_v22 = vld [vmem:[#allocation33_spill] sm:$0xff]  ;;  %v29186_v43 = vld [vmem:[#allocation34_spill] sm:$0xff]  ;;  %v29187_v41 = vld [vmem:[#allocation35_spill] sm:$0xff] }
 0x556   : > { %v16864_v13 = vmax.f32 %v16736_v45, 0.0  ;;  %v18087_v17 = vcombine.low %v8218_v50, %v8228_v59  ;;  %v19019_v37 = vcombine.low %v15514_v29, %v15517_v33 }
 0x557   : > { %20840 = vmatmul.mubr.msk.bf16.gmra.mrb[120].mxu0 %vm1963_vm3, %v19017_v40  ;;  %v16737_v18 = vadd.f32 %v28222_v1, %v16602_v27  ;;  %v16862_v61 = vmax.f32 %v16734_v20, 0.0  ;;  %v16735_v9 = vadd.f32 %v28222_v1, %v16600_v38  ;;  %v20737_v40 = vpop.f32.mrb[16].mxu0  ;;  %v29188_v27 = vld [vmem:[#allocation36_spill] sm:$0xff] }
 0x558   : > { %20843 = vmatprep.mubr.msk.bf16.mxu0 %vm1963_vm3, %v19018_v12  ;;  %16992 = vst [vmem:[%s28273_s29 + $0x70] sm:$0xff] %v16864_v13  ;;  %v20865_v58 = vadd.f32 %v20737_v40, %v29181_v51  ;;  %v16005_v3 = vpop.f32.mrb[17].mxu0 }
 0x559   : > { %v16865_v26 = vmax.f32 %v16737_v18, 0.0  ;;  %16990 = vst [vmem:[%s28273_s29 + $0x60] sm:$0xff] %v16862_v61  ;;  %v16863_v34 = vmax.f32 %v16735_v9, 0.0  ;;  %v20866_v42 = vadd.f32 %v16005_v3, %v29182_v39  ;;  %v20738_v32 = vpop.f32.mrb[18].mxu0  ;;  %20324 = vmatmul.mubr.msk.bf16.gmra.mrb[124].mxu1 %vm1963_vm3, %v18087_v17 }
 0x55a   : > { %v16605_v46 = vmul.f32 %v20865_v58, %v28204_v0  ;;  %v20867_v25 = vadd.f32 %v20738_v32, %v29183_v16  ;;  %v16008_v15 = vpop.f32.mrb[19].mxu0 }
 0x55b   : > { %16993 = vst [vmem:[%s28273_s29 + $0x78] sm:$0xff] %v16865_v26  ;;  %16991 = vst [vmem:[%s28273_s29 + $0x68] sm:$0xff] %v16863_v34  ;;  %v16603_v12 = vmul.f32 %v20866_v42, %v28204_v0  ;;  %v20868_v5 = vadd.f32 %v16008_v15, %v29184_v47 }
 0x55c   : > { %v16740_v2 = vadd.f32 %v28222_v1, %v16605_v46  ;;  %v16606_v49 = vmul.f32 %v20867_v25, %v28204_v0 }
 0x55d   : > { %v16738_v14 = vadd.f32 %v28222_v1, %v16603_v12  ;;  %v16604_v28 = vmul.f32 %v20868_v5, %v28204_v0  ;;  %v20741_v19 = vpop.f32.mrb[20].mxu0 }
 0x55e   : > { %v16868_v36 = vmax.f32 %v16740_v2, 0.0  ;;  %v16741_v57 = vadd.f32 %v28222_v1, %v16606_v49  ;;  %v20869_v35 = vadd.f32 %v20741_v19, %v29185_v22  ;;  %v16021_v6 = vpop.f32.mrb[21].mxu0  ;;  %v29190_v19 = vld [vmem:[#allocation37_spill] sm:$0xff] }
 0x55f   : > { %20844 = vmatmul.mubr.msk.bf16.gmra.mrb[124].mxu0 %vm1963_vm3, %v19019_v37  ;;  %v16866_v62 = vmax.f32 %v16738_v14, 0.0  ;;  %v16739_v30 = vadd.f32 %v28222_v1, %v16604_v28  ;;  %v20870_v23 = vadd.f32 %v16021_v6, %v29186_v43  ;;  %v20742_v55 = vpop.f32.mrb[22].mxu0  ;;  %v29191_v6 = vld [vmem:[#allocation38_spill] sm:$0xff] }
 0x560   : > { %16996 = vst [vmem:[%s28273_s29 + $0x90] sm:$0xff] %v16868_v36  ;;  %v16869_v54 = vmax.f32 %v16741_v57, 0.0  ;;  %v16609_v60 = vmul.f32 %v20869_v35, %v28204_v0  ;;  %v20871_v50 = vadd.f32 %v20742_v55, %v29187_v41  ;;  %v16024_v29 = vpop.f32.mrb[23].mxu0  ;;  %v29189_v36 = vld [vmem:[#allocation21_spill] sm:$0xff] }
 0x561   : > { %16994 = vst [vmem:[%s28273_s29 + $0x80] sm:$0xff] %v16866_v62  ;;  %v16867_v21 = vmax.f32 %v16739_v30, 0.0  ;;  %v16607_v45 = vmul.f32 %v20870_v23, %v28204_v0  ;;  %v20872_v33 = vadd.f32 %v16024_v29, %v29188_v27 }
 0x562   : > { %16997 = vst [vmem:[%s28273_s29 + $0x98] sm:$0xff] %v16869_v54  ;;  %v16744_v20 = vadd.f32 %v28222_v1, %v16609_v60  ;;  %v16610_v38 = vmul.f32 %v20871_v50, %v28204_v0 }
 0x563   : > { %16995 = vst [vmem:[%s28273_s29 + $0x88] sm:$0xff] %v16867_v21  ;;  %v16742_v59 = vadd.f32 %v28222_v1, %v16607_v45  ;;  %v16608_v13 = vmul.f32 %v20872_v33, %v28204_v0  ;;  %v29192_v33 = vld [vmem:[#allocation39_spill] sm:$0xff] }
 0x564   : > { %v16872_v18 = vmax.f32 %v16744_v20, 0.0  ;;  %v16745_v61 = vadd.f32 %v28222_v1, %v16610_v38 }
 0x565   : > { %v16870_v9 = vmax.f32 %v16742_v59, 0.0  ;;  %v16743_v40 = vadd.f32 %v28222_v1, %v16608_v13  ;;  %v20745_v26 = vpop.f32.mrb[24].mxu0  ;;  %v29193_v13 = vld [vmem:[#allocation40_spill] sm:$0xff] }
 0x566   : > { %17000 = vst [vmem:[%s28273_s29 + $0xb0] sm:$0xff] %v16872_v18  ;;  %v16873_v51 = vmax.f32 %v16745_v61, 0.0  ;;  %v20873_v58 = vadd.f32 %v20745_v26, %v27578_v24  ;;  %v16037_v3 = vpop.f32.mrb[25].mxu0 }
 0x567   : > { %16998 = vst [vmem:[%s28273_s29 + $0xa0] sm:$0xff] %v16870_v9  ;;  %v16871_v17 = vmax.f32 %v16743_v40, 0.0  ;;  %v20874_v37 = vadd.f32 %v16037_v3, %v27580_v10  ;;  %v20746_v34 = vpop.f32.mrb[26].mxu0  ;;  %v29194_v40 = vld [vmem:[#allocation41_spill] sm:$0xff]  ;;  %v29195_v3 = vld [vmem:[#allocation42_spill] sm:$0xff] }
 0x568   : > { %17001 = vst [vmem:[%s28273_s29 + $0xb8] sm:$0xff] %v16873_v51  ;;  %v16613_v39 = vmul.f32 %v20873_v58, %v28204_v0  ;;  %v20875_v42 = vadd.f32 %v20746_v34, %v27583_v7  ;;  %v16040_v32 = vpop.f32.mrb[27].mxu0 }
 0x569   : > { %16999 = vst [vmem:[%s28273_s29 + $0xa8] sm:$0xff] %v16871_v17  ;;  %v16611_v46 = vmul.f32 %v20874_v37, %v28204_v0  ;;  %v20876_v16 = vadd.f32 %v16040_v32, %v27600_v4 }
 0x56a   : > { %v16748_v24 = vadd.f32 %v28222_v1, %v16613_v39  ;;  %v16614_v25 = vmul.f32 %v20875_v42, %v28204_v0 }
 0x56b   : > { %v16746_v10 = vadd.f32 %v28222_v1, %v16611_v46  ;;  %v16612_v15 = vmul.f32 %v20876_v16, %v28204_v0 }
 0x56c   : > { %v16876_v12 = vmax.f32 %v16748_v24, 0.0  ;;  %v16749_v47 = vadd.f32 %v28222_v1, %v16614_v25 }
 0x56d   : > { %v16874_v7 = vmax.f32 %v16746_v10, 0.0  ;;  %v16747_v5 = vadd.f32 %v28222_v1, %v16612_v15  ;;  %v20749_v2 = vpop.f32.mrb[28].mxu0  ;;  %v29196_v15 = vld [vmem:[#allocation24_spill] sm:$0xff] }
 0x56e   : > { %17004 = vst [vmem:[%s28273_s29 + $0xd0] sm:$0xff] %v16876_v12  ;;  %v16877_v49 = vmax.f32 %v16749_v47, 0.0  ;;  %v20877_v4 = vadd.f32 %v20749_v2, %v27649_v56  ;;  %v16053_v14 = vpop.f32.mrb[29].mxu0 }
 0x56f   : > { %17002 = vst [vmem:[%s28273_s29 + $0xc0] sm:$0xff] %v16874_v7  ;;  %v16875_v28 = vmax.f32 %v16747_v5, 0.0  ;;  %v20878_v57 = vadd.f32 %v16053_v14, %v29189_v36  ;;  %v20750_v62 = vpop.f32.mrb[30].mxu0  ;;  %v29197_v5 = vld [vmem:[#allocation43_spill] sm:$0xff]  ;;  %v29198_v14 = vld [vmem:[#allocation44_spill] sm:$0xff] }
 0x570   : > { %17005 = vst [vmem:[%s28273_s29 + $0xd8] sm:$0xff] %v16877_v49  ;;  %v16617_v30 = vmul.f32 %v20877_v4, %v28204_v0  ;;  %v20879_v54 = vadd.f32 %v20750_v62, %v29190_v19  ;;  %v16056_v22 = vpop.f32.mrb[31].mxu0  ;;  %v29199_v62 = vld [vmem:[#allocation45_spill] sm:$0xff] }
 0x571   : > { %17003 = vst [vmem:[%s28273_s29 + $0xc8] sm:$0xff] %v16875_v28  ;;  %v16615_v35 = vmul.f32 %v20878_v57, %v28204_v0  ;;  %v20880_v21 = vadd.f32 %v16056_v22, %v29191_v6 }
 0x572   : > { %v16752_v56 = vadd.f32 %v28222_v1, %v16617_v30  ;;  %v16618_v43 = vmul.f32 %v20879_v54, %v28204_v0 }
 0x573   : > { %v16750_v23 = vadd.f32 %v28222_v1, %v16615_v35  ;;  %v16616_v55 = vmul.f32 %v20880_v21, %v28204_v0 }
 0x574   : > { %v16880_v60 = vmax.f32 %v16752_v56, 0.0  ;;  %v16753_v41 = vadd.f32 %v28222_v1, %v16618_v43 }
 0x575   : > { %v16878_v50 = vmax.f32 %v16750_v23, 0.0  ;;  %v16751_v29 = vadd.f32 %v28222_v1, %v16616_v55  ;;  %v20753_v45 = vpop.f32.mrb[32].mxu0 }
 0x576   : > { %17008 = vst [vmem:[%s28273_s29 + $0xf0] sm:$0xff] %v16880_v60  ;;  %v16881_v27 = vmax.f32 %v16753_v41, 0.0  ;;  %v20881_v20 = vadd.f32 %v20753_v45, %v29192_v33  ;;  %v16069_v38 = vpop.f32.mrb[33].mxu0  ;;  %v29200_v60 = vld [vmem:[#allocation46_spill] sm:$0xff]  ;;  %v29201_v45 = vld [vmem:[#allocation47_spill] sm:$0xff] }
 0x577   : > { %17006 = vst [vmem:[%s28273_s29 + $0xe0] sm:$0xff] %v16878_v50  ;;  %v16879_v59 = vmax.f32 %v16751_v29, 0.0  ;;  %v20882_v18 = vadd.f32 %v16069_v38, %v29193_v13  ;;  %v20754_v61 = vpop.f32.mrb[34].mxu0  ;;  %v29202_v38 = vld [vmem:[#allocation48_spill] sm:$0xff] }
 0x578   : > { %17009 = vst [vmem:[%s28273_s29 + $0xf8] sm:$0xff] %v16881_v27  ;;  %v16621_v9 = vmul.f32 %v20881_v20, %v28204_v0  ;;  %v20883_v26 = vadd.f32 %v20754_v61, %v29194_v40  ;;  %v16072_v51 = vpop.f32.mrb[35].mxu0  ;;  %v29203_v61 = vld [vmem:[#allocation49_spill] sm:$0xff] }
 0x579   : > { %17007 = vst [vmem:[%s28273_s29 + $0xe8] sm:$0xff] %v16879_v59  ;;  %v16619_v58 = vmul.f32 %v20882_v18, %v28204_v0  ;;  %v20884_v17 = vadd.f32 %v16072_v51, %v29195_v3 }
 0x57a   : > { %v16756_v37 = vadd.f32 %v28222_v1, %v16621_v9  ;;  %v16622_v34 = vmul.f32 %v20883_v26, %v28204_v0 }
 0x57b   : > { %v16754_v39 = vadd.f32 %v28222_v1, %v16619_v58  ;;  %v16620_v42 = vmul.f32 %v20884_v17, %v28204_v0 }
 0x57c   : > { %v16884_v32 = vmax.f32 %v16756_v37, 0.0  ;;  %v16757_v46 = vadd.f32 %v28222_v1, %v16622_v34 }
 0x57d   : > { %v16882_v16 = vmax.f32 %v16754_v39, 0.0  ;;  %v16755_v24 = vadd.f32 %v28222_v1, %v16620_v42  ;;  %v20757_v25 = vpop.f32.mrb[36].mxu0 }
 0x57e   : > { %17012 = vst [vmem:[%s28273_s29 + $0x110] sm:$0xff] %v16884_v32  ;;  %v16885_v10 = vmax.f32 %v16757_v46, 0.0  ;;  %v20885_v12 = vadd.f32 %v20757_v25, %v29196_v15  ;;  %v16085_v47 = vpop.f32.mrb[37].mxu0  ;;  %v29204_v32 = vld [vmem:[#allocation19_spill] sm:$0xff]  ;;  %v29205_v25 = vld [vmem:[#allocation6_spill] sm:$0xff] }
 0x57f   : > { %17010 = vst [vmem:[%s28273_s29 + $0x100] sm:$0xff] %v16882_v16  ;;  %v16883_v7 = vmax.f32 %v16755_v24, 0.0  ;;  %v20886_v2 = vadd.f32 %v16085_v47, %v29197_v5  ;;  %v20758_v49 = vpop.f32.mrb[38].mxu0 }
 0x580   : > { %17013 = vst [vmem:[%s28273_s29 + $0x118] sm:$0xff] %v16885_v10  ;;  %v16625_v4 = vmul.f32 %v20885_v12, %v28204_v0  ;;  %v20887_v28 = vadd.f32 %v20758_v49, %v29198_v14  ;;  %v16088_v36 = vpop.f32.mrb[39].mxu0 }
 0x581   : > { %17011 = vst [vmem:[%s28273_s29 + $0x108] sm:$0xff] %v16883_v7  ;;  %v16623_v57 = vmul.f32 %v20886_v2, %v28204_v0  ;;  %v20888_v30 = vadd.f32 %v16088_v36, %v29199_v62 }
 0x582   : > { %v16760_v19 = vadd.f32 %v28222_v1, %v16625_v4  ;;  %v16626_v54 = vmul.f32 %v20887_v28, %v28204_v0 }
 0x583   : > { %v16758_v22 = vadd.f32 %v28222_v1, %v16623_v57  ;;  %v16624_v35 = vmul.f32 %v20888_v30, %v28204_v0 }
 0x584   : > { %v16888_v6 = vmax.f32 %v16760_v19, 0.0  ;;  %v16761_v21 = vadd.f32 %v28222_v1, %v16626_v54 }
 0x585   : > { %v16886_v56 = vmax.f32 %v16758_v22, 0.0  ;;  %v16759_v43 = vadd.f32 %v28222_v1, %v16624_v35  ;;  %v20761_v23 = vpop.f32.mrb[40].mxu0 }
 0x586   : > { %17016 = vst [vmem:[%s28273_s29 + $0x130] sm:$0xff] %v16888_v6  ;;  %v16889_v55 = vmax.f32 %v16761_v21, 0.0  ;;  %v20889_v41 = vadd.f32 %v20761_v23, %v29200_v60  ;;  %v16101_v50 = vpop.f32.mrb[41].mxu0  ;;  %v29207_v60 = vld [vmem:[#allocation20_spill] sm:$0xff] }
 0x587   : > { %17014 = vst [vmem:[%s28273_s29 + $0x120] sm:$0xff] %v16886_v56  ;;  %v16887_v29 = vmax.f32 %v16759_v43, 0.0  ;;  %v20890_v27 = vadd.f32 %v16101_v50, %v29201_v45  ;;  %v20762_v33 = vpop.f32.mrb[42].mxu0  ;;  %v29206_v56 = vld [vmem:[#allocation16_spill] sm:$0xff] }
 0x588   : > { %17017 = vst [vmem:[%s28273_s29 + $0x138] sm:$0xff] %v16889_v55  ;;  %v16629_v20 = vmul.f32 %v20889_v41, %v28204_v0  ;;  %v20891_v59 = vadd.f32 %v20762_v33, %v29202_v38  ;;  %v16104_v13 = vpop.f32.mrb[43].mxu0 }
 0x589   : > { %17015 = vst [vmem:[%s28273_s29 + $0x128] sm:$0xff] %v16887_v29  ;;  %v16627_v18 = vmul.f32 %v20890_v27, %v28204_v0  ;;  %v20892_v9 = vadd.f32 %v16104_v13, %v29203_v61  ;;  %v29208_v13 = vld [vmem:[#allocation30_spill] sm:$0xff] }
 0x58a   : > { %v16764_v40 = vadd.f32 %v28222_v1, %v16629_v20  ;;  %v16630_v26 = vmul.f32 %v20891_v59, %v28204_v0 }
 0x58b   : > { %v16762_v51 = vadd.f32 %v28222_v1, %v16627_v18  ;;  %v16628_v58 = vmul.f32 %v20892_v9, %v28204_v0 }
 0x58c   : > { %v16892_v3 = vmax.f32 %v16764_v40, 0.0  ;;  %v16765_v17 = vadd.f32 %v28222_v1, %v16630_v26  ;;  %v29209_v40 = vld [vmem:[#allocation32_spill] sm:$0xff] }
 0x58d   : > { %v16890_v37 = vmax.f32 %v16762_v51, 0.0  ;;  %v16763_v34 = vadd.f32 %v28222_v1, %v16628_v58  ;;  %v20765_v39 = vpop.f32.mrb[44].mxu0 }
 0x58e   : > { %17020 = vst [vmem:[%s28273_s29 + $0x150] sm:$0xff] %v16892_v3  ;;  %v16893_v42 = vmax.f32 %v16765_v17, 0.0  ;;  %v20893_v46 = vadd.f32 %v20765_v39, %v29204_v32  ;;  %v16117_v16 = vpop.f32.mrb[45].mxu0  ;;  %v29210_v3 = vld [vmem:[#allocation50_spill] sm:$0xff]  ;;  %v29211_v39 = vld [vmem:[#allocation51_spill] sm:$0xff] }
 0x58f   : > { %17018 = vst [vmem:[%s28273_s29 + $0x140] sm:$0xff] %v16890_v37  ;;  %v16891_v24 = vmax.f32 %v16763_v34, 0.0  ;;  %v20894_v10 = vadd.f32 %v16117_v16, %v29205_v25  ;;  %v20766_v15 = vpop.f32.mrb[46].mxu0 }
 0x590   : > { %17021 = vst [vmem:[%s28273_s29 + $0x158] sm:$0xff] %v16893_v42  ;;  %v16633_v12 = vmul.f32 %v20893_v46, %v28204_v0  ;;  %v20895_v47 = vadd.f32 %v20766_v15, %v27897_v53  ;;  %v16120_v7 = vpop.f32.mrb[47].mxu0 }
 0x591   : > { %17019 = vst [vmem:[%s28273_s29 + $0x148] sm:$0xff] %v16891_v24  ;;  %v16631_v5 = vmul.f32 %v20894_v10, %v28204_v0  ;;  %v20896_v2 = vadd.f32 %v16120_v7, %v27900_v31 }
 0x592   : > { %v16768_v49 = vadd.f32 %v28222_v1, %v16633_v12  ;;  %v16634_v4 = vmul.f32 %v20895_v47, %v28204_v0 }
 0x593   : > { %v16766_v14 = vadd.f32 %v28222_v1, %v16631_v5  ;;  %v16632_v28 = vmul.f32 %v20896_v2, %v28204_v0  ;;  %v29212_v5 = vld [vmem:[#allocation52_spill] sm:$0xff] }
 0x594   : > { %v16896_v36 = vmax.f32 %v16768_v49, 0.0  ;;  %v16769_v57 = vadd.f32 %v28222_v1, %v16634_v4 }
 0x595   : > { %v16894_v53 = vmax.f32 %v16766_v14, 0.0  ;;  %v16767_v62 = vadd.f32 %v28222_v1, %v16632_v28  ;;  %v20769_v30 = vpop.f32.mrb[48].mxu0  ;;  %v29213_v14 = vld [vmem:[#allocation53_spill] sm:$0xff] }
 0x596   : > { %17024 = vst [vmem:[%s28273_s29 + $0x170] sm:$0xff] %v16896_v36  ;;  %v16897_v19 = vmax.f32 %v16769_v57, 0.0  ;;  %v20897_v31 = vadd.f32 %v20769_v30, %v27942_v8  ;;  %v16133_v54 = vpop.f32.mrb[49].mxu0 }
 0x597   : > { %17022 = vst [vmem:[%s28273_s29 + $0x160] sm:$0xff] %v16894_v53  ;;  %v16895_v22 = vmax.f32 %v16767_v62, 0.0  ;;  %v20898_v35 = vadd.f32 %v16133_v54, %v27945_v63  ;;  %v20770_v6 = vpop.f32.mrb[50].mxu0  ;;  %v29214_v53 = vld [vmem:[#allocation54_spill] sm:$0xff] }
 0x598   : > { %17025 = vst [vmem:[%s28273_s29 + $0x178] sm:$0xff] %v16897_v19  ;;  %v16637_v21 = vmul.f32 %v20897_v31, %v28204_v0  ;;  %v20899_v43 = vadd.f32 %v20770_v6, %v29206_v56  ;;  %v16136_v23 = vpop.f32.mrb[51].mxu0  ;;  %v29215_v31 = vld [vmem:[#allocation55_spill] sm:$0xff] }
 0x599   : > { %17023 = vst [vmem:[%s28273_s29 + $0x168] sm:$0xff] %v16895_v22  ;;  %v16635_v55 = vmul.f32 %v20898_v35, %v28204_v0  ;;  %v20900_v41 = vadd.f32 %v16136_v23, %v29207_v60 }
 0x59a   : > { %v16772_v8 = vadd.f32 %v28222_v1, %v16637_v21  ;;  %v16638_v50 = vmul.f32 %v20899_v43, %v28204_v0 }
 0x59b   : > { %v16770_v63 = vadd.f32 %v28222_v1, %v16635_v55  ;;  %v16636_v29 = vmul.f32 %v20900_v41, %v28204_v0 }
 0x59c   : > { %v16900_v45 = vmax.f32 %v16772_v8, 0.0  ;;  %v16773_v27 = vadd.f32 %v28222_v1, %v16638_v50 }
 0x59d   : > { %v16898_v33 = vmax.f32 %v16770_v63, 0.0  ;;  %v16771_v20 = vadd.f32 %v28222_v1, %v16636_v29  ;;  %v20773_v38 = vpop.f32.mrb[52].mxu0 }
 0x59e   : > { %17028 = vst [vmem:[%s28273_s29 + $0x190] sm:$0xff] %v16900_v45  ;;  %v16901_v59 = vmax.f32 %v16773_v27, 0.0  ;;  %v20901_v18 = vadd.f32 %v20773_v38, %v29208_v13  ;;  %v16149_v61 = vpop.f32.mrb[53].mxu0 }
 0x59f   : > { %17026 = vst [vmem:[%s28273_s29 + $0x180] sm:$0xff] %v16898_v33  ;;  %v16899_v9 = vmax.f32 %v16771_v20, 0.0  ;;  %v20902_v26 = vadd.f32 %v16149_v61, %v29209_v40  ;;  %v20774_v51 = vpop.f32.mrb[54].mxu0 }
 0x5a0   : > { %17029 = vst [vmem:[%s28273_s29 + $0x198] sm:$0xff] %v16901_v59  ;;  %v16641_v58 = vmul.f32 %v20901_v18, %v28204_v0  ;;  %v20903_v17 = vadd.f32 %v20774_v51, %v29210_v3  ;;  %v16152_v37 = vpop.f32.mrb[55].mxu0 }
 0x5a1   : > { %17027 = vst [vmem:[%s28273_s29 + $0x188] sm:$0xff] %v16899_v9  ;;  %v16639_v34 = vmul.f32 %v20902_v26, %v28204_v0  ;;  %v20904_v42 = vadd.f32 %v16152_v37, %v29211_v39 }
 0x5a2   : > { %v16776_v32 = vadd.f32 %v28222_v1, %v16641_v58  ;;  %v16642_v46 = vmul.f32 %v20903_v17, %v28204_v0 }
 0x5a3   : > { %v16774_v16 = vadd.f32 %v28222_v1, %v16639_v34  ;;  %v16640_v24 = vmul.f32 %v20904_v42, %v28204_v0 }
 0x5a4   : > { %v16904_v25 = vmax.f32 %v16776_v32, 0.0  ;;  %v16777_v10 = vadd.f32 %v28222_v1, %v16642_v46 }
 0x5a5   : > { %v16902_v15 = vmax.f32 %v16774_v16, 0.0  ;;  %v16775_v12 = vadd.f32 %v28222_v1, %v16640_v24  ;;  %v20777_v47 = vpop.f32.mrb[56].mxu0 }
 0x5a6   : > { %17032 = vst [vmem:[%s28273_s29 + $0x1b0] sm:$0xff] %v16904_v25  ;;  %v16905_v7 = vmax.f32 %v16777_v10, 0.0  ;;  %v20905_v2 = vadd.f32 %v20777_v47, %v29212_v5  ;;  %v16165_v49 = vpop.f32.mrb[57].mxu0 }
 0x5a7   : > { %17030 = vst [vmem:[%s28273_s29 + $0x1a0] sm:$0xff] %v16902_v15  ;;  %v16903_v4 = vmax.f32 %v16775_v12, 0.0  ;;  %v20906_v28 = vadd.f32 %v16165_v49, %v29213_v14  ;;  %v20778_v36 = vpop.f32.mrb[58].mxu0 }
 0x5a8   : > { %17033 = vst [vmem:[%s28273_s29 + $0x1b8] sm:$0xff] %v16905_v7  ;;  %v16645_v57 = vmul.f32 %v20905_v2, %v28204_v0  ;;  %v20907_v62 = vadd.f32 %v20778_v36, %v29214_v53  ;;  %v16168_v30 = vpop.f32.mrb[59].mxu0 }
 0x5a9   : > { %17031 = vst [vmem:[%s28273_s29 + $0x1a8] sm:$0xff] %v16903_v4  ;;  %v16643_v19 = vmul.f32 %v20906_v28, %v28204_v0  ;;  %v20908_v54 = vadd.f32 %v16168_v30, %v29215_v31 }
 0x5aa   : > { %v16780_v22 = vadd.f32 %v28222_v1, %v16645_v57  ;;  %v16646_v35 = vmul.f32 %v20907_v62, %v28204_v0 }
 0x5ab   : > { %v16778_v6 = vadd.f32 %v28222_v1, %v16643_v19  ;;  %v16644_v21 = vmul.f32 %v20908_v54, %v28204_v0 }
 0x5ac   : > { %v16908_v56 = vmax.f32 %v16780_v22, 0.0  ;;  %v16781_v43 = vadd.f32 %v28222_v1, %v16646_v35 }
 0x5ad   : > { %v16906_v23 = vmax.f32 %v16778_v6, 0.0  ;;  %v16779_v55 = vadd.f32 %v28222_v1, %v16644_v21 }
 0x5ae   : > { %v20781_v60 = vpop.f32.mrb[60].mxu0  ;;  %17036 = vst [vmem:[%s28273_s29 + $0x1d0] sm:$0xff] %v16908_v56  ;;  %v16909_v41 = vmax.f32 %v16781_v43, 0.0 }
 0x5af   : > { %v20909_v8 = vadd.f32 %v20781_v60, %v28107_v44  ;;  %v16181_v50 = vpop.f32.mrb[61].mxu0  ;;  %17034 = vst [vmem:[%s28273_s29 + $0x1c0] sm:$0xff] %v16906_v23  ;;  %v16907_v63 = vmax.f32 %v16779_v55, 0.0  ;;  %v28613_v55 = vld [vmem:[%s28851_s2] ss:$0 sm:$0xff] }
 0x5b0   : > { %v20910_v29 = vadd.f32 %v16181_v50, %v28121_v11  ;;  %v20782_v45 = vpop.f32.mrb[62].mxu0  ;;  %17037 = vst [vmem:[%s28273_s29 + $0x1d8] sm:$0xff] %v16909_v41 }
 0x5b1   : > { %v16649_v27 = vmul.f32 %v20909_v8, %v28204_v0  ;;  %v20911_v33 = vadd.f32 %v20782_v45, %v28131_v48  ;;  %v16184_v20 = vpop.f32.mrb[63].mxu0  ;;  %17035 = vst [vmem:[%s28273_s29 + $0x1c8] sm:$0xff] %v16907_v63 }
 0x5b2   : > { %v16647_v38 = vmul.f32 %v20910_v29, %v28204_v0  ;;  %v20912_v59 = vadd.f32 %v16184_v20, %v28144_v52 }
 0x5b3   : > { %v16784_v44 = vadd.f32 %v28222_v1, %v16649_v27  ;;  %v16650_v13 = vmul.f32 %v20911_v33, %v28204_v0 }
 0x5b4   : > { %v16782_v11 = vadd.f32 %v28222_v1, %v16647_v38  ;;  %v16648_v18 = vmul.f32 %v20912_v59, %v28204_v0  ;;  %v20265_v26 = vpop.f32.mrb[64].mxu1 }
 0x5b5   : > { %v16912_v61 = vmax.f32 %v16784_v44, 0.0  ;;  %v16785_v9 = vadd.f32 %v28222_v1, %v16650_v13  ;;  %v8908_v3 = vpop.f32.mrb[65].mxu1 }
 0x5b6   : > { %v16910_v48 = vmax.f32 %v16782_v11, 0.0  ;;  %v16783_v40 = vadd.f32 %v28222_v1, %v16648_v18  ;;  %v20785_v51 = vpop.f32.mrb[64].mxu0  ;;  %v20266_v39 = vpop.f32.mrb[66].mxu1 }
 0x5b7   : > { %17040 = vst [vmem:[%s28273_s29 + $0x1f0] sm:$0xff] %v16912_v61  ;;  %v16913_v52 = vmax.f32 %v16785_v9, 0.0  ;;  %v20913_v58 = vadd.f32 %v20785_v51, %v20265_v26  ;;  %v16197_v17 = vpop.f32.mrb[65].mxu0  ;;  %v8911_v16 = vpop.f32.mrb[67].mxu1  ;;  %v28629_v51 = vld [vmem:[%s28852_s3] ss:$0 sm:$0xff] }
 0x5b8   : > { %17038 = vst [vmem:[%s28273_s29 + $0x1e0] sm:$0xff] %v16910_v48  ;;  %v16911_v37 = vmax.f32 %v16783_v40, 0.0  ;;  %v20914_v34 = vadd.f32 %v16197_v17, %v8908_v3  ;;  %v20786_v42 = vpop.f32.mrb[66].mxu0 }
 0x5b9   : > { %17041 = vst [vmem:[%s28273_s29 + $0x1f8] sm:$0xff] %v16913_v52  ;;  %v16653_v32 = vmul.f32 %v20913_v58, %v28204_v0  ;;  %v20915_v46 = vadd.f32 %v20786_v42, %v20266_v39  ;;  %v16200_v24 = vpop.f32.mrb[67].mxu0 }
 0x5ba   : > { %17039 = vst [vmem:[%s28273_s29 + $0x1e8] sm:$0xff] %v16911_v37  ;;  %v16651_v25 = vmul.f32 %v20914_v34, %v28204_v0  ;;  %v20916_v10 = vadd.f32 %v16200_v24, %v8911_v16 }
 0x5bb   : > { %v16788_v15 = vadd.f32 %v28222_v1, %v16653_v32  ;;  %v16654_v12 = vmul.f32 %v20915_v46, %v28204_v0 }
 0x5bc   : > { %v16786_v47 = vadd.f32 %v28222_v1, %v16651_v25  ;;  %v16652_v7 = vmul.f32 %v20916_v10, %v28204_v0  ;;  %v20269_v14 = vpop.f32.mrb[68].mxu1 }
 0x5bd   : > { %v16916_v5 = vmax.f32 %v16788_v15, 0.0  ;;  %v16789_v2 = vadd.f32 %v28222_v1, %v16654_v12  ;;  %v8924_v53 = vpop.f32.mrb[69].mxu1 }
 0x5be   : > { %v16914_v49 = vmax.f32 %v16786_v47, 0.0  ;;  %v16787_v4 = vadd.f32 %v28222_v1, %v16652_v7  ;;  %v20789_v28 = vpop.f32.mrb[68].mxu0  ;;  %v20270_v31 = vpop.f32.mrb[70].mxu1 }
 0x5bf   : > { %17044 = vst [vmem:[%s28273_s29 + $0x210] sm:$0xff] %v16916_v5  ;;  %v16917_v36 = vmax.f32 %v16789_v2, 0.0  ;;  %v20917_v57 = vadd.f32 %v20789_v28, %v20269_v14  ;;  %v16213_v62 = vpop.f32.mrb[69].mxu0  ;;  %v8927_v6 = vpop.f32.mrb[71].mxu1 }
 0x5c0   : > { %17042 = vst [vmem:[%s28273_s29 + $0x200] sm:$0xff] %v16914_v49  ;;  %v16915_v30 = vmax.f32 %v16787_v4, 0.0  ;;  %v20918_v19 = vadd.f32 %v16213_v62, %v8924_v53  ;;  %v20790_v54 = vpop.f32.mrb[70].mxu0 }
 0x5c1   : > { %17045 = vst [vmem:[%s28273_s29 + $0x218] sm:$0xff] %v16917_v36  ;;  %v16657_v22 = vmul.f32 %v20917_v57, %v28204_v0  ;;  %v20919_v35 = vadd.f32 %v20790_v54, %v20270_v31  ;;  %v16216_v21 = vpop.f32.mrb[71].mxu0 }
 0x5c2   : > { %17043 = vst [vmem:[%s28273_s29 + $0x208] sm:$0xff] %v16915_v30  ;;  %v16655_v56 = vmul.f32 %v20918_v19, %v28204_v0  ;;  %v20920_v43 = vadd.f32 %v16216_v21, %v8927_v6 }
 0x5c3   : > { %v16792_v23 = vadd.f32 %v28222_v1, %v16657_v22  ;;  %v16658_v60 = vmul.f32 %v28613_v55, %v20919_v35 }
 0x5c4   : > { %v16790_v41 = vadd.f32 %v28222_v1, %v16655_v56  ;;  %v16656_v8 = vmul.f32 %v28613_v55, %v20920_v43  ;;  %v20273_v45 = vpop.f32.mrb[72].mxu1 }
 0x5c5   : > { %v16920_v50 = vmax.f32 %v16792_v23, 0.0  ;;  %v16793_v63 = vadd.f32 %v28222_v1, %v16658_v60  ;;  %v8940_v38 = vpop.f32.mrb[73].mxu1 }
 0x5c6   : > { %v16918_v0 = vmax.f32 %v16790_v41, 0.0  ;;  %v16791_v29 = vadd.f32 %v28222_v1, %v16656_v8  ;;  %v20793_v27 = vpop.f32.mrb[72].mxu0  ;;  %v20274_v11 = vpop.f32.mrb[74].mxu1 }
 0x5c7   : > { %17048 = vst [vmem:[%s28273_s29 + $0x230] sm:$0xff] %v16920_v50  ;;  %v16921_v33 = vmax.f32 %v16793_v63, 0.0  ;;  %v20921_v20 = vadd.f32 %v20793_v27, %v20273_v45  ;;  %v16229_v59 = vpop.f32.mrb[73].mxu0  ;;  %v8943_v48 = vpop.f32.mrb[75].mxu1 }
 0x5c8   : > { %17046 = vst [vmem:[%s28273_s29 + $0x220] sm:$0xff] %v16918_v0  ;;  %v16919_v44 = vmax.f32 %v16791_v29, 0.0  ;;  %v20922_v13 = vadd.f32 %v16229_v59, %v8940_v38  ;;  %v20794_v18 = vpop.f32.mrb[74].mxu0 }
 0x5c9   : > { %17049 = vst [vmem:[%s28273_s29 + $0x238] sm:$0xff] %v16921_v33  ;;  %v16661_v61 = vmul.f32 %v28613_v55, %v20921_v20  ;;  %v20923_v9 = vadd.f32 %v20794_v18, %v20274_v11  ;;  %v16232_v1 = vpop.f32.mrb[75].mxu0 }
 0x5ca   : > { %17047 = vst [vmem:[%s28273_s29 + $0x228] sm:$0xff] %v16919_v44  ;;  %v16659_v40 = vmul.f32 %v28613_v55, %v20922_v13  ;;  %v20924_v26 = vadd.f32 %v16232_v1, %v8943_v48 }
 0x5cb   : > { %v16796_v52 = vadd.f32 %v28629_v51, %v16661_v61  ;;  %v16662_v58 = vmul.f32 %v28613_v55, %v20923_v9 }
 0x5cc   : > { %v16794_v3 = vadd.f32 %v28629_v51, %v16659_v40  ;;  %v16660_v17 = vmul.f32 %v28613_v55, %v20924_v26  ;;  %v20277_v32 = vpop.f32.mrb[76].mxu1 }
 0x5cd   : > { %v16924_v37 = vmax.f32 %v16796_v52, 0.0  ;;  %v16797_v34 = vadd.f32 %v28629_v51, %v16662_v58  ;;  %v8956_v25 = vpop.f32.mrb[77].mxu1 }
 0x5ce   : > { %v16922_v39 = vmax.f32 %v16794_v3, 0.0  ;;  %v16795_v42 = vadd.f32 %v28629_v51, %v16660_v17  ;;  %v20797_v46 = vpop.f32.mrb[76].mxu0  ;;  %v20278_v47 = vpop.f32.mrb[78].mxu1 }
 0x5cf   : > { %17052 = vst [vmem:[%s28273_s29 + $0x250] sm:$0xff] %v16924_v37  ;;  %v16925_v16 = vmax.f32 %v16797_v34, 0.0  ;;  %v20925_v24 = vadd.f32 %v20797_v46, %v20277_v32  ;;  %v16245_v10 = vpop.f32.mrb[77].mxu0  ;;  %v8959_v49 = vpop.f32.mrb[79].mxu1 }
 0x5d0   : > { %17050 = vst [vmem:[%s28273_s29 + $0x240] sm:$0xff] %v16922_v39  ;;  %v16923_v15 = vmax.f32 %v16795_v42, 0.0  ;;  %v20926_v12 = vadd.f32 %v16245_v10, %v8956_v25  ;;  %v20798_v7 = vpop.f32.mrb[78].mxu0 }
 0x5d1   : > { %17053 = vst [vmem:[%s28273_s29 + $0x258] sm:$0xff] %v16925_v16  ;;  %v16665_v5 = vmul.f32 %v28613_v55, %v20925_v24  ;;  %v20927_v2 = vadd.f32 %v20798_v7, %v20278_v47  ;;  %v16248_v4 = vpop.f32.mrb[79].mxu0 }
 0x5d2   : > { %17051 = vst [vmem:[%s28273_s29 + $0x248] sm:$0xff] %v16923_v15  ;;  %v16663_v14 = vmul.f32 %v28613_v55, %v20926_v12  ;;  %v20928_v28 = vadd.f32 %v16248_v4, %v8959_v49 }
 0x5d3   : > { %v16800_v36 = vadd.f32 %v28629_v51, %v16665_v5  ;;  %v16666_v57 = vmul.f32 %v28613_v55, %v20927_v2 }
 0x5d4   : > { %v16798_v53 = vadd.f32 %v28629_v51, %v16663_v14  ;;  %v16664_v62 = vmul.f32 %v28613_v55, %v20928_v28  ;;  %v20281_v22 = vpop.f32.mrb[80].mxu1 }
 0x5d5   : > { %v16928_v30 = vmax.f32 %v16800_v36, 0.0  ;;  %v16801_v19 = vadd.f32 %v28629_v51, %v16666_v57  ;;  %v8972_v56 = vpop.f32.mrb[81].mxu1 }
 0x5d6   : > { %v16926_v31 = vmax.f32 %v16798_v53, 0.0  ;;  %v16799_v54 = vadd.f32 %v28629_v51, %v16664_v62  ;;  %v20282_v41 = vpop.f32.mrb[82].mxu1 }
 0x5d7   : > { %v20801_v35 = vpop.f32.mrb[80].mxu0  ;;  %17056 = vst [vmem:[%s28273_s29 + $0x270] sm:$0xff] %v16928_v30  ;;  %v16929_v6 = vmax.f32 %v16801_v19, 0.0  ;;  %v8975_v0 = vpop.f32.mrb[83].mxu1 }
 0x5d8   : > { %v20929_v21 = vadd.f32 %v20801_v35, %v20281_v22  ;;  %v16261_v43 = vpop.f32.mrb[81].mxu0  ;;  %17054 = vst [vmem:[%s28273_s29 + $0x260] sm:$0xff] %v16926_v31  ;;  %v16927_v23 = vmax.f32 %v16799_v54, 0.0 }
 0x5d9   : > { %v20930_v60 = vadd.f32 %v16261_v43, %v8972_v56  ;;  %v20802_v8 = vpop.f32.mrb[82].mxu0  ;;  %17057 = vst [vmem:[%s28273_s29 + $0x278] sm:$0xff] %v16929_v6 }
 0x5da   : > { %v16669_v50 = vmul.f32 %v28613_v55, %v20929_v21  ;;  %v20931_v63 = vadd.f32 %v20802_v8, %v20282_v41  ;;  %v16264_v29 = vpop.f32.mrb[83].mxu0  ;;  %17055 = vst [vmem:[%s28273_s29 + $0x268] sm:$0xff] %v16927_v23 }
 0x5db   : > { %v16667_v45 = vmul.f32 %v28613_v55, %v20930_v60  ;;  %v20932_v27 = vadd.f32 %v16264_v29, %v8975_v0 }
 0x5dc   : > { %v16804_v33 = vadd.f32 %v28629_v51, %v16669_v50  ;;  %v16670_v20 = vmul.f32 %v28613_v55, %v20931_v63  ;;  %v20285_v61 = vpop.f32.mrb[84].mxu1 }
 0x5dd   : > { %v16802_v38 = vadd.f32 %v28629_v51, %v16667_v45  ;;  %v16668_v59 = vmul.f32 %v28613_v55, %v20932_v27  ;;  %v8988_v40 = vpop.f32.mrb[85].mxu1 }
 0x5de   : > { %v16932_v44 = vmax.f32 %v16804_v33, 0.0  ;;  %v16805_v13 = vadd.f32 %v28629_v51, %v16670_v20  ;;  %v20286_v3 = vpop.f32.mrb[86].mxu1 }
 0x5df   : > { %v16930_v11 = vmax.f32 %v16802_v38, 0.0  ;;  %v16803_v18 = vadd.f32 %v28629_v51, %v16668_v59  ;;  %v20805_v9 = vpop.f32.mrb[84].mxu0  ;;  %v8991_v39 = vpop.f32.mrb[87].mxu1 }
 0x5e0   : > { %17060 = vst [vmem:[%s28273_s29 + $0x290] sm:$0xff] %v16932_v44  ;;  %v16933_v48 = vmax.f32 %v16805_v13, 0.0  ;;  %v20933_v1 = vadd.f32 %v20805_v9, %v20285_v61  ;;  %v16277_v26 = vpop.f32.mrb[85].mxu0 }
 0x5e1   : > { %17058 = vst [vmem:[%s28273_s29 + $0x280] sm:$0xff] %v16930_v11  ;;  %v16931_v52 = vmax.f32 %v16803_v18, 0.0  ;;  %v20934_v58 = vadd.f32 %v16277_v26, %v8988_v40  ;;  %v20806_v17 = vpop.f32.mrb[86].mxu0 }
 0x5e2   : > { %17061 = vst [vmem:[%s28273_s29 + $0x298] sm:$0xff] %v16933_v48  ;;  %v16673_v37 = vmul.f32 %v28613_v55, %v20933_v1  ;;  %v20935_v34 = vadd.f32 %v20806_v17, %v20286_v3  ;;  %v16280_v42 = vpop.f32.mrb[87].mxu0 }
 0x5e3   : > { %17059 = vst [vmem:[%s28273_s29 + $0x288] sm:$0xff] %v16931_v52  ;;  %v16671_v32 = vmul.f32 %v28613_v55, %v20934_v58  ;;  %v20936_v46 = vadd.f32 %v16280_v42, %v8991_v39 }
 0x5e4   : > { %v16808_v16 = vadd.f32 %v28629_v51, %v16673_v37  ;;  %v16674_v24 = vmul.f32 %v28613_v55, %v20935_v34  ;;  %v20289_v5 = vpop.f32.mrb[88].mxu1 }
 0x5e5   : > { %v16806_v25 = vadd.f32 %v28629_v51, %v16671_v32  ;;  %v16672_v10 = vmul.f32 %v28613_v55, %v20936_v46  ;;  %v9004_v14 = vpop.f32.mrb[89].mxu1 }
 0x5e6   : > { %v16936_v15 = vmax.f32 %v16808_v16, 0.0  ;;  %v16809_v12 = vadd.f32 %v28629_v51, %v16674_v24  ;;  %v20290_v53 = vpop.f32.mrb[90].mxu1 }
 0x5e7   : > { %v16934_v47 = vmax.f32 %v16806_v25, 0.0  ;;  %v16807_v7 = vadd.f32 %v28629_v51, %v16672_v10  ;;  %v20809_v2 = vpop.f32.mrb[88].mxu0  ;;  %v9007_v31 = vpop.f32.mrb[91].mxu1 }
 0x5e8   : > { %17064 = vst [vmem:[%s28273_s29 + $0x2b0] sm:$0xff] %v16936_v15  ;;  %v16937_v49 = vmax.f32 %v16809_v12, 0.0  ;;  %v20937_v4 = vadd.f32 %v20809_v2, %v20289_v5  ;;  %v16293_v28 = vpop.f32.mrb[89].mxu0 }
 0x5e9   : > { %17062 = vst [vmem:[%s28273_s29 + $0x2a0] sm:$0xff] %v16934_v47  ;;  %v16935_v36 = vmax.f32 %v16807_v7, 0.0  ;;  %v20938_v57 = vadd.f32 %v16293_v28, %v9004_v14  ;;  %v20810_v62 = vpop.f32.mrb[90].mxu0 }
 0x5ea   : > { %17065 = vst [vmem:[%s28273_s29 + $0x2b8] sm:$0xff] %v16937_v49  ;;  %v16677_v30 = vmul.f32 %v28613_v55, %v20937_v4  ;;  %v20939_v19 = vadd.f32 %v20810_v62, %v20290_v53  ;;  %v16296_v54 = vpop.f32.mrb[91].mxu0 }
 0x5eb   : > { %17063 = vst [vmem:[%s28273_s29 + $0x2a8] sm:$0xff] %v16935_v36  ;;  %v16675_v22 = vmul.f32 %v28613_v55, %v20938_v57  ;;  %v20940_v35 = vadd.f32 %v16296_v54, %v9007_v31 }
 0x5ec   : > { %v16812_v6 = vadd.f32 %v28629_v51, %v16677_v30  ;;  %v16678_v21 = vmul.f32 %v28613_v55, %v20939_v19  ;;  %v20293_v50 = vpop.f32.mrb[92].mxu1 }
 0x5ed   : > { %v16810_v56 = vadd.f32 %v28629_v51, %v16675_v22  ;;  %v16676_v43 = vmul.f32 %v28613_v55, %v20940_v35  ;;  %v9020_v45 = vpop.f32.mrb[93].mxu1 }
 0x5ee   : > { %v16940_v23 = vmax.f32 %v16812_v6, 0.0  ;;  %v16813_v60 = vadd.f32 %v28629_v51, %v16678_v21  ;;  %v20294_v38 = vpop.f32.mrb[94].mxu1 }
 0x5ef   : > { %v16938_v41 = vmax.f32 %v16810_v56, 0.0  ;;  %v16811_v8 = vadd.f32 %v28629_v51, %v16676_v43  ;;  %v20813_v63 = vpop.f32.mrb[92].mxu0  ;;  %v9023_v11 = vpop.f32.mrb[95].mxu1 }
 0x5f0   : > { %17068 = vst [vmem:[%s28273_s29 + $0x2d0] sm:$0xff] %v16940_v23  ;;  %v16941_v0 = vmax.f32 %v16813_v60, 0.0  ;;  %v20941_v29 = vadd.f32 %v20813_v63, %v20293_v50  ;;  %v16309_v27 = vpop.f32.mrb[93].mxu0 }
 0x5f1   : > { %17066 = vst [vmem:[%s28273_s29 + $0x2c0] sm:$0xff] %v16938_v41  ;;  %v16939_v33 = vmax.f32 %v16811_v8, 0.0  ;;  %v20942_v20 = vadd.f32 %v16309_v27, %v9020_v45  ;;  %v20814_v59 = vpop.f32.mrb[94].mxu0 }
 0x5f2   : > { %17069 = vst [vmem:[%s28273_s29 + $0x2d8] sm:$0xff] %v16941_v0  ;;  %v16681_v44 = vmul.f32 %v28613_v55, %v20941_v29  ;;  %v20943_v13 = vadd.f32 %v20814_v59, %v20294_v38  ;;  %v16312_v18 = vpop.f32.mrb[95].mxu0 }
 0x5f3   : > { %17067 = vst [vmem:[%s28273_s29 + $0x2c8] sm:$0xff] %v16939_v33  ;;  %v16679_v61 = vmul.f32 %v28613_v55, %v20942_v20  ;;  %v20944_v9 = vadd.f32 %v16312_v18, %v9023_v11 }
 0x5f4   : > { %v16816_v48 = vadd.f32 %v28629_v51, %v16681_v44  ;;  %v16682_v1 = vmul.f32 %v28613_v55, %v20943_v13  ;;  %v20297_v37 = vpop.f32.mrb[96].mxu1 }
 0x5f5   : > { %v16814_v40 = vadd.f32 %v28629_v51, %v16679_v61  ;;  %v16680_v26 = vmul.f32 %v28613_v55, %v20944_v9  ;;  %v9036_v32 = vpop.f32.mrb[97].mxu1 }
 0x5f6   : > { %v16944_v52 = vmax.f32 %v16816_v48, 0.0  ;;  %v16817_v58 = vadd.f32 %v28629_v51, %v16682_v1  ;;  %v20298_v25 = vpop.f32.mrb[98].mxu1 }
 0x5f7   : > { %v16942_v3 = vmax.f32 %v16814_v40, 0.0  ;;  %v16815_v17 = vadd.f32 %v28629_v51, %v16680_v26  ;;  %v20817_v34 = vpop.f32.mrb[96].mxu0  ;;  %v9039_v47 = vpop.f32.mrb[99].mxu1 }
 0x5f8   : > { %17072 = vst [vmem:[%s28273_s29 + $0x2f0] sm:$0xff] %v16944_v52  ;;  %v16945_v39 = vmax.f32 %v16817_v58, 0.0  ;;  %v20945_v42 = vadd.f32 %v20817_v34, %v20297_v37  ;;  %v16325_v46 = vpop.f32.mrb[97].mxu0 }
 0x5f9   : > { %17070 = vst [vmem:[%s28273_s29 + $0x2e0] sm:$0xff] %v16942_v3  ;;  %v16943_v16 = vmax.f32 %v16815_v17, 0.0  ;;  %v20946_v24 = vadd.f32 %v16325_v46, %v9036_v32  ;;  %v20818_v10 = vpop.f32.mrb[98].mxu0 }
 0x5fa   : > { %17073 = vst [vmem:[%s28273_s29 + $0x2f8] sm:$0xff] %v16945_v39  ;;  %v16685_v15 = vmul.f32 %v28613_v55, %v20945_v42  ;;  %v20947_v12 = vadd.f32 %v20818_v10, %v20298_v25  ;;  %v16328_v7 = vpop.f32.mrb[99].mxu0 }
 0x5fb   : > { %17071 = vst [vmem:[%s28273_s29 + $0x2e8] sm:$0xff] %v16943_v16  ;;  %v16683_v5 = vmul.f32 %v28613_v55, %v20946_v24  ;;  %v20948_v2 = vadd.f32 %v16328_v7, %v9039_v47 }
 0x5fc   : > { %v16820_v49 = vadd.f32 %v28629_v51, %v16685_v15  ;;  %v16686_v4 = vmul.f32 %v28613_v55, %v20947_v12  ;;  %v20301_v30 = vpop.f32.mrb[100].mxu1 }
 0x5fd   : > { %v16818_v14 = vadd.f32 %v28629_v51, %v16683_v5  ;;  %v16684_v28 = vmul.f32 %v28613_v55, %v20948_v2  ;;  %v9052_v22 = vpop.f32.mrb[101].mxu1 }
 0x5fe   : > { %v16948_v36 = vmax.f32 %v16820_v49, 0.0  ;;  %v16821_v57 = vadd.f32 %v28629_v51, %v16686_v4  ;;  %v20302_v56 = vpop.f32.mrb[102].mxu1 }
 0x5ff   : > { %v16946_v53 = vmax.f32 %v16818_v14, 0.0  ;;  %v16819_v62 = vadd.f32 %v28629_v51, %v16684_v28  ;;  %v20821_v19 = vpop.f32.mrb[100].mxu0  ;;  %v9055_v41 = vpop.f32.mrb[103].mxu1 }
 0x600   : > { %17076 = vst [vmem:[%s28273_s29 + $0x310] sm:$0xff] %v16948_v36  ;;  %v16949_v31 = vmax.f32 %v16821_v57, 0.0  ;;  %v20949_v54 = vadd.f32 %v20821_v19, %v20301_v30  ;;  %v16341_v35 = vpop.f32.mrb[101].mxu0 }
 0x601   : > { %17074 = vst [vmem:[%s28273_s29 + $0x300] sm:$0xff] %v16946_v53  ;;  %v16947_v6 = vmax.f32 %v16819_v62, 0.0  ;;  %v20950_v21 = vadd.f32 %v16341_v35, %v9052_v22  ;;  %v20822_v43 = vpop.f32.mrb[102].mxu0 }
 0x602   : > { %17077 = vst [vmem:[%s28273_s29 + $0x318] sm:$0xff] %v16949_v31  ;;  %v16689_v23 = vmul.f32 %v28613_v55, %v20949_v54  ;;  %v20951_v60 = vadd.f32 %v20822_v43, %v20302_v56  ;;  %v16344_v8 = vpop.f32.mrb[103].mxu0 }
 0x603   : > { %17075 = vst [vmem:[%s28273_s29 + $0x308] sm:$0xff] %v16947_v6  ;;  %v16687_v50 = vmul.f32 %v28613_v55, %v20950_v21  ;;  %v20952_v63 = vadd.f32 %v16344_v8, %v9055_v41 }
 0x604   : > { %v16824_v0 = vadd.f32 %v28629_v51, %v16689_v23  ;;  %v16690_v29 = vmul.f32 %v28613_v55, %v20951_v60  ;;  %v20305_v44 = vpop.f32.mrb[104].mxu1 }
 0x605   : > { %v16822_v45 = vadd.f32 %v28629_v51, %v16687_v50  ;;  %v16688_v27 = vmul.f32 %v28613_v55, %v20952_v63  ;;  %v9068_v61 = vpop.f32.mrb[105].mxu1 }
 0x606   : > { %v16952_v33 = vmax.f32 %v16824_v0, 0.0  ;;  %v16825_v20 = vadd.f32 %v28629_v51, %v16690_v29  ;;  %v20306_v40 = vpop.f32.mrb[106].mxu1 }
 0x607   : > { %v16950_v38 = vmax.f32 %v16822_v45, 0.0  ;;  %v16823_v59 = vadd.f32 %v28629_v51, %v16688_v27  ;;  %v9071_v3 = vpop.f32.mrb[107].mxu1 }
 0x608   : > { %v20825_v13 = vpop.f32.mrb[104].mxu0  ;;  %17080 = vst [vmem:[%s28273_s29 + $0x330] sm:$0xff] %v16952_v33  ;;  %v16953_v11 = vmax.f32 %v16825_v20, 0.0 }
 0x609   : > { %v20953_v18 = vadd.f32 %v20825_v13, %v20305_v44  ;;  %v16357_v9 = vpop.f32.mrb[105].mxu0  ;;  %17078 = vst [vmem:[%s28273_s29 + $0x320] sm:$0xff] %v16950_v38  ;;  %v16951_v48 = vmax.f32 %v16823_v59, 0.0 }
 0x60a   : > { %v20954_v1 = vadd.f32 %v16357_v9, %v9068_v61  ;;  %v20826_v26 = vpop.f32.mrb[106].mxu0  ;;  %17081 = vst [vmem:[%s28273_s29 + $0x338] sm:$0xff] %v16953_v11 }
 0x60b   : > { %v16693_v52 = vmul.f32 %v28613_v55, %v20953_v18  ;;  %v20955_v58 = vadd.f32 %v20826_v26, %v20306_v40  ;;  %v16360_v17 = vpop.f32.mrb[107].mxu0  ;;  %17079 = vst [vmem:[%s28273_s29 + $0x328] sm:$0xff] %v16951_v48 }
 0x60c   : > { %v16691_v37 = vmul.f32 %v28613_v55, %v20954_v1  ;;  %v20956_v34 = vadd.f32 %v16360_v17, %v9071_v3  ;;  %v20309_v15 = vpop.f32.mrb[108].mxu1 }
 0x60d   : > { %v16828_v39 = vadd.f32 %v28629_v51, %v16693_v52  ;;  %v16694_v42 = vmul.f32 %v28613_v55, %v20955_v58  ;;  %v9084_v5 = vpop.f32.mrb[109].mxu1 }
 0x60e   : > { %v16826_v32 = vadd.f32 %v28629_v51, %v16691_v37  ;;  %v16692_v46 = vmul.f32 %v28613_v55, %v20956_v34  ;;  %v20310_v14 = vpop.f32.mrb[110].mxu1 }
 0x60f   : > { %v16956_v16 = vmax.f32 %v16828_v39, 0.0  ;;  %v16829_v24 = vadd.f32 %v28629_v51, %v16694_v42  ;;  %v9087_v53 = vpop.f32.mrb[111].mxu1 }
 0x610   : > { %v16954_v25 = vmax.f32 %v16826_v32, 0.0  ;;  %v16827_v10 = vadd.f32 %v28629_v51, %v16692_v46 }
 0x611   : > { %17084 = vst [vmem:[%s28273_s29 + $0x350] sm:$0xff] %v16956_v16  ;;  %v16957_v47 = vmax.f32 %v16829_v24, 0.0 }
 0x612   : > { %v20829_v12 = vpop.f32.mrb[108].mxu0  ;;  %17082 = vst [vmem:[%s28273_s29 + $0x340] sm:$0xff] %v16954_v25  ;;  %v16955_v49 = vmax.f32 %v16827_v10, 0.0 }
 0x613   : > { %v20957_v7 = vadd.f32 %v20829_v12, %v20309_v15  ;;  %v16373_v2 = vpop.f32.mrb[109].mxu0  ;;  %17085 = vst [vmem:[%s28273_s29 + $0x358] sm:$0xff] %v16957_v47 }
 0x614   : > { %v20958_v4 = vadd.f32 %v16373_v2, %v9084_v5  ;;  %v20830_v28 = vpop.f32.mrb[110].mxu0  ;;  %17083 = vst [vmem:[%s28273_s29 + $0x348] sm:$0xff] %v16955_v49  ;;  %v20313_v23 = vpop.f32.mrb[112].mxu1 }
 0x615   : > { %v16697_v36 = vmul.f32 %v28613_v55, %v20957_v7  ;;  %v20959_v57 = vadd.f32 %v20830_v28, %v20310_v14  ;;  %v16376_v62 = vpop.f32.mrb[111].mxu0  ;;  %v9100_v50 = vpop.f32.mrb[113].mxu1 }
 0x616   : > { %v16695_v30 = vmul.f32 %v28613_v55, %v20958_v4  ;;  %v20960_v19 = vadd.f32 %v16376_v62, %v9087_v53  ;;  %v20314_v45 = vpop.f32.mrb[114].mxu1 }
 0x617   : > { %v16832_v31 = vadd.f32 %v28629_v51, %v16697_v36  ;;  %v16698_v54 = vmul.f32 %v28613_v55, %v20959_v57  ;;  %v9103_v38 = vpop.f32.mrb[115].mxu1 }
 0x618   : > { %v16830_v22 = vadd.f32 %v28629_v51, %v16695_v30  ;;  %v16696_v35 = vmul.f32 %v28613_v55, %v20960_v19 }
 0x619   : > { %v16960_v6 = vmax.f32 %v16832_v31, 0.0  ;;  %v16833_v21 = vadd.f32 %v28629_v51, %v16698_v54 }
 0x61a   : > { %v16958_v56 = vmax.f32 %v16830_v22, 0.0  ;;  %v16831_v43 = vadd.f32 %v28629_v51, %v16696_v35  ;;  %v20833_v60 = vpop.f32.mrb[112].mxu0 }
 0x61b   : > { %17088 = vst [vmem:[%s28273_s29 + $0x370] sm:$0xff] %v16960_v6  ;;  %v16961_v41 = vmax.f32 %v16833_v21, 0.0  ;;  %v20961_v8 = vadd.f32 %v20833_v60, %v20313_v23  ;;  %v16389_v63 = vpop.f32.mrb[113].mxu0 }
 0x61c   : > { %17086 = vst [vmem:[%s28273_s29 + $0x360] sm:$0xff] %v16958_v56  ;;  %v16959_v0 = vmax.f32 %v16831_v43, 0.0  ;;  %v20962_v29 = vadd.f32 %v16389_v63, %v9100_v50  ;;  %v20834_v27 = vpop.f32.mrb[114].mxu0  ;;  %v20317_v52 = vpop.f32.mrb[116].mxu1 }
 0x61d   : > { %17089 = vst [vmem:[%s28273_s29 + $0x378] sm:$0xff] %v16961_v41  ;;  %v16701_v33 = vmul.f32 %v28613_v55, %v20961_v8  ;;  %v20963_v20 = vadd.f32 %v20834_v27, %v20314_v45  ;;  %v16392_v59 = vpop.f32.mrb[115].mxu0  ;;  %v9116_v37 = vpop.f32.mrb[117].mxu1 }
 0x61e   : > { %17087 = vst [vmem:[%s28273_s29 + $0x368] sm:$0xff] %v16959_v0  ;;  %v16699_v44 = vmul.f32 %v28613_v55, %v20962_v29  ;;  %v20964_v13 = vadd.f32 %v16392_v59, %v9103_v38  ;;  %v20318_v32 = vpop.f32.mrb[118].mxu1 }
 0x61f   : > { %v16836_v11 = vadd.f32 %v28629_v51, %v16701_v33  ;;  %v16702_v18 = vmul.f32 %v28613_v55, %v20963_v20  ;;  %v9119_v25 = vpop.f32.mrb[119].mxu1 }
 0x620   : > { %v16834_v61 = vadd.f32 %v28629_v51, %v16699_v44  ;;  %v16700_v9 = vmul.f32 %v28613_v55, %v20964_v13 }
 0x621   : > { %v16964_v48 = vmax.f32 %v16836_v11, 0.0  ;;  %v16837_v1 = vadd.f32 %v28629_v51, %v16702_v18 }
 0x622   : > { %v16962_v40 = vmax.f32 %v16834_v61, 0.0  ;;  %v16835_v26 = vadd.f32 %v28629_v51, %v16700_v9  ;;  %v20837_v58 = vpop.f32.mrb[116].mxu0 }
 0x623   : > { %17092 = vst [vmem:[%s28273_s29 + $0x390] sm:$0xff] %v16964_v48  ;;  %v16965_v3 = vmax.f32 %v16837_v1, 0.0  ;;  %v20965_v17 = vadd.f32 %v20837_v58, %v20317_v52  ;;  %v16405_v34 = vpop.f32.mrb[117].mxu0 }
 0x624   : > { %17090 = vst [vmem:[%s28273_s29 + $0x380] sm:$0xff] %v16962_v40  ;;  %v16963_v39 = vmax.f32 %v16835_v26, 0.0  ;;  %v20966_v42 = vadd.f32 %v16405_v34, %v9116_v37  ;;  %v20838_v46 = vpop.f32.mrb[118].mxu0  ;;  %v20321_v36 = vpop.f32.mrb[120].mxu1 }
 0x625   : > { %17093 = vst [vmem:[%s28273_s29 + $0x398] sm:$0xff] %v16965_v3  ;;  %v16705_v16 = vmul.f32 %v28613_v55, %v20965_v17  ;;  %v20967_v24 = vadd.f32 %v20838_v46, %v20318_v32  ;;  %v16408_v10 = vpop.f32.mrb[119].mxu0  ;;  %v9132_v30 = vpop.f32.mrb[121].mxu1 }
 0x626   : > { %17091 = vst [vmem:[%s28273_s29 + $0x388] sm:$0xff] %v16963_v39  ;;  %v16703_v15 = vmul.f32 %v28613_v55, %v20966_v42  ;;  %v20968_v12 = vadd.f32 %v16408_v10, %v9119_v25  ;;  %v20322_v22 = vpop.f32.mrb[122].mxu1 }
 0x627   : > { %v16840_v47 = vadd.f32 %v28629_v51, %v16705_v16  ;;  %v16706_v7 = vmul.f32 %v28613_v55, %v20967_v24  ;;  %v9135_v56 = vpop.f32.mrb[123].mxu1 }
 0x628   : > { %v16838_v5 = vadd.f32 %v28629_v51, %v16703_v15  ;;  %v16704_v2 = vmul.f32 %v28613_v55, %v20968_v12 }
 0x629   : > { %v16968_v49 = vmax.f32 %v16840_v47, 0.0  ;;  %v16841_v4 = vadd.f32 %v28629_v51, %v16706_v7 }
 0x62a   : > { %v16966_v14 = vmax.f32 %v16838_v5, 0.0  ;;  %v16839_v28 = vadd.f32 %v28629_v51, %v16704_v2  ;;  %v20841_v57 = vpop.f32.mrb[120].mxu0 }
 0x62b   : > { %17096 = vst [vmem:[%s28273_s29 + $0x3b0] sm:$0xff] %v16968_v49  ;;  %v16969_v53 = vmax.f32 %v16841_v4, 0.0  ;;  %v20969_v62 = vadd.f32 %v20841_v57, %v20321_v36  ;;  %v16421_v19 = vpop.f32.mrb[121].mxu0 }
 0x62c   : > { %17094 = vst [vmem:[%s28273_s29 + $0x3a0] sm:$0xff] %v16966_v14  ;;  %v16967_v31 = vmax.f32 %v16839_v28, 0.0  ;;  %v20970_v54 = vadd.f32 %v16421_v19, %v9132_v30  ;;  %v20842_v35 = vpop.f32.mrb[122].mxu0  ;;  %v20325_v33 = vpop.f32.mrb[124].mxu1 }
 0x62d   : > { %17097 = vst [vmem:[%s28273_s29 + $0x3b8] sm:$0xff] %v16969_v53  ;;  %v16709_v6 = vmul.f32 %v28613_v55, %v20969_v62  ;;  %v20971_v21 = vadd.f32 %v20842_v35, %v20322_v22  ;;  %v16424_v43 = vpop.f32.mrb[123].mxu0  ;;  %v9148_v44 = vpop.f32.mrb[125].mxu1 }
 0x62e   : > { %17095 = vst [vmem:[%s28273_s29 + $0x3a8] sm:$0xff] %v16967_v31  ;;  %v16707_v23 = vmul.f32 %v28613_v55, %v20970_v54  ;;  %v20972_v60 = vadd.f32 %v16424_v43, %v9135_v56  ;;  %v20326_v61 = vpop.f32.mrb[126].mxu1 }
 0x62f   : > { %v16844_v41 = vadd.f32 %v28629_v51, %v16709_v6  ;;  %v16710_v8 = vmul.f32 %v28613_v55, %v20971_v21  ;;  %v9151_v40 = vpop.f32.mrb[127].mxu1 }
 0x630   : > { %v16842_v50 = vadd.f32 %v28629_v51, %v16707_v23  ;;  %v16708_v63 = vmul.f32 %v28613_v55, %v20972_v60 }
 0x631   : > { %v16972_v0 = vmax.f32 %v16844_v41, 0.0  ;;  %v16845_v29 = vadd.f32 %v28629_v51, %v16710_v8 }
 0x632   : > { %v16970_v45 = vmax.f32 %v16842_v50, 0.0  ;;  %v16843_v27 = vadd.f32 %v28629_v51, %v16708_v63  ;;  %v20845_v20 = vpop.f32.mrb[124].mxu0 }
 0x633   : > { %17100 = vst [vmem:[%s28273_s29 + $0x3d0] sm:$0xff] %v16972_v0  ;;  %v16973_v38 = vmax.f32 %v16845_v29, 0.0  ;;  %v20973_v59 = vadd.f32 %v20845_v20, %v20325_v33  ;;  %v16437_v13 = vpop.f32.mrb[125].mxu0 }
 0x634   : > { %17098 = vst [vmem:[%s28273_s29 + $0x3c0] sm:$0xff] %v16970_v45  ;;  %v16971_v11 = vmax.f32 %v16843_v27, 0.0  ;;  %v20974_v18 = vadd.f32 %v16437_v13, %v9148_v44  ;;  %v20846_v9 = vpop.f32.mrb[126].mxu0 }
 0x635   : > { %17101 = vst [vmem:[%s28273_s29 + $0x3d8] sm:$0xff] %v16973_v38  ;;  %v16713_v48 = vmul.f32 %v28613_v55, %v20973_v59  ;;  %v20975_v1 = vadd.f32 %v20846_v9, %v20326_v61  ;;  %v16440_v26 = vpop.f32.mrb[127].mxu0 }
 0x636   : > { %17099 = vst [vmem:[%s28273_s29 + $0x3c8] sm:$0xff] %v16971_v11  ;;  %v16711_v52 = vmul.f32 %v28613_v55, %v20974_v18  ;;  %v20976_v58 = vadd.f32 %v16440_v26, %v9151_v40 }
 0x637   : > { %v16848_v3 = vadd.f32 %v28629_v51, %v16713_v48  ;;  %v16714_v17 = vmul.f32 %v28613_v55, %v20975_v1 }
 0x638   : > { %v16846_v37 = vadd.f32 %v28629_v51, %v16711_v52  ;;  %v16712_v34 = vmul.f32 %v28613_v55, %v20976_v58 }
 0x639   : > { %v16976_v39 = vmax.f32 %v16848_v3, 0.0  ;;  %v16849_v42 = vadd.f32 %v28629_v51, %v16714_v17 }
 0x63a   : > { %v16974_v32 = vmax.f32 %v16846_v37, 0.0  ;;  %v16847_v46 = vadd.f32 %v28629_v51, %v16712_v34 }
 0x63b   : > { %17104 = vst [vmem:[%s28273_s29 + $0x3f0] sm:$0xff] %v16976_v39  ;;  %v16977_v16 = vmax.f32 %v16849_v42, 0.0 }
 0x63c   : > { %17102 = vst [vmem:[%s28273_s29 + $0x3e0] sm:$0xff] %v16974_v32  ;;  %v16975_v55 = vmax.f32 %v16847_v46, 0.0 }
 0x63d   : > { %17105 = vst [vmem:[%s28273_s29 + $0x3f8] sm:$0xff] %v16977_v16 }
 0x63e   : > { %17103 = vst [vmem:[%s28273_s29 + $0x3e8] sm:$0xff] %v16975_v55 }
 0x63f   : > { %22589 = shalt.err (!%p22586_p3)
}
 0x640   : > { %s22590_s14 = scalar_lea.hbm %s28799_s11, 16384  ;;  %s22594_s29 = scalar_lea.hbm %s28853_s4, 32768 }
 0x641   : > { %p22591_p4 = scmp.ne.s32.totalorder %s28799_s11, %s22590_s14  ;;  %p22595_p9 = scmp.lt.u32.totalorder %s28799_s11, %s28853_s4 }
 0x642   : > { %p22596_p10 = scmp.lt.u32.totalorder %s22594_s29, %s22590_s14  ;;  %p22598_p12 = scmp.lt.u32.totalorder %s22590_s14, %s28799_s11 }
 0x643   : > { %p22592_p7 = pnand %p22591_p4, %p22706_p5 }
 0x644   : > { %p22597_p11 = por %p22596_p10, %p22595_p9 }
 0x645   : > { %p22593_p8 = pneg %p22592_p7 }
 0x646   : > { %p22599_p13 = por %p22598_p12, %p22597_p11 }
 0x648   : > { %p22600_p0 = pnand %p22599_p13, %p22593_p8 }
 0x64a   : > { %22603 = shalt.err (!%p22600_p0)
}
 0x64b   : > { %s22641_s5 = smov 128   ;;  %s22642_s6 = smov 8  }
 0x64c   : > { %21884 = dma.vmem_to_hbm [thread:$0]  (%p22706_p5), %s28801_s8, 16384, %s28799_s11, %s28808_s19, %s22641_s5, %s22641_s5, %s22642_s6  }
 0x64d PF: > { %p21890_p1 = scmp.ge.s32.totalorder %s22638_s18, 2  ;;  %s17135_s7 = sand.u32 1, %s22626_s15  }
 0x64e   : > { %s17136_s9 = scalar_lea.sflag [#allocation3], %s17135_s7 }
 0x64f   : > { %p21887_p2 = pnand %p21890_p1, %p22710_p6 }
 0x651   : > { %22621 = dma.done.wait (!%p21887_p2), %s17136_s9, 16384  }
 0x652   : > { %22623 = vsyncadd (!%p21887_p2), %s17136_s9, 4294950912  ;;  %p14_p3 = scmp.ge.s32.totalorder %s22693_s21, 4   ;;  %s29216_s15 = smov %s22630_s16 }
 0x653   : > { %s29217_s16 = smov %s22634_s17  ;;  %s29218_s17 = smov %s22704_s24 }
 0x654   : > { %s29219_s18 = smov %s22693_s21  ;;  %16 = sbr.rel (!%p14_p3) target bundleno = 3 (0x3), region = 81 }
 0x65b   :  { %17141 = vsyncpa [#allocation3], 1 }
 0x65c   :  { %17143 = vsyncpa [#allocation3 + $0x1], 1 }

</bundles_post_ra>
